<compile_context>
chip_gen: v6e
topology: v6e:2x2x1
jax: 0.10.0
libtpu: 0.0.40
codegen_flags: <defaults>
</compile_context>

<pallas_src>
import jax
import jax.numpy as jnp
from jax.experimental import pallas as pl
from jax.experimental.pallas import tpu as pltpu

_HP = jax.lax.Precision.HIGHEST


# ------------------------------ fused Pallas kernel ------------------------------

def _autoencoder_kernel(x_ref, w1, w2, w3, w4, w5, w6, b_ref, o_ref):
    """Whole AutoEncoder_CNN forward for one batch tile, fully VMEM resident.

    x_ref : (B_tile, 784)   flattened input images (batch on sublanes)
    wK    : (Fin_K, Fout_K) dense per-layer operator (conv folded to a matmul)
    b_ref : (6, Fmax)       per-layer bias rows, zero-padded to Fmax lanes
    o_ref : (B_tile, 784)   flattened reconstructed images
    """

    def layer(x, w_ref, i):
        fout = w_ref.shape[1]
        y = jnp.dot(x, w_ref[...], preferred_element_type=jnp.float32)
        return y + b_ref[i:i + 1, :fout]          # (1, fout) broadcasts over batch

    h = jnp.maximum(layer(x_ref[...], w1, 0), 0.0)   # conv1  + ReLU -> (B, c*196)
    h = jnp.maximum(layer(h, w2, 1), 0.0)            # conv2  + ReLU -> (B, 2c*49)
    h = layer(h, w3, 2)                              # enc fc        -> (B, L)
    h = layer(h, w4, 3)                              # dec fc        -> (B, 2c*49)
    h = jnp.maximum(layer(h, w5, 4), 0.0)            # convT2 + ReLU -> (B, c*196)
    o_ref[...] = jnp.tanh(layer(h, w6, 5))           # convT1 + tanh -> (B, 784)


# --------------------- one-time weight -> dense-operator lowering ---------------------

def _conv_dense_T(w, hin, win, stride, pad):
    """Conv2d weight (Cout,Cin,k,k) -> transposed dense operator (Fin, Fout)."""
    cout, cin, k, _ = w.shape
    fin = cin * hin * win
    eye = jnp.eye(fin, dtype=jnp.float32).reshape(fin, cin, hin, win)
    y = jax.lax.conv_general_dilated(
        eye, w, (stride, stride), [(pad, pad), (pad, pad)],
        dimension_numbers=("NCHW", "OIHW", "NCHW"), precision=_HP)
    return y.reshape(fin, -1)                        # row i = layer(e_i)  ==  op.T


def _convT_dense_T(w, hin, win, stride, pad):
    """ConvTranspose2d weight (Cin,Cout,k,k) -> transposed dense operator (Fin, Fout)."""
    cin, cout, k, _ = w.shape
    fin = cin * hin * win
    wf = jnp.flip(w, (2, 3)).transpose(1, 0, 2, 3)   # flipped, in/out swapped kernel
    eye = jnp.eye(fin, dtype=jnp.float32).reshape(fin, cin, hin, win)
    y = jax.lax.conv_general_dilated(
        eye, wf, (1, 1), [(k - 1 - pad, k - 1 - pad)] * 2,
        lhs_dilation=(stride, stride),
        dimension_numbers=("NCHW", "OIHW", "NCHW"), precision=_HP)
    return y.reshape(fin, -1)


def prepare_params(params, capacity, latent_dims):
    """One-time conversion of torch-layout weights into dense (Fin,Fout) matrices."""
    (w1, b1, w2, b2, wen, ben, wde, bde, wt2, bt2, wt1, bt1) = params
    c = capacity

    W1 = _conv_dense_T(w1, 28, 28, 2, 1)             # (784,     c*14*14)
    W2 = _conv_dense_T(w2, 14, 14, 2, 1)             # (c*14*14, 2c*7*7)
    W3 = wen.T                                       # (2c*7*7,  L)
    W4 = wde.T                                       # (L,       2c*7*7)
    W5 = _convT_dense_T(wt2, 7, 7, 2, 1)             # (2c*7*7,  c*14*14)
    W6 = _convT_dense_T(wt1, 14, 14, 2, 1)           # (c*14*14, 784)

    biases = (
        jnp.repeat(b1, 14 * 14),                     # per-output-element conv biases
        jnp.repeat(b2, 7 * 7),
        ben,
        bde,
        jnp.repeat(bt2, 14 * 14),
        jnp.repeat(bt1, 28 * 28),
    )
    fmax = max(b.shape[0] for b in biases)
    bias_slab = jnp.stack(
        [jnp.pad(b.astype(jnp.float32), (0, fmax - b.shape[0])) for b in biases])

    cast = lambda a: a.astype(jnp.float32)
    return (cast(W1), cast(W2), cast(W3), cast(W4), cast(W5), cast(W6), bias_slab)


# ----------------------------------- forward -----------------------------------

def _round_up(x, m):
    return (x + m - 1) // m * m


@jax.jit
def autoencoder_cnn_forward(x, prepped):
    n, cin, hh, ww = x.shape
    fin = cin * hh * ww
    fout = prepped[5].shape[1]                       # = 1*28*28

    x2 = x.reshape(n, fin).astype(jnp.float32)
    b_tile = 128 if n >= 128 else _round_up(n, 8)    # batch tile (sublane-aligned)
    n_pad = _round_up(n, b_tile)
    if n_pad != n:
        x2 = jnp.pad(x2, ((0, n_pad - n), (0, 0)))

    def const_spec(a):
        return pl.BlockSpec(a.shape, lambda i, _nd=a.ndim: (0,) * _nd)

    out = pl.pallas_call(
        _autoencoder_kernel,
        out_shape=jax.ShapeDtypeStruct((n_pad, fout), jnp.float32),
        grid=(n_pad // b_tile,),
        in_specs=[pl.BlockSpec((b_tile, fin), lambda i: (i, 0))]
        + [const_spec(a) for a in prepped],
        out_specs=pl.BlockSpec((b_tile, fout), lambda i: (i, 0)),
        compiler_params=pltpu.CompilerParams(
            dimension_semantics=("parallel",),
            vmem_limit_bytes=48 * 1024 * 1024),
    )(x2, *prepped)

    return out[:n].reshape(n, 1, hh, ww)


# ------------------------------- parameter init -------------------------------

def init_params(key, capacity, latent_dims):
    c = capacity

    def u(k, shape, fan_in):
        b = 1.0 / jnp.sqrt(jnp.float32(fan_in))
        return jax.random.uniform(k, shape, jnp.float32, -b, b)

    ks = jax.random.split(key, 12)
    w1 = u(ks[0], (c, 1, 4, 4), 1 * 16)
    b1 = u(ks[1], (c,), 1 * 16)
    w2 = u(ks[2], (2 * c, c, 4, 4), c * 16)
    b2 = u(ks[3], (2 * c,), c * 16)
    wen = u(ks[4], (latent_dims, 2 * c * 7 * 7), 2 * c * 49)
    ben = u(ks[5], (latent_dims,), 2 * c * 49)
    wde = u(ks[6], (2 * c * 7 * 7, latent_dims), latent_dims)
    bde = u(ks[7], (2 * c * 7 * 7,), latent_dims)
    wt2 = u(ks[8], (2 * c, c, 4, 4), c * 16)         # ConvTranspose2d(2c -> c)
    bt2 = u(ks[9], (c,), c * 16)
    wt1 = u(ks[10], (c, 1, 4, 4), 1 * 16)            # ConvTranspose2d(c -> 1)
    bt1 = u(ks[11], (1,), 16)
    return (w1, b1, w2, b2, wen, ben, wde, bde, wt2, bt2, wt1, bt1)


# ----------------------------- pure-JAX reference -----------------------------

def ref_forward(x, params):
    (w1, b1, w2, b2, wen, ben, wde, bde, wt2, bt2, wt1, bt1) = params
    dn = ("NCHW", "OIHW", "NCHW")
    y = jax.lax.conv_general_dilated(x, w1, (2, 2), [(1, 1), (1, 1)],
                                     dimension_numbers=dn, precision=_HP)
    y = jnp.maximum(y + b1[None, :, None, None], 0.0)
    y = jax.lax.conv_general_dilated(y, w2, (2, 2), [(1, 1), (1, 1)],
                                     dimension_numbers=dn, precision=_HP)
    y = jnp.maximum(y + b2[None, :, None, None], 0.0)
    lat = jnp.dot(y.reshape(y.shape[0], -1), wen.T, precision=_HP) + ben
    d = jnp.dot(lat, wde.T, precision=_HP) + bde
    d = d.reshape(d.shape[0], -1, 7, 7)
    wt2c = jnp.flip(wt2, (2, 3)).transpose(1, 0, 2, 3)
    y = jax.lax.conv_general_dilated(d, wt2c, (1, 1), [(2, 2), (2, 2)],
                                     lhs_dilation=(2, 2), dimension_numbers=dn,
                                     precision=_HP)
    y = jnp.maximum(y + bt2[None, :, None, None], 0.0)
    wt1c = jnp.flip(wt1, (2, 3)).transpose(1, 0, 2, 3)
    y = jax.lax.conv_general_dilated(y, wt1c, (1, 1), [(2, 2), (2, 2)],
                                     lhs_dilation=(2, 2), dimension_numbers=dn,
                                     precision=_HP)
    return jnp.tanh(y + bt1[None, :, None, None])


# ----------------------------------- main -----------------------------------

if __name__ == "__main__":
    # `capacity` / `latent_dims` are undefined module-level globals in the
    # original source; choose small values. Input 1x28x28 is forced by the
    # 2c*7*7 flatten in the encoder fc.
    capacity, latent_dims, batch = 4, 8, 2

    key = jax.random.PRNGKey(0)
    kx, kp = jax.random.split(key)
    x = jax.random.normal(kx, (batch, 1, 28, 28), jnp.float32)

    params = init_params(kp, capacity, latent_dims)
    prepped = prepare_params(params, capacity, latent_dims)

    out = jax.block_until_ready(autoencoder_cnn_forward(x, prepped))
    assert out.shape == (batch, 1, 28, 28), out.shape

    ref = jax.block_until_ready(ref_forward(x, params))
    err = float(jnp.max(jnp.abs(out - ref)))
    assert jnp.allclose(out, ref, atol=5e-3, rtol=5e-3), f"max abs err = {err}"

    print("KERNEL_OK")
</pallas_src>

<mosaic_0001>
module attributes {stable_mosaic.version = 11 : i64} {
  func.func @_autoencoder_kernel(%arg0: i32, %arg1: memref<8x784xf32, #tpu.memory_space<vmem>>, %arg2: memref<784x784xf32, #tpu.memory_space<vmem>>, %arg3: memref<784x392xf32, #tpu.memory_space<vmem>>, %arg4: memref<392x8xf32, #tpu.memory_space<vmem>>, %arg5: memref<8x392xf32, #tpu.memory_space<vmem>>, %arg6: memref<392x784xf32, #tpu.memory_space<vmem>>, %arg7: memref<784x784xf32, #tpu.memory_space<vmem>>, %arg8: memref<6x784xf32, #tpu.memory_space<vmem>>, %arg9: memref<8x784xf32, #tpu.memory_space<vmem>>) attributes {dimension_semantics = [#tpu.dimension_semantics<parallel>], iteration_bounds = array<i64: 1>, scalar_prefetch = 0 : i64, scratch_operands = 0 : i64, tpu.core_type = #tpu.core_type<tc>, window_params = [{transform_indices = @transform_0, window_bounds = array<i64: 8, 784>}, {pipeline_mode = #tpu.pipeline_mode<synchronous>, transform_indices = @transform_1, window_bounds = array<i64: 784, 784>}, {pipeline_mode = #tpu.pipeline_mode<synchronous>, transform_indices = @transform_2, window_bounds = array<i64: 784, 392>}, {pipeline_mode = #tpu.pipeline_mode<synchronous>, transform_indices = @transform_3, window_bounds = array<i64: 392, 8>}, {pipeline_mode = #tpu.pipeline_mode<synchronous>, transform_indices = @transform_4, window_bounds = array<i64: 8, 392>}, {pipeline_mode = #tpu.pipeline_mode<synchronous>, transform_indices = @transform_5, window_bounds = array<i64: 392, 784>}, {pipeline_mode = #tpu.pipeline_mode<synchronous>, transform_indices = @transform_6, window_bounds = array<i64: 784, 784>}, {pipeline_mode = #tpu.pipeline_mode<synchronous>, transform_indices = @transform_7, window_bounds = array<i64: 6, 784>}, {transform_indices = @transform_8, window_bounds = array<i64: 8, 784>}]} {
    %c0 = arith.constant 0 : index
    %c0_0 = arith.constant 0 : index
    %0 = vector.load %arg1[%c0, %c0_0] : memref<8x784xf32, #tpu.memory_space<vmem>>, vector<8x784xf32>
    %c0_1 = arith.constant 0 : index
    %c0_2 = arith.constant 0 : index
    %1 = vector.load %arg2[%c0_1, %c0_2] : memref<784x784xf32, #tpu.memory_space<vmem>>, vector<784x784xf32>
    %cst = arith.constant dense<0.000000e+00> : vector<8x784xf32>
    %2 = tpu.matmul %0, %1, %cst {dimension_numbers = #tpu.dot_dimension_numbers<[1], [0], [0], [1], [0, 0, 1, 1], [], []>} : vector<8x784xf32>, vector<784x784xf32>, vector<8x784xf32> -> vector<8x784xf32>
    %c0_3 = arith.constant 0 : index
    %c0_4 = arith.constant 0 : index
    %3 = vector.load %arg8[%c0_3, %c0_4] : memref<6x784xf32, #tpu.memory_space<vmem>>, vector<1x784xf32>
    %4 = vector.broadcast %3 : vector<1x784xf32> to vector<8x784xf32>
    %5 = arith.addf %2, %4 : vector<8x784xf32>
    %cst_5 = arith.constant 0.000000e+00 : f32
    %6 = vector.broadcast %cst_5 : f32 to vector<8x784xf32>
    %7 = arith.maximumf %5, %6 : vector<8x784xf32>
    %c0_6 = arith.constant 0 : index
    %c0_7 = arith.constant 0 : index
    %8 = vector.load %arg3[%c0_6, %c0_7] : memref<784x392xf32, #tpu.memory_space<vmem>>, vector<784x392xf32>
    %cst_8 = arith.constant dense<0.000000e+00> : vector<8x392xf32>
    %9 = tpu.matmul %7, %8, %cst_8 {dimension_numbers = #tpu.dot_dimension_numbers<[1], [0], [0], [1], [0, 0, 1, 1], [], []>} : vector<8x784xf32>, vector<784x392xf32>, vector<8x392xf32> -> vector<8x392xf32>
    %c1 = arith.constant 1 : index
    %c0_9 = arith.constant 0 : index
    %10 = vector.load %arg8[%c1, %c0_9] : memref<6x784xf32, #tpu.memory_space<vmem>>, vector<1x392xf32>
    %11 = vector.broadcast %10 : vector<1x392xf32> to vector<8x392xf32>
    %12 = arith.addf %9, %11 : vector<8x392xf32>
    %cst_10 = arith.constant 0.000000e+00 : f32
    %13 = vector.broadcast %cst_10 : f32 to vector<8x392xf32>
    %14 = arith.maximumf %12, %13 : vector<8x392xf32>
    %c0_11 = arith.constant 0 : index
    %c0_12 = arith.constant 0 : index
    %15 = vector.load %arg4[%c0_11, %c0_12] : memref<392x8xf32, #tpu.memory_space<vmem>>, vector<392x8xf32>
    %cst_13 = arith.constant dense<0.000000e+00> : vector<8x8xf32>
    %16 = tpu.matmul %14, %15, %cst_13 {dimension_numbers = #tpu.dot_dimension_numbers<[1], [0], [0], [1], [0, 0, 1, 1], [], []>} : vector<8x392xf32>, vector<392x8xf32>, vector<8x8xf32> -> vector<8x8xf32>
    %c2 = arith.constant 2 : index
    %c0_14 = arith.constant 0 : index
    %17 = vector.load %arg8[%c2, %c0_14] : memref<6x784xf32, #tpu.memory_space<vmem>>, vector<1x8xf32>
    %18 = vector.broadcast %17 : vector<1x8xf32> to vector<8x8xf32>
    %19 = arith.addf %16, %18 : vector<8x8xf32>
    %c0_15 = arith.constant 0 : index
    %c0_16 = arith.constant 0 : index
    %20 = vector.load %arg5[%c0_15, %c0_16] : memref<8x392xf32, #tpu.memory_space<vmem>>, vector<8x392xf32>
    %cst_17 = arith.constant dense<0.000000e+00> : vector<8x392xf32>
    %21 = tpu.matmul %19, %20, %cst_17 {dimension_numbers = #tpu.dot_dimension_numbers<[1], [0], [0], [1], [0, 0, 1, 1], [], []>} : vector<8x8xf32>, vector<8x392xf32>, vector<8x392xf32> -> vector<8x392xf32>
    %c3 = arith.constant 3 : index
    %c0_18 = arith.constant 0 : index
    %22 = vector.load %arg8[%c3, %c0_18] : memref<6x784xf32, #tpu.memory_space<vmem>>, vector<1x392xf32>
    %23 = vector.broadcast %22 : vector<1x392xf32> to vector<8x392xf32>
    %24 = arith.addf %21, %23 : vector<8x392xf32>
    %c0_19 = arith.constant 0 : index
    %c0_20 = arith.constant 0 : index
    %25 = vector.load %arg6[%c0_19, %c0_20] : memref<392x784xf32, #tpu.memory_space<vmem>>, vector<392x784xf32>
    %cst_21 = arith.constant dense<0.000000e+00> : vector<8x784xf32>
    %26 = tpu.matmul %24, %25, %cst_21 {dimension_numbers = #tpu.dot_dimension_numbers<[1], [0], [0], [1], [0, 0, 1, 1], [], []>} : vector<8x392xf32>, vector<392x784xf32>, vector<8x784xf32> -> vector<8x784xf32>
    %c4 = arith.constant 4 : index
    %c0_22 = arith.constant 0 : index
    %27 = vector.load %arg8[%c4, %c0_22] : memref<6x784xf32, #tpu.memory_space<vmem>>, vector<1x784xf32>
    %28 = vector.broadcast %27 : vector<1x784xf32> to vector<8x784xf32>
    %29 = arith.addf %26, %28 : vector<8x784xf32>
    %cst_23 = arith.constant 0.000000e+00 : f32
    %30 = vector.broadcast %cst_23 : f32 to vector<8x784xf32>
    %31 = arith.maximumf %29, %30 : vector<8x784xf32>
    %c0_24 = arith.constant 0 : index
    %c0_25 = arith.constant 0 : index
    %32 = vector.load %arg7[%c0_24, %c0_25] : memref<784x784xf32, #tpu.memory_space<vmem>>, vector<784x784xf32>
    %cst_26 = arith.constant dense<0.000000e+00> : vector<8x784xf32>
    %33 = tpu.matmul %31, %32, %cst_26 {dimension_numbers = #tpu.dot_dimension_numbers<[1], [0], [0], [1], [0, 0, 1, 1], [], []>} : vector<8x784xf32>, vector<784x784xf32>, vector<8x784xf32> -> vector<8x784xf32>
    %c5 = arith.constant 5 : index
    %c0_27 = arith.constant 0 : index
    %34 = vector.load %arg8[%c5, %c0_27] : memref<6x784xf32, #tpu.memory_space<vmem>>, vector<1x784xf32>
    %35 = vector.broadcast %34 : vector<1x784xf32> to vector<8x784xf32>
    %36 = arith.addf %33, %35 : vector<8x784xf32>
    %37 = math.tanh %36 : vector<8x784xf32>
    %c0_28 = arith.constant 0 : index
    %c0_29 = arith.constant 0 : index
    %38 = vector.load %arg9[%c0_28, %c0_29] : memref<8x784xf32, #tpu.memory_space<vmem>>, vector<8x784xf32>
    tpu.vector_store %arg9[%c0_28, %c0_29], %37 {strides = array<i32>} : memref<8x784xf32, #tpu.memory_space<vmem>>, vector<8x784xf32>,
    return
  }
  func.func @transform_0(%arg0: i32) -> (i32, i32) {
    %c0_i32 = arith.constant 0 : i32
    %c0_i32_0 = arith.constant 0 : i32
    return %arg0, %c0_i32 : i32, i32
  }
  func.func @transform_1(%arg0: i32) -> (i32, i32) {
    %c0_i32 = arith.constant 0 : i32
    %c0_i32_0 = arith.constant 0 : i32
    %c0_i32_1 = arith.constant 0 : i32
    return %c0_i32, %c0_i32_0 : i32, i32
  }
  func.func @transform_2(%arg0: i32) -> (i32, i32) {
    %c0_i32 = arith.constant 0 : i32
    %c0_i32_0 = arith.constant 0 : i32
    %c0_i32_1 = arith.constant 0 : i32
    return %c0_i32, %c0_i32_0 : i32, i32
  }
  func.func @transform_3(%arg0: i32) -> (i32, i32) {
    %c0_i32 = arith.constant 0 : i32
    %c0_i32_0 = arith.constant 0 : i32
    %c0_i32_1 = arith.constant 0 : i32
    return %c0_i32, %c0_i32_0 : i32, i32
  }
  func.func @transform_4(%arg0: i32) -> (i32, i32) {
    %c0_i32 = arith.constant 0 : i32
    %c0_i32_0 = arith.constant 0 : i32
    %c0_i32_1 = arith.constant 0 : i32
    return %c0_i32, %c0_i32_0 : i32, i32
  }
  func.func @transform_5(%arg0: i32) -> (i32, i32) {
    %c0_i32 = arith.constant 0 : i32
    %c0_i32_0 = arith.constant 0 : i32
    %c0_i32_1 = arith.constant 0 : i32
    return %c0_i32, %c0_i32_0 : i32, i32
  }
  func.func @transform_6(%arg0: i32) -> (i32, i32) {
    %c0_i32 = arith.constant 0 : i32
    %c0_i32_0 = arith.constant 0 : i32
    %c0_i32_1 = arith.constant 0 : i32
    return %c0_i32, %c0_i32_0 : i32, i32
  }
  func.func @transform_7(%arg0: i32) -> (i32, i32) {
    %c0_i32 = arith.constant 0 : i32
    %c0_i32_0 = arith.constant 0 : i32
    %c0_i32_1 = arith.constant 0 : i32
    return %c0_i32, %c0_i32_0 : i32, i32
  }
  func.func @transform_8(%arg0: i32) -> (i32, i32) {
    %c0_i32 = arith.constant 0 : i32
    %c0_i32_0 = arith.constant 0 : i32
    return %arg0, %c0_i32 : i32, i32
  }
}

</mosaic_0001>

<bundles_post_ra>
// kernel: autoencoder_cnn_forward.1
= control target key start
LH: loop header
LB: loop body
LE: loop exit
PB: predicated region body
PF: predicated region fallthrough
CT: control target
= control target key end

     0   :  { %13 = vsyncpa [#allocation3], 0  ;;  %s10403_s0 = inlined_call_operand.vmem [shape: f32[8,784], index: 0, kind: input, shape index: {}]   ;;  %s10404_s1 = inlined_call_operand.vmem [shape: f32[784,784], index: 1, kind: input, shape index: {}]   ;;  %s10405_s2 = inlined_call_operand.vmem [shape: f32[784,392], index: 2, kind: input, shape index: {}]   ;;  %s10406_s3 = inlined_call_operand.vmem [shape: f32[392,8], index: 3, kind: input, shape index: {}]   ;;  %s10407_s4 = inlined_call_operand.vmem [shape: f32[8,392], index: 4, kind: input, shape index: {}]   ;;  %s10408_s5 = inlined_call_operand.hbm [shape: f32[392,784], index: 5, kind: input, shape index: {}]   ;;  %s10409_s6 = inlined_call_operand.hbm [shape: f32[784,784], index: 6, kind: input, shape index: {}]   ;;  %s10410_s7 = inlined_call_operand.vmem [shape: f32[6,784], index: 7, kind: input, shape index: {}]   ;;  %s10411_s8 = inlined_call_operand.vmem [shape: f32[8,784], index: 8, kind: output, shape index: {}]  }
   0x1   :  { %14 = vsyncpa [#allocation5], 0  ;;  %s6525_s27 = smov [#allocation2]  }
   0x2   :  { %s30_s28 = sshll.u32 %s6525_s27, 4  ;;  %s31_s28 = int_to_ptr.vmem [resolvable:$true] %s30_s28 }
   0x3   :  { %s6489_s29 = scalar_lea.vmem %s31_s28, 43904  ;;  %p6494_p1 = scmp.lt.s32.totalorder %s31_s28, %s31_s28 }
   0x4   :  { %p6490_p0 = scmp.ne.s32.totalorder %s31_s28, %s6489_s29  ;;  %p6495_p2 = scmp.lt.s32.totalorder %s6489_s29, %s6489_s29 }
   0x6   :  { %p6496_p3 = por %p6495_p2, %p6494_p1 }
   0x8   :  { %p6497_p4 = pnand %p6496_p3, %p6490_p0 }
   0xa   :  { %6500 = shalt.err (!%p6497_p4)
}
   0xb   :  { %s6526_s30 = smov 896   ;;  %s6527_s9 = smov 56  }
   0xc   :  { %36 = dma.hbm_to_vmem [thread:$0]  %s10408_s5, 43904, %s31_s28, [#allocation3], %s6526_s30, %s6526_s30, %s6527_s9  }
   0xd   :  { %s6528_s12 = smov [#allocation4]  }
   0xe   :  { %s42_s13 = sshll.u32 %s6528_s12, 4  ;;  %s43_s13 = int_to_ptr.vmem [resolvable:$true] %s42_s13 }
   0xf   :  { %s6509_s14 = scalar_lea.vmem %s43_s13, 87808  ;;  %p6514_p6 = scmp.lt.s32.totalorder %s43_s13, %s43_s13 }
  0x10   :  { %p6510_p5 = scmp.ne.s32.totalorder %s43_s13, %s6509_s14  ;;  %p6515_p7 = scmp.lt.s32.totalorder %s6509_s14, %s6509_s14 }
  0x12   :  { %p6516_p8 = por %p6515_p7, %p6514_p6 }
  0x14   :  { %p6517_p9 = pnand %p6516_p8, %p6510_p5 }
  0x16   :  { %6520 = shalt.err (!%p6517_p9)
}
  0x17   :  { %48 = dma.hbm_to_vmem [thread:$0]  %s10409_s6, 87808, %s43_s13, [#allocation5], %s6526_s30, %s6526_s30, %s6527_s9  }
  0x18   :  { %6521 = dma.done.wait [#allocation3], 43904  }
  0x19   :  { %6522 = vsyncadd [#allocation3], 4294923392 }
  0x1a   :  { %6523 = dma.done.wait [#allocation5], 87808  }
  0x1b   :  { %6524 = vsyncadd [#allocation5], 4294879488  ;;  %v170_v0 = vld [vmem:[%s10404_s1 + $0x350] sm:$0xff]  ;;  %v169_v2 = vld [vmem:[%s10404_s1 + $0x348] sm:$0xff]  ;;  %vm789_vm0 = vcmask 130048   ;;  %vm6530_vm1 = vmmov 0  }
  0x1c   :  { %v394_v1 = vld [vmem:[%s10404_s1 + $0xa50] sm:$0xff]  ;;  %793 = vmatprep.subr.mxu0 %v170_v0  ;;  %v393_v3 = vld [vmem:[%s10404_s1 + $0xa48] sm:$0xff]  ;;  %v163_v4 = vld [vmem:[%s10404_s1 + $0x318] sm:$0xff]  ;;  %vm2972_vm2 = vcmask 64512  }
  0x1d   :  { %864 = vmatprep.subr.mxu1 %v394_v1  ;;  %v387_v5 = vld [vmem:[%s10404_s1 + $0xa18] sm:$0xff]  ;;  %794 = vmatpush1.msra.mxu0 %v169_v2  ;;  %v162_v6 = vld [vmem:[%s10404_s1 + $0x310] sm:$0xff]  ;;  %v156_v8 = vld [vmem:[%s10404_s1 + $0x2e0] sm:$0xff] }
  0x1e   :  { %865 = vmatpush1.msra.mxu1 %v393_v3  ;;  %v386_v7 = vld [vmem:[%s10404_s1 + $0xa10] sm:$0xff]  ;;  %795 = vmatprep.subr.mxu0 %v163_v4  ;;  %v380_v9 = vld [vmem:[%s10404_s1 + $0x9e0] sm:$0xff]  ;;  %v155_v10 = vld [vmem:[%s10404_s1 + $0x2d8] sm:$0xff] }
  0x1f   :  { %866 = vmatprep.subr.mxu1 %v387_v5  ;;  %v379_v11 = vld [vmem:[%s10404_s1 + $0x9d8] sm:$0xff]  ;;  %796 = vmatpush1.msra.mxu0 %v162_v6  ;;  %v149_v12 = vld [vmem:[%s10404_s1 + $0x2a8] sm:$0xff]  ;;  %v148_v14 = vld [vmem:[%s10404_s1 + $0x2a0] sm:$0xff] }
  0x20   :  { %867 = vmatpush1.msra.mxu1 %v386_v7  ;;  %v373_v13 = vld [vmem:[%s10404_s1 + $0x9a8] sm:$0xff]  ;;  %797 = vmatprep.subr.mxu0 %v156_v8  ;;  %v372_v15 = vld [vmem:[%s10404_s1 + $0x9a0] sm:$0xff]  ;;  %v142_v16 = vld [vmem:[%s10404_s1 + $0x270] sm:$0xff] }
  0x21   :  { %868 = vmatprep.subr.mxu1 %v380_v9  ;;  %798 = vmatpush1.msra.mxu0 %v155_v10  ;;  %v366_v17 = vld [vmem:[%s10404_s1 + $0x970] sm:$0xff]  ;;  %v141_v18 = vld [vmem:[%s10404_s1 + $0x268] sm:$0xff]  ;;  %v135_v20 = vld [vmem:[%s10404_s1 + $0x238] sm:$0xff] }
  0x22   :  { %869 = vmatpush1.msra.mxu1 %v379_v11  ;;  %799 = vmatprep.subr.mxu0 %v149_v12  ;;  %v365_v19 = vld [vmem:[%s10404_s1 + $0x968] sm:$0xff]  ;;  %v359_v21 = vld [vmem:[%s10404_s1 + $0x938] sm:$0xff]  ;;  %v134_v22 = vld [vmem:[%s10404_s1 + $0x230] sm:$0xff] }
  0x23   :  { %870 = vmatprep.subr.mxu1 %v373_v13  ;;  %800 = vmatpush1.msra.mxu0 %v148_v14  ;;  %v358_v23 = vld [vmem:[%s10404_s1 + $0x930] sm:$0xff]  ;;  %v128_v24 = vld [vmem:[%s10404_s1 + $0x200] sm:$0xff]  ;;  %v127_v26 = vld [vmem:[%s10404_s1 + $0x1f8] sm:$0xff] }
  0x24   :  { %871 = vmatpush1.msra.mxu1 %v372_v15  ;;  %801 = vmatprep.subr.mxu0 %v142_v16  ;;  %v352_v25 = vld [vmem:[%s10404_s1 + $0x900] sm:$0xff]  ;;  %v351_v27 = vld [vmem:[%s10404_s1 + $0x8f8] sm:$0xff]  ;;  %v121_v28 = vld [vmem:[%s10404_s1 + $0x1c8] sm:$0xff] }
  0x25   :  { %872 = vmatprep.subr.mxu1 %v366_v17  ;;  %802 = vmatpush1.msra.mxu0 %v141_v18  ;;  %v345_v29 = vld [vmem:[%s10404_s1 + $0x8c8] sm:$0xff]  ;;  %v120_v30 = vld [vmem:[%s10404_s1 + $0x1c0] sm:$0xff]  ;;  %v114_v32 = vld [vmem:[%s10404_s1 + $0x190] sm:$0xff] }
  0x26   :  { %873 = vmatpush1.msra.mxu1 %v365_v19  ;;  %803 = vmatprep.subr.mxu0 %v135_v20  ;;  %v344_v31 = vld [vmem:[%s10404_s1 + $0x8c0] sm:$0xff]  ;;  %v338_v33 = vld [vmem:[%s10404_s1 + $0x890] sm:$0xff]  ;;  %v113_v34 = vld [vmem:[%s10404_s1 + $0x188] sm:$0xff] }
  0x27   :  { %874 = vmatprep.subr.mxu1 %v359_v21  ;;  %804 = vmatpush1.msra.mxu0 %v134_v22  ;;  %v337_v35 = vld [vmem:[%s10404_s1 + $0x888] sm:$0xff]  ;;  %v107_v36 = vld [vmem:[%s10404_s1 + $0x158] sm:$0xff]  ;;  %v106_v38 = vld [vmem:[%s10404_s1 + $0x150] sm:$0xff] }
  0x28   :  { %875 = vmatpush1.msra.mxu1 %v358_v23  ;;  %805 = vmatprep.subr.mxu0 %v128_v24  ;;  %v331_v37 = vld [vmem:[%s10404_s1 + $0x858] sm:$0xff]  ;;  %v330_v39 = vld [vmem:[%s10404_s1 + $0x850] sm:$0xff]  ;;  %v100_v40 = vld [vmem:[%s10404_s1 + $0x120] sm:$0xff] }
  0x29   :  { %876 = vmatprep.subr.mxu1 %v352_v25  ;;  %806 = vmatpush1.msra.mxu0 %v127_v26  ;;  %v324_v41 = vld [vmem:[%s10404_s1 + $0x820] sm:$0xff]  ;;  %v99_v42 = vld [vmem:[%s10404_s1 + $0x118] sm:$0xff]  ;;  %v93_v44 = vld [vmem:[%s10404_s1 + $0xe8] sm:$0xff] }
  0x2a   :  { %877 = vmatpush1.msra.mxu1 %v351_v27  ;;  %807 = vmatprep.subr.mxu0 %v121_v28  ;;  %v323_v43 = vld [vmem:[%s10404_s1 + $0x818] sm:$0xff]  ;;  %v317_v45 = vld [vmem:[%s10404_s1 + $0x7e8] sm:$0xff]  ;;  %v92_v46 = vld [vmem:[%s10404_s1 + $0xe0] sm:$0xff] }
  0x2b   :  { %878 = vmatprep.subr.mxu1 %v345_v29  ;;  %808 = vmatpush1.msra.mxu0 %v120_v30  ;;  %v316_v47 = vld [vmem:[%s10404_s1 + $0x7e0] sm:$0xff]  ;;  %v86_v48 = vld [vmem:[%s10404_s1 + $0xb0] sm:$0xff]  ;;  %v85_v50 = vld [vmem:[%s10404_s1 + $0xa8] sm:$0xff] }
  0x2c   :  { %879 = vmatpush1.msra.mxu1 %v344_v31  ;;  %809 = vmatprep.subr.mxu0 %v114_v32  ;;  %v310_v49 = vld [vmem:[%s10404_s1 + $0x7b0] sm:$0xff]  ;;  %v309_v51 = vld [vmem:[%s10404_s1 + $0x7a8] sm:$0xff]  ;;  %v79_v52 = vld [vmem:[%s10404_s1 + $0x78] sm:$0xff] }
  0x2d   :  { %880 = vmatprep.subr.mxu1 %v338_v33  ;;  %810 = vmatpush1.msra.mxu0 %v113_v34  ;;  %v303_v53 = vld [vmem:[%s10404_s1 + $0x778] sm:$0xff]  ;;  %v78_v54 = vld [vmem:[%s10404_s1 + $0x70] sm:$0xff]  ;;  %v72_v56 = vld [vmem:[%s10404_s1 + $0x40] sm:$0xff] }
  0x2e   :  { %881 = vmatpush1.msra.mxu1 %v337_v35  ;;  %811 = vmatprep.subr.mxu0 %v107_v36  ;;  %v302_v55 = vld [vmem:[%s10404_s1 + $0x770] sm:$0xff]  ;;  %v296_v57 = vld [vmem:[%s10404_s1 + $0x740] sm:$0xff]  ;;  %v71_v58 = vld [vmem:[%s10404_s1 + $0x38] sm:$0xff] }
  0x2f   :  { %882 = vmatprep.subr.mxu1 %v331_v37  ;;  %812 = vmatpush1.msra.mxu0 %v106_v38  ;;  %v295_v59 = vld [vmem:[%s10404_s1 + $0x738] sm:$0xff]  ;;  %v65_v60 = vld [vmem:[%s10404_s1 + $0x8] sm:$0xff]  ;;  %v64_v62 = vld [vmem:[%s10404_s1] sm:$0xff] }
  0x30   :  { %883 = vmatpush1.msra.mxu1 %v330_v39  ;;  %813 = vmatprep.subr.mxu0 %v100_v40  ;;  %v289_v61 = vld [vmem:[%s10404_s1 + $0x708] sm:$0xff]  ;;  %v288_v63 = vld [vmem:[%s10404_s1 + $0x700] sm:$0xff]  ;;  %v282_v0 = vld [vmem:[%s10404_s1 + $0x6d0] sm:$0xff] }
  0x31   :  { %884 = vmatprep.subr.mxu1 %v324_v41  ;;  %814 = vmatpush1.msra.mxu0 %v99_v42  ;;  %v506_v1 = vld [vmem:[%s10404_s1 + $0xdd0] sm:$0xff]  ;;  %v281_v2 = vld [vmem:[%s10404_s1 + $0x6c8] sm:$0xff]  ;;  %v275_v4 = vld [vmem:[%s10404_s1 + $0x698] sm:$0xff] }
  0x32   :  { %885 = vmatpush1.msra.mxu1 %v323_v43  ;;  %815 = vmatprep.subr.mxu0 %v93_v44  ;;  %v505_v3 = vld [vmem:[%s10404_s1 + $0xdc8] sm:$0xff]  ;;  %v499_v5 = vld [vmem:[%s10404_s1 + $0xd98] sm:$0xff]  ;;  %v274_v6 = vld [vmem:[%s10404_s1 + $0x690] sm:$0xff] }
  0x33   :  { %886 = vmatprep.subr.mxu1 %v317_v45  ;;  %816 = vmatpush1.msra.mxu0 %v92_v46  ;;  %v498_v7 = vld [vmem:[%s10404_s1 + $0xd90] sm:$0xff]  ;;  %v268_v8 = vld [vmem:[%s10404_s1 + $0x660] sm:$0xff]  ;;  %v267_v10 = vld [vmem:[%s10404_s1 + $0x658] sm:$0xff] }
  0x34   :  { %887 = vmatpush1.msra.mxu1 %v316_v47  ;;  %817 = vmatprep.subr.mxu0 %v86_v48  ;;  %v492_v9 = vld [vmem:[%s10404_s1 + $0xd60] sm:$0xff]  ;;  %v491_v11 = vld [vmem:[%s10404_s1 + $0xd58] sm:$0xff]  ;;  %v261_v12 = vld [vmem:[%s10404_s1 + $0x628] sm:$0xff] }
  0x35   :  { %888 = vmatprep.subr.mxu1 %v310_v49  ;;  %818 = vmatpush1.msra.mxu0 %v85_v50  ;;  %v485_v13 = vld [vmem:[%s10404_s1 + $0xd28] sm:$0xff]  ;;  %v260_v14 = vld [vmem:[%s10404_s1 + $0x620] sm:$0xff]  ;;  %v254_v16 = vld [vmem:[%s10404_s1 + $0x5f0] sm:$0xff] }
  0x36   :  { %889 = vmatpush1.msra.mxu1 %v309_v51  ;;  %819 = vmatprep.subr.mxu0 %v79_v52  ;;  %v484_v15 = vld [vmem:[%s10404_s1 + $0xd20] sm:$0xff]  ;;  %v478_v17 = vld [vmem:[%s10404_s1 + $0xcf0] sm:$0xff]  ;;  %v253_v18 = vld [vmem:[%s10404_s1 + $0x5e8] sm:$0xff] }
  0x37   :  { %890 = vmatprep.subr.mxu1 %v303_v53  ;;  %820 = vmatpush1.msra.mxu0 %v78_v54  ;;  %v477_v19 = vld [vmem:[%s10404_s1 + $0xce8] sm:$0xff]  ;;  %v247_v20 = vld [vmem:[%s10404_s1 + $0x5b8] sm:$0xff]  ;;  %v246_v22 = vld [vmem:[%s10404_s1 + $0x5b0] sm:$0xff] }
  0x38   :  { %891 = vmatpush1.msra.mxu1 %v302_v55  ;;  %821 = vmatprep.subr.mxu0 %v72_v56  ;;  %v471_v21 = vld [vmem:[%s10404_s1 + $0xcb8] sm:$0xff]  ;;  %v470_v23 = vld [vmem:[%s10404_s1 + $0xcb0] sm:$0xff]  ;;  %v240_v24 = vld [vmem:[%s10404_s1 + $0x580] sm:$0xff] }
  0x39   :  { %892 = vmatprep.subr.mxu1 %v296_v57  ;;  %822 = vmatpush1.msra.mxu0 %v71_v58  ;;  %v464_v25 = vld [vmem:[%s10404_s1 + $0xc80] sm:$0xff]  ;;  %v239_v26 = vld [vmem:[%s10404_s1 + $0x578] sm:$0xff]  ;;  %v233_v28 = vld [vmem:[%s10404_s1 + $0x548] sm:$0xff] }
  0x3a   :  { %893 = vmatpush1.msra.mxu1 %v295_v59  ;;  %823 = vmatprep.subr.mxu0 %v65_v60  ;;  %v463_v27 = vld [vmem:[%s10404_s1 + $0xc78] sm:$0xff]  ;;  %v457_v29 = vld [vmem:[%s10404_s1 + $0xc48] sm:$0xff]  ;;  %v232_v30 = vld [vmem:[%s10404_s1 + $0x540] sm:$0xff] }
  0x3b   :  { %894 = vmatprep.subr.mxu1 %v289_v61  ;;  %824 = vmatpush1.msra.mxu0 %v64_v62  ;;  %v456_v31 = vld [vmem:[%s10404_s1 + $0xc40] sm:$0xff]  ;;  %v226_v32 = vld [vmem:[%s10404_s1 + $0x510] sm:$0xff]  ;;  %v225_v34 = vld [vmem:[%s10404_s1 + $0x508] sm:$0xff] }
  0x3c   :  { %895 = vmatpush1.msra.mxu1 %v288_v63  ;;  %825 = vmatprep.subr.mxu0 %v282_v0  ;;  %v450_v33 = vld [vmem:[%s10404_s1 + $0xc10] sm:$0xff]  ;;  %v449_v35 = vld [vmem:[%s10404_s1 + $0xc08] sm:$0xff]  ;;  %v219_v36 = vld [vmem:[%s10404_s1 + $0x4d8] sm:$0xff] }
  0x3d   :  { %896 = vmatprep.subr.mxu1 %v506_v1  ;;  %826 = vmatpush2.msra.mxu0 %v281_v2  ;;  %v443_v37 = vld [vmem:[%s10404_s1 + $0xbd8] sm:$0xff]  ;;  %v218_v38 = vld [vmem:[%s10404_s1 + $0x4d0] sm:$0xff]  ;;  %v212_v40 = vld [vmem:[%s10404_s1 + $0x4a0] sm:$0xff] }
  0x3e   :  { %897 = vmatpush2.msra.mxu1 %v505_v3  ;;  %827 = vmatprep.subr.mxu0 %v275_v4  ;;  %v442_v39 = vld [vmem:[%s10404_s1 + $0xbd0] sm:$0xff]  ;;  %v436_v41 = vld [vmem:[%s10404_s1 + $0xba0] sm:$0xff]  ;;  %v211_v42 = vld [vmem:[%s10404_s1 + $0x498] sm:$0xff] }
  0x3f   :  { %898 = vmatprep.subr.mxu1 %v499_v5  ;;  %828 = vmatpush2.msra.mxu0 %v274_v6  ;;  %v435_v43 = vld [vmem:[%s10404_s1 + $0xb98] sm:$0xff]  ;;  %v205_v44 = vld [vmem:[%s10404_s1 + $0x468] sm:$0xff]  ;;  %v204_v46 = vld [vmem:[%s10404_s1 + $0x460] sm:$0xff] }
  0x40   :  { %899 = vmatpush2.msra.mxu1 %v498_v7  ;;  %829 = vmatprep.subr.mxu0 %v268_v8  ;;  %v429_v45 = vld [vmem:[%s10404_s1 + $0xb68] sm:$0xff]  ;;  %v428_v47 = vld [vmem:[%s10404_s1 + $0xb60] sm:$0xff]  ;;  %v198_v48 = vld [vmem:[%s10404_s1 + $0x430] sm:$0xff] }
  0x41   :  { %900 = vmatprep.subr.mxu1 %v492_v9  ;;  %830 = vmatpush2.msra.mxu0 %v267_v10  ;;  %v422_v49 = vld [vmem:[%s10404_s1 + $0xb30] sm:$0xff]  ;;  %v197_v50 = vld [vmem:[%s10404_s1 + $0x428] sm:$0xff]  ;;  %v191_v52 = vld [vmem:[%s10404_s1 + $0x3f8] sm:$0xff] }
  0x42   :  { %901 = vmatpush2.msra.mxu1 %v491_v11  ;;  %831 = vmatprep.subr.mxu0 %v261_v12  ;;  %v421_v51 = vld [vmem:[%s10404_s1 + $0xb28] sm:$0xff]  ;;  %v415_v53 = vld [vmem:[%s10404_s1 + $0xaf8] sm:$0xff]  ;;  %v190_v54 = vld [vmem:[%s10404_s1 + $0x3f0] sm:$0xff] }
  0x43   :  { %902 = vmatprep.subr.mxu1 %v485_v13  ;;  %832 = vmatpush2.msra.mxu0 %v260_v14  ;;  %v414_v55 = vld [vmem:[%s10404_s1 + $0xaf0] sm:$0xff]  ;;  %v184_v56 = vld [vmem:[%s10404_s1 + $0x3c0] sm:$0xff]  ;;  %v183_v58 = vld [vmem:[%s10404_s1 + $0x3b8] sm:$0xff] }
  0x44   :  { %903 = vmatpush2.msra.mxu1 %v484_v15  ;;  %833 = vmatprep.subr.mxu0 %v254_v16  ;;  %v408_v57 = vld [vmem:[%s10404_s1 + $0xac0] sm:$0xff]  ;;  %v407_v59 = vld [vmem:[%s10404_s1 + $0xab8] sm:$0xff]  ;;  %v177_v60 = vld [vmem:[%s10404_s1 + $0x388] sm:$0xff] }
  0x45   :  { %904 = vmatprep.subr.mxu1 %v478_v17  ;;  %834 = vmatpush2.msra.mxu0 %v253_v18  ;;  %v401_v61 = vld [vmem:[%s10404_s1 + $0xa88] sm:$0xff]  ;;  %v176_v62 = vld [vmem:[%s10404_s1 + $0x380] sm:$0xff]  ;;  %v60_v2 = vld [vmem:[%s10403_s0 + $0x18] sm:$0xff]  ;;  %v6529_v17 = vmov 0.0  }
  0x46   :  { %905 = vmatpush2.msra.mxu1 %v477_v19  ;;  %835 = vmatprep.subr.mxu0 %v247_v20  ;;  %v6966_v63 = vld [vmem:[%s10403_s0 + $0x8] sm:$0xff]  ;;  %v400_v0 = vld [vmem:[%s10404_s1 + $0xa80] sm:$0xff]  ;;  %v618_v3 = vld [vmem:[%s10404_s1 + $0x1150] sm:$0xff] }
  0x47   :  { %906 = vmatprep.subr.mxu1 %v471_v21  ;;  %836 = vmatpush2.msra.mxu0 %v246_v22  ;;  %v6974_v1 = vld [vmem:[%s10403_s0] sm:$0xff]  ;;  %v59_v5 = vld [vmem:[%s10403_s0 + $0x10] sm:$0xff]  ;;  %v617_v6 = vld [vmem:[%s10404_s1 + $0x1148] sm:$0xff] }
  0x48   :  { %907 = vmatpush2.msra.mxu1 %v470_v23  ;;  %837 = vmatprep.subr.mxu0 %v240_v24  ;;  %v744_v4 = vld [vmem:[%s10404_s1 + $0x1540] sm:$0xff]  ;;  %v743_v7 = vld [vmem:[%s10404_s1 + $0x1538] sm:$0xff]  ;;  %v737_v9 = vld [vmem:[%s10404_s1 + $0x1508] sm:$0xff] }
  0x49   :  { %908 = vmatprep.subr.mxu1 %v464_v25  ;;  %838 = vmatpush2.msra.mxu0 %v239_v26  ;;  %v611_v8 = vld [vmem:[%s10404_s1 + $0x1118] sm:$0xff]  ;;  %v610_v10 = vld [vmem:[%s10404_s1 + $0x1110] sm:$0xff]  ;;  %v736_v11 = vld [vmem:[%s10404_s1 + $0x1500] sm:$0xff] }
  0x4a   :  { %909 = vmatpush2.msra.mxu1 %v463_v27  ;;  %839 = vmatprep.subr.mxu0 %v233_v28  ;;  %v604_v12 = vld [vmem:[%s10404_s1 + $0x10e0] sm:$0xff]  ;;  %v603_v14 = vld [vmem:[%s10404_s1 + $0x10d8] sm:$0xff]  ;;  %v63_v15 = vld [vmem:[%s10403_s0 + $0x30] sm:$0xff] }
  0x4b   :  { %910 = vmatprep.subr.mxu1 %v457_v29  ;;  %840 = vmatpush2.msra.mxu0 %v232_v30  ;;  %v172_v13 = vld [vmem:[%s10404_s1 + $0x360] sm:$0xff]  ;;  %v597_v16 = vld [vmem:[%s10404_s1 + $0x10a8] sm:$0xff]  ;;  %v171_v18 = vld [vmem:[%s10404_s1 + $0x358] sm:$0xff] }
  0x4c   :  { %911 = vmatpush2.msra.mxu1 %v456_v31  ;;  %841 = vmatprep.subr.mxu0 %v226_v32  ;;  %v596_v19 = vld [vmem:[%s10404_s1 + $0x10a0] sm:$0xff]  ;;  %v165_v20 = vld [vmem:[%s10404_s1 + $0x328] sm:$0xff]  ;;  %v590_v21 = vld [vmem:[%s10404_s1 + $0x1070] sm:$0xff] }
  0x4d   :  { %912 = vmatprep.subr.mxu1 %v450_v33  ;;  %842 = vmatpush2.msra.mxu0 %v225_v34  ;;  %v164_v22 = vld [vmem:[%s10404_s1 + $0x320] sm:$0xff]  ;;  %v589_v23 = vld [vmem:[%s10404_s1 + $0x1068] sm:$0xff]  ;;  %v158_v24 = vld [vmem:[%s10404_s1 + $0x2f0] sm:$0xff] }
  0x4e   :  { %913 = vmatpush2.msra.mxu1 %v449_v35  ;;  %843 = vmatprep.subr.mxu0 %v219_v36  ;;  %v583_v25 = vld [vmem:[%s10404_s1 + $0x1038] sm:$0xff]  ;;  %v157_v26 = vld [vmem:[%s10404_s1 + $0x2e8] sm:$0xff]  ;;  %v582_v27 = vld [vmem:[%s10404_s1 + $0x1030] sm:$0xff] }
  0x4f   :  { %914 = vmatprep.subr.mxu1 %v443_v37  ;;  %844 = vmatpush2.msra.mxu0 %v218_v38  ;;  %v151_v28 = vld [vmem:[%s10404_s1 + $0x2b8] sm:$0xff]  ;;  %v576_v29 = vld [vmem:[%s10404_s1 + $0x1000] sm:$0xff]  ;;  %v150_v30 = vld [vmem:[%s10404_s1 + $0x2b0] sm:$0xff] }
  0x50   :  { %915 = vmatpush2.msra.mxu1 %v442_v39  ;;  %845 = vmatprep.subr.mxu0 %v212_v40  ;;  %v575_v31 = vld [vmem:[%s10404_s1 + $0xff8] sm:$0xff]  ;;  %v144_v32 = vld [vmem:[%s10404_s1 + $0x280] sm:$0xff]  ;;  %v569_v33 = vld [vmem:[%s10404_s1 + $0xfc8] sm:$0xff] }
  0x51   :  { %916 = vmatprep.subr.mxu1 %v436_v41  ;;  %846 = vmatpush2.msra.mxu0 %v211_v42  ;;  %v143_v34 = vld [vmem:[%s10404_s1 + $0x278] sm:$0xff]  ;;  %v568_v35 = vld [vmem:[%s10404_s1 + $0xfc0] sm:$0xff]  ;;  %v137_v36 = vld [vmem:[%s10404_s1 + $0x248] sm:$0xff] }
  0x52   :  { %917 = vmatpush2.msra.mxu1 %v435_v43  ;;  %847 = vmatprep.subr.mxu0 %v205_v44  ;;  %v562_v37 = vld [vmem:[%s10404_s1 + $0xf90] sm:$0xff]  ;;  %v136_v38 = vld [vmem:[%s10404_s1 + $0x240] sm:$0xff]  ;;  %v561_v39 = vld [vmem:[%s10404_s1 + $0xf88] sm:$0xff] }
  0x53   :  { %918 = vmatprep.subr.mxu1 %v429_v45  ;;  %848 = vmatpush2.msra.mxu0 %v204_v46  ;;  %v130_v40 = vld [vmem:[%s10404_s1 + $0x210] sm:$0xff]  ;;  %v555_v41 = vld [vmem:[%s10404_s1 + $0xf58] sm:$0xff]  ;;  %v129_v42 = vld [vmem:[%s10404_s1 + $0x208] sm:$0xff] }
  0x54   :  { %919 = vmatpush2.msra.mxu1 %v428_v47  ;;  %849 = vmatprep.subr.mxu0 %v198_v48  ;;  %v554_v43 = vld [vmem:[%s10404_s1 + $0xf50] sm:$0xff]  ;;  %v123_v44 = vld [vmem:[%s10404_s1 + $0x1d8] sm:$0xff]  ;;  %v548_v45 = vld [vmem:[%s10404_s1 + $0xf20] sm:$0xff] }
  0x55   :  { %920 = vmatprep.subr.mxu1 %v422_v49  ;;  %850 = vmatpush2.msra.mxu0 %v197_v50  ;;  %v122_v46 = vld [vmem:[%s10404_s1 + $0x1d0] sm:$0xff]  ;;  %v547_v47 = vld [vmem:[%s10404_s1 + $0xf18] sm:$0xff]  ;;  %v116_v48 = vld [vmem:[%s10404_s1 + $0x1a0] sm:$0xff] }
  0x56   :  { %921 = vmatpush2.msra.mxu1 %v421_v51  ;;  %851 = vmatprep.subr.mxu0 %v191_v52  ;;  %v541_v49 = vld [vmem:[%s10404_s1 + $0xee8] sm:$0xff]  ;;  %v115_v50 = vld [vmem:[%s10404_s1 + $0x198] sm:$0xff]  ;;  %v540_v51 = vld [vmem:[%s10404_s1 + $0xee0] sm:$0xff] }
  0x57   :  { %922 = vmatprep.subr.mxu1 %v415_v53  ;;  %852 = vmatpush2.msra.mxu0 %v190_v54  ;;  %v109_v52 = vld [vmem:[%s10404_s1 + $0x168] sm:$0xff]  ;;  %v534_v53 = vld [vmem:[%s10404_s1 + $0xeb0] sm:$0xff]  ;;  %v108_v54 = vld [vmem:[%s10404_s1 + $0x160] sm:$0xff] }
  0x58   :  { %923 = vmatpush2.msra.mxu1 %v414_v55  ;;  %853 = vmatprep.subr.mxu0 %v184_v56  ;;  %v533_v55 = vld [vmem:[%s10404_s1 + $0xea8] sm:$0xff]  ;;  %v102_v56 = vld [vmem:[%s10404_s1 + $0x130] sm:$0xff] }
  0x59   :  { %924 = vmatprep.subr.mxu1 %v408_v57  ;;  %854 = vmatpush2.msra.mxu0 %v183_v58  ;;  %v527_v57 = vld [vmem:[%s10404_s1 + $0xe78] sm:$0xff]  ;;  %v101_v58 = vld [vmem:[%s10404_s1 + $0x128] sm:$0xff] }
  0x5a   :  { %925 = vmatpush2.msra.mxu1 %v407_v59  ;;  %855 = vmatprep.subr.mxu0 %v177_v60  ;;  %v526_v59 = vld [vmem:[%s10404_s1 + $0xe70] sm:$0xff]  ;;  %v95_v60 = vld [vmem:[%s10404_s1 + $0xf8] sm:$0xff] }
  0x5b   :  { %926 = vmatprep.subr.mxu1 %v401_v61  ;;  %856 = vmatpush2.msra.mxu0 %v176_v62  ;;  %v520_v61 = vld [vmem:[%s10404_s1 + $0xe40] sm:$0xff]  ;;  %v94_v62 = vld [vmem:[%s10404_s1 + $0xf0] sm:$0xff] }
  0x5c   :  { %857 = vmatprep.mubr.f32.mxu0 %v6966_v63  ;;  %927 = vmatpush2.msra.mxu1 %v400_v0  ;;  %v519_v0 = vld [vmem:[%s10404_s1 + $0xe38] sm:$0xff] }
  0x5d   :  { %858 = vmatmul.mubr.f32.vlgmr.msra.gmra.mxu0 %v6974_v1  ;;  %928 = vmatprep.mubr.f32.mxu1 %v60_v2  ;;  %v88_v2 = vld [vmem:[%s10404_s1 + $0xc0] sm:$0xff] }
  0x5e   :  { %935 = vmatprep.subr.mxu0 %v618_v3  ;;  %1034 = vmatprep.subr.mxu1 %v744_v4  ;;  %v513_v3 = vld [vmem:[%s10404_s1 + $0xe08] sm:$0xff]  ;;  %v87_v4 = vld [vmem:[%s10404_s1 + $0xb8] sm:$0xff] }
  0x5f   :  { %929 = vmatmul.mubr.f32.vlgmr.msra.gmra.mxu1 %v59_v5  ;;  %936 = vmatpush1.msra.mxu0 %v617_v6  ;;  %v512_v5 = vld [vmem:[%s10404_s1 + $0xe00] sm:$0xff]  ;;  %v81_v6 = vld [vmem:[%s10404_s1 + $0x88] sm:$0xff] }
  0x60   :  { %1035 = vmatpush1.msra.mxu1 %v743_v7  ;;  %937 = vmatprep.subr.mxu0 %v611_v8  ;;  %v730_v7 = vld [vmem:[%s10404_s1 + $0x14d0] sm:$0xff]  ;;  %v80_v8 = vld [vmem:[%s10404_s1 + $0x80] sm:$0xff] }
  0x61   :  { %1036 = vmatprep.subr.mxu1 %v737_v9  ;;  %938 = vmatpush1.msra.mxu0 %v610_v10  ;;  %v729_v9 = vld [vmem:[%s10404_s1 + $0x14c8] sm:$0xff]  ;;  %v74_v10 = vld [vmem:[%s10404_s1 + $0x50] sm:$0xff] }
  0x62   :  { %1037 = vmatpush1.msra.mxu1 %v736_v11  ;;  %939 = vmatprep.subr.mxu0 %v604_v12  ;;  %v723_v11 = vld [vmem:[%s10404_s1 + $0x1498] sm:$0xff]  ;;  %v73_v12 = vld [vmem:[%s10404_s1 + $0x48] sm:$0xff] }
  0x63   :  { %1070 = vmatprep.mubr.f32.mxu1 %v6529_v17  ;;  %1077 = vmatprep.subr.mxu1 %v172_v13  ;;  %v722_v13 = vld [vmem:[%s10404_s1 + $0x1490] sm:$0xff] }
  0x64   :  { %940 = vmatpush1.msra.mxu0 %v603_v14  ;;  %6128 = vmatmul.mubr.msk.f32.vlgmr.msra.gmra.mxu1 %vm789_vm0, %v63_v15  ;;  %v67_v14 = vld [vmem:[%s10404_s1 + $0x18] sm:$0xff]  ;;  %v716_v15 = vld [vmem:[%s10404_s1 + $0x1460] sm:$0xff] }
  0x65   :  { %941 = vmatprep.subr.mxu0 %v597_v16  ;;  %1078 = vmatpush1.msra.mxu1 %v171_v18  ;;  %v66_v16 = vld [vmem:[%s10404_s1 + $0x10] sm:$0xff]  ;;  %v715_v18 = vld [vmem:[%s10404_s1 + $0x1458] sm:$0xff] }
  0x66   :  { %942 = vmatpush1.msra.mxu0 %v596_v19  ;;  %1079 = vmatprep.subr.mxu1 %v165_v20  ;;  %v284_v19 = vld [vmem:[%s10404_s1 + $0x6e0] sm:$0xff]  ;;  %v709_v20 = vld [vmem:[%s10404_s1 + $0x1428] sm:$0xff] }
  0x67   :  { %943 = vmatprep.subr.mxu0 %v590_v21  ;;  %1080 = vmatpush1.msra.mxu1 %v164_v22  ;;  %v283_v21 = vld [vmem:[%s10404_s1 + $0x6d8] sm:$0xff]  ;;  %v708_v22 = vld [vmem:[%s10404_s1 + $0x1420] sm:$0xff] }
  0x68   :  { %944 = vmatpush1.msra.mxu0 %v589_v23  ;;  %1081 = vmatprep.subr.mxu1 %v158_v24  ;;  %v277_v23 = vld [vmem:[%s10404_s1 + $0x6a8] sm:$0xff]  ;;  %v702_v24 = vld [vmem:[%s10404_s1 + $0x13f0] sm:$0xff] }
  0x69   :  { %945 = vmatprep.subr.mxu0 %v583_v25  ;;  %1082 = vmatpush1.msra.mxu1 %v157_v26  ;;  %v276_v25 = vld [vmem:[%s10404_s1 + $0x6a0] sm:$0xff]  ;;  %v701_v26 = vld [vmem:[%s10404_s1 + $0x13e8] sm:$0xff] }
  0x6a   :  { %946 = vmatpush1.msra.mxu0 %v582_v27  ;;  %1083 = vmatprep.subr.mxu1 %v151_v28  ;;  %v270_v27 = vld [vmem:[%s10404_s1 + $0x670] sm:$0xff]  ;;  %v695_v28 = vld [vmem:[%s10404_s1 + $0x13b8] sm:$0xff] }
  0x6b   :  { %947 = vmatprep.subr.mxu0 %v576_v29  ;;  %1084 = vmatpush1.msra.mxu1 %v150_v30  ;;  %v269_v29 = vld [vmem:[%s10404_s1 + $0x668] sm:$0xff]  ;;  %v694_v30 = vld [vmem:[%s10404_s1 + $0x13b0] sm:$0xff] }
  0x6c   :  { %948 = vmatpush1.msra.mxu0 %v575_v31  ;;  %1085 = vmatprep.subr.mxu1 %v144_v32  ;;  %v263_v31 = vld [vmem:[%s10404_s1 + $0x638] sm:$0xff]  ;;  %v688_v32 = vld [vmem:[%s10404_s1 + $0x1380] sm:$0xff] }
  0x6d   :  { %949 = vmatprep.subr.mxu0 %v569_v33  ;;  %1086 = vmatpush1.msra.mxu1 %v143_v34  ;;  %v262_v33 = vld [vmem:[%s10404_s1 + $0x630] sm:$0xff]  ;;  %v687_v34 = vld [vmem:[%s10404_s1 + $0x1378] sm:$0xff] }
  0x6e   :  { %950 = vmatpush1.msra.mxu0 %v568_v35  ;;  %1087 = vmatprep.subr.mxu1 %v137_v36  ;;  %v256_v35 = vld [vmem:[%s10404_s1 + $0x600] sm:$0xff]  ;;  %v681_v36 = vld [vmem:[%s10404_s1 + $0x1348] sm:$0xff] }
  0x6f   :  { %951 = vmatprep.subr.mxu0 %v562_v37  ;;  %1088 = vmatpush1.msra.mxu1 %v136_v38  ;;  %v255_v37 = vld [vmem:[%s10404_s1 + $0x5f8] sm:$0xff]  ;;  %v680_v38 = vld [vmem:[%s10404_s1 + $0x1340] sm:$0xff] }
  0x70   :  { %952 = vmatpush1.msra.mxu0 %v561_v39  ;;  %1089 = vmatprep.subr.mxu1 %v130_v40  ;;  %v249_v39 = vld [vmem:[%s10404_s1 + $0x5c8] sm:$0xff]  ;;  %v674_v40 = vld [vmem:[%s10404_s1 + $0x1310] sm:$0xff] }
  0x71   :  { %953 = vmatprep.subr.mxu0 %v555_v41  ;;  %1090 = vmatpush1.msra.mxu1 %v129_v42  ;;  %v248_v41 = vld [vmem:[%s10404_s1 + $0x5c0] sm:$0xff]  ;;  %v673_v42 = vld [vmem:[%s10404_s1 + $0x1308] sm:$0xff] }
  0x72   :  { %954 = vmatpush1.msra.mxu0 %v554_v43  ;;  %1091 = vmatprep.subr.mxu1 %v123_v44  ;;  %v242_v43 = vld [vmem:[%s10404_s1 + $0x590] sm:$0xff]  ;;  %v667_v44 = vld [vmem:[%s10404_s1 + $0x12d8] sm:$0xff] }
  0x73   :  { %955 = vmatprep.subr.mxu0 %v548_v45  ;;  %1092 = vmatpush1.msra.mxu1 %v122_v46  ;;  %v241_v45 = vld [vmem:[%s10404_s1 + $0x588] sm:$0xff]  ;;  %v666_v46 = vld [vmem:[%s10404_s1 + $0x12d0] sm:$0xff] }
  0x74   :  { %956 = vmatpush1.msra.mxu0 %v547_v47  ;;  %1093 = vmatprep.subr.mxu1 %v116_v48  ;;  %v235_v47 = vld [vmem:[%s10404_s1 + $0x558] sm:$0xff]  ;;  %v660_v48 = vld [vmem:[%s10404_s1 + $0x12a0] sm:$0xff] }
  0x75   :  { %957 = vmatprep.subr.mxu0 %v541_v49  ;;  %1094 = vmatpush1.msra.mxu1 %v115_v50  ;;  %v234_v49 = vld [vmem:[%s10404_s1 + $0x550] sm:$0xff]  ;;  %v659_v50 = vld [vmem:[%s10404_s1 + $0x1298] sm:$0xff] }
  0x76   :  { %958 = vmatpush1.msra.mxu0 %v540_v51  ;;  %1095 = vmatprep.subr.mxu1 %v109_v52  ;;  %v228_v51 = vld [vmem:[%s10404_s1 + $0x520] sm:$0xff]  ;;  %v653_v52 = vld [vmem:[%s10404_s1 + $0x1268] sm:$0xff] }
  0x77   :  { %959 = vmatprep.subr.mxu0 %v534_v53  ;;  %1096 = vmatpush1.msra.mxu1 %v108_v54  ;;  %v227_v53 = vld [vmem:[%s10404_s1 + $0x518] sm:$0xff]  ;;  %v652_v54 = vld [vmem:[%s10404_s1 + $0x1260] sm:$0xff] }
  0x78   :  { %960 = vmatpush1.msra.mxu0 %v533_v55  ;;  %1097 = vmatprep.subr.mxu1 %v102_v56  ;;  %v221_v55 = vld [vmem:[%s10404_s1 + $0x4e8] sm:$0xff]  ;;  %v646_v56 = vld [vmem:[%s10404_s1 + $0x1230] sm:$0xff] }
  0x79   :  { %961 = vmatprep.subr.mxu0 %v527_v57  ;;  %1098 = vmatpush1.msra.mxu1 %v101_v58  ;;  %v220_v57 = vld [vmem:[%s10404_s1 + $0x4e0] sm:$0xff]  ;;  %v645_v58 = vld [vmem:[%s10404_s1 + $0x1228] sm:$0xff] }
  0x7a   :  { %962 = vmatpush1.msra.mxu0 %v526_v59  ;;  %1099 = vmatprep.subr.mxu1 %v95_v60  ;;  %v214_v59 = vld [vmem:[%s10404_s1 + $0x4b0] sm:$0xff]  ;;  %v639_v60 = vld [vmem:[%s10404_s1 + $0x11f8] sm:$0xff] }
  0x7b   :  { %963 = vmatprep.subr.mxu0 %v520_v61  ;;  %1100 = vmatpush1.msra.mxu1 %v94_v62  ;;  %v213_v61 = vld [vmem:[%s10404_s1 + $0x4a8] sm:$0xff]  ;;  %v638_v62 = vld [vmem:[%s10404_s1 + $0x11f0] sm:$0xff] }
  0x7c   :  { %964 = vmatpush1.msra.mxu0 %v519_v0  ;;  %1101 = vmatprep.subr.mxu1 %v88_v2  ;;  %v207_v0 = vld [vmem:[%s10404_s1 + $0x478] sm:$0xff]  ;;  %v632_v2 = vld [vmem:[%s10404_s1 + $0x11c0] sm:$0xff] }
  0x7d   :  { %965 = vmatprep.subr.mxu0 %v513_v3  ;;  %1102 = vmatpush1.msra.mxu1 %v87_v4  ;;  %v206_v3 = vld [vmem:[%s10404_s1 + $0x470] sm:$0xff]  ;;  %v631_v4 = vld [vmem:[%s10404_s1 + $0x11b8] sm:$0xff] }
  0x7e   :  { %966 = vmatpush1.msra.mxu0 %v512_v5  ;;  %1103 = vmatprep.subr.mxu1 %v81_v6  ;;  %v200_v5 = vld [vmem:[%s10404_s1 + $0x440] sm:$0xff]  ;;  %v625_v6 = vld [vmem:[%s10404_s1 + $0x1188] sm:$0xff] }
  0x7f   :  { %967 = vmatprep.subr.mxu0 %v730_v7  ;;  %1104 = vmatpush1.msra.mxu1 %v80_v8  ;;  %v199_v7 = vld [vmem:[%s10404_s1 + $0x438] sm:$0xff]  ;;  %v624_v8 = vld [vmem:[%s10404_s1 + $0x1180] sm:$0xff] }
  0x80   :  { %968 = vmatpush2.msra.mxu0 %v729_v9  ;;  %1105 = vmatprep.subr.mxu1 %v74_v10  ;;  %v193_v9 = vld [vmem:[%s10404_s1 + $0x408] sm:$0xff] }
  0x81   :  { %969 = vmatprep.subr.mxu0 %v723_v11  ;;  %1106 = vmatpush1.msra.mxu1 %v73_v12  ;;  %v7373_v10 = vld [vmem:[%s10403_s0 + $0x28] sm:$0xff]  ;;  %v192_v11 = vld [vmem:[%s10404_s1 + $0x400] sm:$0xff] }
  0x82   :  { %970 = vmatpush2.msra.mxu0 %v722_v13  ;;  %1107 = vmatprep.subr.mxu1 %v67_v14  ;;  %v7381_v12 = vld [vmem:[%s10403_s0 + $0x20] sm:$0xff]  ;;  %v186_v13 = vld [vmem:[%s10404_s1 + $0x3d0] sm:$0xff] }
  0x83   :  { %971 = vmatprep.subr.mxu0 %v716_v15  ;;  %1108 = vmatpush1.msra.mxu1 %v66_v16  ;;  %v396_v14 = vld [vmem:[%s10404_s1 + $0xa60] sm:$0xff]  ;;  %v185_v15 = vld [vmem:[%s10404_s1 + $0x3c8] sm:$0xff]  ;;  %v395_v16 = vld [vmem:[%s10404_s1 + $0xa58] sm:$0xff] }
  0x84   :  { %972 = vmatpush2.msra.mxu0 %v715_v18  ;;  %1109 = vmatprep.subr.mxu1 %v284_v19  ;;  %v179_v18 = vld [vmem:[%s10404_s1 + $0x398] sm:$0xff]  ;;  %v389_v19 = vld [vmem:[%s10404_s1 + $0xa28] sm:$0xff] }
  0x85   :  { %973 = vmatprep.subr.mxu0 %v709_v20  ;;  %1110 = vmatpush2.msra.mxu1 %v283_v21  ;;  %v178_v20 = vld [vmem:[%s10404_s1 + $0x390] sm:$0xff]  ;;  %v388_v21 = vld [vmem:[%s10404_s1 + $0xa20] sm:$0xff] }
  0x86   :  { %974 = vmatpush2.msra.mxu0 %v708_v22  ;;  %1111 = vmatprep.subr.mxu1 %v277_v23  ;;  %v382_v22 = vld [vmem:[%s10404_s1 + $0x9f0] sm:$0xff]  ;;  %v620_v23 = vld [vmem:[%s10404_s1 + $0x1160] sm:$0xff] }
  0x87   :  { %975 = vmatprep.subr.mxu0 %v702_v24  ;;  %1112 = vmatpush2.msra.mxu1 %v276_v25  ;;  %v381_v24 = vld [vmem:[%s10404_s1 + $0x9e8] sm:$0xff]  ;;  %v619_v25 = vld [vmem:[%s10404_s1 + $0x1158] sm:$0xff] }
  0x88   :  { %976 = vmatpush2.msra.mxu0 %v701_v26  ;;  %1113 = vmatprep.subr.mxu1 %v270_v27  ;;  %v375_v26 = vld [vmem:[%s10404_s1 + $0x9b8] sm:$0xff]  ;;  %v613_v27 = vld [vmem:[%s10404_s1 + $0x1128] sm:$0xff] }
  0x89   :  { %977 = vmatprep.subr.mxu0 %v695_v28  ;;  %1114 = vmatpush2.msra.mxu1 %v269_v29  ;;  %v374_v28 = vld [vmem:[%s10404_s1 + $0x9b0] sm:$0xff]  ;;  %v368_v29 = vld [vmem:[%s10404_s1 + $0x980] sm:$0xff] }
  0x8a   :  { %978 = vmatpush2.msra.mxu0 %v694_v30  ;;  %1115 = vmatprep.subr.mxu1 %v263_v31  ;;  %v606_v30 = vld [vmem:[%s10404_s1 + $0x10f0] sm:$0xff]  ;;  %v605_v31 = vld [vmem:[%s10404_s1 + $0x10e8] sm:$0xff] }
  0x8b   :  { %979 = vmatprep.subr.mxu0 %v688_v32  ;;  %1116 = vmatpush2.msra.mxu1 %v262_v33  ;;  %v361_v32 = vld [vmem:[%s10404_s1 + $0x948] sm:$0xff]  ;;  %v599_v33 = vld [vmem:[%s10404_s1 + $0x10b8] sm:$0xff] }
  0x8c   :  { %980 = vmatpush2.msra.mxu0 %v687_v34  ;;  %1117 = vmatprep.subr.mxu1 %v256_v35  ;;  %v360_v34 = vld [vmem:[%s10404_s1 + $0x940] sm:$0xff]  ;;  %v598_v35 = vld [vmem:[%s10404_s1 + $0x10b0] sm:$0xff] }
  0x8d   :  { %981 = vmatprep.subr.mxu0 %v681_v36  ;;  %1118 = vmatpush2.msra.mxu1 %v255_v37  ;;  %v354_v36 = vld [vmem:[%s10404_s1 + $0x910] sm:$0xff]  ;;  %v592_v37 = vld [vmem:[%s10404_s1 + $0x1080] sm:$0xff] }
  0x8e   :  { %982 = vmatpush2.msra.mxu0 %v680_v38  ;;  %1119 = vmatprep.subr.mxu1 %v249_v39  ;;  %v353_v38 = vld [vmem:[%s10404_s1 + $0x908] sm:$0xff]  ;;  %v591_v39 = vld [vmem:[%s10404_s1 + $0x1078] sm:$0xff] }
  0x8f   :  { %983 = vmatprep.subr.mxu0 %v674_v40  ;;  %1120 = vmatpush2.msra.mxu1 %v248_v41  ;;  %v347_v40 = vld [vmem:[%s10404_s1 + $0x8d8] sm:$0xff]  ;;  %v585_v41 = vld [vmem:[%s10404_s1 + $0x1048] sm:$0xff] }
  0x90   :  { %984 = vmatpush2.msra.mxu0 %v673_v42  ;;  %1121 = vmatprep.subr.mxu1 %v242_v43  ;;  %v346_v42 = vld [vmem:[%s10404_s1 + $0x8d0] sm:$0xff]  ;;  %v584_v43 = vld [vmem:[%s10404_s1 + $0x1040] sm:$0xff] }
  0x91   :  { %985 = vmatprep.subr.mxu0 %v667_v44  ;;  %1122 = vmatpush2.msra.mxu1 %v241_v45  ;;  %v340_v44 = vld [vmem:[%s10404_s1 + $0x8a0] sm:$0xff]  ;;  %v578_v45 = vld [vmem:[%s10404_s1 + $0x1010] sm:$0xff] }
  0x92   :  { %986 = vmatpush2.msra.mxu0 %v666_v46  ;;  %1123 = vmatprep.subr.mxu1 %v235_v47  ;;  %v339_v46 = vld [vmem:[%s10404_s1 + $0x898] sm:$0xff]  ;;  %v577_v47 = vld [vmem:[%s10404_s1 + $0x1008] sm:$0xff] }
  0x93   :  { %987 = vmatprep.subr.mxu0 %v660_v48  ;;  %1124 = vmatpush2.msra.mxu1 %v234_v49  ;;  %v333_v48 = vld [vmem:[%s10404_s1 + $0x868] sm:$0xff]  ;;  %v571_v49 = vld [vmem:[%s10404_s1 + $0xfd8] sm:$0xff] }
  0x94   :  { %988 = vmatpush2.msra.mxu0 %v659_v50  ;;  %1125 = vmatprep.subr.mxu1 %v228_v51  ;;  %v332_v50 = vld [vmem:[%s10404_s1 + $0x860] sm:$0xff]  ;;  %v570_v51 = vld [vmem:[%s10404_s1 + $0xfd0] sm:$0xff] }
  0x95   :  { %989 = vmatprep.subr.mxu0 %v653_v52  ;;  %1126 = vmatpush2.msra.mxu1 %v227_v53  ;;  %v326_v52 = vld [vmem:[%s10404_s1 + $0x830] sm:$0xff]  ;;  %v564_v53 = vld [vmem:[%s10404_s1 + $0xfa0] sm:$0xff] }
  0x96   :  { %990 = vmatpush2.msra.mxu0 %v652_v54  ;;  %1127 = vmatprep.subr.mxu1 %v221_v55  ;;  %v325_v54 = vld [vmem:[%s10404_s1 + $0x828] sm:$0xff]  ;;  %v563_v55 = vld [vmem:[%s10404_s1 + $0xf98] sm:$0xff] }
  0x97   :  { %991 = vmatprep.subr.mxu0 %v646_v56  ;;  %1128 = vmatpush2.msra.mxu1 %v220_v57  ;;  %v319_v56 = vld [vmem:[%s10404_s1 + $0x7f8] sm:$0xff]  ;;  %v557_v57 = vld [vmem:[%s10404_s1 + $0xf68] sm:$0xff] }
  0x98   :  { %992 = vmatpush2.msra.mxu0 %v645_v58  ;;  %1129 = vmatprep.subr.mxu1 %v214_v59  ;;  %v318_v58 = vld [vmem:[%s10404_s1 + $0x7f0] sm:$0xff]  ;;  %v556_v59 = vld [vmem:[%s10404_s1 + $0xf60] sm:$0xff] }
  0x99   :  { %993 = vmatprep.subr.mxu0 %v639_v60  ;;  %1130 = vmatpush2.msra.mxu1 %v213_v61  ;;  %v312_v60 = vld [vmem:[%s10404_s1 + $0x7c0] sm:$0xff]  ;;  %v550_v61 = vld [vmem:[%s10404_s1 + $0xf30] sm:$0xff] }
  0x9a   :  { %994 = vmatpush2.msra.mxu0 %v638_v62  ;;  %1131 = vmatprep.subr.mxu1 %v207_v0  ;;  %v311_v62 = vld [vmem:[%s10404_s1 + $0x7b8] sm:$0xff]  ;;  %v549_v0 = vld [vmem:[%s10404_s1 + $0xf28] sm:$0xff] }
  0x9b   :  { %995 = vmatprep.subr.mxu0 %v632_v2  ;;  %1132 = vmatpush2.msra.mxu1 %v206_v3  ;;  %v305_v2 = vld [vmem:[%s10404_s1 + $0x788] sm:$0xff]  ;;  %v543_v3 = vld [vmem:[%s10404_s1 + $0xef8] sm:$0xff] }
  0x9c   :  { %996 = vmatpush2.msra.mxu0 %v631_v4  ;;  %1133 = vmatprep.subr.mxu1 %v200_v5  ;;  %v304_v4 = vld [vmem:[%s10404_s1 + $0x780] sm:$0xff]  ;;  %v542_v5 = vld [vmem:[%s10404_s1 + $0xef0] sm:$0xff] }
  0x9d   :  { %997 = vmatprep.subr.mxu0 %v625_v6  ;;  %1134 = vmatpush2.msra.mxu1 %v199_v7  ;;  %v298_v6 = vld [vmem:[%s10404_s1 + $0x750] sm:$0xff]  ;;  %v536_v7 = vld [vmem:[%s10404_s1 + $0xec0] sm:$0xff] }
  0x9e   :  { %998 = vmatpush2.msra.mxu0 %v624_v8  ;;  %1135 = vmatprep.subr.mxu1 %v193_v9  ;;  %v297_v8 = vld [vmem:[%s10404_s1 + $0x748] sm:$0xff]  ;;  %v535_v9 = vld [vmem:[%s10404_s1 + $0xeb8] sm:$0xff] }
  0x9f   :  { %999 = vmatprep.mubr.f32.mxu0 %v7373_v10  ;;  %1136 = vmatpush2.msra.mxu1 %v192_v11  ;;  %v291_v11 = vld [vmem:[%s10404_s1 + $0x718] sm:$0xff] }
  0xa0   :  { %1000 = vmatmul.mubr.f32.vlgmr.msra.gmra.mxu0 %v7381_v12  ;;  %1137 = vmatprep.subr.mxu1 %v186_v13  ;;  %v529_v13 = vld [vmem:[%s10404_s1 + $0xe88] sm:$0xff] }
  0xa1   :  { %1148 = vmatprep.subr.mxu0 %v396_v14  ;;  %1138 = vmatpush2.msra.mxu1 %v185_v15  ;;  %v290_v14 = vld [vmem:[%s10404_s1 + $0x710] sm:$0xff]  ;;  %v528_v15 = vld [vmem:[%s10404_s1 + $0xe80] sm:$0xff] }
  0xa2   :  { %1149 = vmatpush1.msra.mxu0 %v395_v16  ;;  %1139 = vmatprep.subr.mxu1 %v179_v18  ;;  %v508_v16 = vld [vmem:[%s10404_s1 + $0xde0] sm:$0xff]  ;;  %v522_v18 = vld [vmem:[%s10404_s1 + $0xe50] sm:$0xff] }
  0xa3   :  { %1150 = vmatprep.subr.mxu0 %v389_v19  ;;  %1140 = vmatpush2.msra.mxu1 %v178_v20  ;;  %v507_v19 = vld [vmem:[%s10404_s1 + $0xdd8] sm:$0xff]  ;;  %v521_v20 = vld [vmem:[%s10404_s1 + $0xe48] sm:$0xff] }
  0xa4   :  { %1151 = vmatpush1.msra.mxu0 %v388_v21  ;;  %1141 = vmatprep.mubr.f32.mxu1 %v6966_v63  ;;  %v612_v63 = vld [vmem:[%s10404_s1 + $0x1120] sm:$0xff]  ;;  %v501_v21 = vld [vmem:[%s10404_s1 + $0xda8] sm:$0xff] }
  0xa5   :  { %1152 = vmatprep.subr.mxu0 %v382_v22  ;;  %1219 = vmatprep.subr.mxu1 %v620_v23  ;;  %v515_v22 = vld [vmem:[%s10404_s1 + $0xe18] sm:$0xff]  ;;  %v500_v23 = vld [vmem:[%s10404_s1 + $0xda0] sm:$0xff] }
  0xa6   :  { %1142 = vmatmul.mubr.f32.vlgmr.msra.gmra.mxu1 %v6974_v1  ;;  %1153 = vmatpush1.msra.mxu0 %v381_v24  ;;  %v367_v1 = vld [vmem:[%s10404_s1 + $0x978] sm:$0xff]  ;;  %v514_v24 = vld [vmem:[%s10404_s1 + $0xe10] sm:$0xff] }
  0xa7   :  { %1220 = vmatpush1.msra.mxu1 %v619_v25  ;;  %1154 = vmatprep.subr.mxu0 %v375_v26  ;;  %v494_v25 = vld [vmem:[%s10404_s1 + $0xd70] sm:$0xff]  ;;  %v732_v26 = vld [vmem:[%s10404_s1 + $0x14e0] sm:$0xff] }
  0xa8   :  { %1221 = vmatprep.subr.mxu1 %v613_v27  ;;  %1155 = vmatpush1.msra.mxu0 %v374_v28  ;;  %v493_v27 = vld [vmem:[%s10404_s1 + $0xd68] sm:$0xff]  ;;  %v731_v28 = vld [vmem:[%s10404_s1 + $0x14d8] sm:$0xff] }
  0xa9   :  { %1222 = vmatpush1.msra.mxu1 %v612_v63  ;;  %1156 = vmatprep.subr.mxu0 %v368_v29  ;;  %v487_v63 = vld [vmem:[%s10404_s1 + $0xd38] sm:$0xff]  ;;  %v725_v29 = vld [vmem:[%s10404_s1 + $0x14a8] sm:$0xff] }
  0xaa   :  { %1223 = vmatprep.subr.mxu1 %v606_v30  ;;  %1157 = vmatpush1.msra.mxu0 %v367_v1  ;;  %v486_v30 = vld [vmem:[%s10404_s1 + $0xd30] sm:$0xff]  ;;  %v724_v1 = vld [vmem:[%s10404_s1 + $0x14a0] sm:$0xff] }
  0xab   :  { %1224 = vmatpush1.msra.mxu1 %v605_v31  ;;  %1158 = vmatprep.subr.mxu0 %v361_v32  ;;  %v480_v31 = vld [vmem:[%s10404_s1 + $0xd00] sm:$0xff]  ;;  %v718_v32 = vld [vmem:[%s10404_s1 + $0x1470] sm:$0xff] }
  0xac   :  { %1225 = vmatprep.subr.mxu1 %v599_v33  ;;  %1159 = vmatpush1.msra.mxu0 %v360_v34  ;;  %v479_v33 = vld [vmem:[%s10404_s1 + $0xcf8] sm:$0xff]  ;;  %v717_v34 = vld [vmem:[%s10404_s1 + $0x1468] sm:$0xff] }
  0xad   :  { %1226 = vmatpush1.msra.mxu1 %v598_v35  ;;  %1160 = vmatprep.subr.mxu0 %v354_v36  ;;  %v473_v35 = vld [vmem:[%s10404_s1 + $0xcc8] sm:$0xff]  ;;  %v711_v36 = vld [vmem:[%s10404_s1 + $0x1438] sm:$0xff] }
  0xae   :  { %1227 = vmatprep.subr.mxu1 %v592_v37  ;;  %1161 = vmatpush1.msra.mxu0 %v353_v38  ;;  %v472_v37 = vld [vmem:[%s10404_s1 + $0xcc0] sm:$0xff]  ;;  %v710_v38 = vld [vmem:[%s10404_s1 + $0x1430] sm:$0xff] }
  0xaf   :  { %1228 = vmatpush1.msra.mxu1 %v591_v39  ;;  %1162 = vmatprep.subr.mxu0 %v347_v40  ;;  %v466_v39 = vld [vmem:[%s10404_s1 + $0xc90] sm:$0xff]  ;;  %v704_v40 = vld [vmem:[%s10404_s1 + $0x1400] sm:$0xff] }
  0xb0   :  { %1229 = vmatprep.subr.mxu1 %v585_v41  ;;  %1163 = vmatpush1.msra.mxu0 %v346_v42  ;;  %v465_v41 = vld [vmem:[%s10404_s1 + $0xc88] sm:$0xff]  ;;  %v703_v42 = vld [vmem:[%s10404_s1 + $0x13f8] sm:$0xff] }
  0xb1   :  { %1230 = vmatpush1.msra.mxu1 %v584_v43  ;;  %1164 = vmatprep.subr.mxu0 %v340_v44  ;;  %v459_v43 = vld [vmem:[%s10404_s1 + $0xc58] sm:$0xff]  ;;  %v697_v44 = vld [vmem:[%s10404_s1 + $0x13c8] sm:$0xff] }
  0xb2   :  { %1231 = vmatprep.subr.mxu1 %v578_v45  ;;  %1165 = vmatpush1.msra.mxu0 %v339_v46  ;;  %v458_v45 = vld [vmem:[%s10404_s1 + $0xc50] sm:$0xff]  ;;  %v696_v46 = vld [vmem:[%s10404_s1 + $0x13c0] sm:$0xff] }
  0xb3   :  { %1232 = vmatpush1.msra.mxu1 %v577_v47  ;;  %1166 = vmatprep.subr.mxu0 %v333_v48  ;;  %v452_v47 = vld [vmem:[%s10404_s1 + $0xc20] sm:$0xff]  ;;  %v690_v48 = vld [vmem:[%s10404_s1 + $0x1390] sm:$0xff] }
  0xb4   :  { %1233 = vmatprep.subr.mxu1 %v571_v49  ;;  %1167 = vmatpush1.msra.mxu0 %v332_v50  ;;  %v451_v49 = vld [vmem:[%s10404_s1 + $0xc18] sm:$0xff]  ;;  %v689_v50 = vld [vmem:[%s10404_s1 + $0x1388] sm:$0xff] }
  0xb5   :  { %1234 = vmatpush1.msra.mxu1 %v570_v51  ;;  %1168 = vmatprep.subr.mxu0 %v326_v52  ;;  %v445_v51 = vld [vmem:[%s10404_s1 + $0xbe8] sm:$0xff]  ;;  %v683_v52 = vld [vmem:[%s10404_s1 + $0x1358] sm:$0xff] }
  0xb6   :  { %1235 = vmatprep.subr.mxu1 %v564_v53  ;;  %1169 = vmatpush1.msra.mxu0 %v325_v54  ;;  %v444_v53 = vld [vmem:[%s10404_s1 + $0xbe0] sm:$0xff]  ;;  %v682_v54 = vld [vmem:[%s10404_s1 + $0x1350] sm:$0xff] }
  0xb7   :  { %1236 = vmatpush1.msra.mxu1 %v563_v55  ;;  %1170 = vmatprep.subr.mxu0 %v319_v56  ;;  %v438_v55 = vld [vmem:[%s10404_s1 + $0xbb0] sm:$0xff]  ;;  %v676_v56 = vld [vmem:[%s10404_s1 + $0x1320] sm:$0xff] }
  0xb8   :  { %1237 = vmatprep.subr.mxu1 %v557_v57  ;;  %1171 = vmatpush1.msra.mxu0 %v318_v58  ;;  %v437_v57 = vld [vmem:[%s10404_s1 + $0xba8] sm:$0xff]  ;;  %v675_v58 = vld [vmem:[%s10404_s1 + $0x1318] sm:$0xff] }
  0xb9   :  { %1238 = vmatpush1.msra.mxu1 %v556_v59  ;;  %1172 = vmatprep.subr.mxu0 %v312_v60  ;;  %v431_v59 = vld [vmem:[%s10404_s1 + $0xb78] sm:$0xff]  ;;  %v669_v60 = vld [vmem:[%s10404_s1 + $0x12e8] sm:$0xff] }
  0xba   :  { %1239 = vmatprep.subr.mxu1 %v550_v61  ;;  %1173 = vmatpush1.msra.mxu0 %v311_v62  ;;  %v430_v61 = vld [vmem:[%s10404_s1 + $0xb70] sm:$0xff]  ;;  %v668_v62 = vld [vmem:[%s10404_s1 + $0x12e0] sm:$0xff] }
  0xbb   :  { %1240 = vmatpush1.msra.mxu1 %v549_v0  ;;  %1174 = vmatprep.subr.mxu0 %v305_v2  ;;  %v424_v0 = vld [vmem:[%s10404_s1 + $0xb40] sm:$0xff]  ;;  %v662_v2 = vld [vmem:[%s10404_s1 + $0x12b0] sm:$0xff] }
  0xbc   :  { %1241 = vmatprep.subr.mxu1 %v543_v3  ;;  %1175 = vmatpush1.msra.mxu0 %v304_v4  ;;  %v423_v3 = vld [vmem:[%s10404_s1 + $0xb38] sm:$0xff]  ;;  %v661_v4 = vld [vmem:[%s10404_s1 + $0x12a8] sm:$0xff] }
  0xbd   :  { %1242 = vmatpush1.msra.mxu1 %v542_v5  ;;  %1176 = vmatprep.subr.mxu0 %v298_v6  ;;  %v417_v5 = vld [vmem:[%s10404_s1 + $0xb08] sm:$0xff]  ;;  %v655_v6 = vld [vmem:[%s10404_s1 + $0x1278] sm:$0xff] }
  0xbe   :  { %1243 = vmatprep.subr.mxu1 %v536_v7  ;;  %1177 = vmatpush1.msra.mxu0 %v297_v8  ;;  %v416_v7 = vld [vmem:[%s10404_s1 + $0xb00] sm:$0xff]  ;;  %v654_v8 = vld [vmem:[%s10404_s1 + $0x1270] sm:$0xff] }
  0xbf   :  { %1244 = vmatpush1.msra.mxu1 %v535_v9  ;;  %1178 = vmatprep.subr.mxu0 %v291_v11  ;;  %v410_v9 = vld [vmem:[%s10404_s1 + $0xad0] sm:$0xff]  ;;  %v648_v11 = vld [vmem:[%s10404_s1 + $0x1240] sm:$0xff] }
  0xc0   :  { %1245 = vmatprep.subr.mxu1 %v529_v13  ;;  %1179 = vmatpush1.msra.mxu0 %v290_v14  ;;  %v409_v13 = vld [vmem:[%s10404_s1 + $0xac8] sm:$0xff]  ;;  %v647_v14 = vld [vmem:[%s10404_s1 + $0x1238] sm:$0xff] }
  0xc1   :  { %1246 = vmatpush1.msra.mxu1 %v528_v15  ;;  %1180 = vmatprep.subr.mxu0 %v508_v16  ;;  %v403_v15 = vld [vmem:[%s10404_s1 + $0xa98] sm:$0xff]  ;;  %v641_v16 = vld [vmem:[%s10404_s1 + $0x1208] sm:$0xff] }
  0xc2   :  { %1247 = vmatprep.subr.mxu1 %v522_v18  ;;  %1181 = vmatpush2.msra.mxu0 %v507_v19  ;;  %v402_v18 = vld [vmem:[%s10404_s1 + $0xa90] sm:$0xff]  ;;  %v640_v19 = vld [vmem:[%s10404_s1 + $0x1200] sm:$0xff] }
  0xc3   :  { %1248 = vmatpush1.msra.mxu1 %v521_v20  ;;  %1182 = vmatprep.subr.mxu0 %v501_v21  ;;  %v634_v20 = vld [vmem:[%s10404_s1 + $0x11d0] sm:$0xff] }
  0xc4   :  { %1249 = vmatprep.subr.mxu1 %v515_v22  ;;  %1183 = vmatpush2.msra.mxu0 %v500_v23  ;;  %v174_v21 = vld [vmem:[%s10404_s1 + $0x370] sm:$0xff]  ;;  %v7780_v22 = vld [vmem:[%s10403_s0 + $0x18] sm:$0xff]  ;;  %v633_v23 = vld [vmem:[%s10404_s1 + $0x11c8] sm:$0xff] }
  0xc5   :  { %1250 = vmatpush1.msra.mxu1 %v514_v24  ;;  %1184 = vmatprep.subr.mxu0 %v494_v25  ;;  %v173_v24 = vld [vmem:[%s10404_s1 + $0x368] sm:$0xff]  ;;  %v7792_v25 = vld [vmem:[%s10403_s0 + $0x10] sm:$0xff] }
  0xc6   :  { %1251 = vmatprep.subr.mxu1 %v732_v26  ;;  %1185 = vmatpush2.msra.mxu0 %v493_v27  ;;  %v627_v26 = vld [vmem:[%s10404_s1 + $0x1198] sm:$0xff] }
  0xc7   :  { %1252 = vmatpush2.msra.mxu1 %v731_v28  ;;  %1186 = vmatprep.subr.mxu0 %v487_v63  ;;  %v167_v27 = vld [vmem:[%s10404_s1 + $0x338] sm:$0xff]  ;;  %v626_v28 = vld [vmem:[%s10404_s1 + $0x1190] sm:$0xff] }
  0xc8   :  { %1253 = vmatprep.subr.mxu1 %v725_v29  ;;  %1187 = vmatpush2.msra.mxu0 %v486_v30  ;;  %v166_v63 = vld [vmem:[%s10404_s1 + $0x330] sm:$0xff]  ;;  %v160_v30 = vld [vmem:[%s10404_s1 + $0x300] sm:$0xff] }
  0xc9   :  { %1254 = vmatpush2.msra.mxu1 %v724_v1  ;;  %1188 = vmatprep.subr.mxu0 %v480_v31  ;;  %v746_v29 = vld [vmem:[%s10404_s1 + $0x1550] sm:$0xff]  ;;  %v745_v1 = vld [vmem:[%s10404_s1 + $0x1548] sm:$0xff]  ;;  %v159_v31 = vld [vmem:[%s10404_s1 + $0x2f8] sm:$0xff] }
  0xca   :  { %1255 = vmatprep.subr.mxu1 %v718_v32  ;;  %1189 = vmatpush2.msra.mxu0 %v479_v33  ;;  %v739_v32 = vld [vmem:[%s10404_s1 + $0x1518] sm:$0xff]  ;;  %v153_v33 = vld [vmem:[%s10404_s1 + $0x2c8] sm:$0xff] }
  0xcb   :  { %1256 = vmatpush2.msra.mxu1 %v717_v34  ;;  %1190 = vmatprep.subr.mxu0 %v473_v35  ;;  %v146_v34 = vld [vmem:[%s10404_s1 + $0x290] sm:$0xff] }
  0xcc   :  { %1257 = vmatprep.subr.mxu1 %v711_v36  ;;  %1191 = vmatpush2.msra.mxu0 %v472_v37  ;;  %v398_v35 = vld [vmem:[%s10404_s1 + $0xa70] sm:$0xff]  ;;  %v145_v36 = vld [vmem:[%s10404_s1 + $0x288] sm:$0xff] }
  0xcd   :  { %1258 = vmatpush2.msra.mxu1 %v710_v38  ;;  %1192 = vmatprep.subr.mxu0 %v466_v39  ;;  %v397_v37 = vld [vmem:[%s10404_s1 + $0xa68] sm:$0xff]  ;;  %v7849_v38 = vld [vmem:[%s10403_s0 + $0x30] sm:$0xff]  ;;  %v139_v39 = vld [vmem:[%s10404_s1 + $0x258] sm:$0xff] }
  0xce   :  { %1259 = vmatprep.subr.mxu1 %v704_v40  ;;  %1193 = vmatpush2.msra.mxu0 %v465_v41  ;;  %v391_v40 = vld [vmem:[%s10404_s1 + $0xa38] sm:$0xff]  ;;  %v138_v41 = vld [vmem:[%s10404_s1 + $0x250] sm:$0xff] }
  0xcf   :  { %1260 = vmatpush2.msra.mxu1 %v703_v42  ;;  %1194 = vmatprep.subr.mxu0 %v459_v43  ;;  %v390_v42 = vld [vmem:[%s10404_s1 + $0xa30] sm:$0xff]  ;;  %v132_v43 = vld [vmem:[%s10404_s1 + $0x220] sm:$0xff] }
  0xd0   :  { %1261 = vmatprep.subr.mxu1 %v697_v44  ;;  %1195 = vmatpush2.msra.mxu0 %v458_v45  ;;  %v384_v44 = vld [vmem:[%s10404_s1 + $0xa00] sm:$0xff]  ;;  %v131_v45 = vld [vmem:[%s10404_s1 + $0x218] sm:$0xff] }
  0xd1   :  { %1262 = vmatpush2.msra.mxu1 %v696_v46  ;;  %1196 = vmatprep.subr.mxu0 %v452_v47  ;;  %v383_v46 = vld [vmem:[%s10404_s1 + $0x9f8] sm:$0xff]  ;;  %v125_v47 = vld [vmem:[%s10404_s1 + $0x1e8] sm:$0xff] }
  0xd2   :  { %1263 = vmatprep.subr.mxu1 %v690_v48  ;;  %1197 = vmatpush2.msra.mxu0 %v451_v49  ;;  %v377_v48 = vld [vmem:[%s10404_s1 + $0x9c8] sm:$0xff]  ;;  %v124_v49 = vld [vmem:[%s10404_s1 + $0x1e0] sm:$0xff] }
  0xd3   :  { %1264 = vmatpush2.msra.mxu1 %v689_v50  ;;  %1198 = vmatprep.subr.mxu0 %v445_v51  ;;  %v376_v50 = vld [vmem:[%s10404_s1 + $0x9c0] sm:$0xff]  ;;  %v118_v51 = vld [vmem:[%s10404_s1 + $0x1b0] sm:$0xff] }
  0xd4   :  { %1265 = vmatprep.subr.mxu1 %v683_v52  ;;  %1199 = vmatpush2.msra.mxu0 %v444_v53  ;;  %v370_v52 = vld [vmem:[%s10404_s1 + $0x990] sm:$0xff]  ;;  %v117_v53 = vld [vmem:[%s10404_s1 + $0x1a8] sm:$0xff] }
  0xd5   :  { %1266 = vmatpush2.msra.mxu1 %v682_v54  ;;  %1200 = vmatprep.subr.mxu0 %v438_v55  ;;  %v369_v54 = vld [vmem:[%s10404_s1 + $0x988] sm:$0xff]  ;;  %v111_v55 = vld [vmem:[%s10404_s1 + $0x178] sm:$0xff] }
  0xd6   :  { %1267 = vmatprep.subr.mxu1 %v676_v56  ;;  %1201 = vmatpush2.msra.mxu0 %v437_v57  ;;  %v363_v56 = vld [vmem:[%s10404_s1 + $0x958] sm:$0xff]  ;;  %v110_v57 = vld [vmem:[%s10404_s1 + $0x170] sm:$0xff] }
  0xd7   :  { %1268 = vmatpush2.msra.mxu1 %v675_v58  ;;  %1202 = vmatprep.subr.mxu0 %v431_v59  ;;  %v362_v58 = vld [vmem:[%s10404_s1 + $0x950] sm:$0xff]  ;;  %v104_v59 = vld [vmem:[%s10404_s1 + $0x140] sm:$0xff] }
  0xd8   :  { %1269 = vmatprep.subr.mxu1 %v669_v60  ;;  %1203 = vmatpush2.msra.mxu0 %v430_v61  ;;  %v356_v60 = vld [vmem:[%s10404_s1 + $0x920] sm:$0xff]  ;;  %v103_v61 = vld [vmem:[%s10404_s1 + $0x138] sm:$0xff] }
  0xd9   :  { %1270 = vmatpush2.msra.mxu1 %v668_v62  ;;  %1204 = vmatprep.subr.mxu0 %v424_v0  ;;  %v355_v62 = vld [vmem:[%s10404_s1 + $0x918] sm:$0xff]  ;;  %v97_v0 = vld [vmem:[%s10404_s1 + $0x108] sm:$0xff] }
  0xda   :  { %1271 = vmatprep.subr.mxu1 %v662_v2  ;;  %1205 = vmatpush2.msra.mxu0 %v423_v3  ;;  %v349_v2 = vld [vmem:[%s10404_s1 + $0x8e8] sm:$0xff]  ;;  %v96_v3 = vld [vmem:[%s10404_s1 + $0x100] sm:$0xff] }
  0xdb   :  { %1272 = vmatpush2.msra.mxu1 %v661_v4  ;;  %1206 = vmatprep.subr.mxu0 %v417_v5  ;;  %v348_v4 = vld [vmem:[%s10404_s1 + $0x8e0] sm:$0xff]  ;;  %v90_v5 = vld [vmem:[%s10404_s1 + $0xd0] sm:$0xff] }
  0xdc   :  { %1273 = vmatprep.subr.mxu1 %v655_v6  ;;  %1207 = vmatpush2.msra.mxu0 %v416_v7  ;;  %v342_v6 = vld [vmem:[%s10404_s1 + $0x8b0] sm:$0xff]  ;;  %v89_v7 = vld [vmem:[%s10404_s1 + $0xc8] sm:$0xff] }
  0xdd   :  { %1274 = vmatpush2.msra.mxu1 %v654_v8  ;;  %1208 = vmatprep.subr.mxu0 %v410_v9  ;;  %v341_v8 = vld [vmem:[%s10404_s1 + $0x8a8] sm:$0xff]  ;;  %v83_v9 = vld [vmem:[%s10404_s1 + $0x98] sm:$0xff] }
  0xde   :  { %1275 = vmatprep.subr.mxu1 %v648_v11  ;;  %1209 = vmatpush2.msra.mxu0 %v409_v13  ;;  %v335_v11 = vld [vmem:[%s10404_s1 + $0x878] sm:$0xff]  ;;  %v82_v13 = vld [vmem:[%s10404_s1 + $0x90] sm:$0xff] }
  0xdf   :  { %1276 = vmatpush2.msra.mxu1 %v647_v14  ;;  %1210 = vmatprep.subr.mxu0 %v403_v15  ;;  %v334_v14 = vld [vmem:[%s10404_s1 + $0x870] sm:$0xff]  ;;  %v76_v15 = vld [vmem:[%s10404_s1 + $0x60] sm:$0xff] }
  0xe0   :  { %1277 = vmatprep.subr.mxu1 %v641_v16  ;;  %1211 = vmatpush2.msra.mxu0 %v402_v18  ;;  %v328_v16 = vld [vmem:[%s10404_s1 + $0x840] sm:$0xff]  ;;  %v75_v18 = vld [vmem:[%s10404_s1 + $0x58] sm:$0xff] }
  0xe1   :  { %1212 = vmatprep.mubr.f32.mxu0 %v7780_v22  ;;  %1278 = vmatpush2.msra.mxu1 %v640_v19  ;;  %v327_v19 = vld [vmem:[%s10404_s1 + $0x838] sm:$0xff] }
  0xe2   :  { %1213 = vmatmul.mubr.f32.vlgmr.msra.gmra.mxu0 %v7792_v25  ;;  %1279 = vmatprep.subr.mxu1 %v634_v20  ;;  %v69_v20 = vld [vmem:[%s10404_s1 + $0x28] sm:$0xff] }
  0xe3   :  { %1361 = vmatprep.subr.mxu0 %v174_v21  ;;  %1280 = vmatpush2.msra.mxu1 %v633_v23  ;;  %v321_v21 = vld [vmem:[%s10404_s1 + $0x808] sm:$0xff]  ;;  %v68_v23 = vld [vmem:[%s10404_s1 + $0x20] sm:$0xff] }
  0xe4   :  { %1362 = vmatpush1.msra.mxu0 %v173_v24  ;;  %1281 = vmatprep.subr.mxu1 %v627_v26  ;;  %v320_v24 = vld [vmem:[%s10404_s1 + $0x800] sm:$0xff]  ;;  %v286_v26 = vld [vmem:[%s10404_s1 + $0x6f0] sm:$0xff] }
  0xe5   :  { %1363 = vmatprep.subr.mxu0 %v167_v27  ;;  %1282 = vmatpush2.msra.mxu1 %v626_v28  ;;  %v314_v27 = vld [vmem:[%s10404_s1 + $0x7d0] sm:$0xff]  ;;  %v285_v28 = vld [vmem:[%s10404_s1 + $0x6e8] sm:$0xff] }
  0xe6   :  { %1283 = vmatprep.mubr.f32.mxu1 %v7373_v10  ;;  %1364 = vmatpush1.msra.mxu0 %v166_v63  ;;  %v738_v10 = vld [vmem:[%s10404_s1 + $0x1510] sm:$0xff]  ;;  %v313_v63 = vld [vmem:[%s10404_s1 + $0x7c8] sm:$0xff] }
  0xe7   :  { %1284 = vmatmul.mubr.f32.vlgmr.msra.gmra.mxu1 %v7381_v12  ;;  %1318 = vmatprep.subr.mxu1 %v746_v29  ;;  %v152_v12 = vld [vmem:[%s10404_s1 + $0x2c0] sm:$0xff]  ;;  %v279_v29 = vld [vmem:[%s10404_s1 + $0x6b8] sm:$0xff] }
  0xe8   :  { %1365 = vmatprep.subr.mxu0 %v160_v30  ;;  %1319 = vmatpush1.msra.mxu1 %v745_v1  ;;  %v307_v30 = vld [vmem:[%s10404_s1 + $0x798] sm:$0xff]  ;;  %v278_v1 = vld [vmem:[%s10404_s1 + $0x6b0] sm:$0xff] }
  0xe9   :  { %1366 = vmatpush1.msra.mxu0 %v159_v31  ;;  %1320 = vmatprep.subr.mxu1 %v739_v32  ;;  %v306_v31 = vld [vmem:[%s10404_s1 + $0x790] sm:$0xff]  ;;  %v272_v32 = vld [vmem:[%s10404_s1 + $0x680] sm:$0xff] }
  0xea   :  { %1367 = vmatprep.subr.mxu0 %v153_v33  ;;  %1321 = vmatpush1.msra.mxu1 %v738_v10  ;;  %v300_v33 = vld [vmem:[%s10404_s1 + $0x760] sm:$0xff]  ;;  %v271_v10 = vld [vmem:[%s10404_s1 + $0x678] sm:$0xff] }
  0xeb   :  { %1354 = vmatprep.mubr.f32.mxu1 %v6529_v17  ;;  %1368 = vmatpush1.msra.mxu0 %v152_v12  ;;  %v299_v12 = vld [vmem:[%s10404_s1 + $0x758] sm:$0xff] }
  0xec   :  { %6129 = vmatmul.mubr.msk.f32.vlgmr.msra.gmra.mxu1 %vm789_vm0, %v7849_v38  ;;  %1369 = vmatprep.subr.mxu0 %v146_v34  ;;  %v265_v34 = vld [vmem:[%s10404_s1 + $0x648] sm:$0xff] }
  0xed   :  { %1432 = vmatprep.subr.mxu1 %v398_v35  ;;  %1370 = vmatpush1.msra.mxu0 %v145_v36  ;;  %v293_v35 = vld [vmem:[%s10404_s1 + $0x728] sm:$0xff]  ;;  %v264_v36 = vld [vmem:[%s10404_s1 + $0x640] sm:$0xff] }
  0xee   :  { %1433 = vmatpush1.msra.mxu1 %v397_v37  ;;  %1371 = vmatprep.subr.mxu0 %v139_v39  ;;  %v292_v37 = vld [vmem:[%s10404_s1 + $0x720] sm:$0xff]  ;;  %v258_v39 = vld [vmem:[%s10404_s1 + $0x610] sm:$0xff] }
  0xef   :  { %1434 = vmatprep.subr.mxu1 %v391_v40  ;;  %1372 = vmatpush1.msra.mxu0 %v138_v41  ;;  %v510_v40 = vld [vmem:[%s10404_s1 + $0xdf0] sm:$0xff]  ;;  %v257_v41 = vld [vmem:[%s10404_s1 + $0x608] sm:$0xff] }
  0xf0   :  { %1435 = vmatpush1.msra.mxu1 %v390_v42  ;;  %1373 = vmatprep.subr.mxu0 %v132_v43  ;;  %v509_v42 = vld [vmem:[%s10404_s1 + $0xde8] sm:$0xff]  ;;  %v251_v43 = vld [vmem:[%s10404_s1 + $0x5d8] sm:$0xff] }
  0xf1   :  { %1436 = vmatprep.subr.mxu1 %v384_v44  ;;  %1374 = vmatpush1.msra.mxu0 %v131_v45  ;;  %v503_v44 = vld [vmem:[%s10404_s1 + $0xdb8] sm:$0xff]  ;;  %v250_v45 = vld [vmem:[%s10404_s1 + $0x5d0] sm:$0xff] }
  0xf2   :  { %1437 = vmatpush1.msra.mxu1 %v383_v46  ;;  %1375 = vmatprep.subr.mxu0 %v125_v47  ;;  %v502_v46 = vld [vmem:[%s10404_s1 + $0xdb0] sm:$0xff]  ;;  %v244_v47 = vld [vmem:[%s10404_s1 + $0x5a0] sm:$0xff] }
  0xf3   :  { %1438 = vmatprep.subr.mxu1 %v377_v48  ;;  %1376 = vmatpush1.msra.mxu0 %v124_v49  ;;  %v496_v48 = vld [vmem:[%s10404_s1 + $0xd80] sm:$0xff]  ;;  %v754_v49 = vlaneseq }
  0xf4   :  { %1439 = vmatpush1.msra.mxu1 %v376_v50  ;;  %1377 = vmatprep.subr.mxu0 %v118_v51  ;;  %v243_v50 = vld [vmem:[%s10404_s1 + $0x598] sm:$0xff] }
  0xf5   :  { %1440 = vmatprep.subr.mxu1 %v370_v52  ;;  %1378 = vmatpush1.msra.mxu0 %v117_v53  ;;  %v495_v51 = vld [vmem:[%s10404_s1 + $0xd78] sm:$0xff]  ;;  %v237_v52 = vld [vmem:[%s10404_s1 + $0x568] sm:$0xff] }
  0xf6   :  { %1441 = vmatpush1.msra.mxu1 %v369_v54  ;;  %1379 = vmatprep.subr.mxu0 %v111_v55  ;;  %v489_v53 = vld [vmem:[%s10404_s1 + $0xd48] sm:$0xff]  ;;  %v236_v54 = vld [vmem:[%s10404_s1 + $0x560] sm:$0xff] }
  0xf7   :  { %1442 = vmatprep.subr.mxu1 %v363_v56  ;;  %1380 = vmatpush1.msra.mxu0 %v110_v57  ;;  %v488_v55 = vld [vmem:[%s10404_s1 + $0xd40] sm:$0xff]  ;;  %v230_v56 = vld [vmem:[%s10404_s1 + $0x530] sm:$0xff] }
  0xf8   :  { %1443 = vmatpush1.msra.mxu1 %v362_v58  ;;  %1381 = vmatprep.subr.mxu0 %v104_v59  ;;  %v482_v57 = vld [vmem:[%s10404_s1 + $0xd10] sm:$0xff]  ;;  %v229_v58 = vld [vmem:[%s10404_s1 + $0x528] sm:$0xff] }
  0xf9   :  { %1444 = vmatprep.subr.mxu1 %v356_v60  ;;  %1382 = vmatpush1.msra.mxu0 %v103_v61  ;;  %v481_v59 = vld [vmem:[%s10404_s1 + $0xd08] sm:$0xff]  ;;  %v8093_v60 = vshrl.u32 %v754_v49, 7  ;;  %v608_v49 = vld [vmem:[%s10404_s1 + $0x1100] sm:$0xff] }
  0xfa   :  { %1445 = vmatpush1.msra.mxu1 %v355_v62  ;;  %1383 = vmatprep.subr.mxu0 %v97_v0  ;;  %v750_v61 = vld [vmem:[%s10410_s7] ss:$8 sm:$0xf] }
  0xfb   :  { %1446 = vmatprep.subr.mxu1 %v349_v2  ;;  %1384 = vmatpush1.msra.mxu0 %v96_v3  ;;  %v751_v62 = vld [vmem:[%s10410_s7] ss:$8 sm:$0x70]  ;;  %v223_v0 = vld [vmem:[%s10404_s1 + $0x4f8] sm:$0xff] }
  0xfc   :  { %1447 = vmatpush1.msra.mxu1 %v348_v4  ;;  %1385 = vmatprep.subr.mxu0 %v90_v5  ;;  %v475_v2 = vld [vmem:[%s10404_s1 + $0xcd8] sm:$0xff]  ;;  %v222_v3 = vld [vmem:[%s10404_s1 + $0x4f0] sm:$0xff]  ;;  %v216_v5 = vld [vmem:[%s10404_s1 + $0x4c0] sm:$0xff] }
  0xfd   :  { %1448 = vmatprep.subr.mxu1 %v342_v6  ;;  %1386 = vmatpush1.msra.mxu0 %v89_v7  ;;  %v474_v4 = vld [vmem:[%s10404_s1 + $0xcd0] sm:$0xff]  ;;  %v468_v6 = vld [vmem:[%s10404_s1 + $0xca0] sm:$0xff]  ;;  %v8119_v7 = vor.u32 %v751_v62, %v750_v61  ;;  %v587_v61 = vld [vmem:[%s10404_s1 + $0x1058] sm:$0xff] }
  0xfe   :  { %1449 = vmatpush1.msra.mxu1 %v341_v8  ;;  %1387 = vmatprep.subr.mxu0 %v83_v9  ;;  %v8122_v8 = vsub.s32 0, %v8093_v60  ;;  %v215_v9 = vld [vmem:[%s10404_s1 + $0x4b8] sm:$0xff]  ;;  %v741_v62 = vld [vmem:[%s10404_s1 + $0x1528] sm:$0xff] }
  0xff   :  { %1450 = vmatprep.subr.mxu1 %v335_v11  ;;  %1388 = vmatpush1.msra.mxu0 %v82_v13  ;;  %v467_v11 = vld [vmem:[%s10404_s1 + $0xc98] sm:$0xff]  ;;  %v209_v13 = vld [vmem:[%s10404_s1 + $0x488] sm:$0xff] }
 0x100   :  { %1451 = vmatpush1.msra.mxu1 %v334_v14  ;;  %1389 = vmatprep.subr.mxu0 %v76_v15  ;;  %v461_v14 = vld [vmem:[%s10404_s1 + $0xc68] sm:$0xff]  ;;  %v208_v15 = vld [vmem:[%s10404_s1 + $0x480] sm:$0xff] }
 0x101   :  { %1452 = vmatprep.subr.mxu1 %v328_v16  ;;  %1390 = vmatpush1.msra.mxu0 %v75_v18  ;;  %v460_v16 = vld [vmem:[%s10404_s1 + $0xc60] sm:$0xff]  ;;  %v202_v18 = vld [vmem:[%s10404_s1 + $0x450] sm:$0xff] }
 0x102   :  { %1453 = vmatpush1.msra.mxu1 %v327_v19  ;;  %1391 = vmatprep.subr.mxu0 %v69_v20  ;;  %v454_v19 = vld [vmem:[%s10404_s1 + $0xc30] sm:$0xff]  ;;  %v757_v20 = vrot.slane %v8119_v7, %v8122_v8 }
 0x103   :  { %1454 = vmatprep.subr.mxu1 %v321_v21  ;;  %1392 = vmatpush1.msra.mxu0 %v68_v23  ;;  %v201_v21 = vld [vmem:[%s10404_s1 + $0x448] sm:$0xff] }
 0x104   :  { %1455 = vmatpush1.msra.mxu1 %v320_v24  ;;  %1393 = vmatprep.subr.mxu0 %v286_v26  ;;  %v453_v23 = vld [vmem:[%s10404_s1 + $0xc28] sm:$0xff]  ;;  %v195_v24 = vld [vmem:[%s10404_s1 + $0x418] sm:$0xff] }
 0x105   :  { %1456 = vmatprep.subr.mxu1 %v314_v27  ;;  %1394 = vmatpush2.msra.mxu0 %v285_v28  ;;  %v447_v26 = vld [vmem:[%s10404_s1 + $0xbf8] sm:$0xff]  ;;  %v194_v27 = vld [vmem:[%s10404_s1 + $0x410] sm:$0xff] }
 0x106   :  { %1457 = vmatpush1.msra.mxu1 %v313_v63  ;;  %1395 = vmatprep.subr.mxu0 %v279_v29  ;;  %v446_v28 = vld [vmem:[%s10404_s1 + $0xbf0] sm:$0xff]  ;;  %v188_v29 = vld [vmem:[%s10404_s1 + $0x3e0] sm:$0xff] }
 0x107   :  { %1458 = vmatprep.subr.mxu1 %v307_v30  ;;  %1396 = vmatpush2.msra.mxu0 %v278_v1  ;;  %v440_v30 = vld [vmem:[%s10404_s1 + $0xbc0] sm:$0xff] }
 0x108   :  { %1459 = vmatpush1.msra.mxu1 %v306_v31  ;;  %1397 = vmatprep.subr.mxu0 %v272_v32  ;;  %v187_v31 = vld [vmem:[%s10404_s1 + $0x3d8] sm:$0xff] }
 0x109   :  { %1460 = vmatprep.subr.mxu1 %v300_v33  ;;  %1398 = vmatpush2.msra.mxu0 %v271_v10  ;;  %v439_v32 = vld [vmem:[%s10404_s1 + $0xbb8] sm:$0xff]  ;;  %v181_v10 = vld [vmem:[%s10404_s1 + $0x3a8] sm:$0xff] }
 0x10a   :  { %1461 = vmatpush1.msra.mxu1 %v299_v12  ;;  %1399 = vmatprep.subr.mxu0 %v265_v34  ;;  %v433_v12 = vld [vmem:[%s10404_s1 + $0xb88] sm:$0xff] }
 0x10b   :  { %1462 = vmatprep.subr.mxu1 %v293_v35  ;;  %1400 = vmatpush2.msra.mxu0 %v264_v36  ;;  %v180_v35 = vld [vmem:[%s10404_s1 + $0x3a0] sm:$0xff] }
 0x10c   :  { %1463 = vmatpush1.msra.mxu1 %v292_v37  ;;  %1401 = vmatprep.subr.mxu0 %v258_v39  ;;  %v432_v36 = vld [vmem:[%s10404_s1 + $0xb80] sm:$0xff]  ;;  %v426_v37 = vld [vmem:[%s10404_s1 + $0xb50] sm:$0xff] }
 0x10d   :  { %1464 = vmatprep.subr.mxu1 %v510_v40  ;;  %1402 = vmatpush2.msra.mxu0 %v257_v41  ;;  %v622_v39 = vld [vmem:[%s10404_s1 + $0x1170] sm:$0xff]  ;;  %v8203_v40 = vld [vmem:[%s10403_s0 + $0x8] sm:$0xff] }
 0x10e   :  { %1465 = vmatpush2.msra.mxu1 %v509_v42  ;;  %1403 = vmatprep.subr.mxu0 %v251_v43  ;;  %v425_v41 = vld [vmem:[%s10404_s1 + $0xb48] sm:$0xff]  ;;  %v8215_v43 = vld [vmem:[%s10403_s0] sm:$0xff] }
 0x10f   :  { %1466 = vmatprep.subr.mxu1 %v503_v44  ;;  %1404 = vmatpush2.msra.mxu0 %v250_v45  ;;  %v621_v42 = vld [vmem:[%s10404_s1 + $0x1168] sm:$0xff]  ;;  %v419_v44 = vld [vmem:[%s10404_s1 + $0xb18] sm:$0xff] }
 0x110   :  { %1467 = vmatpush2.msra.mxu1 %v502_v46  ;;  %1405 = vmatprep.subr.mxu0 %v244_v47  ;;  %v615_v45 = vld [vmem:[%s10404_s1 + $0x1138] sm:$0xff]  ;;  %v418_v46 = vld [vmem:[%s10404_s1 + $0xb10] sm:$0xff] }
 0x111   :  { %1468 = vmatprep.subr.mxu1 %v496_v48  ;;  %1406 = vmatpush2.msra.mxu0 %v243_v50  ;;  %v614_v47 = vld [vmem:[%s10404_s1 + $0x1130] sm:$0xff]  ;;  %v412_v48 = vld [vmem:[%s10404_s1 + $0xae0] sm:$0xff]  ;;  %v411_v50 = vld [vmem:[%s10404_s1 + $0xad8] sm:$0xff] }
 0x112   :  { %1469 = vmatpush2.msra.mxu1 %v495_v51  ;;  %1407 = vmatprep.subr.mxu0 %v237_v52  ;;  %v607_v51 = vld [vmem:[%s10404_s1 + $0x10f8] sm:$0xff]  ;;  %v405_v52 = vld [vmem:[%s10404_s1 + $0xaa8] sm:$0xff] }
 0x113   :  { %1470 = vmatprep.subr.mxu1 %v489_v53  ;;  %1408 = vmatpush2.msra.mxu0 %v236_v54  ;;  %v601_v53 = vld [vmem:[%s10404_s1 + $0x10c8] sm:$0xff]  ;;  %v404_v54 = vld [vmem:[%s10404_s1 + $0xaa0] sm:$0xff] }
 0x114   :  { %1471 = vmatpush2.msra.mxu1 %v488_v55  ;;  %1409 = vmatprep.subr.mxu0 %v230_v56  ;;  %v600_v55 = vld [vmem:[%s10404_s1 + $0x10c0] sm:$0xff]  ;;  %v594_v56 = vld [vmem:[%s10404_s1 + $0x1090] sm:$0xff] }
 0x115   :  { %1472 = vmatprep.subr.mxu1 %v482_v57  ;;  %1410 = vmatpush2.msra.mxu0 %v229_v58  ;;  %v748_v57 = vld [vmem:[%s10404_s1 + $0x1560] sm:$0xff]  ;;  %v593_v58 = vld [vmem:[%s10404_s1 + $0x1088] sm:$0xff] }
 0x116   :  { %1473 = vmatpush2.msra.mxu1 %v481_v59  ;;  %1411 = vmatprep.subr.mxu0 %v223_v0  ;;  %v747_v59 = vld [vmem:[%s10404_s1 + $0x1558] sm:$0xff]  ;;  %v740_v0 = vld [vmem:[%s10404_s1 + $0x1520] sm:$0xff] }
 0x117   :  { %1474 = vmatprep.subr.mxu1 %v475_v2  ;;  %1412 = vmatpush2.msra.mxu0 %v222_v3  ;;  %v287_v2 = vld [vmem:[%s10404_s1 + $0x6f8] sm:$0xff] }
 0x118   :  { %1475 = vmatpush2.msra.mxu1 %v474_v4  ;;  %1413 = vmatprep.subr.mxu0 %v216_v5  ;;  %v579_v3 = vld [vmem:[%s10404_s1 + $0x1018] sm:$0xff]  ;;  %v573_v4 = vld [vmem:[%s10404_s1 + $0xfe8] sm:$0xff] }
 0x119   :  { %1476 = vmatprep.subr.mxu1 %v468_v6  ;;  %1414 = vmatpush2.msra.mxu0 %v215_v9  ;;  %v175_v5 = vld [vmem:[%s10404_s1 + $0x378] sm:$0xff]  ;;  %v572_v6 = vld [vmem:[%s10404_s1 + $0xfe0] sm:$0xff] }
 0x11a   :  { %1477 = vmatpush2.msra.mxu1 %v467_v11  ;;  %1415 = vmatprep.subr.mxu0 %v209_v13  ;;  %v280_v9 = vld [vmem:[%s10404_s1 + $0x6c0] sm:$0xff]  ;;  %v566_v11 = vld [vmem:[%s10404_s1 + $0xfb0] sm:$0xff] }
 0x11b   :  { %1478 = vmatprep.subr.mxu1 %v461_v14  ;;  %1416 = vmatpush2.msra.mxu0 %v208_v15  ;;  %v168_v13 = vld [vmem:[%s10404_s1 + $0x340] sm:$0xff]  ;;  %v565_v14 = vld [vmem:[%s10404_s1 + $0xfa8] sm:$0xff] }
 0x11c   :  { %1479 = vmatpush2.msra.mxu1 %v460_v16  ;;  %1417 = vmatprep.subr.mxu0 %v202_v18  ;;  %v273_v15 = vld [vmem:[%s10404_s1 + $0x688] sm:$0xff]  ;;  %v559_v16 = vld [vmem:[%s10404_s1 + $0xf78] sm:$0xff]  ;;  %v558_v18 = vld [vmem:[%s10404_s1 + $0xf70] sm:$0xff] }
 0x11d   :  { %1480 = vmatprep.subr.mxu1 %v454_v19  ;;  %v859_v63 = vpop.f32.mrf.mxu0  ;;  %1418 = vmatpush2.msra.mxu0 %v201_v21  ;;  %v266_v19 = vld [vmem:[%s10404_s1 + $0x650] sm:$0xff] }
 0x11e   :  { %1481 = vmatpush2.msra.mxu1 %v453_v23  ;;  %v860_v1 = vadd.f32 %v859_v63, %v757_v20  ;;  %1419 = vmatprep.subr.mxu0 %v195_v24  ;;  %v552_v20 = vld [vmem:[%s10404_s1 + $0xf40] sm:$0xff]  ;;  %v154_v21 = vld [vmem:[%s10404_s1 + $0x2d0] sm:$0xff]  ;;  %v551_v23 = vld [vmem:[%s10404_s1 + $0xf38] sm:$0xff] }
 0x11f   :  { %1482 = vmatprep.subr.mxu1 %v447_v26  ;;  %v930_v33 = vpop.f32.mrf.mxu1  ;;  %1420 = vmatpush2.msra.mxu0 %v194_v27  ;;  %v259_v24 = vld [vmem:[%s10404_s1 + $0x618] sm:$0xff]  ;;  %v545_v26 = vld [vmem:[%s10404_s1 + $0xf08] sm:$0xff]  ;;  %v252_v63 = vld [vmem:[%s10404_s1 + $0x5e0] sm:$0xff] }
 0x120   :  { %1483 = vmatpush2.msra.mxu1 %v446_v28  ;;  %v8186_v34 = vadd.f32 %v930_v33, %v860_v1  ;;  %1421 = vmatprep.subr.mxu0 %v188_v29  ;;  %v147_v27 = vld [vmem:[%s10404_s1 + $0x298] sm:$0xff]  ;;  %v544_v28 = vld [vmem:[%s10404_s1 + $0xf00] sm:$0xff]  ;;  %v538_v29 = vld [vmem:[%s10404_s1 + $0xed0] sm:$0xff] }
 0x121   :  { %1484 = vmatprep.subr.mxu1 %v440_v30  ;;  %1422 = vmatpush2.msra.mxu0 %v187_v31  ;;  %v140_v30 = vld [vmem:[%s10404_s1 + $0x260] sm:$0xff]  ;;  %v537_v1 = vld [vmem:[%s10404_s1 + $0xec8] sm:$0xff] }
 0x122   :  { %1485 = vmatpush2.msra.mxu1 %v439_v32  ;;  %1423 = vmatprep.subr.mxu0 %v181_v10  ;;  %v245_v31 = vld [vmem:[%s10404_s1 + $0x5a8] sm:$0xff]  ;;  %v531_v32 = vld [vmem:[%s10404_s1 + $0xe98] sm:$0xff]  ;;  %v530_v10 = vld [vmem:[%s10404_s1 + $0xe90] sm:$0xff] }
 0x123   :  { %1486 = vmatprep.subr.mxu1 %v433_v12  ;;  %1424 = vmatpush2.msra.mxu0 %v180_v35  ;;  %v133_v33 = vld [vmem:[%s10404_s1 + $0x228] sm:$0xff]  ;;  %v238_v12 = vld [vmem:[%s10404_s1 + $0x570] sm:$0xff]  ;;  %v524_v35 = vld [vmem:[%s10404_s1 + $0xe60] sm:$0xff] }
 0x124   :  { %1425 = vmatprep.mubr.f32.mxu0 %v8203_v40  ;;  %1487 = vmatpush2.msra.mxu1 %v432_v36  ;;  %v126_v36 = vld [vmem:[%s10404_s1 + $0x1f0] sm:$0xff] }
 0x125   :  { %1426 = vmatmul.mubr.f32.vlgmr.msra.gmra.mxu0 %v8215_v43  ;;  %1488 = vmatprep.subr.mxu1 %v426_v37  ;;  %v523_v37 = vld [vmem:[%s10404_s1 + $0xe58] sm:$0xff] }
 0x126   :  { %1503 = vmatprep.subr.mxu0 %v622_v39  ;;  %1489 = vmatpush2.msra.mxu1 %v425_v41  ;;  %v231_v39 = vld [vmem:[%s10404_s1 + $0x538] sm:$0xff]  ;;  %v517_v41 = vld [vmem:[%s10404_s1 + $0xe28] sm:$0xff] }
 0x127   :  { %1504 = vmatpush1.msra.mxu0 %v621_v42  ;;  %1490 = vmatprep.subr.mxu1 %v419_v44  ;;  %v119_v42 = vld [vmem:[%s10404_s1 + $0x1b8] sm:$0xff]  ;;  %v516_v44 = vld [vmem:[%s10404_s1 + $0xe20] sm:$0xff] }
 0x128   :  { %1505 = vmatprep.subr.mxu0 %v615_v45  ;;  %1491 = vmatpush2.msra.mxu1 %v418_v46  ;;  %v224_v45 = vld [vmem:[%s10404_s1 + $0x500] sm:$0xff]  ;;  %v734_v46 = vld [vmem:[%s10404_s1 + $0x14f0] sm:$0xff] }
 0x129   :  { %1506 = vmatpush1.msra.mxu0 %v614_v47  ;;  %1492 = vmatprep.subr.mxu1 %v412_v48  ;;  %v112_v47 = vld [vmem:[%s10404_s1 + $0x180] sm:$0xff]  ;;  %v733_v48 = vld [vmem:[%s10404_s1 + $0x14e8] sm:$0xff] }
 0x12a   :  { %1507 = vmatprep.subr.mxu0 %v608_v49  ;;  %1493 = vmatpush2.msra.mxu1 %v411_v50  ;;  %v217_v49 = vld [vmem:[%s10404_s1 + $0x4c8] sm:$0xff]  ;;  %v727_v50 = vld [vmem:[%s10404_s1 + $0x14b8] sm:$0xff] }
 0x12b   :  { %1508 = vmatpush1.msra.mxu0 %v607_v51  ;;  %1494 = vmatprep.subr.mxu1 %v405_v52  ;;  %v105_v51 = vld [vmem:[%s10404_s1 + $0x148] sm:$0xff]  ;;  %v726_v52 = vld [vmem:[%s10404_s1 + $0x14b0] sm:$0xff] }
 0x12c   :  { %1509 = vmatprep.subr.mxu0 %v601_v53  ;;  %1495 = vmatpush2.msra.mxu1 %v404_v54  ;;  %v210_v53 = vld [vmem:[%s10404_s1 + $0x490] sm:$0xff]  ;;  %v720_v54 = vld [vmem:[%s10404_s1 + $0x1480] sm:$0xff] }
 0x12d   :  { %1496 = vmatprep.mubr.f32.mxu1 %v7780_v22  ;;  %1510 = vmatpush1.msra.mxu0 %v600_v55  ;;  %v586_v22 = vld [vmem:[%s10404_s1 + $0x1050] sm:$0xff] }
 0x12e   :  { %1497 = vmatmul.mubr.f32.vlgmr.msra.gmra.mxu1 %v7792_v25  ;;  %1511 = vmatprep.subr.mxu0 %v594_v56  ;;  %v580_v25 = vld [vmem:[%s10404_s1 + $0x1020] sm:$0xff]  ;;  %v98_v55 = vld [vmem:[%s10404_s1 + $0x110] sm:$0xff]  ;;  %v719_v56 = vld [vmem:[%s10404_s1 + $0x1478] sm:$0xff] }
 0x12f   :  { %1602 = vmatprep.subr.mxu1 %v748_v57  ;;  %1512 = vmatpush1.msra.mxu0 %v593_v58  ;;  %v203_v57 = vld [vmem:[%s10404_s1 + $0x458] sm:$0xff]  ;;  %v713_v58 = vld [vmem:[%s10404_s1 + $0x1448] sm:$0xff] }
 0x130   :  { %1603 = vmatpush1.msra.mxu1 %v747_v59  ;;  %1513 = vmatprep.subr.mxu0 %v587_v61  ;;  %v91_v59 = vld [vmem:[%s10404_s1 + $0xd8] sm:$0xff]  ;;  %v712_v61 = vld [vmem:[%s10404_s1 + $0x1440] sm:$0xff] }
 0x131   :  { %1604 = vmatprep.subr.mxu1 %v741_v62  ;;  %1514 = vmatpush1.msra.mxu0 %v586_v22  ;;  %v196_v62 = vld [vmem:[%s10404_s1 + $0x420] sm:$0xff]  ;;  %v706_v22 = vld [vmem:[%s10404_s1 + $0x1410] sm:$0xff] }
 0x132   :  { %1605 = vmatpush1.msra.mxu1 %v740_v0  ;;  %1515 = vmatprep.subr.mxu0 %v580_v25  ;;  %v84_v0 = vld [vmem:[%s10404_s1 + $0xa0] sm:$0xff]  ;;  %v705_v25 = vld [vmem:[%s10404_s1 + $0x1408] sm:$0xff] }
 0x133   :  { %1638 = vmatprep.mubr.f32.mxu1 %v6529_v17  ;;  %6151 = vmatprep.subr.mxu1 %v287_v2  ;;  %v189_v2 = vld [vmem:[%s10404_s1 + $0x3e8] sm:$0xff] }
 0x134   :  { %1516 = vmatpush1.msra.mxu0 %v579_v3  ;;  %6130 = vmatmul.mubr.msk.f32.vlgmr.msra.gmra.mxu1 %vm789_vm0, %v7849_v38  ;;  %v161_v38 = vld [vmem:[%s10404_s1 + $0x308] sm:$0xff]  ;;  %v699_v3 = vld [vmem:[%s10404_s1 + $0x13d8] sm:$0xff] }
 0x135   :  { %1517 = vmatprep.subr.mxu0 %v573_v4  ;;  %6152 = vmatpush3.msra.mxu1 %v175_v5  ;;  %v77_v4 = vld [vmem:[%s10404_s1 + $0x68] sm:$0xff]  ;;  %v698_v5 = vld [vmem:[%s10404_s1 + $0x13d0] sm:$0xff] }
 0x136   :  { %1518 = vmatpush1.msra.mxu0 %v572_v6  ;;  %6153 = vmatprep.subr.mxu1 %v280_v9  ;;  %v182_v6 = vld [vmem:[%s10404_s1 + $0x3b0] sm:$0xff]  ;;  %v692_v9 = vld [vmem:[%s10404_s1 + $0x13a0] sm:$0xff] }
 0x137   :  { %1519 = vmatprep.subr.mxu0 %v566_v11  ;;  %6154 = vmatpush3.msra.mxu1 %v168_v13  ;;  %v70_v11 = vld [vmem:[%s10404_s1 + $0x30] sm:$0xff]  ;;  %v511_v13 = vld [vmem:[%s10404_s1 + $0xdf8] sm:$0xff] }
 0x138   :  { %1520 = vmatpush1.msra.mxu0 %v565_v14  ;;  %6155 = vmatprep.subr.mxu1 %v273_v15  ;;  %v691_v14 = vld [vmem:[%s10404_s1 + $0x1398] sm:$0xff]  ;;  %v685_v15 = vld [vmem:[%s10404_s1 + $0x1368] sm:$0xff] }
 0x139   :  { %1521 = vmatprep.subr.mxu0 %v559_v16  ;;  %6156 = vmatpush3.msra.mxu1 %v161_v38  ;;  %v399_v16 = vld [vmem:[%s10404_s1 + $0xa78] sm:$0xff]  ;;  %v684_v38 = vld [vmem:[%s10404_s1 + $0x1360] sm:$0xff] }
 0x13a   :  { %1522 = vmatpush1.msra.mxu0 %v558_v18  ;;  %6157 = vmatprep.subr.mxu1 %v266_v19  ;;  %v504_v18 = vld [vmem:[%s10404_s1 + $0xdc0] sm:$0xff]  ;;  %v678_v19 = vld [vmem:[%s10404_s1 + $0x1330] sm:$0xff] }
 0x13b   :  { %1523 = vmatprep.subr.mxu0 %v552_v20  ;;  %6158 = vmatpush3.msra.mxu1 %v154_v21  ;;  %v677_v20 = vld [vmem:[%s10404_s1 + $0x1328] sm:$0xff] }
 0x13c   :  { %1524 = vmatpush1.msra.mxu0 %v551_v23  ;;  %6159 = vmatprep.subr.mxu1 %v259_v24  ;;  %v497_v21 = vld [vmem:[%s10404_s1 + $0xd88] sm:$0xff]  ;;  %v671_v23 = vld [vmem:[%s10404_s1 + $0x12f8] sm:$0xff]  ;;  %v670_v24 = vld [vmem:[%s10404_s1 + $0x12f0] sm:$0xff] }
 0x13d   :  { %1525 = vmatprep.subr.mxu0 %v545_v26  ;;  %6160 = vmatpush3.msra.mxu1 %v147_v27  ;;  %v490_v26 = vld [vmem:[%s10404_s1 + $0xd50] sm:$0xff]  ;;  %v664_v27 = vld [vmem:[%s10404_s1 + $0x12c0] sm:$0xff] }
 0x13e   :  { %1526 = vmatpush1.msra.mxu0 %v544_v28  ;;  %6161 = vmatprep.subr.mxu1 %v252_v63  ;;  %v378_v28 = vld [vmem:[%s10404_s1 + $0x9d0] sm:$0xff]  ;;  %v663_v63 = vld [vmem:[%s10404_s1 + $0x12b8] sm:$0xff] }
 0x13f   :  { %1527 = vmatprep.subr.mxu0 %v538_v29  ;;  %6162 = vmatpush3.msra.mxu1 %v140_v30  ;;  %v483_v29 = vld [vmem:[%s10404_s1 + $0xd18] sm:$0xff]  ;;  %v657_v30 = vld [vmem:[%s10404_s1 + $0x1288] sm:$0xff] }
 0x140   :  { %1528 = vmatpush1.msra.mxu0 %v537_v1  ;;  %6163 = vmatprep.subr.mxu1 %v245_v31  ;;  %v371_v1 = vld [vmem:[%s10404_s1 + $0x998] sm:$0xff]  ;;  %v656_v31 = vld [vmem:[%s10404_s1 + $0x1280] sm:$0xff] }
 0x141   :  { %1529 = vmatprep.subr.mxu0 %v531_v32  ;;  %6164 = vmatpush3.msra.mxu1 %v133_v33  ;;  %v476_v32 = vld [vmem:[%s10404_s1 + $0xce0] sm:$0xff]  ;;  %v650_v33 = vld [vmem:[%s10404_s1 + $0x1250] sm:$0xff] }
 0x142   :  { %1530 = vmatpush1.msra.mxu0 %v530_v10  ;;  %6165 = vmatprep.subr.mxu1 %v238_v12  ;;  %v8549_v10 = vpop.f32.mrf.mxu0  ;;  %v364_v12 = vld [vmem:[%s10404_s1 + $0x960] sm:$0xff] }
 0x143   :  { %1531 = vmatprep.subr.mxu0 %v524_v35  ;;  %6166 = vmatpush3.msra.mxu1 %v126_v36  ;;  %v649_v35 = vld [vmem:[%s10404_s1 + $0x1248] sm:$0xff] }
 0x144   :  { %1532 = vmatpush1.msra.mxu0 %v523_v37  ;;  %6167 = vmatprep.subr.mxu1 %v231_v39  ;;  %v469_v36 = vld [vmem:[%s10404_s1 + $0xca8] sm:$0xff]  ;;  %v643_v37 = vld [vmem:[%s10404_s1 + $0x1218] sm:$0xff]  ;;  %v8563_v39 = vpop.f32.mrf.mxu1 }
 0x145   :  { %1533 = vmatprep.subr.mxu0 %v517_v41  ;;  %6168 = vmatpush3.msra.mxu1 %v119_v42  ;;  %v357_v41 = vld [vmem:[%s10404_s1 + $0x928] sm:$0xff]  ;;  %v642_v42 = vld [vmem:[%s10404_s1 + $0x1210] sm:$0xff] }
 0x146   :  { %1534 = vmatpush1.msra.mxu0 %v516_v44  ;;  %6169 = vmatprep.subr.mxu1 %v224_v45  ;;  %v462_v45 = vld [vmem:[%s10404_s1 + $0xc70] sm:$0xff] }
 0x147   :  { %1535 = vmatprep.subr.mxu0 %v734_v46  ;;  %6170 = vmatpush3.msra.mxu1 %v112_v47  ;;  %v636_v46 = vld [vmem:[%s10404_s1 + $0x11e0] sm:$0xff] }
 0x148   :  { %1536 = vmatpush2.msra.mxu0 %v733_v48  ;;  %6171 = vmatprep.subr.mxu1 %v217_v49  ;;  %v1072_v48 = vpop.f32.mrf.mxu1  ;;  %v350_v49 = vld [vmem:[%s10404_s1 + $0x8f0] sm:$0xff] }
 0x149   :  { %1537 = vmatprep.subr.mxu0 %v727_v50  ;;  %6172 = vmatpush3.msra.mxu1 %v105_v51  ;;  %v635_v50 = vld [vmem:[%s10404_s1 + $0x11d8] sm:$0xff] }
 0x14a   :  { %1538 = vmatpush2.msra.mxu0 %v726_v52  ;;  %6173 = vmatprep.subr.mxu1 %v210_v53  ;;  %v455_v51 = vld [vmem:[%s10404_s1 + $0xc38] sm:$0xff] }
 0x14b   :  { %1539 = vmatprep.subr.mxu0 %v720_v54  ;;  %6174 = vmatpush3.msra.mxu1 %v98_v55  ;;  %v343_v53 = vld [vmem:[%s10404_s1 + $0x8b8] sm:$0xff]  ;;  %v628_v54 = vld [vmem:[%s10404_s1 + $0x11a0] sm:$0xff] }
 0x14c   :  { %1540 = vmatpush2.msra.mxu0 %v719_v56  ;;  %6175 = vmatprep.subr.mxu1 %v203_v57  ;;  %v448_v55 = vld [vmem:[%s10404_s1 + $0xc00] sm:$0xff]  ;;  %v8602_v56 = vsub.s32 1, %v8093_v60 }
 0x14d   :  { %1541 = vmatprep.subr.mxu0 %v713_v58  ;;  %6176 = vmatpush3.msra.mxu1 %v91_v59  ;;  %v336_v57 = vld [vmem:[%s10404_s1 + $0x880] sm:$0xff]  ;;  %v441_v58 = vld [vmem:[%s10404_s1 + $0xbc8] sm:$0xff]  ;;  %v735_v59 = vld [vmem:[%s10404_s1 + $0x14f8] sm:$0xff] }
 0x14e   :  { %1542 = vmatpush2.msra.mxu0 %v712_v61  ;;  %6177 = vmatprep.subr.mxu1 %v196_v62  ;;  %v8616_v61 = vld [vmem:[%s10403_s0 + $0x28] sm:$0xff] }
 0x14f   :  { %1543 = vmatprep.subr.mxu0 %v706_v22  ;;  %6178 = vmatpush3.msra.mxu1 %v84_v0  ;;  %v329_v62 = vld [vmem:[%s10404_s1 + $0x848] sm:$0xff]  ;;  %v623_v22 = vld [vmem:[%s10404_s1 + $0x1178] sm:$0xff]  ;;  %v8628_v0 = vld [vmem:[%s10403_s0 + $0x20] sm:$0xff] }
 0x150   :  { %1544 = vmatpush2.msra.mxu0 %v705_v25  ;;  %6179 = vmatprep.subr.mxu1 %v189_v2  ;;  %v434_v25 = vld [vmem:[%s10404_s1 + $0xb90] sm:$0xff]  ;;  %v728_v2 = vld [vmem:[%s10404_s1 + $0x14c0] sm:$0xff] }
 0x151   :  { %1545 = vmatprep.subr.mxu0 %v699_v3  ;;  %6180 = vmatpush3.msra.mxu1 %v77_v4  ;;  %v761_v3 = vrot.slane %v8119_v7, %v8602_v56  ;;  %v322_v4 = vld [vmem:[%s10404_s1 + $0x810] sm:$0xff] }
 0x152   :  { %1546 = vmatpush2.msra.mxu0 %v698_v5  ;;  %6181 = vmatprep.subr.mxu1 %v182_v6  ;;  %v616_v5 = vld [vmem:[%s10404_s1 + $0x1140] sm:$0xff]  ;;  %v427_v6 = vld [vmem:[%s10404_s1 + $0xb58] sm:$0xff] }
 0x153   :  { %1547 = vmatprep.subr.mxu0 %v692_v9  ;;  %6182 = vmatpush3.msra.mxu1 %v70_v11  ;;  %v721_v9 = vld [vmem:[%s10404_s1 + $0x1488] sm:$0xff]  ;;  %v315_v11 = vld [vmem:[%s10404_s1 + $0x7d8] sm:$0xff] }
 0x154   :  { %1709 = vmatprep.mubr.f32.mxu1 %v8203_v40  ;;  %6186 = vmatprep.subr.mxu1 %v511_v13  ;;  %v392_v40 = vld [vmem:[%s10404_s1 + $0xa40] sm:$0xff]  ;;  %v609_v13 = vld [vmem:[%s10404_s1 + $0x1108] sm:$0xff] }
 0x155   :  { %1548 = vmatpush2.msra.mxu0 %v691_v14  ;;  %1710 = vmatmul.mubr.f32.vlgmr.msra.gmra.mxu1 %v8215_v43  ;;  %v385_v43 = vld [vmem:[%s10404_s1 + $0xa08] sm:$0xff]  ;;  %v420_v14 = vld [vmem:[%s10404_s1 + $0xb20] sm:$0xff] }
 0x156   :  { %1549 = vmatprep.subr.mxu0 %v685_v15  ;;  %6187 = vmatpush3.msra.mxu1 %v399_v16  ;;  %v714_v15 = vld [vmem:[%s10404_s1 + $0x1450] sm:$0xff]  ;;  %v862_v16 = vadd.f32 %v8549_v10, %v761_v3  ;;  %v1074_v10 = vpop.f32.mrf.mxu1  ;;  %v1973_v3 = vld [vmem:[%s10405_s2 + $0x148] sm:$0xff] }
 0x157   :  { %1550 = vmatpush2.msra.mxu0 %v684_v38  ;;  %6188 = vmatprep.subr.mxu1 %v504_v18  ;;  %v308_v38 = vld [vmem:[%s10404_s1 + $0x7a0] sm:$0xff]  ;;  %v602_v18 = vld [vmem:[%s10404_s1 + $0x10d0] sm:$0xff] }
 0x158   :  { %1551 = vmatprep.subr.mxu0 %v678_v19  ;;  %6189 = vmatpush3.msra.mxu1 %v392_v40  ;;  %v413_v19 = vld [vmem:[%s10404_s1 + $0xae8] sm:$0xff]  ;;  %v707_v40 = vld [vmem:[%s10404_s1 + $0x1418] sm:$0xff] }
 0x159   :  { %1552 = vmatpush2.msra.mxu0 %v677_v20  ;;  %6190 = vmatprep.subr.mxu1 %v497_v21  ;;  %v301_v20 = vld [vmem:[%s10404_s1 + $0x768] sm:$0xff]  ;;  %v595_v21 = vld [vmem:[%s10404_s1 + $0x1098] sm:$0xff] }
 0x15a   :  { %1553 = vmatprep.subr.mxu0 %v671_v23  ;;  %6191 = vmatpush3.msra.mxu1 %v385_v43  ;;  %v406_v43 = vld [vmem:[%s10404_s1 + $0xab0] sm:$0xff] }
 0x15b   :  { %1554 = vmatpush2.msra.mxu0 %v670_v24  ;;  %6192 = vmatprep.subr.mxu1 %v490_v26  ;;  %v700_v24 = vld [vmem:[%s10404_s1 + $0x13e0] sm:$0xff]  ;;  %v933_v26 = vadd.f32 %v8563_v39, %v862_v16  ;;  %v1993_v39 = vld [vmem:[%s10405_s2 + $0x1e8] sm:$0xff]  ;;  %v518_v16 = vld [vmem:[%s10404_s1 + $0xe30] sm:$0xff] }
 0x15c   :  { %1555 = vmatprep.subr.mxu0 %v664_v27  ;;  %6193 = vmatpush3.msra.mxu1 %v378_v28  ;;  %v294_v27 = vld [vmem:[%s10404_s1 + $0x730] sm:$0xff]  ;;  %v588_v28 = vld [vmem:[%s10404_s1 + $0x1060] sm:$0xff] }
 0x15d   :  { %1556 = vmatpush2.msra.mxu0 %v663_v63  ;;  %6194 = vmatprep.subr.mxu1 %v483_v29  ;;  %v693_v29 = vld [vmem:[%s10404_s1 + $0x13a8] sm:$0xff] }
 0x15e   :  { %1557 = vmatprep.subr.mxu0 %v657_v30  ;;  %6195 = vmatpush3.msra.mxu1 %v371_v1  ;;  %v6478_v30 = vld [vmem:[%s10403_s0 + $0x18] sm:$0xff]  ;;  %v581_v1 = vld [vmem:[%s10404_s1 + $0x1028] sm:$0xff] }
 0x15f   :  { %1558 = vmatpush2.msra.mxu0 %v656_v31  ;;  %6196 = vmatprep.subr.mxu1 %v476_v32  ;;  %v749_v31 = vld [vmem:[%s10404_s1 + $0x1568] sm:$0xff]  ;;  %v6479_v32 = vld [vmem:[%s10403_s0 + $0x10] sm:$0xff] }
 0x160   :  { %1559 = vmatprep.subr.mxu0 %v650_v33  ;;  %v1001_v44 = vpop.f32.mrf.mxu0  ;;  %6197 = vmatpush3.msra.mxu1 %v364_v12  ;;  %v686_v33 = vld [vmem:[%s10404_s1 + $0x1370] sm:$0xff] }
 0x161   :  { %1560 = vmatpush2.msra.mxu0 %v649_v35  ;;  %v1002_v47 = vadd.f32 %v1001_v44, %v8186_v34  ;;  %6198 = vmatprep.subr.mxu1 %v469_v36  ;;  %v629_v34 = vld [vmem:[%s10404_s1 + $0x11a8] sm:$0xff]  ;;  %v574_v12 = vld [vmem:[%s10404_s1 + $0xff0] sm:$0xff]  ;;  %v672_v44 = vld [vmem:[%s10404_s1 + $0x1300] sm:$0xff] }
 0x162   :  { %1561 = vmatprep.subr.mxu0 %v643_v37  ;;  %6199 = vmatpush3.msra.mxu1 %v357_v41  ;;  %v1003_v23 = vpop.f32.mrf.mxu0  ;;  %v742_v35 = vld [vmem:[%s10404_s1 + $0x1530] sm:$0xff]  ;;  %v679_v37 = vld [vmem:[%s10404_s1 + $0x1338] sm:$0xff] }
 0x163   :  { %1562 = vmatpush2.msra.mxu0 %v642_v42  ;;  %v8590_v52 = vadd.f32 %v1072_v48, %v1002_v47  ;;  %6200 = vmatprep.subr.mxu1 %v462_v45  ;;  %v1004_v63 = vadd.f32 %v1003_v23, %v933_v26  ;;  %v567_v41 = vld [vmem:[%s10404_s1 + $0xfb8] sm:$0xff]  ;;  %v1992_v42 = vld [vmem:[%s10405_s2 + $0x1e0] sm:$0xff]  ;;  %v1989_v47 = vld [vmem:[%s10405_s2 + $0x1c8] sm:$0xff] }
 0x164   :  { %1563 = vmatprep.subr.mxu0 %v636_v46  ;;  %6201 = vmatpush3.msra.mxu1 %v350_v49  ;;  %v6480_v46 = vld [vmem:[%s10403_s0 + $0x30] sm:$0xff]  ;;  %v560_v48 = vld [vmem:[%s10404_s1 + $0xf80] sm:$0xff]  ;;  %v2117_v23 = vld [vmem:[%s10405_s2 + $0x5c8] sm:$0xff] }
 0x165   :  { %1564 = vmatpush2.msra.mxu0 %v635_v50  ;;  %6202 = vmatprep.subr.mxu1 %v455_v51  ;;  %v8720_v36 = vadd.f32 %v1074_v10, %v1004_v63  ;;  %v1988_v49 = vld [vmem:[%s10405_s2 + $0x1c0] sm:$0xff]  ;;  %v665_v50 = vld [vmem:[%s10404_s1 + $0x12c8] sm:$0xff] }
 0x166   :  { %1565 = vmatprep.subr.mxu0 %v629_v34  ;;  %6203 = vmatpush3.msra.mxu1 %v343_v53  ;;  %v1985_v51 = vld [vmem:[%s10405_s2 + $0x1a8] sm:$0xff]  ;;  %v1984_v53 = vld [vmem:[%s10405_s2 + $0x1a0] sm:$0xff] }
 0x167   :  { %1566 = vmatpush2.msra.mxu0 %v628_v54  ;;  %6204 = vmatprep.subr.mxu1 %v448_v55  ;;  %v1926_v45 = vmax.f32 %v8720_v36, 0.0  ;;  %v553_v34 = vld [vmem:[%s10404_s1 + $0xf48] sm:$0xff]  ;;  %v658_v54 = vld [vmem:[%s10404_s1 + $0x1290] sm:$0xff]  ;;  %v1952_v26 = vld [vmem:[%s10405_s2 + $0xa0] sm:$0xff] }
 0x168   :  { %1567 = vmatprep.mubr.f32.mxu0 %v8616_v61  ;;  %6205 = vmatpush3.msra.mxu1 %v336_v57  ;;  %v1981_v55 = vld [vmem:[%s10405_s2 + $0x188] sm:$0xff]  ;;  %v546_v57 = vld [vmem:[%s10404_s1 + $0xf10] sm:$0xff]  ;;  %v1983_v36 = vld [vmem:[%s10405_s2 + $0x198] sm:$0xff] }
 0x169   :  { %1568 = vmatmul.mubr.f32.vlgmr.msra.gmra.mxu0 %v8628_v0  ;;  %6206 = vmatprep.subr.mxu1 %v441_v58  ;;  %v1980_v58 = vld [vmem:[%s10405_s2 + $0x180] sm:$0xff]  ;;  %v2109_v63 = vld [vmem:[%s10405_s2 + $0x588] sm:$0xff] }
 0x16a   :  { %6221 = vmatprep.subr.mxu0 %v735_v59  ;;  %6207 = vmatpush3.msra.mxu1 %v329_v62  ;;  %v651_v59 = vld [vmem:[%s10404_s1 + $0x1258] sm:$0xff]  ;;  %v1977_v62 = vld [vmem:[%s10405_s2 + $0x168] sm:$0xff] }
 0x16b   :  { %6222 = vmatpush3.msra.mxu0 %v623_v22  ;;  %6208 = vmatprep.subr.mxu1 %v434_v25  ;;  %v539_v22 = vld [vmem:[%s10404_s1 + $0xed8] sm:$0xff]  ;;  %v1976_v25 = vld [vmem:[%s10405_s2 + $0x160] sm:$0xff]  ;;  %v1941_v10 = vld [vmem:[%s10405_s2 + $0x48] sm:$0xff] }
 0x16c   :  { %6223 = vmatprep.subr.mxu0 %v728_v2  ;;  %6209 = vmatpush3.msra.mxu1 %v322_v4  ;;  %v644_v2 = vld [vmem:[%s10404_s1 + $0x1220] sm:$0xff] }
 0x16d   :  { %6224 = vmatpush3.msra.mxu0 %v616_v5  ;;  %6210 = vmatprep.subr.mxu1 %v427_v6  ;;  %v532_v4 = vld [vmem:[%s10404_s1 + $0xea0] sm:$0xff]  ;;  %v637_v6 = vld [vmem:[%s10404_s1 + $0x11e8] sm:$0xff] }
 0x16e   :  { %6225 = vmatprep.subr.mxu0 %v721_v9  ;;  %6211 = vmatpush3.msra.mxu1 %v315_v11  ;;  %v1972_v5 = vld [vmem:[%s10405_s2 + $0x140] sm:$0xff]  ;;  %v1969_v9 = vld [vmem:[%s10405_s2 + $0x128] sm:$0xff] }
 0x16f   :  { %6226 = vmatpush3.msra.mxu0 %v609_v13  ;;  %6212 = vmatprep.subr.mxu1 %v420_v14  ;;  %v525_v11 = vld [vmem:[%s10404_s1 + $0xe68] sm:$0xff]  ;;  %v1968_v13 = vld [vmem:[%s10405_s2 + $0x120] sm:$0xff]  ;;  %v630_v14 = vld [vmem:[%s10404_s1 + $0x11b0] sm:$0xff] }
 0x170   :  { %6227 = vmatprep.subr.mxu0 %v714_v15  ;;  %6213 = vmatpush3.msra.mxu1 %v308_v38  ;;  %v1965_v15 = vld [vmem:[%s10405_s2 + $0x108] sm:$0xff]  ;;  %v1964_v38 = vld [vmem:[%s10405_s2 + $0x100] sm:$0xff] }
 0x171   :  { %6228 = vmatpush3.msra.mxu0 %v602_v18  ;;  %6214 = vmatprep.subr.mxu1 %v413_v19  ;;  %v1961_v18 = vld [vmem:[%s10405_s2 + $0xe8] sm:$0xff] }
 0x172   :  { %6229 = vmatprep.subr.mxu0 %v707_v40  ;;  %6215 = vmatpush3.msra.mxu1 %v301_v20  ;;  %v2121_v19 = vld [vmem:[%s10405_s2 + $0x5e8] sm:$0xff]  ;;  %v1960_v40 = vld [vmem:[%s10405_s2 + $0xe0] sm:$0xff] }
 0x173   :  { %6230 = vmatpush3.msra.mxu0 %v595_v21  ;;  %6216 = vmatprep.subr.mxu1 %v406_v43  ;;  %v2120_v20 = vld [vmem:[%s10405_s2 + $0x5e0] sm:$0xff]  ;;  %v1957_v21 = vld [vmem:[%s10405_s2 + $0xc8] sm:$0xff] }
 0x174   :  { %6231 = vmatprep.subr.mxu0 %v700_v24  ;;  %6217 = vmatpush3.msra.mxu1 %v294_v27  ;;  %v2116_v43 = vld [vmem:[%s10405_s2 + $0x5c0] sm:$0xff]  ;;  %v1953_v24 = vld [vmem:[%s10405_s2 + $0xa8] sm:$0xff] }
 0x175   :  { %1779 = vmatprep.mubr.f32.mxu1 %v6478_v30  ;;  %6232 = vmatpush3.msra.mxu0 %v588_v28  ;;  %v2112_v27 = vld [vmem:[%s10405_s2 + $0x5a0] sm:$0xff]  ;;  %v1949_v28 = vld [vmem:[%s10405_s2 + $0x88] sm:$0xff] }
 0x176   :  { %1780 = vmatmul.mubr.f32.vlgmr.msra.gmra.mxu1 %v6479_v32  ;;  %6233 = vmatprep.subr.mxu0 %v693_v29  ;;  %v1948_v29 = vld [vmem:[%s10405_s2 + $0x80] sm:$0xff] }
 0x177   :  { %6437 = vmatprep.subr.mxu1 %v6529_v17  ;;  %6234 = vmatpush3.msra.mxu0 %v581_v1  ;;  %v2108_v30 = vld [vmem:[%s10405_s2 + $0x580] sm:$0xff]  ;;  %v1945_v1 = vld [vmem:[%s10405_s2 + $0x68] sm:$0xff] }
 0x178   :  { %6438 = vmatpush3.msra.mxu1 %v749_v31  ;;  %6235 = vmatprep.subr.mxu0 %v686_v33  ;;  %v2105_v31 = vld [vmem:[%s10405_s2 + $0x568] sm:$0xff]  ;;  %v1944_v32 = vld [vmem:[%s10405_s2 + $0x60] sm:$0xff] }
 0x179   :  { %6439 = vmatprep.subr.mxu1 %v6529_v17  ;;  %6236 = vmatpush3.msra.mxu0 %v574_v12  ;;  %v2104_v33 = vld [vmem:[%s10405_s2 + $0x560] sm:$0xff]  ;;  %v2101_v12 = vld [vmem:[%s10405_s2 + $0x548] sm:$0xff] }
 0x17a   :  { %6440 = vmatpush3.msra.mxu1 %v742_v35  ;;  %6441 = vmatprep.mubr.msk.f32.mxu1 %vm6530_vm1, %v6529_v17  ;;  %v1940_v35 = vld [vmem:[%s10405_s2 + $0x40] sm:$0xff] }
 0x17b   :  { %6237 = vmatprep.subr.mxu0 %v679_v37  ;;  %6442 = vmatmul.mubr.msk.f32.vlgmr.msra.gmra.mxu1 %vm789_vm0, %v6480_v46  ;;  %v2100_v37 = vld [vmem:[%s10405_s2 + $0x540] sm:$0xff]  ;;  %v1933_v46 = vld [vmem:[%s10405_s2 + $0x8] sm:$0xff] }
 0x17c   :  { %2350 = vmatprep.subr.mxu1 %v1993_v39  ;;  %6238 = vmatpush3.msra.mxu0 %v567_v41  ;;  %v1937_v39 = vld [vmem:[%s10405_s2 + $0x28] sm:$0xff] }
 0x17d   :  { %2351 = vmatpush1.msra.mxu1 %v1992_v42  ;;  %2414 = vmatprep.mubr.f32.mxu1 %v1926_v45  ;;  %v2097_v41 = vld [vmem:[%s10405_s2 + $0x528] sm:$0xff]  ;;  %v1936_v42 = vld [vmem:[%s10405_s2 + $0x20] sm:$0xff] }
 0x17e   :  { %6239 = vmatprep.subr.mxu0 %v672_v44  ;;  %2352 = vmatprep.subr.mxu1 %v1989_v47  ;;  %v2096_v44 = vld [vmem:[%s10405_s2 + $0x520] sm:$0xff]  ;;  %v2093_v47 = vld [vmem:[%s10405_s2 + $0x508] sm:$0xff] }
 0x17f   :  { %6240 = vmatpush3.msra.mxu0 %v560_v48  ;;  %2353 = vmatpush1.msra.mxu1 %v1988_v49  ;;  %v1932_v48 = vld [vmem:[%s10405_s2] sm:$0xff] }
 0x180   :  { %6241 = vmatprep.subr.mxu0 %v665_v50  ;;  %2354 = vmatprep.subr.mxu1 %v1985_v51  ;;  %v2092_v49 = vld [vmem:[%s10405_s2 + $0x500] sm:$0xff]  ;;  %v2057_v50 = vld [vmem:[%s10405_s2 + $0x3e8] sm:$0xff] }
 0x181   :  { %6242 = vmatpush3.msra.mxu0 %v553_v34  ;;  %2355 = vmatpush1.msra.mxu1 %v1984_v53  ;;  %v2089_v51 = vld [vmem:[%s10405_s2 + $0x4e8] sm:$0xff]  ;;  %v2056_v34 = vld [vmem:[%s10405_s2 + $0x3e0] sm:$0xff] }
 0x182   :  { %6243 = vmatprep.subr.mxu0 %v658_v54  ;;  %2356 = vmatprep.subr.mxu1 %v1981_v55  ;;  %v2088_v53 = vld [vmem:[%s10405_s2 + $0x4e0] sm:$0xff]  ;;  %v2053_v54 = vld [vmem:[%s10405_s2 + $0x3c8] sm:$0xff] }
 0x183   :  { %6244 = vmatpush3.msra.mxu0 %v546_v57  ;;  %2357 = vmatpush1.msra.mxu1 %v1980_v58  ;;  %v2085_v55 = vld [vmem:[%s10405_s2 + $0x4c8] sm:$0xff]  ;;  %v2052_v57 = vld [vmem:[%s10405_s2 + $0x3c0] sm:$0xff] }
 0x184   :  { %6245 = vmatprep.subr.mxu0 %v651_v59  ;;  %2358 = vmatprep.subr.mxu1 %v1977_v62  ;;  %v2084_v58 = vld [vmem:[%s10405_s2 + $0x4c0] sm:$0xff]  ;;  %v2049_v59 = vld [vmem:[%s10405_s2 + $0x3a8] sm:$0xff] }
 0x185   :  { %6246 = vmatpush3.msra.mxu0 %v539_v22  ;;  %2359 = vmatpush1.msra.mxu1 %v1976_v25  ;;  %v2081_v62 = vld [vmem:[%s10405_s2 + $0x4a8] sm:$0xff]  ;;  %v2048_v22 = vld [vmem:[%s10405_s2 + $0x3a0] sm:$0xff] }
 0x186   :  { %6247 = vmatprep.subr.mxu0 %v644_v2  ;;  %2360 = vmatprep.subr.mxu1 %v1973_v3  ;;  %v2080_v25 = vld [vmem:[%s10405_s2 + $0x4a0] sm:$0xff]  ;;  %v2045_v2 = vld [vmem:[%s10405_s2 + $0x388] sm:$0xff]  ;;  %v8965_v3 = vpop.f32.mrf.mxu1 }
 0x187   :  { %6248 = vmatpush3.msra.mxu0 %v532_v4  ;;  %2361 = vmatpush1.msra.mxu1 %v1972_v5  ;;  %v2077_v4 = vld [vmem:[%s10405_s2 + $0x488] sm:$0xff]  ;;  %v2044_v5 = vld [vmem:[%s10405_s2 + $0x380] sm:$0xff] }
 0x188   :  { %6249 = vmatprep.subr.mxu0 %v637_v6  ;;  %2362 = vmatprep.subr.mxu1 %v1969_v9  ;;  %v2076_v6 = vld [vmem:[%s10405_s2 + $0x480] sm:$0xff]  ;;  %v2041_v9 = vld [vmem:[%s10405_s2 + $0x368] sm:$0xff] }
 0x189   :  { %6250 = vmatpush3.msra.mxu0 %v525_v11  ;;  %2363 = vmatpush1.msra.mxu1 %v1968_v13  ;;  %v2073_v11 = vld [vmem:[%s10405_s2 + $0x468] sm:$0xff]  ;;  %v2040_v13 = vld [vmem:[%s10405_s2 + $0x360] sm:$0xff] }
 0x18a   :  { %6251 = vmatprep.subr.mxu0 %v630_v14  ;;  %2364 = vmatprep.subr.mxu1 %v1965_v15  ;;  %v2072_v14 = vld [vmem:[%s10405_s2 + $0x460] sm:$0xff]  ;;  %v2037_v15 = vld [vmem:[%s10405_s2 + $0x348] sm:$0xff] }
 0x18b   :  { %6252 = vmatpush3.msra.mxu0 %v518_v16  ;;  %1849 = vmatprep.mubr.f32.mxu0 %v8616_v61  ;;  %v1956_v61 = vld [vmem:[%s10405_s2 + $0xc0] sm:$0xff]  ;;  %v1145_v16 = vpop.f32.mrf.mxu1 }
 0x18c   :  { %2365 = vmatpush1.msra.mxu1 %v1964_v38  ;;  %1850 = vmatmul.mubr.f32.vlgmr.msra.gmra.mxu0 %v8628_v0  ;;  %v2113_v0 = vld [vmem:[%s10405_s2 + $0x5a8] sm:$0xff] }
 0x18d   :  { %2366 = vmatprep.subr.mxu1 %v1961_v18  ;;  %2421 = vmatprep.subr.mxu0 %v2121_v19  ;;  %v2069_v38 = vld [vmem:[%s10405_s2 + $0x448] sm:$0xff]  ;;  %v2036_v18 = vld [vmem:[%s10405_s2 + $0x340] sm:$0xff] }
 0x18e   :  { %2367 = vmatpush1.msra.mxu1 %v1960_v40  ;;  %2422 = vmatpush1.msra.mxu0 %v2120_v20  ;;  %v2068_v19 = vld [vmem:[%s10405_s2 + $0x440] sm:$0xff]  ;;  %v2033_v40 = vld [vmem:[%s10405_s2 + $0x328] sm:$0xff]  ;;  %v9004_v20 = vsub.s32 3, %v8093_v60 }
 0x18f   :  { %2368 = vmatprep.subr.mxu1 %v1957_v21  ;;  %2423 = vmatprep.subr.mxu0 %v2117_v23  ;;  %v2065_v21 = vld [vmem:[%s10405_s2 + $0x428] sm:$0xff]  ;;  %v2032_v23 = vld [vmem:[%s10405_s2 + $0x320] sm:$0xff] }
 0x190   :  { %2369 = vmatpush1.msra.mxu1 %v1956_v61  ;;  %2424 = vmatpush1.msra.mxu0 %v2116_v43  ;;  %v2064_v43 = vld [vmem:[%s10405_s2 + $0x420] sm:$0xff] }
 0x191   :  { %2370 = vmatprep.subr.mxu1 %v1953_v24  ;;  %2425 = vmatprep.subr.mxu0 %v2113_v0  ;;  %v2029_v24 = vld [vmem:[%s10405_s2 + $0x308] sm:$0xff] }
 0x192   :  { %2371 = vmatpush1.msra.mxu1 %v1952_v26  ;;  %2426 = vmatpush1.msra.mxu0 %v2112_v27  ;;  %v2061_v0 = vld [vmem:[%s10405_s2 + $0x408] sm:$0xff]  ;;  %v2028_v26 = vld [vmem:[%s10405_s2 + $0x300] sm:$0xff] }
 0x193   :  { %2372 = vmatprep.subr.mxu1 %v1949_v28  ;;  %2427 = vmatprep.subr.mxu0 %v2109_v63  ;;  %v2060_v27 = vld [vmem:[%s10405_s2 + $0x400] sm:$0xff]  ;;  %v2025_v63 = vld [vmem:[%s10405_s2 + $0x2e8] sm:$0xff] }
 0x194   :  { %2373 = vmatpush1.msra.mxu1 %v1948_v29  ;;  %2428 = vmatpush1.msra.mxu0 %v2108_v30  ;;  %v769_v30 = vrot.slane %v8119_v7, %v9004_v20 }
 0x195   :  { %2374 = vmatprep.subr.mxu1 %v1945_v1  ;;  %2429 = vmatprep.subr.mxu0 %v2105_v31  ;;  %v2185_v1 = vld [vmem:[%s10405_s2 + $0x7e8] sm:$0xff]  ;;  %v2024_v31 = vld [vmem:[%s10405_s2 + $0x2e0] sm:$0xff] }
 0x196   :  { %2375 = vmatpush1.msra.mxu1 %v1944_v32  ;;  %2430 = vmatpush1.msra.mxu0 %v2104_v33  ;;  %v2184_v32 = vld [vmem:[%s10405_s2 + $0x7e0] sm:$0xff]  ;;  %v2021_v33 = vld [vmem:[%s10405_s2 + $0x2c8] sm:$0xff] }
 0x197   :  { %2376 = vmatprep.subr.mxu1 %v1941_v10  ;;  %2431 = vmatprep.subr.mxu0 %v2101_v12  ;;  %v2181_v10 = vld [vmem:[%s10405_s2 + $0x7c8] sm:$0xff]  ;;  %v2020_v12 = vld [vmem:[%s10405_s2 + $0x2c0] sm:$0xff] }
 0x198   :  { %2377 = vmatpush1.msra.mxu1 %v1940_v35  ;;  %2432 = vmatpush1.msra.mxu0 %v2100_v37  ;;  %v2180_v37 = vld [vmem:[%s10405_s2 + $0x7c0] sm:$0xff] }
 0x199   :  { %2378 = vmatprep.subr.mxu1 %v1937_v39  ;;  %2433 = vmatprep.subr.mxu0 %v2097_v41  ;;  %v2017_v39 = vld [vmem:[%s10405_s2 + $0x2a8] sm:$0xff] }
 0x19a   :  { %2379 = vmatpush1.msra.mxu1 %v1936_v42  ;;  %2434 = vmatpush1.msra.mxu0 %v2096_v44  ;;  %v1146_v42 = vadd.f32 %v1145_v16, %v769_v30  ;;  %v2177_v44 = vld [vmem:[%s10405_s2 + $0x7a8] sm:$0xff]  ;;  %v1996_v16 = vld [vmem:[%s10405_s2 + $0x200] sm:$0xff] }
 0x19b   :  { %2380 = vmatprep.subr.mxu1 %v1933_v46  ;;  %2435 = vmatprep.subr.mxu0 %v2093_v47  ;;  %v2016_v46 = vld [vmem:[%s10405_s2 + $0x2a0] sm:$0xff] }
 0x19c   :  { %2381 = vmatpush1.msra.mxu1 %v1932_v48  ;;  %2436 = vmatpush1.msra.mxu0 %v2092_v49  ;;  %v2176_v47 = vld [vmem:[%s10405_s2 + $0x7a0] sm:$0xff]  ;;  %v2013_v48 = vld [vmem:[%s10405_s2 + $0x288] sm:$0xff] }
 0x19d   :  { %2382 = vmatprep.subr.mxu1 %v2057_v50  ;;  %2437 = vmatprep.subr.mxu0 %v2089_v51  ;;  %v2173_v50 = vld [vmem:[%s10405_s2 + $0x788] sm:$0xff]  ;;  %v2012_v51 = vld [vmem:[%s10405_s2 + $0x280] sm:$0xff] }
 0x19e   :  { %2383 = vmatpush2.msra.mxu1 %v2056_v34  ;;  %2438 = vmatpush1.msra.mxu0 %v2088_v53  ;;  %v2172_v34 = vld [vmem:[%s10405_s2 + $0x780] sm:$0xff]  ;;  %v2009_v53 = vld [vmem:[%s10405_s2 + $0x268] sm:$0xff] }
 0x19f   :  { %2384 = vmatprep.subr.mxu1 %v2053_v54  ;;  %2439 = vmatprep.subr.mxu0 %v2085_v55  ;;  %v2144_v30 = vld [vmem:[%s10405_s2 + $0x6a0] sm:$0xff] }
 0x1a0   :  { %2385 = vmatpush2.msra.mxu1 %v2052_v57  ;;  %2440 = vmatpush1.msra.mxu0 %v2084_v58  ;;  %v2169_v57 = vld [vmem:[%s10405_s2 + $0x768] sm:$0xff]  ;;  %v2008_v58 = vld [vmem:[%s10405_s2 + $0x260] sm:$0xff] }
 0x1a1   :  { %2386 = vmatprep.subr.mxu1 %v2049_v59  ;;  %2441 = vmatprep.subr.mxu0 %v2081_v62  ;;  %v2168_v59 = vld [vmem:[%s10405_s2 + $0x760] sm:$0xff]  ;;  %v2005_v62 = vld [vmem:[%s10405_s2 + $0x248] sm:$0xff] }
 0x1a2   :  { %2387 = vmatpush2.msra.mxu1 %v2048_v22  ;;  %2442 = vmatpush1.msra.mxu0 %v2080_v25  ;;  %v9029_v28 = vpop.f32.mrf.mxu0  ;;  %v2165_v25 = vld [vmem:[%s10405_s2 + $0x748] sm:$0xff] }
 0x1a3   :  { %2388 = vmatprep.subr.mxu1 %v2045_v2  ;;  %2443 = vmatprep.subr.mxu0 %v2077_v4  ;;  %v2004_v2 = vld [vmem:[%s10405_s2 + $0x240] sm:$0xff] }
 0x1a4   :  { %2389 = vmatpush2.msra.mxu1 %v2044_v5  ;;  %2444 = vmatpush1.msra.mxu0 %v2076_v6  ;;  %v1216_v35 = vpop.f32.mrf.mxu0  ;;  %v2164_v4 = vld [vmem:[%s10405_s2 + $0x740] sm:$0xff]  ;;  %v2001_v5 = vld [vmem:[%s10405_s2 + $0x228] sm:$0xff] }
 0x1a5   :  { %2390 = vmatprep.subr.mxu1 %v2041_v9  ;;  %2445 = vmatprep.subr.mxu0 %v2073_v11  ;;  %v1217_v49 = vadd.f32 %v1216_v35, %v1146_v42  ;;  %v2161_v6 = vld [vmem:[%s10405_s2 + $0x728] sm:$0xff]  ;;  %v2000_v9 = vld [vmem:[%s10405_s2 + $0x220] sm:$0xff] }
 0x1a6   :  { %2391 = vmatpush2.msra.mxu1 %v2040_v13  ;;  %2446 = vmatpush1.msra.mxu0 %v2072_v14  ;;  %v2160_v11 = vld [vmem:[%s10405_s2 + $0x720] sm:$0xff]  ;;  %v1997_v13 = vld [vmem:[%s10405_s2 + $0x208] sm:$0xff] }
 0x1a7   :  { %2392 = vmatprep.subr.mxu1 %v2037_v15  ;;  %v9012_v61 = vpop.f32.mrf.mxu1  ;;  %2447 = vmatprep.subr.mxu0 %v2069_v38  ;;  %v2157_v15 = vld [vmem:[%s10405_s2 + $0x708] sm:$0xff]  ;;  %v9132_v38 = vsub.s32 2, %v8093_v60 }
 0x1a8   :  { %2393 = vmatpush2.msra.mxu1 %v2036_v18  ;;  %2448 = vmatpush1.msra.mxu0 %v2068_v19  ;;  %v2156_v18 = vld [vmem:[%s10405_s2 + $0x700] sm:$0xff]  ;;  %v2153_v19 = vld [vmem:[%s10405_s2 + $0x6e8] sm:$0xff] }
 0x1a9   :  { %2394 = vmatprep.subr.mxu1 %v2033_v40  ;;  %2449 = vmatprep.subr.mxu0 %v2065_v21  ;;  %v1287_v29 = vpop.f32.mrf.mxu1  ;;  %v1925_v40 = vmax.f32 %v8590_v52, 0.0  ;;  %v2152_v21 = vld [vmem:[%s10405_s2 + $0x6e0] sm:$0xff]  ;;  %v2137_v35 = vld [vmem:[%s10405_s2 + $0x668] sm:$0xff]  ;;  %v2925_v52 = vld [vmem:[%s10406_s3 + $0x18] sm:$0xff] }
 0x1aa   :  { %2395 = vmatpush2.msra.mxu1 %v2032_v23  ;;  %2450 = vmatpush1.msra.mxu0 %v2064_v43  ;;  %v1288_v55 = vadd.f32 %v1287_v29, %v1217_v49  ;;  %v2249_v23 = vld [vmem:[%s10405_s2 + $0x9e8] sm:$0xff]  ;;  %v2244_v29 = vld [vmem:[%s10405_s2 + $0x9c0] sm:$0xff] }
 0x1ab   :  { %2396 = vmatprep.subr.mxu1 %v2029_v24  ;;  %2451 = vmatprep.subr.mxu0 %v2061_v0  ;;  %v2149_v43 = vld [vmem:[%s10405_s2 + $0x6c8] sm:$0xff]  ;;  %v2248_v24 = vld [vmem:[%s10405_s2 + $0x9e0] sm:$0xff]  ;;  %v765_v0 = vrot.slane %v8119_v7, %v9132_v38 }
 0x1ac   :  { %2397 = vmatpush2.msra.mxu1 %v2028_v26  ;;  %2452 = vmatpush1.msra.mxu0 %v2060_v27  ;;  %v9060_v41 = vpop.f32.mrf.mxu1  ;;  %v2148_v26 = vld [vmem:[%s10405_s2 + $0x6c0] sm:$0xff]  ;;  %v2245_v27 = vld [vmem:[%s10405_s2 + $0x9c8] sm:$0xff] }
 0x1ad   :  { %2398 = vmatprep.subr.mxu1 %v2025_v63  ;;  %2453 = vmatprep.subr.mxu0 %v2185_v1  ;;  %v2145_v63 = vld [vmem:[%s10405_s2 + $0x6a8] sm:$0xff] }
 0x1ae   :  { %2399 = vmatpush2.msra.mxu1 %v2024_v31  ;;  %2454 = vmatpush2.msra.mxu0 %v2184_v32  ;;  %v1358_v54 = vpop.f32.mrf.mxu1  ;;  %v2241_v1 = vld [vmem:[%s10405_s2 + $0x9a8] sm:$0xff]  ;;  %v2240_v32 = vld [vmem:[%s10405_s2 + $0x9a0] sm:$0xff] }
 0x1af   :  { %2400 = vmatprep.subr.mxu1 %v2021_v33  ;;  %2455 = vmatprep.subr.mxu0 %v2181_v10  ;;  %v9098_v22 = vadd.f32 %v1358_v54, %v1288_v55  ;;  %v2141_v31 = vld [vmem:[%s10405_s2 + $0x688] sm:$0xff]  ;;  %v1144_v33 = vadd.f32 %v8965_v3, %v765_v0  ;;  %v2140_v10 = vld [vmem:[%s10405_s2 + $0x680] sm:$0xff] }
 0x1b0   :  { %2401 = vmatpush2.msra.mxu1 %v2020_v12  ;;  %2456 = vmatpush2.msra.mxu0 %v2180_v37  ;;  %v2237_v12 = vld [vmem:[%s10405_s2 + $0x988] sm:$0xff]  ;;  %v2236_v3 = vld [vmem:[%s10405_s2 + $0x980] sm:$0xff] }
 0x1b1   :  { %2402 = vmatprep.subr.mxu1 %v2017_v39  ;;  %2457 = vmatprep.subr.mxu0 %v2177_v44  ;;  %v1928_v14 = vmax.f32 %v9098_v22, 0.0  ;;  %v1215_v37 = vadd.f32 %v9029_v28, %v1144_v33  ;;  %v2136_v39 = vld [vmem:[%s10405_s2 + $0x660] sm:$0xff]  ;;  %v2233_v42 = vld [vmem:[%s10405_s2 + $0x968] sm:$0xff]  ;;  %v2110_v22 = vld [vmem:[%s10405_s2 + $0x590] sm:$0xff] }
 0x1b2   :  { %2403 = vmatpush2.msra.mxu1 %v2016_v46  ;;  %2458 = vmatpush2.msra.mxu0 %v2176_v47  ;;  %v2133_v44 = vld [vmem:[%s10405_s2 + $0x648] sm:$0xff]  ;;  %v2232_v28 = vld [vmem:[%s10405_s2 + $0x960] sm:$0xff] }
 0x1b3   :  { %2404 = vmatprep.subr.mxu1 %v2013_v48  ;;  %2459 = vmatprep.subr.mxu0 %v2173_v50  ;;  %v1286_v46 = vadd.f32 %v9012_v61, %v1215_v37  ;;  %v2132_v47 = vld [vmem:[%s10405_s2 + $0x640] sm:$0xff]  ;;  %v2229_v48 = vld [vmem:[%s10405_s2 + $0x948] sm:$0xff] }
 0x1b4   :  { %2405 = vmatpush2.msra.mxu1 %v2012_v51  ;;  %2460 = vmatpush2.msra.mxu0 %v2172_v34  ;;  %v2129_v49 = vld [vmem:[%s10405_s2 + $0x628] sm:$0xff]  ;;  %v2228_v61 = vld [vmem:[%s10405_s2 + $0x940] sm:$0xff] }
 0x1b5   :  { %2406 = vmatprep.subr.mxu1 %v2009_v53  ;;  %2461 = vmatprep.subr.mxu0 %v2169_v57  ;;  %v9223_v50 = vadd.f32 %v9060_v41, %v1286_v46  ;;  %v2128_v51 = vld [vmem:[%s10405_s2 + $0x620] sm:$0xff]  ;;  %v2225_v34 = vld [vmem:[%s10405_s2 + $0x928] sm:$0xff] }
 0x1b6   :  { %2407 = vmatpush2.msra.mxu1 %v2008_v58  ;;  %2462 = vmatpush2.msra.mxu0 %v2168_v59  ;;  %v2125_v53 = vld [vmem:[%s10405_s2 + $0x608] sm:$0xff]  ;;  %v2224_v41 = vld [vmem:[%s10405_s2 + $0x920] sm:$0xff] }
 0x1b7   :  { %2408 = vmatprep.subr.mxu1 %v2005_v62  ;;  %2463 = vmatprep.subr.mxu0 %v2165_v25  ;;  %v2124_v54 = vld [vmem:[%s10405_s2 + $0x600] sm:$0xff]  ;;  %v2221_v55 = vld [vmem:[%s10405_s2 + $0x908] sm:$0xff]  ;;  %v1927_v58 = vmax.f32 %v9223_v50, 0.0  ;;  %v2058_v50 = vld [vmem:[%s10405_s2 + $0x3f0] sm:$0xff] }
 0x1b8   :  { %2409 = vmatpush2.msra.mxu1 %v2004_v2  ;;  %2464 = vmatpush2.msra.mxu0 %v2164_v4  ;;  %v2220_v57 = vld [vmem:[%s10405_s2 + $0x900] sm:$0xff]  ;;  %v2217_v59 = vld [vmem:[%s10405_s2 + $0x8e8] sm:$0xff] }
 0x1b9   :  { %2410 = vmatprep.subr.mxu1 %v2001_v5  ;;  %2465 = vmatprep.subr.mxu0 %v2161_v6  ;;  %v2216_v62 = vld [vmem:[%s10405_s2 + $0x8e0] sm:$0xff]  ;;  %v2213_v25 = vld [vmem:[%s10405_s2 + $0x8c8] sm:$0xff] }
 0x1ba   :  { %2411 = vmatpush2.msra.mxu1 %v2000_v9  ;;  %2466 = vmatpush2.msra.mxu0 %v2160_v11  ;;  %v2212_v2 = vld [vmem:[%s10405_s2 + $0x8c0] sm:$0xff]  ;;  %v2209_v4 = vld [vmem:[%s10405_s2 + $0x8a8] sm:$0xff] }
 0x1bb   :  { %2412 = vmatprep.subr.mxu1 %v1997_v13  ;;  %2467 = vmatprep.subr.mxu0 %v2157_v15  ;;  %v2208_v5 = vld [vmem:[%s10405_s2 + $0x8a0] sm:$0xff]  ;;  %v2205_v6 = vld [vmem:[%s10405_s2 + $0x888] sm:$0xff] }
 0x1bc   :  { %2413 = vmatpush2.msra.mxu1 %v1996_v16  ;;  %2468 = vmatpush2.msra.mxu0 %v2156_v18  ;;  %v2204_v9 = vld [vmem:[%s10405_s2 + $0x880] sm:$0xff]  ;;  %v2321_v11 = vld [vmem:[%s10405_s2 + $0xc28] sm:$0xff] }
 0x1bd   :  { %2485 = vmatprep.mubr.f32.mxu0 %v1928_v14  ;;  %2415 = vmatmul.mubr.f32.vlgmr.msra.gmra.mxu1 %v1925_v40  ;;  %v2201_v13 = vld [vmem:[%s10405_s2 + $0x868] sm:$0xff]  ;;  %v2320_v15 = vld [vmem:[%s10405_s2 + $0xc20] sm:$0xff] }
 0x1be   :  { %2469 = vmatprep.subr.mxu0 %v2153_v19  ;;  %2492 = vmatprep.subr.mxu1 %v2249_v23  ;;  %v2200_v16 = vld [vmem:[%s10405_s2 + $0x860] sm:$0xff]  ;;  %v2317_v18 = vld [vmem:[%s10405_s2 + $0xc08] sm:$0xff]  ;;  %v1995_v23 = vld [vmem:[%s10405_s2 + $0x1f8] sm:$0xff] }
 0x1bf   :  { %2470 = vmatpush2.msra.mxu0 %v2152_v21  ;;  %2493 = vmatpush1.msra.mxu1 %v2248_v24  ;;  %v2197_v19 = vld [vmem:[%s10405_s2 + $0x848] sm:$0xff]  ;;  %v2316_v21 = vld [vmem:[%s10405_s2 + $0xc00] sm:$0xff] }
 0x1c0   :  { %2471 = vmatprep.subr.mxu0 %v2149_v43  ;;  %2494 = vmatprep.subr.mxu1 %v2245_v27  ;;  %v2196_v43 = vld [vmem:[%s10405_s2 + $0x840] sm:$0xff]  ;;  %v2193_v24 = vld [vmem:[%s10405_s2 + $0x828] sm:$0xff] }
 0x1c1   :  { %2472 = vmatpush2.msra.mxu0 %v2148_v26  ;;  %2495 = vmatpush1.msra.mxu1 %v2244_v29  ;;  %v2192_v0 = vld [vmem:[%s10405_s2 + $0x820] sm:$0xff]  ;;  %v2189_v26 = vld [vmem:[%s10405_s2 + $0x808] sm:$0xff] }
 0x1c2   :  { %2473 = vmatprep.subr.mxu0 %v2145_v63  ;;  %2496 = vmatprep.subr.mxu1 %v2241_v1  ;;  %v2188_v27 = vld [vmem:[%s10405_s2 + $0x800] sm:$0xff]  ;;  %v2313_v63 = vld [vmem:[%s10405_s2 + $0xbe8] sm:$0xff] }
 0x1c3   :  { %2474 = vmatpush2.msra.mxu0 %v2144_v30  ;;  %2497 = vmatpush1.msra.mxu1 %v2240_v32  ;;  %v2312_v29 = vld [vmem:[%s10405_s2 + $0xbe0] sm:$0xff]  ;;  %v2309_v30 = vld [vmem:[%s10405_s2 + $0xbc8] sm:$0xff] }
 0x1c4   :  { %2475 = vmatprep.subr.mxu0 %v2141_v31  ;;  %2498 = vmatprep.subr.mxu1 %v2237_v12  ;;  %v2308_v1 = vld [vmem:[%s10405_s2 + $0xbc0] sm:$0xff]  ;;  %v2305_v31 = vld [vmem:[%s10405_s2 + $0xba8] sm:$0xff] }
 0x1c5   :  { %2476 = vmatpush2.msra.mxu0 %v2140_v10  ;;  %2499 = vmatpush1.msra.mxu1 %v2236_v3  ;;  %v2304_v32 = vld [vmem:[%s10405_s2 + $0xba0] sm:$0xff]  ;;  %v2301_v33 = vld [vmem:[%s10405_s2 + $0xb88] sm:$0xff] }
 0x1c6   :  { %2477 = vmatprep.subr.mxu0 %v2137_v35  ;;  %2500 = vmatprep.subr.mxu1 %v2233_v42  ;;  %v2300_v10 = vld [vmem:[%s10405_s2 + $0xb80] sm:$0xff]  ;;  %v2297_v12 = vld [vmem:[%s10405_s2 + $0xb68] sm:$0xff] }
 0x1c7   :  { %2478 = vmatpush2.msra.mxu0 %v2136_v39  ;;  %2501 = vmatpush1.msra.mxu1 %v2232_v28  ;;  %v2296_v35 = vld [vmem:[%s10405_s2 + $0xb60] sm:$0xff]  ;;  %v2293_v3 = vld [vmem:[%s10405_s2 + $0xb48] sm:$0xff] }
 0x1c8   :  { %2479 = vmatprep.subr.mxu0 %v2133_v44  ;;  %2502 = vmatprep.subr.mxu1 %v2229_v48  ;;  %v2292_v37 = vld [vmem:[%s10405_s2 + $0xb40] sm:$0xff]  ;;  %v2289_v39 = vld [vmem:[%s10405_s2 + $0xb28] sm:$0xff] }
 0x1c9   :  { %2480 = vmatpush2.msra.mxu0 %v2132_v47  ;;  %2503 = vmatpush1.msra.mxu1 %v2228_v61  ;;  %v2288_v42 = vld [vmem:[%s10405_s2 + $0xb20] sm:$0xff]  ;;  %v2285_v44 = vld [vmem:[%s10405_s2 + $0xb08] sm:$0xff] }
 0x1ca   :  { %2481 = vmatprep.subr.mxu0 %v2129_v49  ;;  %2504 = vmatprep.subr.mxu1 %v2225_v34  ;;  %v2284_v28 = vld [vmem:[%s10405_s2 + $0xb00] sm:$0xff]  ;;  %v2281_v46 = vld [vmem:[%s10405_s2 + $0xae8] sm:$0xff] }
 0x1cb   :  { %2482 = vmatpush2.msra.mxu0 %v2128_v51  ;;  %2505 = vmatpush1.msra.mxu1 %v2224_v41  ;;  %v2280_v47 = vld [vmem:[%s10405_s2 + $0xae0] sm:$0xff]  ;;  %v2277_v48 = vld [vmem:[%s10405_s2 + $0xac8] sm:$0xff] }
 0x1cc   :  { %2483 = vmatprep.subr.mxu0 %v2125_v53  ;;  %2506 = vmatprep.subr.mxu1 %v2221_v55  ;;  %v2276_v49 = vld [vmem:[%s10405_s2 + $0xac0] sm:$0xff]  ;;  %v2273_v61 = vld [vmem:[%s10405_s2 + $0xaa8] sm:$0xff] }
 0x1cd   :  { %2484 = vmatpush2.msra.mxu0 %v2124_v54  ;;  %2507 = vmatpush1.msra.mxu1 %v2220_v57  ;;  %v2272_v51 = vld [vmem:[%s10405_s2 + $0xaa0] sm:$0xff]  ;;  %v2269_v34 = vld [vmem:[%s10405_s2 + $0xa88] sm:$0xff] }
 0x1ce   :  { %2486 = vmatmul.mubr.f32.vlgmr.msra.gmra.mxu0 %v1927_v58  ;;  %2508 = vmatprep.subr.mxu1 %v2217_v59  ;;  %v2268_v53 = vld [vmem:[%s10405_s2 + $0xa80] sm:$0xff]  ;;  %v2265_v41 = vld [vmem:[%s10405_s2 + $0xa68] sm:$0xff] }
 0x1cf   :  { %2627 = vmatprep.mubr.f32.mxu0 %v6529_v17  ;;  %2509 = vmatpush1.msra.mxu1 %v2216_v62  ;;  %v2264_v54 = vld [vmem:[%s10405_s2 + $0xa60] sm:$0xff]  ;;  %v2261_v55 = vld [vmem:[%s10405_s2 + $0xa48] sm:$0xff] }
 0x1d0   :  { %2510 = vmatprep.subr.mxu1 %v2213_v25  ;;  %2591 = vmatprep.subr.mxu0 %v2321_v11  ;;  %v2260_v57 = vld [vmem:[%s10405_s2 + $0xa40] sm:$0xff]  ;;  %v2257_v59 = vld [vmem:[%s10405_s2 + $0xa28] sm:$0xff] }
 0x1d1   :  { %2511 = vmatpush1.msra.mxu1 %v2212_v2  ;;  %2592 = vmatpush1.msra.mxu0 %v2320_v15  ;;  %v2256_v62 = vld [vmem:[%s10405_s2 + $0xa20] sm:$0xff]  ;;  %v2253_v25 = vld [vmem:[%s10405_s2 + $0xa08] sm:$0xff] }
 0x1d2   :  { %2512 = vmatprep.subr.mxu1 %v2209_v4  ;;  %2593 = vmatprep.subr.mxu0 %v2317_v18  ;;  %v2252_v2 = vld [vmem:[%s10405_s2 + $0xa00] sm:$0xff]  ;;  %v2123_v4 = vld [vmem:[%s10405_s2 + $0x5f8] sm:$0xff] }
 0x1d3   :  { %2513 = vmatpush1.msra.mxu1 %v2208_v5  ;;  %2594 = vmatpush1.msra.mxu0 %v2316_v21  ;;  %v9413_v5 = vsub.s32 4, %v8093_v60 }
 0x1d4   :  { %2514 = vmatprep.subr.mxu1 %v2205_v6  ;;  %2634 = vmatprep.subr.mxu0 %v1995_v23  ;;  %v9416_v6 = vsub.s32 5, %v8093_v60 }
 0x1d5   :  { %2515 = vmatpush1.msra.mxu1 %v2204_v9  ;;  %v773_v11 = vrot.slane %v8119_v7, %v9413_v5 }
 0x1d6   :  { %2516 = vmatprep.subr.mxu1 %v2201_v13  ;;  %v777_v15 = vrot.slane %v8119_v7, %v9416_v6 }
 0x1d7   :  { %2517 = vmatpush1.msra.mxu1 %v2200_v16 }
 0x1d8   :  { %2518 = vmatprep.subr.mxu1 %v2197_v19 }
 0x1d9   :  { %2519 = vmatpush1.msra.mxu1 %v2196_v43 }
 0x1da   :  { %2520 = vmatprep.subr.mxu1 %v2193_v24 }
 0x1db   :  { %2521 = vmatpush1.msra.mxu1 %v2192_v0 }
 0x1dc   :  { %2522 = vmatprep.subr.mxu1 %v2189_v26 }
 0x1dd   :  { %2523 = vmatpush1.msra.mxu1 %v2188_v27 }
 0x1de   :  { %2524 = vmatprep.subr.mxu1 %v2313_v63 }
 0x1df   :  { %2525 = vmatpush2.msra.mxu1 %v2312_v29 }
 0x1e0   :  { %2526 = vmatprep.subr.mxu1 %v2309_v30 }
 0x1e1   :  { %2527 = vmatpush2.msra.mxu1 %v2308_v1 }
 0x1e2   :  { %2528 = vmatprep.subr.mxu1 %v2305_v31 }
 0x1e3   :  { %2529 = vmatpush2.msra.mxu1 %v2304_v32 }
 0x1e4   :  { %2530 = vmatprep.subr.mxu1 %v2301_v33 }
 0x1e5   :  { %2531 = vmatpush2.msra.mxu1 %v2300_v10  ;;  %v1427_v9 = vpop.f32.mrf.mxu0  ;;  %v2122_v10 = vld [vmem:[%s10405_s2 + $0x5f0] sm:$0xff] }
 0x1e6   :  { %2532 = vmatprep.subr.mxu1 %v2297_v12  ;;  %v1428_v18 = vadd.f32 %v1427_v9, %v773_v11  ;;  %v2119_v12 = vld [vmem:[%s10405_s2 + $0x5d8] sm:$0xff]  ;;  %v2078_v9 = vld [vmem:[%s10405_s2 + $0x490] sm:$0xff] }
 0x1e7   :  { %2533 = vmatpush2.msra.mxu1 %v2296_v35  ;;  %v1429_v16 = vpop.f32.mrf.mxu0  ;;  %v2118_v35 = vld [vmem:[%s10405_s2 + $0x5d0] sm:$0xff]  ;;  %v2075_v11 = vld [vmem:[%s10405_s2 + $0x478] sm:$0xff] }
 0x1e8   :  { %2534 = vmatprep.subr.mxu1 %v2293_v3  ;;  %v1430_v21 = vadd.f32 %v1429_v16, %v777_v15  ;;  %v2071_v16 = vld [vmem:[%s10405_s2 + $0x458] sm:$0xff] }
 0x1e9   :  { %2535 = vmatpush2.msra.mxu1 %v2292_v37  ;;  %v2115_v37 = vld [vmem:[%s10405_s2 + $0x5b8] sm:$0xff] }
 0x1ea   :  { %2536 = vmatprep.subr.mxu1 %v2289_v39  ;;  %v2114_v39 = vld [vmem:[%s10405_s2 + $0x5b0] sm:$0xff] }
 0x1eb   :  { %2537 = vmatpush2.msra.mxu1 %v2288_v42 }
 0x1ec   :  { %2538 = vmatprep.subr.mxu1 %v2285_v44  ;;  %v2111_v44 = vld [vmem:[%s10405_s2 + $0x598] sm:$0xff] }
 0x1ed   :  { %2539 = vmatpush2.msra.mxu1 %v2284_v28  ;;  %v2106_v28 = vld [vmem:[%s10405_s2 + $0x570] sm:$0xff] }
 0x1ee   :  { %2540 = vmatprep.subr.mxu1 %v2281_v46  ;;  %v1498_v13 = vpop.f32.mrf.mxu1 }
 0x1ef   :  { %2541 = vmatpush2.msra.mxu1 %v2280_v47  ;;  %v1499_v23 = vadd.f32 %v1498_v13, %v1428_v18  ;;  %v2103_v47 = vld [vmem:[%s10405_s2 + $0x558] sm:$0xff]  ;;  %v2070_v18 = vld [vmem:[%s10405_s2 + $0x450] sm:$0xff] }
 0x1f0   :  { %2542 = vmatprep.subr.mxu1 %v2277_v48  ;;  %v1500_v19 = vpop.f32.mrf.mxu1  ;;  %v2102_v48 = vld [vmem:[%s10405_s2 + $0x550] sm:$0xff] }
 0x1f1   :  { %2543 = vmatpush2.msra.mxu1 %v2276_v49  ;;  %v1501_v0 = vadd.f32 %v1500_v19, %v1430_v21  ;;  %v2099_v49 = vld [vmem:[%s10405_s2 + $0x538] sm:$0xff] }
 0x1f2   :  { %2544 = vmatprep.subr.mxu1 %v2273_v61  ;;  %v2067_v21 = vld [vmem:[%s10405_s2 + $0x438] sm:$0xff] }
 0x1f3   :  { %2545 = vmatpush2.msra.mxu1 %v2272_v51  ;;  %v2098_v51 = vld [vmem:[%s10405_s2 + $0x530] sm:$0xff] }
 0x1f4   :  { %2546 = vmatprep.subr.mxu1 %v2269_v34  ;;  %v1640_v43 = vpop.f32.mrf.mxu1  ;;  %v2095_v34 = vld [vmem:[%s10405_s2 + $0x518] sm:$0xff] }
 0x1f5   :  { %2547 = vmatpush2.msra.mxu1 %v2268_v53 }
 0x1f6   :  { %2548 = vmatprep.subr.mxu1 %v2265_v41  ;;  %v1642_v29 = vpop.f32.mrf.mxu1  ;;  %v2094_v41 = vld [vmem:[%s10405_s2 + $0x510] sm:$0xff] }
 0x1f7   :  { %2549 = vmatpush2.msra.mxu1 %v2264_v54  ;;  %v2091_v54 = vld [vmem:[%s10405_s2 + $0x4f8] sm:$0xff] }
 0x1f8   :  { %2550 = vmatprep.subr.mxu1 %v2261_v55  ;;  %v2090_v55 = vld [vmem:[%s10405_s2 + $0x4f0] sm:$0xff] }
 0x1f9   :  { %2551 = vmatpush2.msra.mxu1 %v2260_v57  ;;  %v2087_v57 = vld [vmem:[%s10405_s2 + $0x4d8] sm:$0xff] }
 0x1fa   :  { %2552 = vmatprep.subr.mxu1 %v2257_v59  ;;  %v2086_v59 = vld [vmem:[%s10405_s2 + $0x4d0] sm:$0xff] }
 0x1fb   :  { %2553 = vmatpush2.msra.mxu1 %v2256_v62  ;;  %v2083_v62 = vld [vmem:[%s10405_s2 + $0x4b8] sm:$0xff] }
 0x1fc   :  { %2554 = vmatprep.subr.mxu1 %v2253_v25  ;;  %v2082_v25 = vld [vmem:[%s10405_s2 + $0x4b0] sm:$0xff] }
 0x1fd   :  { %2555 = vmatpush2.msra.mxu1 %v2252_v2  ;;  %v9498_v2 = vsub.s32 6, %v8093_v60  ;;  %v2074_v60 = vld [vmem:[%s10405_s2 + $0x470] sm:$0xff] }
 0x1fe   :  { %2705 = vmatprep.subr.mxu1 %v2123_v4  ;;  %v2079_v4 = vld [vmem:[%s10405_s2 + $0x498] sm:$0xff] }
 0x1ff   :  { %v781_v13 = vrot.slane %v8119_v7, %v9498_v2  ;;  %v2066_v7 = vld [vmem:[%s10405_s2 + $0x430] sm:$0xff] }
 0x215   :  { %v6183_v31 = vpop.f32.mrf.mxu1 }
 0x217   :  { %v6184_v3 = vpop.f32.mrf.mxu1 }
 0x218   :  { %v6185_v15 = vadd.f32 %v6184_v3, %v6183_v31  ;;  %v2186_v31 = vld [vmem:[%s10405_s2 + $0x7f0] sm:$0xff] }
 0x229   :  { %v1569_v24 = vpop.f32.mrf.mxu0 }
 0x22a   :  { %v1570_v26 = vadd.f32 %v1569_v24, %v1499_v23  ;;  %v2063_v24 = vld [vmem:[%s10405_s2 + $0x418] sm:$0xff] }
 0x22b   :  { %v1571_v27 = vpop.f32.mrf.mxu0 }
 0x22c   :  { %v1572_v63 = vadd.f32 %v1571_v27, %v1501_v0  ;;  %v9422_v30 = vadd.f32 %v1640_v43, %v1570_v26  ;;  %v1712_v43 = vadd.f32 %v6185_v15, %v781_v13  ;;  %v2062_v26 = vld [vmem:[%s10405_s2 + $0x410] sm:$0xff]  ;;  %v1967_v13 = vld [vmem:[%s10405_s2 + $0x118] sm:$0xff] }
 0x22d   :  { %v2151_v15 = vld [vmem:[%s10405_s2 + $0x6d8] sm:$0xff] }
 0x22e   :  { %v9424_v1 = vadd.f32 %v1642_v29, %v1572_v63  ;;  %v1929_v33 = vmax.f32 %v9422_v30, 0.0  ;;  %v2187_v29 = vld [vmem:[%s10405_s2 + $0x7f8] sm:$0xff]  ;;  %v2966_v30 = vld [vmem:[%s10406_s3 + $0x160] sm:$0xff] }
 0x230   :  { %v1930_v32 = vmax.f32 %v9424_v1, 0.0  ;;  %v2239_v1 = vld [vmem:[%s10405_s2 + $0x998] sm:$0xff] }
 0x232   :  { %2556 = vmatprep.mubr.f32.mxu1 %v1930_v32 }
 0x233   :  { %2557 = vmatmul.mubr.f32.vlgmr.msra.gmra.mxu1 %v1929_v33 }
 0x234   :  { %2706 = vmatpush1.msra.mxu1 %v2122_v10  ;;  %2769 = vmatprep.mubr.f32.mxu1 %v1928_v14  ;;  %v2107_v14 = vld [vmem:[%s10405_s2 + $0x578] sm:$0xff] }
 0x235   :  { %2707 = vmatprep.subr.mxu1 %v2119_v12  ;;  %v2183_v12 = vld [vmem:[%s10405_s2 + $0x7d8] sm:$0xff] }
 0x236   :  { %v6218_v42 = vpop.f32.mrf.mxu1  ;;  %2708 = vmatpush1.msra.mxu1 %v2118_v35  ;;  %v2182_v35 = vld [vmem:[%s10405_s2 + $0x7d0] sm:$0xff] }
 0x237   :  { %2709 = vmatprep.subr.mxu1 %v2115_v37  ;;  %v2179_v37 = vld [vmem:[%s10405_s2 + $0x7b8] sm:$0xff] }
 0x238   :  { %2710 = vmatpush1.msra.mxu1 %v2114_v39  ;;  %v6219_v46 = vpop.f32.mrf.mxu1  ;;  %v2178_v39 = vld [vmem:[%s10405_s2 + $0x7b0] sm:$0xff] }
 0x239   :  { %2711 = vmatprep.subr.mxu1 %v2111_v44  ;;  %v6220_v19 = vadd.f32 %v6219_v46, %v6218_v42  ;;  %v1994_v44 = vld [vmem:[%s10405_s2 + $0x1f0] sm:$0xff] }
 0x23a   :  { %2712 = vmatpush1.msra.mxu1 %v2110_v22  ;;  %v1991_v22 = vld [vmem:[%s10405_s2 + $0x1d8] sm:$0xff]  ;;  %v2174_v46 = vld [vmem:[%s10405_s2 + $0x790] sm:$0xff] }
 0x23b   :  { %2713 = vmatprep.subr.mxu1 %v2107_v14  ;;  %v1921_v61 = vpop.f32.mrf.mxu1  ;;  %v1782_v27 = vadd.f32 %v6220_v19, %v1712_v43  ;;  %v2175_v14 = vld [vmem:[%s10405_s2 + $0x798] sm:$0xff] }
 0x23c   :  { %2714 = vmatpush1.msra.mxu1 %v2106_v28  ;;  %v1990_v28 = vld [vmem:[%s10405_s2 + $0x1d0] sm:$0xff]  ;;  %v1963_v19 = vld [vmem:[%s10405_s2 + $0xf8] sm:$0xff] }
 0x23d   :  { %2715 = vmatprep.subr.mxu1 %v2103_v47  ;;  %v6443_v53 = vpop.f32.mrf.mxu1  ;;  %v1987_v47 = vld [vmem:[%s10405_s2 + $0x1b8] sm:$0xff] }
 0x23e   :  { %2716 = vmatpush1.msra.mxu1 %v2102_v48  ;;  %v2171_v48 = vld [vmem:[%s10405_s2 + $0x778] sm:$0xff] }
 0x23f   :  { %2717 = vmatprep.subr.mxu1 %v2099_v49  ;;  %v1986_v49 = vld [vmem:[%s10405_s2 + $0x1b0] sm:$0xff]  ;;  %v1979_v53 = vld [vmem:[%s10405_s2 + $0x178] sm:$0xff] }
 0x240   :  { %2718 = vmatpush1.msra.mxu1 %v2098_v51  ;;  %v1982_v51 = vld [vmem:[%s10405_s2 + $0x190] sm:$0xff]  ;;  %v1959_v43 = vld [vmem:[%s10405_s2 + $0xd8] sm:$0xff] }
 0x241   :  { %2719 = vmatprep.subr.mxu1 %v2095_v34  ;;  %v2166_v34 = vld [vmem:[%s10405_s2 + $0x750] sm:$0xff] }
 0x242   :  { %2720 = vmatpush1.msra.mxu1 %v2094_v41  ;;  %v2163_v41 = vld [vmem:[%s10405_s2 + $0x738] sm:$0xff] }
 0x243   :  { %2721 = vmatprep.subr.mxu1 %v2091_v54  ;;  %v1978_v54 = vld [vmem:[%s10405_s2 + $0x170] sm:$0xff] }
 0x244   :  { %2722 = vmatpush1.msra.mxu1 %v2090_v55  ;;  %v2162_v55 = vld [vmem:[%s10405_s2 + $0x730] sm:$0xff] }
 0x245   :  { %2723 = vmatprep.subr.mxu1 %v2087_v57  ;;  %v1975_v57 = vld [vmem:[%s10405_s2 + $0x158] sm:$0xff] }
 0x246   :  { %2724 = vmatpush1.msra.mxu1 %v2086_v59  ;;  %v2159_v59 = vld [vmem:[%s10405_s2 + $0x718] sm:$0xff] }
 0x247   :  { %2725 = vmatprep.subr.mxu1 %v2083_v62  ;;  %v1974_v62 = vld [vmem:[%s10405_s2 + $0x150] sm:$0xff] }
 0x248   :  { %2726 = vmatpush1.msra.mxu1 %v2082_v25  ;;  %v2158_v25 = vld [vmem:[%s10405_s2 + $0x710] sm:$0xff] }
 0x249   :  { %2727 = vmatprep.subr.mxu1 %v2079_v4  ;;  %v1971_v4 = vld [vmem:[%s10405_s2 + $0x138] sm:$0xff] }
 0x24a   :  { %2728 = vmatpush1.msra.mxu1 %v2078_v9  ;;  %v2155_v9 = vld [vmem:[%s10405_s2 + $0x6f8] sm:$0xff] }
 0x24b   :  { %2729 = vmatprep.subr.mxu1 %v2075_v11  ;;  %v1970_v11 = vld [vmem:[%s10405_s2 + $0x130] sm:$0xff] }
 0x24c   :  { %2730 = vmatpush1.msra.mxu1 %v2074_v60  ;;  %v6253_v23 = vpop.f32.mrf.mxu0  ;;  %v2154_v60 = vld [vmem:[%s10405_s2 + $0x6f0] sm:$0xff] }
 0x24d   :  { %2731 = vmatprep.subr.mxu1 %v2071_v16  ;;  %v1966_v16 = vld [vmem:[%s10405_s2 + $0x110] sm:$0xff] }
 0x24e   :  { %2732 = vmatpush1.msra.mxu1 %v2070_v18  ;;  %v6254_v0 = vpop.f32.mrf.mxu0  ;;  %v2150_v18 = vld [vmem:[%s10405_s2 + $0x6d0] sm:$0xff] }
 0x24f   :  { %2733 = vmatprep.subr.mxu1 %v2067_v21  ;;  %v6255_v63 = vadd.f32 %v6254_v0, %v6253_v23  ;;  %v2147_v21 = vld [vmem:[%s10405_s2 + $0x6b8] sm:$0xff]  ;;  %v1962_v23 = vld [vmem:[%s10405_s2 + $0xf0] sm:$0xff] }
 0x250   :  { %2734 = vmatpush1.msra.mxu1 %v2066_v7  ;;  %v2146_v7 = vld [vmem:[%s10405_s2 + $0x6b0] sm:$0xff] }
 0x251   :  { %2735 = vmatprep.subr.mxu1 %v2063_v24  ;;  %v1852_v10 = vadd.f32 %v6255_v63, %v1782_v27  ;;  %v2143_v24 = vld [vmem:[%s10405_s2 + $0x698] sm:$0xff]  ;;  %v1958_v0 = vld [vmem:[%s10405_s2 + $0xd0] sm:$0xff] }
 0x252   :  { %2736 = vmatpush1.msra.mxu1 %v2062_v26  ;;  %v2142_v26 = vld [vmem:[%s10405_s2 + $0x690] sm:$0xff]  ;;  %v1955_v27 = vld [vmem:[%s10405_s2 + $0xb8] sm:$0xff] }
 0x253   :  { %2737 = vmatprep.subr.mxu1 %v2187_v29  ;;  %v9544_v3 = vadd.f32 %v1921_v61, %v1852_v10  ;;  %v2170_v61 = vld [vmem:[%s10405_s2 + $0x770] sm:$0xff]  ;;  %v2139_v63 = vld [vmem:[%s10405_s2 + $0x678] sm:$0xff] }
 0x254   :  { %2738 = vmatpush2.msra.mxu1 %v2186_v31  ;;  %v1954_v29 = vld [vmem:[%s10405_s2 + $0xb0] sm:$0xff]  ;;  %v1951_v10 = vld [vmem:[%s10405_s2 + $0x98] sm:$0xff] }
 0x255   :  { %2739 = vmatprep.subr.mxu1 %v2183_v12  ;;  %v1931_v42 = vmax.f32 %v9544_v3, 0.0  ;;  %v2138_v31 = vld [vmem:[%s10405_s2 + $0x670] sm:$0xff]  ;;  %v2135_v12 = vld [vmem:[%s10405_s2 + $0x658] sm:$0xff] }
 0x256   :  { %2740 = vmatpush2.msra.mxu1 %v2182_v35  ;;  %v1950_v35 = vld [vmem:[%s10405_s2 + $0x90] sm:$0xff] }
 0x257   :  { %2741 = vmatprep.subr.mxu1 %v2179_v37  ;;  %6133 = vmatmul.mubr.msk.f32.vlgmr.msra.gmra.mxu0 %vm789_vm0, %v1931_v42  ;;  %v2134_v37 = vld [vmem:[%s10405_s2 + $0x650] sm:$0xff] }
 0x258   :  { %2742 = vmatpush2.msra.mxu1 %v2178_v39  ;;  %2635 = vmatpush1.msra.mxu0 %v1994_v44  ;;  %v1947_v39 = vld [vmem:[%s10405_s2 + $0x78] sm:$0xff]  ;;  %v2936_v3 = vld [vmem:[%s10406_s3 + $0x70] sm:$0xff] }
 0x259   :  { %2698 = vmatprep.mubr.f32.mxu0 %v1926_v45  ;;  %2636 = vmatprep.subr.mxu0 %v1991_v22  ;;  %v2167_v45 = vld [vmem:[%s10405_s2 + $0x758] sm:$0xff]  ;;  %v1946_v22 = vld [vmem:[%s10405_s2 + $0x70] sm:$0xff] }
 0x25a   :  { %2743 = vmatprep.subr.mxu1 %v2175_v14  ;;  %2637 = vmatpush1.msra.mxu0 %v1990_v28  ;;  %v2131_v44 = vld [vmem:[%s10405_s2 + $0x638] sm:$0xff]  ;;  %v2130_v14 = vld [vmem:[%s10405_s2 + $0x630] sm:$0xff] }
 0x25b   :  { %2744 = vmatpush2.msra.mxu1 %v2174_v46  ;;  %2638 = vmatprep.subr.mxu0 %v1987_v47  ;;  %v1943_v28 = vld [vmem:[%s10405_s2 + $0x58] sm:$0xff]  ;;  %v1942_v47 = vld [vmem:[%s10405_s2 + $0x50] sm:$0xff] }
 0x25c   :  { %2745 = vmatprep.subr.mxu1 %v2171_v48  ;;  %2639 = vmatpush1.msra.mxu0 %v1986_v49  ;;  %v2127_v46 = vld [vmem:[%s10405_s2 + $0x618] sm:$0xff]  ;;  %v2126_v48 = vld [vmem:[%s10405_s2 + $0x610] sm:$0xff] }
 0x25d   :  { %2746 = vmatpush2.msra.mxu1 %v2170_v61  ;;  %2640 = vmatprep.subr.mxu0 %v1983_v36  ;;  %v1939_v49 = vld [vmem:[%s10405_s2 + $0x38] sm:$0xff]  ;;  %v1938_v61 = vld [vmem:[%s10405_s2 + $0x30] sm:$0xff] }
 0x25e   :  { %2747 = vmatprep.subr.mxu1 %v2167_v45  ;;  %2641 = vmatpush1.msra.mxu0 %v1982_v51  ;;  %v2323_v36 = vld [vmem:[%s10405_s2 + $0xc38] sm:$0xff]  ;;  %v2322_v51 = vld [vmem:[%s10405_s2 + $0xc30] sm:$0xff] }
 0x25f   :  { %2748 = vmatpush2.msra.mxu1 %v2166_v34  ;;  %2642 = vmatprep.subr.mxu0 %v1979_v53  ;;  %v1935_v45 = vld [vmem:[%s10405_s2 + $0x18] sm:$0xff]  ;;  %v1934_v34 = vld [vmem:[%s10405_s2 + $0x10] sm:$0xff] }
 0x260   :  { %2749 = vmatprep.subr.mxu1 %v2163_v41  ;;  %2643 = vmatpush1.msra.mxu0 %v1978_v54  ;;  %v2319_v53 = vld [vmem:[%s10405_s2 + $0xc18] sm:$0xff]  ;;  %v2318_v54 = vld [vmem:[%s10405_s2 + $0xc10] sm:$0xff] }
 0x261   :  { %2750 = vmatpush2.msra.mxu1 %v2162_v55  ;;  %2644 = vmatprep.subr.mxu0 %v1975_v57  ;;  %v2059_v41 = vld [vmem:[%s10405_s2 + $0x3f8] sm:$0xff]  ;;  %v2054_v55 = vld [vmem:[%s10405_s2 + $0x3d0] sm:$0xff] }
 0x262   :  { %2751 = vmatprep.subr.mxu1 %v2159_v59  ;;  %2645 = vmatpush1.msra.mxu0 %v1974_v62  ;;  %v2953_v57 = vld [vmem:[%s10406_s3 + $0xf8] sm:$0xff] }
 0x263   :  { %2752 = vmatpush2.msra.mxu1 %v2158_v25  ;;  %2646 = vmatprep.subr.mxu0 %v1971_v4  ;;  %v2051_v59 = vld [vmem:[%s10405_s2 + $0x3b8] sm:$0xff]  ;;  %v2050_v25 = vld [vmem:[%s10405_s2 + $0x3b0] sm:$0xff] }
 0x264   :  { %2753 = vmatprep.subr.mxu1 %v2155_v9  ;;  %2647 = vmatpush1.msra.mxu0 %v1970_v11  ;;  %v2937_v62 = vld [vmem:[%s10406_s3 + $0x78] sm:$0xff]  ;;  %v2952_v4 = vld [vmem:[%s10406_s3 + $0xf0] sm:$0xff]  ;;  %v2951_v11 = vld [vmem:[%s10406_s3 + $0xe8] sm:$0xff] }
 0x265   :  { %2754 = vmatpush2.msra.mxu1 %v2154_v60  ;;  %2648 = vmatprep.subr.mxu0 %v1967_v13  ;;  %v2047_v9 = vld [vmem:[%s10405_s2 + $0x398] sm:$0xff]  ;;  %v2935_v13 = vld [vmem:[%s10406_s3 + $0x68] sm:$0xff] }
 0x266   :  { %2755 = vmatprep.subr.mxu1 %v2151_v15  ;;  %2649 = vmatpush1.msra.mxu0 %v1966_v16  ;;  %v2043_v60 = vld [vmem:[%s10405_s2 + $0x378] sm:$0xff]  ;;  %v2042_v15 = vld [vmem:[%s10405_s2 + $0x370] sm:$0xff]  ;;  %v2950_v16 = vld [vmem:[%s10406_s3 + $0xe0] sm:$0xff] }
 0x267   :  { %2756 = vmatpush2.msra.mxu1 %v2150_v18  ;;  %2650 = vmatprep.subr.mxu0 %v1963_v19  ;;  %v2039_v18 = vld [vmem:[%s10405_s2 + $0x358] sm:$0xff]  ;;  %v2934_v19 = vld [vmem:[%s10406_s3 + $0x60] sm:$0xff] }
 0x268   :  { %2757 = vmatprep.subr.mxu1 %v2147_v21  ;;  %2651 = vmatpush1.msra.mxu0 %v1962_v23  ;;  %v2038_v21 = vld [vmem:[%s10405_s2 + $0x350] sm:$0xff]  ;;  %v2949_v23 = vld [vmem:[%s10406_s3 + $0xd8] sm:$0xff] }
 0x269   :  { %2758 = vmatpush2.msra.mxu1 %v2146_v7  ;;  %2652 = vmatprep.subr.mxu0 %v1959_v43  ;;  %v2035_v7 = vld [vmem:[%s10405_s2 + $0x338] sm:$0xff] }
 0x26a   :  { %2759 = vmatprep.subr.mxu1 %v2143_v24  ;;  %2653 = vmatpush1.msra.mxu0 %v1958_v0  ;;  %v2933_v43 = vld [vmem:[%s10406_s3 + $0x58] sm:$0xff]  ;;  %v2034_v24 = vld [vmem:[%s10405_s2 + $0x330] sm:$0xff] }
 0x26b   :  { %2760 = vmatpush2.msra.mxu1 %v2142_v26  ;;  %2654 = vmatprep.subr.mxu0 %v1955_v27  ;;  %v2948_v0 = vld [vmem:[%s10406_s3 + $0xd0] sm:$0xff]  ;;  %v2031_v26 = vld [vmem:[%s10405_s2 + $0x318] sm:$0xff] }
 0x26c   :  { %2761 = vmatprep.subr.mxu1 %v2139_v63  ;;  %2655 = vmatpush1.msra.mxu0 %v1954_v29  ;;  %v2932_v27 = vld [vmem:[%s10406_s3 + $0x50] sm:$0xff]  ;;  %v2947_v29 = vld [vmem:[%s10406_s3 + $0xc8] sm:$0xff] }
 0x26d   :  { %2762 = vmatpush2.msra.mxu1 %v2138_v31  ;;  %2656 = vmatprep.subr.mxu0 %v1951_v10  ;;  %v2030_v63 = vld [vmem:[%s10405_s2 + $0x310] sm:$0xff]  ;;  %v2027_v31 = vld [vmem:[%s10405_s2 + $0x2f8] sm:$0xff]  ;;  %v2931_v10 = vld [vmem:[%s10406_s3 + $0x48] sm:$0xff] }
 0x26e   :  { %2763 = vmatprep.subr.mxu1 %v2135_v12  ;;  %2657 = vmatpush1.msra.mxu0 %v1950_v35  ;;  %v2026_v12 = vld [vmem:[%s10405_s2 + $0x2f0] sm:$0xff]  ;;  %v2946_v35 = vld [vmem:[%s10406_s3 + $0xc0] sm:$0xff] }
 0x26f   :  { %2764 = vmatpush2.msra.mxu1 %v2134_v37  ;;  %2658 = vmatprep.subr.mxu0 %v1947_v39  ;;  %v2023_v37 = vld [vmem:[%s10405_s2 + $0x2d8] sm:$0xff]  ;;  %v2930_v39 = vld [vmem:[%s10406_s3 + $0x40] sm:$0xff] }
 0x270   :  { %2765 = vmatprep.subr.mxu1 %v2131_v44  ;;  %2659 = vmatpush1.msra.mxu0 %v1946_v22  ;;  %v2022_v44 = vld [vmem:[%s10405_s2 + $0x2d0] sm:$0xff]  ;;  %v2945_v22 = vld [vmem:[%s10406_s3 + $0xb8] sm:$0xff] }
 0x271   :  { %2766 = vmatpush2.msra.mxu1 %v2130_v14  ;;  %2660 = vmatprep.subr.mxu0 %v1943_v28  ;;  %v2019_v14 = vld [vmem:[%s10405_s2 + $0x2b8] sm:$0xff] }
 0x272   :  { %2767 = vmatprep.subr.mxu1 %v2127_v46  ;;  %2661 = vmatpush1.msra.mxu0 %v1942_v47  ;;  %v2929_v28 = vld [vmem:[%s10406_s3 + $0x38] sm:$0xff]  ;;  %v2018_v46 = vld [vmem:[%s10405_s2 + $0x2b0] sm:$0xff] }
 0x273   :  { %2768 = vmatpush2.msra.mxu1 %v2126_v48  ;;  %2662 = vmatprep.subr.mxu0 %v1939_v49  ;;  %v2944_v47 = vld [vmem:[%s10406_s3 + $0xb0] sm:$0xff]  ;;  %v2015_v48 = vld [vmem:[%s10405_s2 + $0x298] sm:$0xff] }
 0x274   :  { %2770 = vmatmul.mubr.f32.vlgmr.msra.gmra.mxu1 %v1927_v58  ;;  %2663 = vmatpush1.msra.mxu0 %v1938_v61  ;;  %v2055_v58 = vld [vmem:[%s10405_s2 + $0x3d8] sm:$0xff]  ;;  %v2928_v49 = vld [vmem:[%s10406_s3 + $0x30] sm:$0xff] }
 0x275   :  { %2875 = vmatprep.subr.mxu1 %v2323_v36  ;;  %2664 = vmatprep.subr.mxu0 %v1935_v45  ;;  %v2014_v61 = vld [vmem:[%s10405_s2 + $0x290] sm:$0xff]  ;;  %v2943_v36 = vld [vmem:[%s10406_s3 + $0xa8] sm:$0xff]  ;;  %v2011_v45 = vld [vmem:[%s10405_s2 + $0x278] sm:$0xff] }
 0x276   :  { %2876 = vmatpush1.msra.mxu1 %v2322_v51  ;;  %2665 = vmatpush1.msra.mxu0 %v1934_v34  ;;  %v2927_v51 = vld [vmem:[%s10406_s3 + $0x28] sm:$0xff]  ;;  %v2010_v34 = vld [vmem:[%s10405_s2 + $0x270] sm:$0xff] }
 0x277   :  { %2877 = vmatprep.subr.mxu1 %v2319_v53  ;;  %2666 = vmatprep.subr.mxu0 %v2059_v41  ;;  %v2942_v53 = vld [vmem:[%s10406_s3 + $0xa0] sm:$0xff]  ;;  %v2007_v41 = vld [vmem:[%s10405_s2 + $0x258] sm:$0xff] }
 0x278   :  { %2878 = vmatpush1.msra.mxu1 %v2318_v54  ;;  %2667 = vmatpush2.msra.mxu0 %v2058_v50  ;;  %v2926_v54 = vld [vmem:[%s10406_s3 + $0x20] sm:$0xff]  ;;  %v2006_v50 = vld [vmem:[%s10405_s2 + $0x250] sm:$0xff] }
 0x279   :  { %2911 = vmatprep.mubr.f32.mxu1 %v6529_v17  ;;  %2668 = vmatprep.subr.mxu0 %v2055_v58  ;;  %v2003_v58 = vld [vmem:[%s10405_s2 + $0x238] sm:$0xff] }
 0x27a   :  { %6134 = vmatmul.mubr.msk.f32.vlgmr.msra.gmra.mxu1 %vm789_vm0, %v1931_v42  ;;  %2669 = vmatpush2.msra.mxu0 %v2054_v55  ;;  %v2046_v42 = vld [vmem:[%s10405_s2 + $0x390] sm:$0xff] }
 0x27b   :  { %6259 = vmatprep.subr.mxu1 %v2953_v57  ;;  %2670 = vmatprep.subr.mxu0 %v2051_v59  ;;  %v2002_v55 = vld [vmem:[%s10405_s2 + $0x230] sm:$0xff]  ;;  %v1999_v57 = vld [vmem:[%s10405_s2 + $0x218] sm:$0xff] }
 0x27c   :  { %6260 = vmatpush3.msra.mxu1 %v2937_v62  ;;  %2671 = vmatpush2.msra.mxu0 %v2050_v25  ;;  %v1998_v59 = vld [vmem:[%s10405_s2 + $0x210] sm:$0xff]  ;;  %v2251_v62 = vld [vmem:[%s10405_s2 + $0x9f8] sm:$0xff] }
 0x27d   :  { %6261 = vmatprep.subr.mxu1 %v2952_v4  ;;  %2672 = vmatprep.subr.mxu0 %v2047_v9  ;;  %v2250_v25 = vld [vmem:[%s10405_s2 + $0x9f0] sm:$0xff]  ;;  %v2247_v4 = vld [vmem:[%s10405_s2 + $0x9d8] sm:$0xff] }
 0x27e   :  { %6262 = vmatpush3.msra.mxu1 %v2936_v3  ;;  %2673 = vmatpush2.msra.mxu0 %v2046_v42  ;;  %v2246_v9 = vld [vmem:[%s10405_s2 + $0x9d0] sm:$0xff]  ;;  %v2941_v3 = vld [vmem:[%s10406_s3 + $0x98] sm:$0xff] }
 0x27f   :  { %6263 = vmatprep.subr.mxu1 %v2951_v11  ;;  %2674 = vmatprep.subr.mxu0 %v2043_v60  ;;  %v2243_v42 = vld [vmem:[%s10405_s2 + $0x9b8] sm:$0xff]  ;;  %v2940_v11 = vld [vmem:[%s10406_s3 + $0x90] sm:$0xff] }
 0x280   :  { %6264 = vmatpush3.msra.mxu1 %v2935_v13  ;;  %2675 = vmatpush2.msra.mxu0 %v2042_v15  ;;  %v2238_v60 = vld [vmem:[%s10405_s2 + $0x990] sm:$0xff]  ;;  %v2939_v13 = vld [vmem:[%s10406_s3 + $0x88] sm:$0xff]  ;;  %v2235_v15 = vld [vmem:[%s10405_s2 + $0x978] sm:$0xff] }
 0x281   :  { %6265 = vmatprep.subr.mxu1 %v2950_v16  ;;  %2676 = vmatprep.subr.mxu0 %v2039_v18  ;;  %v2923_v16 = vld [vmem:[%s10406_s3 + $0x8] sm:$0xff]  ;;  %v2938_v18 = vld [vmem:[%s10406_s3 + $0x80] sm:$0xff] }
 0x282   :  { %6266 = vmatpush3.msra.mxu1 %v2934_v19  ;;  %2677 = vmatpush2.msra.mxu0 %v2038_v21  ;;  %v2234_v19 = vld [vmem:[%s10405_s2 + $0x970] sm:$0xff]  ;;  %v2922_v21 = vld [vmem:[%s10406_s3] sm:$0xff] }
 0x283   :  { %6267 = vmatprep.subr.mxu1 %v2949_v23  ;;  %2678 = vmatprep.subr.mxu0 %v2035_v7  ;;  %v2231_v23 = vld [vmem:[%s10405_s2 + $0x958] sm:$0xff]  ;;  %v2230_v7 = vld [vmem:[%s10405_s2 + $0x950] sm:$0xff] }
 0x284   :  { %6268 = vmatpush3.msra.mxu1 %v2933_v43  ;;  %2679 = vmatpush2.msra.mxu0 %v2034_v24  ;;  %v2227_v43 = vld [vmem:[%s10405_s2 + $0x938] sm:$0xff]  ;;  %v2226_v24 = vld [vmem:[%s10405_s2 + $0x930] sm:$0xff] }
 0x285   :  { %6269 = vmatprep.subr.mxu1 %v2948_v0  ;;  %2680 = vmatprep.subr.mxu0 %v2031_v26  ;;  %v2223_v0 = vld [vmem:[%s10405_s2 + $0x918] sm:$0xff]  ;;  %v2222_v26 = vld [vmem:[%s10405_s2 + $0x910] sm:$0xff] }
 0x286   :  { %6270 = vmatpush3.msra.mxu1 %v2932_v27  ;;  %2681 = vmatpush2.msra.mxu0 %v2030_v63  ;;  %v2219_v27 = vld [vmem:[%s10405_s2 + $0x8f8] sm:$0xff]  ;;  %v2218_v63 = vld [vmem:[%s10405_s2 + $0x8f0] sm:$0xff] }
 0x287   :  { %6271 = vmatprep.subr.mxu1 %v2947_v29  ;;  %2682 = vmatprep.subr.mxu0 %v2027_v31  ;;  %v2215_v29 = vld [vmem:[%s10405_s2 + $0x8d8] sm:$0xff]  ;;  %v2214_v31 = vld [vmem:[%s10405_s2 + $0x8d0] sm:$0xff] }
 0x288   :  { %6272 = vmatpush3.msra.mxu1 %v2931_v10  ;;  %2683 = vmatpush2.msra.mxu0 %v2026_v12  ;;  %v2211_v10 = vld [vmem:[%s10405_s2 + $0x8b8] sm:$0xff]  ;;  %v2210_v12 = vld [vmem:[%s10405_s2 + $0x8b0] sm:$0xff] }
 0x289   :  { %6273 = vmatprep.subr.mxu1 %v2946_v35  ;;  %2684 = vmatprep.subr.mxu0 %v2023_v37  ;;  %v2207_v35 = vld [vmem:[%s10405_s2 + $0x898] sm:$0xff]  ;;  %v2206_v37 = vld [vmem:[%s10405_s2 + $0x890] sm:$0xff] }
 0x28a   :  { %6274 = vmatpush3.msra.mxu1 %v2930_v39  ;;  %2685 = vmatpush2.msra.mxu0 %v2022_v44  ;;  %v2203_v39 = vld [vmem:[%s10405_s2 + $0x878] sm:$0xff]  ;;  %v2202_v44 = vld [vmem:[%s10405_s2 + $0x870] sm:$0xff] }
 0x28b   :  { %6275 = vmatprep.subr.mxu1 %v2945_v22  ;;  %2686 = vmatprep.subr.mxu0 %v2019_v14  ;;  %v2199_v22 = vld [vmem:[%s10405_s2 + $0x858] sm:$0xff]  ;;  %v2198_v14 = vld [vmem:[%s10405_s2 + $0x850] sm:$0xff] }
 0x28c   :  { %6276 = vmatpush3.msra.mxu1 %v2929_v28  ;;  %2687 = vmatpush2.msra.mxu0 %v2018_v46  ;;  %v2195_v28 = vld [vmem:[%s10405_s2 + $0x838] sm:$0xff]  ;;  %v2194_v46 = vld [vmem:[%s10405_s2 + $0x830] sm:$0xff] }
 0x28d   :  { %6277 = vmatprep.subr.mxu1 %v2944_v47  ;;  %2688 = vmatprep.subr.mxu0 %v2015_v48  ;;  %v2191_v47 = vld [vmem:[%s10405_s2 + $0x818] sm:$0xff]  ;;  %v2190_v48 = vld [vmem:[%s10405_s2 + $0x810] sm:$0xff] }
 0x28e   :  { %6278 = vmatpush3.msra.mxu1 %v2928_v49  ;;  %2689 = vmatpush2.msra.mxu0 %v2014_v61  ;;  %v2315_v49 = vld [vmem:[%s10405_s2 + $0xbf8] sm:$0xff]  ;;  %v2314_v61 = vld [vmem:[%s10405_s2 + $0xbf0] sm:$0xff] }
 0x28f   :  { %6279 = vmatprep.subr.mxu1 %v2943_v36  ;;  %2690 = vmatprep.subr.mxu0 %v2011_v45  ;;  %v2311_v36 = vld [vmem:[%s10405_s2 + $0xbd8] sm:$0xff]  ;;  %v2310_v45 = vld [vmem:[%s10405_s2 + $0xbd0] sm:$0xff] }
 0x290   :  { %6280 = vmatpush3.msra.mxu1 %v2927_v51  ;;  %2691 = vmatpush2.msra.mxu0 %v2010_v34  ;;  %v2307_v51 = vld [vmem:[%s10405_s2 + $0xbb8] sm:$0xff]  ;;  %v2306_v34 = vld [vmem:[%s10405_s2 + $0xbb0] sm:$0xff] }
 0x291   :  { %6281 = vmatprep.subr.mxu1 %v2942_v53  ;;  %2692 = vmatprep.subr.mxu0 %v2007_v41  ;;  %v2303_v53 = vld [vmem:[%s10405_s2 + $0xb98] sm:$0xff]  ;;  %v2302_v41 = vld [vmem:[%s10405_s2 + $0xb90] sm:$0xff] }
 0x292   :  { %6282 = vmatpush3.msra.mxu1 %v2926_v54  ;;  %2693 = vmatpush2.msra.mxu0 %v2006_v50  ;;  %v2299_v54 = vld [vmem:[%s10405_s2 + $0xb78] sm:$0xff]  ;;  %v2298_v50 = vld [vmem:[%s10405_s2 + $0xb70] sm:$0xff] }
 0x293   :  { %2694 = vmatprep.subr.mxu0 %v2003_v58  ;;  %6283 = vmatprep.subr.mxu1 %v2941_v3  ;;  %v2295_v58 = vld [vmem:[%s10405_s2 + $0xb58] sm:$0xff] }
 0x294   :  { %2695 = vmatpush2.msra.mxu0 %v2002_v55  ;;  %6284 = vmatpush3.msra.mxu1 %v2925_v52  ;;  %v2294_v55 = vld [vmem:[%s10405_s2 + $0xb50] sm:$0xff]  ;;  %v2279_v3 = vld [vmem:[%s10405_s2 + $0xad8] sm:$0xff] }
 0x295   :  { %2696 = vmatprep.subr.mxu0 %v1999_v57  ;;  %6285 = vmatprep.subr.mxu1 %v2940_v11  ;;  %v2291_v57 = vld [vmem:[%s10405_s2 + $0xb38] sm:$0xff] }
 0x296   :  { %2697 = vmatpush2.msra.mxu0 %v1998_v59  ;;  %v2290_v59 = vld [vmem:[%s10405_s2 + $0xb30] sm:$0xff]  ;;  %v2275_v52 = vld [vmem:[%s10405_s2 + $0xab8] sm:$0xff] }
 0x297   :  { %2699 = vmatmul.mubr.f32.vlgmr.msra.gmra.mxu0 %v1925_v40  ;;  %2776 = vmatprep.subr.mxu0 %v2251_v62  ;;  %v2242_v40 = vld [vmem:[%s10405_s2 + $0x9b0] sm:$0xff]  ;;  %v2287_v62 = vld [vmem:[%s10405_s2 + $0xb18] sm:$0xff] }
 0x298   :  { %2777 = vmatpush1.msra.mxu0 %v2250_v25  ;;  %2840 = vmatprep.mubr.f32.mxu0 %v1930_v32  ;;  %v2924_v32 = vld [vmem:[%s10406_s3 + $0x10] sm:$0xff]  ;;  %v2271_v11 = vld [vmem:[%s10405_s2 + $0xa98] sm:$0xff] }
 0x299   :  { %2778 = vmatprep.subr.mxu0 %v2247_v4  ;;  %6286 = vmatpush3.msra.mxu1 %v2924_v32  ;;  %v2286_v25 = vld [vmem:[%s10405_s2 + $0xb10] sm:$0xff]  ;;  %v2283_v4 = vld [vmem:[%s10405_s2 + $0xaf8] sm:$0xff] }
 0x29a   :  { %2779 = vmatpush1.msra.mxu0 %v2246_v9  ;;  %6287 = vmatprep.subr.mxu1 %v2939_v13  ;;  %v2282_v9 = vld [vmem:[%s10405_s2 + $0xaf0] sm:$0xff]  ;;  %v2267_v32 = vld [vmem:[%s10405_s2 + $0xa78] sm:$0xff] }
 0x29b   :  { %2780 = vmatprep.subr.mxu0 %v2243_v42  ;;  %6288 = vmatpush3.msra.mxu1 %v2923_v16  ;;  %v2278_v42 = vld [vmem:[%s10405_s2 + $0xad0] sm:$0xff]  ;;  %v2263_v13 = vld [vmem:[%s10405_s2 + $0xa58] sm:$0xff] }
 0x29c   :  { %2781 = vmatpush1.msra.mxu0 %v2242_v40  ;;  %6289 = vmatprep.subr.mxu1 %v2938_v18  ;;  %v2274_v40 = vld [vmem:[%s10405_s2 + $0xab0] sm:$0xff]  ;;  %v2259_v16 = vld [vmem:[%s10405_s2 + $0xa38] sm:$0xff] }
 0x29d   :  { %2782 = vmatprep.subr.mxu0 %v2239_v1  ;;  %6290 = vmatpush3.msra.mxu1 %v2922_v21  ;;  %v2270_v1 = vld [vmem:[%s10405_s2 + $0xa90] sm:$0xff] }
 0x29e   :  { %2783 = vmatpush1.msra.mxu0 %v2238_v60  ;;  %v2266_v60 = vld [vmem:[%s10405_s2 + $0xa70] sm:$0xff] }
 0x29f   :  { %2784 = vmatprep.subr.mxu0 %v2235_v15  ;;  %v2262_v15 = vld [vmem:[%s10405_s2 + $0xa50] sm:$0xff] }
 0x2a0   :  { %2785 = vmatpush1.msra.mxu0 %v2234_v19  ;;  %v2258_v18 = vld [vmem:[%s10405_s2 + $0xa30] sm:$0xff]  ;;  %v2255_v19 = vld [vmem:[%s10405_s2 + $0xa18] sm:$0xff] }
 0x2a1   :  { %2786 = vmatprep.subr.mxu0 %v2231_v23  ;;  %v2254_v21 = vld [vmem:[%s10405_s2 + $0xa10] sm:$0xff]  ;;  %v2969_v23 = vld [vmem:[%s10406_s3 + $0x178] sm:$0xff] }
 0x2a2   :  { %2787 = vmatpush1.msra.mxu0 %v2230_v7  ;;  %v2968_v7 = vld [vmem:[%s10406_s3 + $0x170] sm:$0xff] }
 0x2a3   :  { %2788 = vmatprep.subr.mxu0 %v2227_v43  ;;  %v2967_v43 = vld [vmem:[%s10406_s3 + $0x168] sm:$0xff] }
 0x2a4   :  { %2789 = vmatpush1.msra.mxu0 %v2226_v24  ;;  %v2964_v24 = vld [vmem:[%s10406_s3 + $0x150] sm:$0xff] }
 0x2a5   :  { %2790 = vmatprep.subr.mxu0 %v2223_v0  ;;  %v2963_v0 = vld [vmem:[%s10406_s3 + $0x148] sm:$0xff] }
 0x2a6   :  { %2791 = vmatpush1.msra.mxu0 %v2222_v26  ;;  %v2962_v26 = vld [vmem:[%s10406_s3 + $0x140] sm:$0xff] }
 0x2a7   :  { %2792 = vmatprep.subr.mxu0 %v2219_v27  ;;  %v2961_v27 = vld [vmem:[%s10406_s3 + $0x138] sm:$0xff] }
 0x2a8   :  { %2793 = vmatpush1.msra.mxu0 %v2218_v63  ;;  %v2960_v63 = vld [vmem:[%s10406_s3 + $0x130] sm:$0xff] }
 0x2a9   :  { %2794 = vmatprep.subr.mxu0 %v2215_v29  ;;  %v2959_v29 = vld [vmem:[%s10406_s3 + $0x128] sm:$0xff] }
 0x2aa   :  { %2795 = vmatpush1.msra.mxu0 %v2214_v31  ;;  %v2958_v31 = vld [vmem:[%s10406_s3 + $0x120] sm:$0xff] }
 0x2ab   :  { %2796 = vmatprep.subr.mxu0 %v2211_v10  ;;  %v2416_v10 = vpop.f32.mrf.mxu1 }
 0x2ac   :  { %2797 = vmatpush1.msra.mxu0 %v2210_v12  ;;  %v6132_v12 = vld [vmem:[%s10410_s7 + $0x1] ss:$8 sm:$0xf] }
 0x2ad   :  { %2798 = vmatprep.subr.mxu0 %v2207_v35  ;;  %v2330_v35 = vrot.slane %v6132_v12, %v8122_v8 }
 0x2ae   :  { %2799 = vmatpush1.msra.mxu0 %v2206_v37  ;;  %v2418_v37 = vpop.f32.mrf.mxu1 }
 0x2af   :  { %2800 = vmatprep.subr.mxu0 %v2203_v39  ;;  %v2487_v39 = vpop.f32.mrf.mxu0 }
 0x2b0   :  { %2801 = vmatpush1.msra.mxu0 %v2202_v44  ;;  %v2334_v44 = vrot.slane %v6132_v12, %v8602_v56 }
 0x2b1   :  { %2802 = vmatprep.subr.mxu0 %v2199_v22 }
 0x2b2   :  { %2803 = vmatpush1.msra.mxu0 %v2198_v14  ;;  %v2417_v14 = vadd.f32 %v2416_v10, %v2330_v35  ;;  %v3596_v10 = vld [vmem:[#allocation2 + $0x9a0] sm:$0xff]  ;;  %v3589_v35 = vld [vmem:[#allocation2 + $0x968] sm:$0xff] }
 0x2b3   :  { %2804 = vmatprep.subr.mxu0 %v2195_v28  ;;  %v2489_v28 = vpop.f32.mrf.mxu0 }
 0x2b4   :  { %2805 = vmatpush1.msra.mxu0 %v2194_v46  ;;  %v2419_v46 = vadd.f32 %v2418_v37, %v2334_v44  ;;  %v3583_v37 = vld [vmem:[#allocation2 + $0x938] sm:$0xff]  ;;  %v3576_v44 = vld [vmem:[#allocation2 + $0x900] sm:$0xff] }
 0x2b5   :  { %2806 = vmatprep.subr.mxu0 %v2191_v47  ;;  %v2488_v47 = vadd.f32 %v2487_v39, %v2417_v14  ;;  %v3582_v39 = vld [vmem:[#allocation2 + $0x930] sm:$0xff]  ;;  %v3569_v14 = vld [vmem:[#allocation2 + $0x8c8] sm:$0xff] }
 0x2b6   :  { %2807 = vmatpush1.msra.mxu0 %v2190_v48 }
 0x2b7   :  { %2808 = vmatprep.subr.mxu0 %v2315_v49  ;;  %v2490_v49 = vadd.f32 %v2489_v28, %v2419_v46  ;;  %v3568_v28 = vld [vmem:[#allocation2 + $0x8c0] sm:$0xff]  ;;  %v3562_v46 = vld [vmem:[#allocation2 + $0x890] sm:$0xff] }
 0x2b8   :  { %2809 = vmatpush2.msra.mxu0 %v2314_v61 }
 0x2b9   :  { %2810 = vmatprep.subr.mxu0 %v2311_v36 }
 0x2ba   :  { %2811 = vmatpush2.msra.mxu0 %v2310_v45  ;;  %v2957_v45 = vld [vmem:[%s10406_s3 + $0x118] sm:$0xff] }
 0x2bb   :  { %2812 = vmatprep.subr.mxu0 %v2307_v51 }
 0x2bc   :  { %2813 = vmatpush2.msra.mxu0 %v2306_v34 }
 0x2bd   :  { %2814 = vmatprep.subr.mxu0 %v2303_v53 }
 0x2be   :  { %2815 = vmatpush2.msra.mxu0 %v2302_v41  ;;  %v2956_v41 = vld [vmem:[%s10406_s3 + $0x110] sm:$0xff] }
 0x2bf   :  { %2816 = vmatprep.subr.mxu0 %v2299_v54 }
 0x2c0   :  { %2817 = vmatpush2.msra.mxu0 %v2298_v50  ;;  %v2955_v50 = vld [vmem:[%s10406_s3 + $0x108] sm:$0xff] }
 0x2c1   :  { %2818 = vmatprep.subr.mxu0 %v2295_v58 }
 0x2c2   :  { %2819 = vmatpush2.msra.mxu0 %v2294_v55 }
 0x2c3   :  { %2820 = vmatprep.subr.mxu0 %v2291_v57  ;;  %v2954_v57 = vld [vmem:[%s10406_s3 + $0x100] sm:$0xff] }
 0x2c4   :  { %2821 = vmatpush2.msra.mxu0 %v2290_v59  ;;  %v2970_v59 = vld [vmem:[%s10406_s3 + $0x180] sm:$0xff] }
 0x2c5   :  { %2822 = vmatprep.subr.mxu0 %v2287_v62  ;;  %v3117_v62 = vld [vmem:[%s10407_s4 + $0x8] sm:$0xff] }
 0x2c6   :  { %2823 = vmatpush2.msra.mxu0 %v2286_v25  ;;  %v3116_v25 = vld [vmem:[%s10407_s4] sm:$0xff]  ;;  %3176 = vmatprep.subr.mxu1 %v3117_v62 }
 0x2c7   :  { %2824 = vmatprep.subr.mxu0 %v2283_v4 }
 0x2c8   :  { %2825 = vmatpush2.msra.mxu0 %v2282_v9  ;;  %v2338_v9 = vrot.slane %v6132_v12, %v9132_v38 }
 0x2c9   :  { %2826 = vmatprep.subr.mxu0 %v2279_v3 }
 0x2ca   :  { %2827 = vmatpush2.msra.mxu0 %v2278_v42  ;;  %v2342_v42 = vrot.slane %v6132_v12, %v9004_v20  ;;  %v3590_v12 = vld [vmem:[#allocation2 + $0x970] sm:$0xff] }
 0x2cb   :  { %2828 = vmatprep.subr.mxu0 %v2275_v52 }
 0x2cc   :  { %2829 = vmatpush2.msra.mxu0 %v2274_v40 }
 0x2cd   :  { %2830 = vmatprep.subr.mxu0 %v2271_v11 }
 0x2ce   :  { %2831 = vmatpush2.msra.mxu0 %v2270_v1 }
 0x2cf   :  { %2832 = vmatprep.subr.mxu0 %v2267_v32 }
 0x2d0   :  { %2833 = vmatpush2.msra.mxu0 %v2266_v60 }
 0x2d1   :  { %2834 = vmatprep.subr.mxu0 %v2263_v13 }
 0x2d2   :  { %2835 = vmatpush2.msra.mxu0 %v2262_v15 }
 0x2d3   :  { %2836 = vmatprep.subr.mxu0 %v2259_v16 }
 0x2d4   :  { %2837 = vmatpush2.msra.mxu0 %v2258_v18 }
 0x2d5   :  { %2838 = vmatprep.subr.mxu0 %v2255_v19 }
 0x2d6   :  { %2839 = vmatpush2.msra.mxu0 %v2254_v21 }
 0x2d7   :  { %2841 = vmatmul.mubr.f32.vlgmr.msra.gmra.mxu0 %v1929_v33  ;;  %3046 = vmatprep.subr.mxu0 %v6529_v17  ;;  %v2965_v33 = vld [vmem:[%s10406_s3 + $0x158] sm:$0xff] }
 0x2d8   :  { %3047 = vmatpush1.msra.mxu0 %v2969_v23 }
 0x2d9   :  { %3048 = vmatprep.subr.mxu0 %v6529_v17 }
 0x2da   :  { %3049 = vmatpush1.msra.mxu0 %v2968_v7 }
 0x2db   :  { %3050 = vmatprep.subr.mxu0 %v6529_v17 }
 0x2dc   :  { %3051 = vmatpush1.msra.mxu0 %v2967_v43 }
 0x2dd   :  { %3052 = vmatprep.subr.mxu0 %v6529_v17 }
 0x2de   :  { %3053 = vmatpush1.msra.mxu0 %v2966_v30 }
 0x2df   :  { %3054 = vmatprep.subr.mxu0 %v6529_v17 }
 0x2e0   :  { %3055 = vmatpush1.msra.mxu0 %v2965_v33  ;;  %v3119_v33 = vld [vmem:[%s10407_s4 + $0x18] sm:$0xff] }
 0x2e1   :  { %3056 = vmatprep.subr.mxu0 %v6529_v17 }
 0x2e2   :  { %3057 = vmatpush1.msra.mxu0 %v2964_v24  ;;  %v3618_v24 = vld [vmem:[#allocation2 + $0xa50] sm:$0xff] }
 0x2e3   :  { %3058 = vmatprep.subr.mxu0 %v6529_v17 }
 0x2e4   :  { %3059 = vmatpush1.msra.mxu0 %v2963_v0  ;;  %v3617_v0 = vld [vmem:[#allocation2 + $0xa48] sm:$0xff] }
 0x2e5   :  { %3060 = vmatprep.subr.mxu0 %v6529_v17 }
 0x2e6   :  { %3061 = vmatpush1.msra.mxu0 %v2962_v26  ;;  %v3611_v26 = vld [vmem:[#allocation2 + $0xa18] sm:$0xff] }
 0x2e7   :  { %3062 = vmatprep.subr.mxu0 %v6529_v17 }
 0x2e8   :  { %3063 = vmatpush1.msra.mxu0 %v2961_v27  ;;  %v3610_v27 = vld [vmem:[#allocation2 + $0xa10] sm:$0xff] }
 0x2e9   :  { %3064 = vmatprep.subr.mxu0 %v6529_v17 }
 0x2ea   :  { %3065 = vmatpush1.msra.mxu0 %v2960_v63  ;;  %v3604_v63 = vld [vmem:[#allocation2 + $0x9e0] sm:$0xff] }
 0x2eb   :  { %3066 = vmatprep.subr.mxu0 %v6529_v17 }
 0x2ec   :  { %3067 = vmatpush1.msra.mxu0 %v2959_v29  ;;  %v3603_v29 = vld [vmem:[#allocation2 + $0x9d8] sm:$0xff] }
 0x2ed   :  { %3068 = vmatprep.subr.mxu0 %v6529_v17 }
 0x2ee   :  { %3069 = vmatpush1.msra.mxu0 %v2958_v31  ;;  %v3597_v31 = vld [vmem:[#allocation2 + $0x9a8] sm:$0xff] }
 0x2ef   :  { %3070 = vmatprep.subr.mxu0 %v6529_v17 }
 0x2f0   :  { %3071 = vmatpush1.msra.mxu0 %v2957_v45  ;;  %v3541_v45 = vld [vmem:[#allocation2 + $0x7e8] sm:$0xff] }
 0x2f1   :  { %3072 = vmatprep.subr.mxu0 %v6529_v17 }
 0x2f2   :  { %3073 = vmatpush1.msra.mxu0 %v2956_v41 }
 0x2f3   :  { %v2558_v22 = vpop.f32.mrf.mxu1  ;;  %3074 = vmatprep.subr.mxu0 %v6529_v17 }
 0x2f4   :  { %v2559_v61 = vadd.f32 %v2558_v22, %v2488_v47  ;;  %3075 = vmatpush1.msra.mxu0 %v2955_v50  ;;  %v3575_v22 = vld [vmem:[#allocation2 + $0x8f8] sm:$0xff]  ;;  %v3561_v47 = vld [vmem:[#allocation2 + $0x888] sm:$0xff]  ;;  %v2971_v50 = vld [vmem:[%s10410_s7 + $0x2] ss:$0 sm:$0xff] }
 0x2f5   :  { %v2560_v48 = vpop.f32.mrf.mxu1  ;;  %3076 = vmatprep.subr.mxu0 %v6529_v17 }
 0x2f6   :  { %v2561_v51 = vadd.f32 %v2560_v48, %v2490_v49  ;;  %3077 = vmatpush1.msra.mxu0 %v2954_v57  ;;  %v3555_v48 = vld [vmem:[#allocation2 + $0x858] sm:$0xff]  ;;  %v3554_v49 = vld [vmem:[#allocation2 + $0x850] sm:$0xff] }
 0x2f7   :  { %3108 = vmatprep.subr.mxu0 %v6529_v17 }
 0x2f8   :  { %3109 = vmatpush2.msra.mxu0 %v2970_v59  ;;  %v3118_v59 = vld [vmem:[%s10407_s4 + $0x10] sm:$0xff] }
 0x2f9   :  { %3745 = vmatprep.subr.mxu0 %v3618_v24  ;;  %v3317_v24 = vld [vmem:[#allocation2 + $0xe8] sm:$0xff] }
 0x317   :  { %v2629_v36 = vpop.f32.mrf.mxu0 }
 0x318   :  { %v2630_v34 = vadd.f32 %v2629_v36, %v2559_v61  ;;  %v3548_v61 = vld [vmem:[#allocation2 + $0x820] sm:$0xff]  ;;  %v3547_v36 = vld [vmem:[#allocation2 + $0x818] sm:$0xff] }
 0x319   :  { %v2631_v53 = vpop.f32.mrf.mxu0 }
 0x31a   :  { %v2632_v54 = vadd.f32 %v2631_v53, %v2561_v51  ;;  %v2918_v55 = vmax.f32 %v2630_v34, 0.0  ;;  %v3540_v51 = vld [vmem:[#allocation2 + $0x7e0] sm:$0xff]  ;;  %v3534_v34 = vld [vmem:[#allocation2 + $0x7b0] sm:$0xff] }
 0x31c   :  { %v2919_v58 = vmax.f32 %v2632_v54, 0.0 }
 0x31e   :  { %3040 = vmatprep.mubr.f32.mxu1 %v2919_v58 }
 0x31f   :  { %3041 = vmatmul.mubr.f32.vlgmr.msra.gmra.mxu1 %v2918_v55 }
 0x320   :  { %3210 = vmatprep.mubr.f32.mxu1 %v6529_v17  ;;  %3177 = vmatpush1.msra.mxu1 %v3116_v25  ;;  %v3394_v25 = vld [vmem:[#allocation2 + $0x350] sm:$0xff] }
 0x321   :  { %3247 = vmatprep.subr.mxu1 %v3119_v33  ;;  %v3323_v33 = vld [vmem:[#allocation2 + $0x118] sm:$0xff] }
 0x334   :  { %v2771_v3 = vpop.f32.mrf.mxu1 }
 0x336   :  { %v2773_v11 = vpop.f32.mrf.mxu1 }
 0x33a   :  { %v2913_v60 = vpop.f32.mrf.mxu1 }
 0x33c   :  { %v2915_v21 = vpop.f32.mrf.mxu1 }
 0x357   :  { %v2700_v4 = vpop.f32.mrf.mxu0 }
 0x358   :  { %v2701_v40 = vadd.f32 %v2700_v4, %v2338_v9  ;;  %v3393_v4 = vld [vmem:[#allocation2 + $0x348] sm:$0xff]  ;;  %v3387_v9 = vld [vmem:[#allocation2 + $0x318] sm:$0xff] }
 0x359   :  { %v2702_v52 = vpop.f32.mrf.mxu0 }
 0x35a   :  { %v2703_v1 = vadd.f32 %v2702_v52, %v2342_v42  ;;  %v2772_v32 = vadd.f32 %v2771_v3, %v2701_v40  ;;  %v3386_v3 = vld [vmem:[#allocation2 + $0x310] sm:$0xff]  ;;  %v3380_v42 = vld [vmem:[#allocation2 + $0x2e0] sm:$0xff]  ;;  %v3379_v52 = vld [vmem:[#allocation2 + $0x2d8] sm:$0xff] }
 0x35b   :  { %v3373_v40 = vld [vmem:[#allocation2 + $0x2a8] sm:$0xff] }
 0x35c   :  { %v2774_v16 = vadd.f32 %v2773_v11, %v2703_v1  ;;  %v3372_v11 = vld [vmem:[#allocation2 + $0x2a0] sm:$0xff]  ;;  %v3366_v1 = vld [vmem:[#allocation2 + $0x270] sm:$0xff] }
 0x397   :  { %v2842_v13 = vpop.f32.mrf.mxu0 }
 0x398   :  { %v2843_v15 = vadd.f32 %v2842_v13, %v2772_v32  ;;  %v3365_v32 = vld [vmem:[#allocation2 + $0x268] sm:$0xff]  ;;  %v3358_v13 = vld [vmem:[#allocation2 + $0x230] sm:$0xff] }
 0x399   :  { %v2844_v18 = vpop.f32.mrf.mxu0 }
 0x39a   :  { %v2845_v19 = vadd.f32 %v2844_v18, %v2774_v16  ;;  %v2914_v23 = vadd.f32 %v2913_v60, %v2843_v15  ;;  %v3359_v60 = vld [vmem:[#allocation2 + $0x238] sm:$0xff]  ;;  %v3352_v15 = vld [vmem:[#allocation2 + $0x200] sm:$0xff]  ;;  %v3345_v18 = vld [vmem:[#allocation2 + $0x1c8] sm:$0xff] }
 0x39b   :  { %v3351_v16 = vld [vmem:[#allocation2 + $0x1f8] sm:$0xff] }
 0x39c   :  { %v2916_v7 = vadd.f32 %v2915_v21, %v2845_v19  ;;  %v2920_v30 = vmax.f32 %v2914_v23, 0.0  ;;  %v3344_v19 = vld [vmem:[#allocation2 + $0x1c0] sm:$0xff]  ;;  %v3338_v21 = vld [vmem:[#allocation2 + $0x190] sm:$0xff]  ;;  %v3337_v23 = vld [vmem:[#allocation2 + $0x188] sm:$0xff] }
 0x39e   :  { %v2921_v43 = vmax.f32 %v2916_v7, 0.0  ;;  %v3331_v7 = vld [vmem:[#allocation2 + $0x158] sm:$0xff] }
 0x3a0   :  { %6135 = vmatprep.mubr.msk.f32.mxu0 %vm2972_vm2, %v2921_v43  ;;  %v3330_v43 = vld [vmem:[#allocation2 + $0x150] sm:$0xff] }
 0x3a1   :  { %3111 = vmatmul.mubr.f32.vlgmr.msra.gmra.mxu0 %v2920_v30  ;;  %v3324_v30 = vld [vmem:[#allocation2 + $0x120] sm:$0xff] }
 0x3a2   :  { %3746 = vmatpush1.msra.mxu0 %v3617_v0  ;;  %v3316_v0 = vld [vmem:[#allocation2 + $0xe0] sm:$0xff] }
 0x3a3   :  { %3747 = vmatprep.subr.mxu0 %v3611_v26  ;;  %v3310_v26 = vld [vmem:[#allocation2 + $0xb0] sm:$0xff] }
 0x3a4   :  { %3748 = vmatpush1.msra.mxu0 %v3610_v27  ;;  %v3309_v27 = vld [vmem:[#allocation2 + $0xa8] sm:$0xff] }
 0x3a5   :  { %3749 = vmatprep.subr.mxu0 %v3604_v63  ;;  %v3303_v63 = vld [vmem:[#allocation2 + $0x78] sm:$0xff] }
 0x3a6   :  { %3750 = vmatpush1.msra.mxu0 %v3603_v29  ;;  %v3302_v29 = vld [vmem:[#allocation2 + $0x70] sm:$0xff] }
 0x3a7   :  { %3751 = vmatprep.subr.mxu0 %v3597_v31  ;;  %v3296_v31 = vld [vmem:[#allocation2 + $0x40] sm:$0xff] }
 0x3a8   :  { %3752 = vmatpush1.msra.mxu0 %v3596_v10  ;;  %v3295_v10 = vld [vmem:[#allocation2 + $0x38] sm:$0xff] }
 0x3a9   :  { %3753 = vmatprep.subr.mxu0 %v3590_v12  ;;  %v3289_v12 = vld [vmem:[#allocation2 + $0x8] sm:$0xff] }
 0x3aa   :  { %3754 = vmatpush1.msra.mxu0 %v3589_v35  ;;  %v3288_v35 = vld [vmem:[#allocation2] sm:$0xff] }
 0x3ab   :  { %3755 = vmatprep.subr.mxu0 %v3583_v37  ;;  %v3506_v37 = vld [vmem:[#allocation2 + $0x6d0] sm:$0xff] }
 0x3ac   :  { %3756 = vmatpush1.msra.mxu0 %v3582_v39  ;;  %v3505_v39 = vld [vmem:[#allocation2 + $0x6c8] sm:$0xff] }
 0x3ad   :  { %3757 = vmatprep.subr.mxu0 %v3576_v44  ;;  %v3499_v44 = vld [vmem:[#allocation2 + $0x698] sm:$0xff] }
 0x3ae   :  { %3758 = vmatpush1.msra.mxu0 %v3575_v22  ;;  %v3498_v22 = vld [vmem:[#allocation2 + $0x690] sm:$0xff] }
 0x3af   :  { %3759 = vmatprep.subr.mxu0 %v3569_v14  ;;  %v3492_v14 = vld [vmem:[#allocation2 + $0x660] sm:$0xff] }
 0x3b0   :  { %3760 = vmatpush1.msra.mxu0 %v3568_v28  ;;  %v3491_v28 = vld [vmem:[#allocation2 + $0x658] sm:$0xff] }
 0x3b1   :  { %3761 = vmatprep.subr.mxu0 %v3562_v46  ;;  %v3485_v46 = vld [vmem:[#allocation2 + $0x628] sm:$0xff] }
 0x3b2   :  { %3762 = vmatpush1.msra.mxu0 %v3561_v47  ;;  %v3484_v47 = vld [vmem:[#allocation2 + $0x620] sm:$0xff] }
 0x3b3   :  { %3763 = vmatprep.subr.mxu0 %v3555_v48  ;;  %v3478_v48 = vld [vmem:[#allocation2 + $0x5f0] sm:$0xff] }
 0x3b4   :  { %3764 = vmatpush1.msra.mxu0 %v3554_v49  ;;  %v3477_v49 = vld [vmem:[#allocation2 + $0x5e8] sm:$0xff] }
 0x3b5   :  { %3765 = vmatprep.subr.mxu0 %v3548_v61  ;;  %v3471_v61 = vld [vmem:[#allocation2 + $0x5b8] sm:$0xff] }
 0x3b6   :  { %3766 = vmatpush1.msra.mxu0 %v3547_v36  ;;  %v3470_v36 = vld [vmem:[#allocation2 + $0x5b0] sm:$0xff] }
 0x3b7   :  { %3767 = vmatprep.subr.mxu0 %v3541_v45  ;;  %v3464_v45 = vld [vmem:[#allocation2 + $0x580] sm:$0xff] }
 0x3b8   :  { %3768 = vmatpush1.msra.mxu0 %v3540_v51  ;;  %v3463_v51 = vld [vmem:[#allocation2 + $0x578] sm:$0xff] }
 0x3b9   :  { %3769 = vmatprep.subr.mxu0 %v3534_v34  ;;  %v3457_v34 = vld [vmem:[#allocation2 + $0x548] sm:$0xff] }
 0x3df   :  { %v6291_v53 = vpop.f32.mrf.mxu1 }
 0x3e1   :  { %v6292_v41 = vpop.f32.mrf.mxu1 }
 0x3e2   :  { %v6293_v54 = vadd.f32 %v6292_v41, %v6291_v53  ;;  %v3456_v53 = vld [vmem:[#allocation2 + $0x540] sm:$0xff]  ;;  %v3450_v41 = vld [vmem:[#allocation2 + $0x510] sm:$0xff] }
 0x3e4   :  { %v3043_v58 = vadd.f32 %v6293_v54, %v2971_v50  ;;  %v3449_v54 = vld [vmem:[#allocation2 + $0x508] sm:$0xff]  ;;  %v3443_v50 = vld [vmem:[#allocation2 + $0x4d8] sm:$0xff] }
 0x461   :  { %v3112_v55 = vpop.f32.mrf.mxu0 }
 0x462   :  { %v3113_v57 = vadd.f32 %v3112_v55, %v3043_v58  ;;  %v3442_v58 = vld [vmem:[#allocation2 + $0x4d0] sm:$0xff]  ;;  %v3436_v55 = vld [vmem:[#allocation2 + $0x4a0] sm:$0xff] }
 0x463   :  { %v3114_v62 = vpop.f32.mrf.mxu0 }
 0x464   :  { %6137 = vmatmul.mubr.msk.f32.vlgmr.msra.gmra.mxu1 %vm2972_vm2, %v3113_v57  ;;  %v3428_v62 = vld [vmem:[#allocation2 + $0x460] sm:$0xff] }
 0x465   :  { %3248 = vmatpush1.msra.mxu1 %v3118_v59  ;;  %3281 = vmatprep.mubr.f32.mxu1 %v6529_v17  ;;  %v3429_v59 = vld [vmem:[#allocation2 + $0x468] sm:$0xff] }
 0x466   :  { %3674 = vmatprep.subr.mxu1 %v3394_v25  ;;  %v3422_v25 = vld [vmem:[#allocation2 + $0x430] sm:$0xff] }
 0x468   :  { %6138 = vmatmul.mubr.msk.f32.vlgmr.msra.gmra.mxu1 %vm2972_vm2, %v3113_v57  ;;  %v3435_v57 = vld [vmem:[#allocation2 + $0x498] sm:$0xff] }
 0x469   :  { %3675 = vmatpush1.msra.mxu1 %v3393_v4  ;;  %v3421_v4 = vld [vmem:[#allocation2 + $0x428] sm:$0xff] }
 0x46a   :  { %3676 = vmatprep.subr.mxu1 %v3387_v9  ;;  %v3415_v9 = vld [vmem:[#allocation2 + $0x3f8] sm:$0xff] }
 0x46b   :  { %3677 = vmatpush1.msra.mxu1 %v3386_v3  ;;  %v3414_v3 = vld [vmem:[#allocation2 + $0x3f0] sm:$0xff] }
 0x46c   :  { %3678 = vmatprep.subr.mxu1 %v3380_v42  ;;  %v3533_v42 = vld [vmem:[#allocation2 + $0x7a8] sm:$0xff] }
 0x46d   :  { %3679 = vmatpush1.msra.mxu1 %v3379_v52  ;;  %3770 = vmatpush1.msra.mxu0 %v3533_v42  ;;  %v3408_v52 = vld [vmem:[#allocation2 + $0x3c0] sm:$0xff]  ;;  %v3353_v42 = vld [vmem:[#allocation2 + $0x208] sm:$0xff] }
 0x46e   :  { %3680 = vmatprep.subr.mxu1 %v3373_v40  ;;  %v3527_v40 = vld [vmem:[#allocation2 + $0x778] sm:$0xff] }
 0x46f   :  { %3681 = vmatpush1.msra.mxu1 %v3372_v11  ;;  %3771 = vmatprep.subr.mxu0 %v3527_v40  ;;  %v3407_v11 = vld [vmem:[#allocation2 + $0x3b8] sm:$0xff] }
 0x470   :  { %3682 = vmatprep.subr.mxu1 %v3366_v1  ;;  %v3526_v1 = vld [vmem:[#allocation2 + $0x770] sm:$0xff]  ;;  %v3347_v40 = vld [vmem:[#allocation2 + $0x1d8] sm:$0xff] }
 0x471   :  { %3683 = vmatpush1.msra.mxu1 %v3365_v32  ;;  %3772 = vmatpush1.msra.mxu0 %v3526_v1  ;;  %v3401_v32 = vld [vmem:[#allocation2 + $0x388] sm:$0xff]  ;;  %v3346_v1 = vld [vmem:[#allocation2 + $0x1d0] sm:$0xff] }
 0x472   :  { %3684 = vmatprep.subr.mxu1 %v3359_v60  ;;  %v3520_v60 = vld [vmem:[#allocation2 + $0x740] sm:$0xff] }
 0x473   :  { %3685 = vmatpush1.msra.mxu1 %v3358_v13  ;;  %3773 = vmatprep.subr.mxu0 %v3520_v60  ;;  %v3400_v13 = vld [vmem:[#allocation2 + $0x380] sm:$0xff] }
 0x474   :  { %3686 = vmatprep.subr.mxu1 %v3352_v15  ;;  %v3519_v15 = vld [vmem:[#allocation2 + $0x738] sm:$0xff]  ;;  %v3340_v60 = vld [vmem:[#allocation2 + $0x1a0] sm:$0xff] }
 0x475   :  { %3687 = vmatpush1.msra.mxu1 %v3351_v16  ;;  %3774 = vmatpush1.msra.mxu0 %v3519_v15  ;;  %v3513_v16 = vld [vmem:[#allocation2 + $0x708] sm:$0xff]  ;;  %v3339_v15 = vld [vmem:[#allocation2 + $0x198] sm:$0xff] }
 0x476   :  { %3688 = vmatprep.subr.mxu1 %v3345_v18  ;;  %v3620_v18 = vld [vmem:[#allocation2 + $0xa60] sm:$0xff]  ;;  %3775 = vmatprep.subr.mxu0 %v3513_v16  ;;  %v3549_v16 = vld [vmem:[#allocation2 + $0x828] sm:$0xff] }
 0x477   :  { %3689 = vmatpush1.msra.mxu1 %v3344_v19  ;;  %v3512_v19 = vld [vmem:[#allocation2 + $0x700] sm:$0xff] }
 0x478   :  { %3690 = vmatprep.subr.mxu1 %v3338_v21  ;;  %3776 = vmatpush1.msra.mxu0 %v3512_v19  ;;  %v3625_v21 = vld [vmem:[#allocation2 + $0xa88] sm:$0xff]  ;;  %v3543_v19 = vld [vmem:[#allocation2 + $0x7f8] sm:$0xff] }
 0x479   :  { %3691 = vmatpush1.msra.mxu1 %v3337_v23  ;;  %3807 = vmatprep.subr.mxu0 %v3625_v21  ;;  %v3624_v23 = vld [vmem:[#allocation2 + $0xa80] sm:$0xff] }
 0x47a   :  { %3692 = vmatprep.subr.mxu1 %v3331_v7  ;;  %3808 = vmatpush2.msra.mxu0 %v3624_v23  ;;  %v3396_v7 = vld [vmem:[#allocation2 + $0x360] sm:$0xff]  ;;  %v3542_v23 = vld [vmem:[#allocation2 + $0x7f0] sm:$0xff] }
 0x47b   :  { %3693 = vmatpush1.msra.mxu1 %v3330_v43  ;;  %3816 = vmatprep.subr.mxu0 %v3396_v7  ;;  %v6136_v43 = vld [vmem:[%s10410_s7 + $0x3] ss:$8 sm:$0xf] }
 0x47c   :  { %3694 = vmatprep.subr.mxu1 %v3324_v30  ;;  %v3130_v30 = vrot.slane %v6136_v43, %v8602_v56  ;;  %v3332_v21 = vld [vmem:[#allocation2 + $0x160] sm:$0xff]  ;;  %v3326_v7 = vld [vmem:[#allocation2 + $0x130] sm:$0xff] }
 0x47d   :  { %3695 = vmatpush1.msra.mxu1 %v3323_v33  ;;  %v3126_v33 = vrot.slane %v6136_v43, %v8122_v8 }
 0x47e   :  { %3696 = vmatprep.subr.mxu1 %v3317_v24 }
 0x47f   :  { %3697 = vmatpush1.msra.mxu1 %v3316_v0 }
 0x480   :  { %3698 = vmatprep.subr.mxu1 %v3310_v26 }
 0x481   :  { %3699 = vmatpush1.msra.mxu1 %v3309_v27  ;;  %v3138_v27 = vrot.slane %v6136_v43, %v9004_v20 }
 0x482   :  { %3700 = vmatprep.subr.mxu1 %v3303_v63 }
 0x483   :  { %3701 = vmatpush1.msra.mxu1 %v3302_v29 }
 0x484   :  { %3702 = vmatprep.subr.mxu1 %v3296_v31  ;;  %v3619_v31 = vld [vmem:[#allocation2 + $0xa58] sm:$0xff] }
 0x485   :  { %3703 = vmatpush1.msra.mxu1 %v3295_v10  ;;  %v3134_v10 = vrot.slane %v6136_v43, %v9132_v38  ;;  %v3536_v43 = vld [vmem:[#allocation2 + $0x7c0] sm:$0xff] }
 0x486   :  { %3704 = vmatprep.subr.mxu1 %v3289_v12  ;;  %v3613_v12 = vld [vmem:[#allocation2 + $0xa28] sm:$0xff] }
 0x487   :  { %3705 = vmatpush1.msra.mxu1 %v3288_v35 }
 0x488   :  { %3706 = vmatprep.subr.mxu1 %v3506_v37  ;;  %v3612_v37 = vld [vmem:[#allocation2 + $0xa20] sm:$0xff] }
 0x489   :  { %3707 = vmatpush2.msra.mxu1 %v3505_v39 }
 0x48a   :  { %3708 = vmatprep.subr.mxu1 %v3499_v44  ;;  %v3606_v44 = vld [vmem:[#allocation2 + $0x9f0] sm:$0xff] }
 0x48b   :  { %3709 = vmatpush2.msra.mxu1 %v3498_v22  ;;  %v3605_v22 = vld [vmem:[#allocation2 + $0x9e8] sm:$0xff] }
 0x48c   :  { %3710 = vmatprep.subr.mxu1 %v3492_v14 }
 0x48d   :  { %3711 = vmatpush2.msra.mxu1 %v3491_v28  ;;  %v3395_v28 = vld [vmem:[#allocation2 + $0x358] sm:$0xff] }
 0x48e   :  { %3712 = vmatprep.subr.mxu1 %v3485_v46  ;;  %v3389_v46 = vld [vmem:[#allocation2 + $0x328] sm:$0xff] }
 0x48f   :  { %3713 = vmatpush2.msra.mxu1 %v3484_v47  ;;  %v3599_v47 = vld [vmem:[#allocation2 + $0x9b8] sm:$0xff] }
 0x490   :  { %3714 = vmatprep.subr.mxu1 %v3478_v48  ;;  %v3388_v48 = vld [vmem:[#allocation2 + $0x320] sm:$0xff] }
 0x491   :  { %3715 = vmatpush2.msra.mxu1 %v3477_v49  ;;  %v3598_v49 = vld [vmem:[#allocation2 + $0x9b0] sm:$0xff] }
 0x492   :  { %3716 = vmatprep.subr.mxu1 %v3471_v61  ;;  %v3382_v61 = vld [vmem:[#allocation2 + $0x2f0] sm:$0xff] }
 0x493   :  { %3717 = vmatpush2.msra.mxu1 %v3470_v36  ;;  %v3592_v36 = vld [vmem:[#allocation2 + $0x980] sm:$0xff] }
 0x494   :  { %3718 = vmatprep.subr.mxu1 %v3464_v45  ;;  %v3381_v45 = vld [vmem:[#allocation2 + $0x2e8] sm:$0xff] }
 0x495   :  { %3719 = vmatpush2.msra.mxu1 %v3463_v51  ;;  %v3591_v51 = vld [vmem:[#allocation2 + $0x978] sm:$0xff] }
 0x496   :  { %3720 = vmatprep.subr.mxu1 %v3457_v34  ;;  %v3375_v34 = vld [vmem:[#allocation2 + $0x2b8] sm:$0xff] }
 0x497   :  { %3721 = vmatpush2.msra.mxu1 %v3456_v53  ;;  %v3585_v53 = vld [vmem:[#allocation2 + $0x948] sm:$0xff] }
 0x498   :  { %3722 = vmatprep.subr.mxu1 %v3450_v41  ;;  %v3374_v41 = vld [vmem:[#allocation2 + $0x2b0] sm:$0xff] }
 0x499   :  { %3723 = vmatpush2.msra.mxu1 %v3449_v54  ;;  %v3584_v54 = vld [vmem:[#allocation2 + $0x940] sm:$0xff] }
 0x49a   :  { %3724 = vmatprep.subr.mxu1 %v3443_v50  ;;  %v3368_v50 = vld [vmem:[#allocation2 + $0x280] sm:$0xff] }
 0x49b   :  { %3725 = vmatpush2.msra.mxu1 %v3442_v58  ;;  %v3578_v58 = vld [vmem:[#allocation2 + $0x910] sm:$0xff] }
 0x49c   :  { %3726 = vmatprep.subr.mxu1 %v3436_v55  ;;  %v3367_v55 = vld [vmem:[#allocation2 + $0x278] sm:$0xff] }
 0x49d   :  { %3727 = vmatpush2.msra.mxu1 %v3435_v57  ;;  %v3577_v57 = vld [vmem:[#allocation2 + $0x908] sm:$0xff] }
 0x49e   :  { %3728 = vmatprep.subr.mxu1 %v3429_v59  ;;  %v3361_v59 = vld [vmem:[#allocation2 + $0x248] sm:$0xff] }
 0x49f   :  { %3729 = vmatpush2.msra.mxu1 %v3428_v62  ;;  %v3571_v62 = vld [vmem:[#allocation2 + $0x8d8] sm:$0xff] }
 0x4a0   :  { %3730 = vmatprep.subr.mxu1 %v3422_v25  ;;  %v3360_v25 = vld [vmem:[#allocation2 + $0x240] sm:$0xff] }
 0x4a1   :  { %3731 = vmatpush2.msra.mxu1 %v3421_v4  ;;  %v3570_v4 = vld [vmem:[#allocation2 + $0x8d0] sm:$0xff] }
 0x4a2   :  { %3732 = vmatprep.subr.mxu1 %v3415_v9  ;;  %v3354_v9 = vld [vmem:[#allocation2 + $0x210] sm:$0xff] }
 0x4a3   :  { %3733 = vmatpush2.msra.mxu1 %v3414_v3  ;;  %v3564_v3 = vld [vmem:[#allocation2 + $0x8a0] sm:$0xff] }
 0x4a4   :  { %3734 = vmatprep.subr.mxu1 %v3408_v52  ;;  %v3563_v52 = vld [vmem:[#allocation2 + $0x898] sm:$0xff] }
 0x4a5   :  { %3735 = vmatpush2.msra.mxu1 %v3407_v11  ;;  %v3557_v11 = vld [vmem:[#allocation2 + $0x868] sm:$0xff] }
 0x4a6   :  { %3736 = vmatprep.subr.mxu1 %v3401_v32  ;;  %v3556_v32 = vld [vmem:[#allocation2 + $0x860] sm:$0xff] }
 0x4a7   :  { %3737 = vmatpush2.msra.mxu1 %v3400_v13  ;;  %v3550_v13 = vld [vmem:[#allocation2 + $0x830] sm:$0xff] }
 0x4a8   :  { %3887 = vmatprep.subr.mxu1 %v3620_v18  ;;  %v3333_v18 = vld [vmem:[#allocation2 + $0x168] sm:$0xff] }
 0x524   :  { %v3212_v24 = vpop.f32.mrf.mxu1 }
 0x525   :  { %v10240_v63 = vadd.f32 %v3212_v24, %v3126_v33  ;;  %v3535_v33 = vld [vmem:[#allocation2 + $0x7b8] sm:$0xff] }
 0x526   :  { %v3214_v0 = vpop.f32.mrf.mxu1  ;;  %v3319_v24 = vld [vmem:[#allocation2 + $0xf8] sm:$0xff] }
 0x527   :  { %v10237_v26 = vadd.f32 %v3214_v0, %v3130_v30  ;;  %v3325_v30 = vld [vmem:[#allocation2 + $0x128] sm:$0xff] }
 0x528   :  { %v3283_v29 = vpop.f32.mrf.mxu1  ;;  %v3529_v0 = vld [vmem:[#allocation2 + $0x788] sm:$0xff] }
 0x529   :  { %3738 = vmatprep.mubr.f32.mxu1 %v10237_v26  ;;  %v10247_v14 = vadd.f32 %v3283_v29, %v3134_v10  ;;  %v3528_v29 = vld [vmem:[#allocation2 + $0x780] sm:$0xff]  ;;  %v3522_v10 = vld [vmem:[#allocation2 + $0x750] sm:$0xff] }
 0x52a   :  { %v3285_v35 = vpop.f32.mrf.mxu1  ;;  %3739 = vmatmul.mubr.f32.vlgmr.msra.gmra.mxu1 %v10240_v63 }
 0x52b   :  { %v10245_v39 = vadd.f32 %v3285_v35, %v3138_v27  ;;  %3888 = vmatpush1.msra.mxu1 %v3619_v31  ;;  %v3318_v27 = vld [vmem:[#allocation2 + $0xf0] sm:$0xff]  ;;  %v3312_v31 = vld [vmem:[#allocation2 + $0xc0] sm:$0xff]  ;;  %v3521_v35 = vld [vmem:[#allocation2 + $0x748] sm:$0xff] }
 0x52c   :  { %3889 = vmatprep.subr.mxu1 %v3613_v12  ;;  %v3311_v12 = vld [vmem:[#allocation2 + $0xb8] sm:$0xff] }
 0x52d   :  { %3890 = vmatpush1.msra.mxu1 %v3612_v37  ;;  %6141 = vmatprep.mubr.msk.f32.mxu0 %vm2972_vm2, %v10245_v39  ;;  %v3305_v37 = vld [vmem:[#allocation2 + $0x88] sm:$0xff] }
 0x52e   :  { %3891 = vmatprep.subr.mxu1 %v3606_v44  ;;  %6142 = vmatprep.mubr.msk.f32.mxu1 %vm2972_vm2, %v10245_v39  ;;  %v3515_v44 = vld [vmem:[#allocation2 + $0x718] sm:$0xff] }
 0x52f   :  { %3810 = vmatmul.mubr.f32.vlgmr.msra.gmra.mxu0 %v10247_v14  ;;  %3892 = vmatpush1.msra.mxu1 %v3605_v22  ;;  %v3304_v22 = vld [vmem:[#allocation2 + $0x80] sm:$0xff] }
 0x530   :  { %3817 = vmatpush1.msra.mxu0 %v3395_v28  ;;  %3880 = vmatprep.mubr.f32.mxu0 %v10237_v26  ;;  %v3514_v28 = vld [vmem:[#allocation2 + $0x710] sm:$0xff] }
 0x531   :  { %3818 = vmatprep.subr.mxu0 %v3389_v46  ;;  %3893 = vmatprep.subr.mxu1 %v3599_v47  ;;  %v3298_v46 = vld [vmem:[#allocation2 + $0x50] sm:$0xff]  ;;  %v3627_v47 = vld [vmem:[#allocation2 + $0xa98] sm:$0xff] }
 0x532   :  { %3819 = vmatpush1.msra.mxu0 %v3388_v48  ;;  %3894 = vmatpush1.msra.mxu1 %v3598_v49  ;;  %v3297_v48 = vld [vmem:[#allocation2 + $0x48] sm:$0xff]  ;;  %v3626_v49 = vld [vmem:[#allocation2 + $0xa90] sm:$0xff] }
 0x533   :  { %3820 = vmatprep.subr.mxu0 %v3382_v61  ;;  %3895 = vmatprep.subr.mxu1 %v3592_v36  ;;  %v3291_v61 = vld [vmem:[#allocation2 + $0x18] sm:$0xff]  ;;  %v3398_v36 = vld [vmem:[#allocation2 + $0x370] sm:$0xff] }
 0x534   :  { %3821 = vmatpush1.msra.mxu0 %v3381_v45  ;;  %3896 = vmatpush1.msra.mxu1 %v3591_v51  ;;  %v3290_v45 = vld [vmem:[#allocation2 + $0x10] sm:$0xff]  ;;  %v3397_v51 = vld [vmem:[#allocation2 + $0x368] sm:$0xff] }
 0x535   :  { %3822 = vmatprep.subr.mxu0 %v3375_v34  ;;  %3897 = vmatprep.subr.mxu1 %v3585_v53  ;;  %v3508_v34 = vld [vmem:[#allocation2 + $0x6e0] sm:$0xff]  ;;  %v3391_v53 = vld [vmem:[#allocation2 + $0x338] sm:$0xff] }
 0x536   :  { %3823 = vmatpush1.msra.mxu0 %v3374_v41  ;;  %3898 = vmatpush1.msra.mxu1 %v3584_v54  ;;  %v3507_v41 = vld [vmem:[#allocation2 + $0x6d8] sm:$0xff]  ;;  %v3390_v54 = vld [vmem:[#allocation2 + $0x330] sm:$0xff] }
 0x537   :  { %3824 = vmatprep.subr.mxu0 %v3368_v50  ;;  %3899 = vmatprep.subr.mxu1 %v3578_v58  ;;  %v3501_v50 = vld [vmem:[#allocation2 + $0x6a8] sm:$0xff]  ;;  %v3384_v58 = vld [vmem:[#allocation2 + $0x300] sm:$0xff] }
 0x538   :  { %3825 = vmatpush1.msra.mxu0 %v3367_v55  ;;  %3900 = vmatpush1.msra.mxu1 %v3577_v57  ;;  %v3500_v55 = vld [vmem:[#allocation2 + $0x6a0] sm:$0xff]  ;;  %v3383_v57 = vld [vmem:[#allocation2 + $0x2f8] sm:$0xff] }
 0x539   :  { %3826 = vmatprep.subr.mxu0 %v3361_v59  ;;  %3901 = vmatprep.subr.mxu1 %v3571_v62  ;;  %v3494_v59 = vld [vmem:[#allocation2 + $0x670] sm:$0xff]  ;;  %v3377_v62 = vld [vmem:[#allocation2 + $0x2c8] sm:$0xff] }
 0x53a   :  { %3827 = vmatpush1.msra.mxu0 %v3360_v25  ;;  %3902 = vmatpush1.msra.mxu1 %v3570_v4  ;;  %v3493_v25 = vld [vmem:[#allocation2 + $0x668] sm:$0xff]  ;;  %v3376_v4 = vld [vmem:[#allocation2 + $0x2c0] sm:$0xff] }
 0x53b   :  { %3828 = vmatprep.subr.mxu0 %v3354_v9  ;;  %3903 = vmatprep.subr.mxu1 %v3564_v3  ;;  %v3487_v9 = vld [vmem:[#allocation2 + $0x638] sm:$0xff]  ;;  %v3370_v3 = vld [vmem:[#allocation2 + $0x290] sm:$0xff] }
 0x53c   :  { %3829 = vmatpush1.msra.mxu0 %v3353_v42  ;;  %3904 = vmatpush1.msra.mxu1 %v3563_v52  ;;  %v3486_v42 = vld [vmem:[#allocation2 + $0x630] sm:$0xff]  ;;  %v3369_v52 = vld [vmem:[#allocation2 + $0x288] sm:$0xff] }
 0x53d   :  { %3830 = vmatprep.subr.mxu0 %v3347_v40  ;;  %3905 = vmatprep.subr.mxu1 %v3557_v11  ;;  %v3480_v40 = vld [vmem:[#allocation2 + $0x600] sm:$0xff]  ;;  %v3363_v11 = vld [vmem:[#allocation2 + $0x258] sm:$0xff] }
 0x53e   :  { %3831 = vmatpush1.msra.mxu0 %v3346_v1  ;;  %3906 = vmatpush1.msra.mxu1 %v3556_v32  ;;  %v3479_v1 = vld [vmem:[#allocation2 + $0x5f8] sm:$0xff]  ;;  %v3362_v32 = vld [vmem:[#allocation2 + $0x250] sm:$0xff] }
 0x53f   :  { %3832 = vmatprep.subr.mxu0 %v3340_v60  ;;  %3907 = vmatprep.subr.mxu1 %v3550_v13  ;;  %v3473_v60 = vld [vmem:[#allocation2 + $0x5c8] sm:$0xff]  ;;  %v3356_v13 = vld [vmem:[#allocation2 + $0x220] sm:$0xff] }
 0x540   :  { %3833 = vmatpush1.msra.mxu0 %v3339_v15  ;;  %3908 = vmatpush1.msra.mxu1 %v3549_v16  ;;  %v3472_v15 = vld [vmem:[#allocation2 + $0x5c0] sm:$0xff]  ;;  %v3355_v16 = vld [vmem:[#allocation2 + $0x218] sm:$0xff] }
 0x541   :  { %3834 = vmatprep.subr.mxu0 %v3333_v18  ;;  %3909 = vmatprep.subr.mxu1 %v3543_v19  ;;  %v3466_v18 = vld [vmem:[#allocation2 + $0x590] sm:$0xff]  ;;  %v3349_v19 = vld [vmem:[#allocation2 + $0x1e8] sm:$0xff] }
 0x542   :  { %3835 = vmatpush1.msra.mxu0 %v3332_v21  ;;  %3910 = vmatpush1.msra.mxu1 %v3542_v23  ;;  %v3465_v21 = vld [vmem:[#allocation2 + $0x588] sm:$0xff]  ;;  %v3348_v23 = vld [vmem:[#allocation2 + $0x1e0] sm:$0xff] }
 0x543   :  { %3836 = vmatprep.subr.mxu0 %v3326_v7  ;;  %3911 = vmatprep.subr.mxu1 %v3536_v43  ;;  %v3459_v7 = vld [vmem:[#allocation2 + $0x558] sm:$0xff]  ;;  %v3342_v43 = vld [vmem:[#allocation2 + $0x1b0] sm:$0xff] }
 0x544   :  { %3837 = vmatpush1.msra.mxu0 %v3325_v30  ;;  %3912 = vmatpush1.msra.mxu1 %v3535_v33  ;;  %v3458_v30 = vld [vmem:[#allocation2 + $0x550] sm:$0xff]  ;;  %v3341_v33 = vld [vmem:[#allocation2 + $0x1a8] sm:$0xff] }
 0x545   :  { %3838 = vmatprep.subr.mxu0 %v3319_v24  ;;  %3913 = vmatprep.subr.mxu1 %v3529_v0  ;;  %v3452_v24 = vld [vmem:[#allocation2 + $0x520] sm:$0xff]  ;;  %v3335_v0 = vld [vmem:[#allocation2 + $0x178] sm:$0xff] }
 0x546   :  { %3839 = vmatpush1.msra.mxu0 %v3318_v27  ;;  %3914 = vmatpush1.msra.mxu1 %v3528_v29  ;;  %v3451_v27 = vld [vmem:[#allocation2 + $0x518] sm:$0xff]  ;;  %v3334_v29 = vld [vmem:[#allocation2 + $0x170] sm:$0xff] }
 0x547   :  { %3840 = vmatprep.subr.mxu0 %v3312_v31  ;;  %3915 = vmatprep.subr.mxu1 %v3522_v10  ;;  %v3445_v31 = vld [vmem:[#allocation2 + $0x4e8] sm:$0xff]  ;;  %v3328_v10 = vld [vmem:[#allocation2 + $0x140] sm:$0xff] }
 0x548   :  { %3841 = vmatpush1.msra.mxu0 %v3311_v12  ;;  %3916 = vmatpush1.msra.mxu1 %v3521_v35  ;;  %v3444_v12 = vld [vmem:[#allocation2 + $0x4e0] sm:$0xff]  ;;  %v3327_v35 = vld [vmem:[#allocation2 + $0x138] sm:$0xff] }
 0x549   :  { %3842 = vmatprep.subr.mxu0 %v3305_v37  ;;  %3917 = vmatprep.subr.mxu1 %v3515_v44  ;;  %v3438_v37 = vld [vmem:[#allocation2 + $0x4b0] sm:$0xff]  ;;  %v3321_v44 = vld [vmem:[#allocation2 + $0x108] sm:$0xff] }
 0x54a   :  { %3843 = vmatpush1.msra.mxu0 %v3304_v22  ;;  %3918 = vmatpush1.msra.mxu1 %v3514_v28  ;;  %v3437_v22 = vld [vmem:[#allocation2 + $0x4a8] sm:$0xff]  ;;  %v3320_v28 = vld [vmem:[#allocation2 + $0x100] sm:$0xff] }
 0x54b   :  { %3844 = vmatprep.subr.mxu0 %v3298_v46  ;;  %3949 = vmatprep.subr.mxu1 %v3627_v47  ;;  %v3431_v46 = vld [vmem:[#allocation2 + $0x478] sm:$0xff]  ;;  %v3314_v47 = vld [vmem:[#allocation2 + $0xd0] sm:$0xff] }
 0x54c   :  { %3845 = vmatpush1.msra.mxu0 %v3297_v48  ;;  %3950 = vmatpush2.msra.mxu1 %v3626_v49  ;;  %v3430_v48 = vld [vmem:[#allocation2 + $0x470] sm:$0xff]  ;;  %v3313_v49 = vld [vmem:[#allocation2 + $0xc8] sm:$0xff] }
 0x54d   :  { %3846 = vmatprep.subr.mxu0 %v3291_v61  ;;  %3952 = vmatmul.mubr.f32.vlgmr.msra.gmra.mxu1 %v10247_v14  ;;  %v3424_v61 = vld [vmem:[#allocation2 + $0x440] sm:$0xff] }
 0x54e   :  { %3958 = vmatprep.subr.mxu1 %v3398_v36  ;;  %3847 = vmatpush1.msra.mxu0 %v3290_v45  ;;  %v3307_v36 = vld [vmem:[#allocation2 + $0x98] sm:$0xff] }
 0x54f   :  { %3959 = vmatpush1.msra.mxu1 %v3397_v51  ;;  %4022 = vmatprep.mubr.f32.mxu1 %v10237_v26  ;;  %v3423_v45 = vld [vmem:[#allocation2 + $0x438] sm:$0xff]  ;;  %v3306_v51 = vld [vmem:[#allocation2 + $0x90] sm:$0xff] }
 0x550   :  { %3848 = vmatprep.subr.mxu0 %v3508_v34  ;;  %3960 = vmatprep.subr.mxu1 %v3391_v53  ;;  %v3417_v34 = vld [vmem:[#allocation2 + $0x408] sm:$0xff]  ;;  %v3300_v53 = vld [vmem:[#allocation2 + $0x60] sm:$0xff] }
 0x551   :  { %3849 = vmatpush2.msra.mxu0 %v3507_v41  ;;  %3961 = vmatpush1.msra.mxu1 %v3390_v54  ;;  %v3416_v41 = vld [vmem:[#allocation2 + $0x400] sm:$0xff]  ;;  %v3299_v54 = vld [vmem:[#allocation2 + $0x58] sm:$0xff] }
 0x552   :  { %3850 = vmatprep.subr.mxu0 %v3501_v50  ;;  %3962 = vmatprep.subr.mxu1 %v3384_v58  ;;  %v3410_v50 = vld [vmem:[#allocation2 + $0x3d0] sm:$0xff]  ;;  %v3293_v58 = vld [vmem:[#allocation2 + $0x28] sm:$0xff] }
 0x553   :  { %3851 = vmatpush2.msra.mxu0 %v3500_v55  ;;  %3963 = vmatpush1.msra.mxu1 %v3383_v57  ;;  %v3409_v55 = vld [vmem:[#allocation2 + $0x3c8] sm:$0xff]  ;;  %v3292_v57 = vld [vmem:[#allocation2 + $0x20] sm:$0xff] }
 0x554   :  { %3852 = vmatprep.subr.mxu0 %v3494_v59  ;;  %3964 = vmatprep.subr.mxu1 %v3377_v62  ;;  %v3403_v59 = vld [vmem:[#allocation2 + $0x398] sm:$0xff]  ;;  %v3510_v62 = vld [vmem:[#allocation2 + $0x6f0] sm:$0xff] }
 0x555   :  { %3853 = vmatpush2.msra.mxu0 %v3493_v25  ;;  %3965 = vmatpush1.msra.mxu1 %v3376_v4  ;;  %v3402_v25 = vld [vmem:[#allocation2 + $0x390] sm:$0xff]  ;;  %v3509_v4 = vld [vmem:[#allocation2 + $0x6e8] sm:$0xff] }
 0x556   :  { %3854 = vmatprep.subr.mxu0 %v3487_v9  ;;  %3966 = vmatprep.subr.mxu1 %v3370_v3  ;;  %v3503_v9 = vld [vmem:[#allocation2 + $0x6b8] sm:$0xff]  ;;  %v3622_v3 = vld [vmem:[#allocation2 + $0xa70] sm:$0xff] }
 0x557   :  { %3855 = vmatpush2.msra.mxu0 %v3486_v42  ;;  %3967 = vmatpush1.msra.mxu1 %v3369_v52  ;;  %v3502_v42 = vld [vmem:[#allocation2 + $0x6b0] sm:$0xff]  ;;  %v3621_v52 = vld [vmem:[#allocation2 + $0xa68] sm:$0xff] }
 0x558   :  { %3856 = vmatprep.subr.mxu0 %v3480_v40  ;;  %3968 = vmatprep.subr.mxu1 %v3363_v11  ;;  %v3496_v40 = vld [vmem:[#allocation2 + $0x680] sm:$0xff]  ;;  %v3615_v11 = vld [vmem:[#allocation2 + $0xa38] sm:$0xff] }
 0x559   :  { %3857 = vmatpush2.msra.mxu0 %v3479_v1  ;;  %3969 = vmatpush1.msra.mxu1 %v3362_v32  ;;  %v3495_v1 = vld [vmem:[#allocation2 + $0x678] sm:$0xff]  ;;  %v3614_v32 = vld [vmem:[#allocation2 + $0xa30] sm:$0xff] }
 0x55a   :  { %3858 = vmatprep.subr.mxu0 %v3473_v60  ;;  %3970 = vmatprep.subr.mxu1 %v3356_v13  ;;  %v3489_v60 = vld [vmem:[#allocation2 + $0x648] sm:$0xff]  ;;  %v3608_v13 = vld [vmem:[#allocation2 + $0xa00] sm:$0xff] }
 0x55b   :  { %3859 = vmatpush2.msra.mxu0 %v3472_v15  ;;  %3971 = vmatpush1.msra.mxu1 %v3355_v16  ;;  %v3488_v15 = vld [vmem:[#allocation2 + $0x640] sm:$0xff]  ;;  %v3607_v16 = vld [vmem:[#allocation2 + $0x9f8] sm:$0xff] }
 0x55c   :  { %3860 = vmatprep.subr.mxu0 %v3466_v18  ;;  %3972 = vmatprep.subr.mxu1 %v3349_v19  ;;  %v3482_v18 = vld [vmem:[#allocation2 + $0x610] sm:$0xff]  ;;  %v3601_v19 = vld [vmem:[#allocation2 + $0x9c8] sm:$0xff] }
 0x55d   :  { %3861 = vmatpush2.msra.mxu0 %v3465_v21  ;;  %3973 = vmatpush1.msra.mxu1 %v3348_v23  ;;  %v3481_v21 = vld [vmem:[#allocation2 + $0x608] sm:$0xff]  ;;  %v3600_v23 = vld [vmem:[#allocation2 + $0x9c0] sm:$0xff] }
 0x55e   :  { %3862 = vmatprep.subr.mxu0 %v3459_v7  ;;  %3974 = vmatprep.subr.mxu1 %v3342_v43  ;;  %v3475_v7 = vld [vmem:[#allocation2 + $0x5d8] sm:$0xff]  ;;  %v3594_v43 = vld [vmem:[#allocation2 + $0x990] sm:$0xff] }
 0x55f   :  { %3863 = vmatpush2.msra.mxu0 %v3458_v30  ;;  %3975 = vmatpush1.msra.mxu1 %v3341_v33  ;;  %v3474_v30 = vld [vmem:[#allocation2 + $0x5d0] sm:$0xff]  ;;  %v3593_v33 = vld [vmem:[#allocation2 + $0x988] sm:$0xff] }
 0x560   :  { %3864 = vmatprep.subr.mxu0 %v3452_v24  ;;  %3976 = vmatprep.subr.mxu1 %v3335_v0  ;;  %v3468_v24 = vld [vmem:[#allocation2 + $0x5a0] sm:$0xff]  ;;  %v3587_v0 = vld [vmem:[#allocation2 + $0x958] sm:$0xff] }
 0x561   :  { %3865 = vmatpush2.msra.mxu0 %v3451_v27  ;;  %3977 = vmatpush1.msra.mxu1 %v3334_v29  ;;  %v3467_v27 = vld [vmem:[#allocation2 + $0x598] sm:$0xff]  ;;  %v3586_v29 = vld [vmem:[#allocation2 + $0x950] sm:$0xff] }
 0x562   :  { %3866 = vmatprep.subr.mxu0 %v3445_v31  ;;  %3978 = vmatprep.subr.mxu1 %v3328_v10  ;;  %v3461_v31 = vld [vmem:[#allocation2 + $0x568] sm:$0xff]  ;;  %v3580_v10 = vld [vmem:[#allocation2 + $0x920] sm:$0xff] }
 0x563   :  { %3867 = vmatpush2.msra.mxu0 %v3444_v12  ;;  %3979 = vmatpush1.msra.mxu1 %v3327_v35  ;;  %v3460_v12 = vld [vmem:[#allocation2 + $0x560] sm:$0xff]  ;;  %v3579_v35 = vld [vmem:[#allocation2 + $0x918] sm:$0xff] }
 0x564   :  { %3868 = vmatprep.subr.mxu0 %v3438_v37  ;;  %3980 = vmatprep.subr.mxu1 %v3321_v44  ;;  %v3454_v37 = vld [vmem:[#allocation2 + $0x530] sm:$0xff]  ;;  %v3573_v44 = vld [vmem:[#allocation2 + $0x8e8] sm:$0xff] }
 0x565   :  { %3869 = vmatpush2.msra.mxu0 %v3437_v22  ;;  %3981 = vmatpush1.msra.mxu1 %v3320_v28  ;;  %v3453_v22 = vld [vmem:[#allocation2 + $0x528] sm:$0xff]  ;;  %v3572_v28 = vld [vmem:[#allocation2 + $0x8e0] sm:$0xff] }
 0x566   :  { %3870 = vmatprep.subr.mxu0 %v3431_v46  ;;  %3982 = vmatprep.subr.mxu1 %v3314_v47  ;;  %v3447_v46 = vld [vmem:[#allocation2 + $0x4f8] sm:$0xff]  ;;  %v3566_v47 = vld [vmem:[#allocation2 + $0x8b0] sm:$0xff] }
 0x567   :  { %3871 = vmatpush2.msra.mxu0 %v3430_v48  ;;  %3983 = vmatpush1.msra.mxu1 %v3313_v49  ;;  %v3446_v48 = vld [vmem:[#allocation2 + $0x4f0] sm:$0xff]  ;;  %v3565_v49 = vld [vmem:[#allocation2 + $0x8a8] sm:$0xff] }
 0x568   :  { %3872 = vmatprep.subr.mxu0 %v3424_v61  ;;  %3984 = vmatprep.subr.mxu1 %v3307_v36  ;;  %v3440_v61 = vld [vmem:[#allocation2 + $0x4c0] sm:$0xff]  ;;  %v3559_v36 = vld [vmem:[#allocation2 + $0x878] sm:$0xff] }
 0x569   :  { %3873 = vmatpush2.msra.mxu0 %v3423_v45  ;;  %3985 = vmatpush1.msra.mxu1 %v3306_v51  ;;  %v3439_v45 = vld [vmem:[#allocation2 + $0x4b8] sm:$0xff]  ;;  %v3558_v51 = vld [vmem:[#allocation2 + $0x870] sm:$0xff] }
 0x56a   :  { %3874 = vmatprep.subr.mxu0 %v3417_v34  ;;  %3986 = vmatprep.subr.mxu1 %v3300_v53  ;;  %v3433_v34 = vld [vmem:[#allocation2 + $0x488] sm:$0xff]  ;;  %v3552_v53 = vld [vmem:[#allocation2 + $0x840] sm:$0xff] }
 0x56b   :  { %3875 = vmatpush2.msra.mxu0 %v3416_v41  ;;  %3987 = vmatpush1.msra.mxu1 %v3299_v54  ;;  %v3432_v41 = vld [vmem:[#allocation2 + $0x480] sm:$0xff]  ;;  %v3551_v54 = vld [vmem:[#allocation2 + $0x838] sm:$0xff] }
 0x56c   :  { %3876 = vmatprep.subr.mxu0 %v3410_v50  ;;  %3988 = vmatprep.subr.mxu1 %v3293_v58  ;;  %v3426_v50 = vld [vmem:[#allocation2 + $0x450] sm:$0xff]  ;;  %v3545_v58 = vld [vmem:[#allocation2 + $0x808] sm:$0xff] }
 0x56d   :  { %3877 = vmatpush2.msra.mxu0 %v3409_v55  ;;  %3989 = vmatpush1.msra.mxu1 %v3292_v57  ;;  %v3425_v55 = vld [vmem:[#allocation2 + $0x448] sm:$0xff]  ;;  %v3544_v57 = vld [vmem:[#allocation2 + $0x800] sm:$0xff] }
 0x56e   :  { %3878 = vmatprep.subr.mxu0 %v3403_v59  ;;  %3990 = vmatprep.subr.mxu1 %v3510_v62  ;;  %v3419_v59 = vld [vmem:[#allocation2 + $0x418] sm:$0xff]  ;;  %v3538_v62 = vld [vmem:[#allocation2 + $0x7d0] sm:$0xff] }
 0x56f   :  { %3879 = vmatpush2.msra.mxu0 %v3402_v25  ;;  %3991 = vmatpush2.msra.mxu1 %v3509_v4  ;;  %v3418_v25 = vld [vmem:[#allocation2 + $0x410] sm:$0xff]  ;;  %v3537_v4 = vld [vmem:[#allocation2 + $0x7c8] sm:$0xff] }
 0x570   :  { %3881 = vmatmul.mubr.f32.vlgmr.msra.gmra.mxu0 %v10240_v63  ;;  %3992 = vmatprep.subr.mxu1 %v3503_v9  ;;  %v3412_v9 = vld [vmem:[#allocation2 + $0x3e0] sm:$0xff] }
 0x571   :  { %4029 = vmatprep.subr.mxu0 %v3622_v3  ;;  %3993 = vmatpush2.msra.mxu1 %v3502_v42  ;;  %v3531_v3 = vld [vmem:[#allocation2 + $0x798] sm:$0xff] }
 0x572   :  { %4030 = vmatpush1.msra.mxu0 %v3621_v52  ;;  %6143 = vmatprep.mubr.msk.f32.mxu0 %vm2972_vm2, %v10245_v39  ;;  %v3411_v42 = vld [vmem:[#allocation2 + $0x3d8] sm:$0xff]  ;;  %v3530_v52 = vld [vmem:[#allocation2 + $0x790] sm:$0xff] }
 0x573   :  { %3994 = vmatprep.subr.mxu1 %v3496_v40  ;;  %4031 = vmatprep.subr.mxu0 %v3615_v11  ;;  %v3405_v40 = vld [vmem:[#allocation2 + $0x3a8] sm:$0xff]  ;;  %v3524_v11 = vld [vmem:[#allocation2 + $0x760] sm:$0xff] }
 0x574   :  { %3995 = vmatpush2.msra.mxu1 %v3495_v1  ;;  %4032 = vmatpush1.msra.mxu0 %v3614_v32  ;;  %v3404_v1 = vld [vmem:[#allocation2 + $0x3a0] sm:$0xff]  ;;  %v3523_v32 = vld [vmem:[#allocation2 + $0x758] sm:$0xff] }
 0x575   :  { %3996 = vmatprep.subr.mxu1 %v3489_v60  ;;  %4033 = vmatprep.subr.mxu0 %v3608_v13  ;;  %v3517_v60 = vld [vmem:[#allocation2 + $0x728] sm:$0xff]  ;;  %v3516_v13 = vld [vmem:[#allocation2 + $0x720] sm:$0xff] }
 0x576   :  { %3997 = vmatpush2.msra.mxu1 %v3488_v15  ;;  %4034 = vmatpush1.msra.mxu0 %v3607_v16  ;;  %v3623_v15 = vld [vmem:[#allocation2 + $0xa78] sm:$0xff]  ;;  %v3629_v16 = vld [vmem:[#allocation2 + $0xaa8] sm:$0xff] }
 0x577   :  { %3998 = vmatprep.subr.mxu1 %v3482_v18  ;;  %4035 = vmatprep.subr.mxu0 %v3601_v19  ;;  %v3628_v18 = vld [vmem:[#allocation2 + $0xaa0] sm:$0xff] }
 0x578   :  { %3999 = vmatpush2.msra.mxu1 %v3481_v21  ;;  %4036 = vmatpush1.msra.mxu0 %v3600_v23  ;;  %v3616_v19 = vld [vmem:[#allocation2 + $0xa40] sm:$0xff]  ;;  %v3511_v21 = vld [vmem:[#allocation2 + $0x6f8] sm:$0xff] }
 0x579   :  { %4000 = vmatprep.subr.mxu1 %v3475_v7  ;;  %4037 = vmatprep.subr.mxu0 %v3594_v43  ;;  %v3399_v23 = vld [vmem:[#allocation2 + $0x378] sm:$0xff]  ;;  %v3609_v7 = vld [vmem:[#allocation2 + $0xa08] sm:$0xff]  ;;  %v3504_v43 = vld [vmem:[#allocation2 + $0x6c0] sm:$0xff] }
 0x57a   :  { %4001 = vmatpush2.msra.mxu1 %v3474_v30  ;;  %4038 = vmatpush1.msra.mxu0 %v3593_v33  ;;  %v3392_v30 = vld [vmem:[#allocation2 + $0x340] sm:$0xff]  ;;  %v3602_v33 = vld [vmem:[#allocation2 + $0x9d0] sm:$0xff] }
 0x57b   :  { %4002 = vmatprep.subr.mxu1 %v3468_v24  ;;  %4039 = vmatprep.subr.mxu0 %v3587_v0  ;;  %v3385_v24 = vld [vmem:[#allocation2 + $0x308] sm:$0xff]  ;;  %v3595_v0 = vld [vmem:[#allocation2 + $0x998] sm:$0xff] }
 0x57c   :  { %4003 = vmatpush2.msra.mxu1 %v3467_v27  ;;  %4040 = vmatpush1.msra.mxu0 %v3586_v29  ;;  %v3490_v27 = vld [vmem:[#allocation2 + $0x650] sm:$0xff] }
 0x57d   :  { %4004 = vmatprep.subr.mxu1 %v3461_v31  ;;  %4041 = vmatprep.subr.mxu0 %v3580_v10  ;;  %v3378_v29 = vld [vmem:[#allocation2 + $0x2d0] sm:$0xff]  ;;  %v3588_v31 = vld [vmem:[#allocation2 + $0x960] sm:$0xff]  ;;  %v3483_v10 = vld [vmem:[#allocation2 + $0x618] sm:$0xff] }
 0x57e   :  { %4005 = vmatpush2.msra.mxu1 %v3460_v12  ;;  %4042 = vmatpush1.msra.mxu0 %v3579_v35  ;;  %v3581_v12 = vld [vmem:[#allocation2 + $0x928] sm:$0xff]  ;;  %v3476_v35 = vld [vmem:[#allocation2 + $0x5e0] sm:$0xff] }
 0x57f   :  { %4006 = vmatprep.subr.mxu1 %v3454_v37  ;;  %4043 = vmatprep.subr.mxu0 %v3573_v44  ;;  %v3364_v37 = vld [vmem:[#allocation2 + $0x260] sm:$0xff]  ;;  %v3574_v44 = vld [vmem:[#allocation2 + $0x8f0] sm:$0xff] }
 0x580   :  { %4007 = vmatpush2.msra.mxu1 %v3453_v22  ;;  %4044 = vmatpush1.msra.mxu0 %v3572_v28  ;;  %v3469_v22 = vld [vmem:[#allocation2 + $0x5a8] sm:$0xff] }
 0x581   :  { %4008 = vmatprep.subr.mxu1 %v3447_v46  ;;  %4045 = vmatprep.subr.mxu0 %v3566_v47  ;;  %v3357_v28 = vld [vmem:[#allocation2 + $0x228] sm:$0xff]  ;;  %v3567_v46 = vld [vmem:[#allocation2 + $0x8b8] sm:$0xff]  ;;  %v3462_v47 = vld [vmem:[#allocation2 + $0x570] sm:$0xff] }
 0x582   :  { %4009 = vmatpush2.msra.mxu1 %v3446_v48  ;;  %4046 = vmatpush1.msra.mxu0 %v3565_v49  ;;  %v3350_v48 = vld [vmem:[#allocation2 + $0x1f0] sm:$0xff]  ;;  %v3560_v49 = vld [vmem:[#allocation2 + $0x880] sm:$0xff] }
 0x583   :  { %4010 = vmatprep.subr.mxu1 %v3440_v61  ;;  %4047 = vmatprep.subr.mxu0 %v3559_v36  ;;  %v3455_v61 = vld [vmem:[#allocation2 + $0x538] sm:$0xff] }
 0x584   :  { %4011 = vmatpush2.msra.mxu1 %v3439_v45  ;;  %4048 = vmatpush1.msra.mxu0 %v3558_v51  ;;  %v3343_v36 = vld [vmem:[#allocation2 + $0x1b8] sm:$0xff]  ;;  %v3553_v45 = vld [vmem:[#allocation2 + $0x848] sm:$0xff]  ;;  %v3448_v51 = vld [vmem:[#allocation2 + $0x500] sm:$0xff] }
 0x585   :  { %4012 = vmatprep.subr.mxu1 %v3433_v34  ;;  %4049 = vmatprep.subr.mxu0 %v3552_v53  ;;  %v3336_v34 = vld [vmem:[#allocation2 + $0x180] sm:$0xff]  ;;  %v3546_v53 = vld [vmem:[#allocation2 + $0x810] sm:$0xff] }
 0x586   :  { %4013 = vmatpush2.msra.mxu1 %v3432_v41  ;;  %4050 = vmatpush1.msra.mxu0 %v3551_v54  ;;  %v3441_v41 = vld [vmem:[#allocation2 + $0x4c8] sm:$0xff] }
 0x587   :  { %4014 = vmatprep.subr.mxu1 %v3426_v50  ;;  %4051 = vmatprep.subr.mxu0 %v3545_v58  ;;  %v3329_v54 = vld [vmem:[#allocation2 + $0x148] sm:$0xff]  ;;  %v3539_v50 = vld [vmem:[#allocation2 + $0x7d8] sm:$0xff]  ;;  %v3434_v58 = vld [vmem:[#allocation2 + $0x490] sm:$0xff] }
 0x588   :  { %4015 = vmatpush2.msra.mxu1 %v3425_v55  ;;  %4052 = vmatpush1.msra.mxu0 %v3544_v57  ;;  %v3322_v55 = vld [vmem:[#allocation2 + $0x110] sm:$0xff]  ;;  %v3532_v57 = vld [vmem:[#allocation2 + $0x7a0] sm:$0xff] }
 0x589   :  { %4016 = vmatprep.subr.mxu1 %v3419_v59  ;;  %4053 = vmatprep.subr.mxu0 %v3538_v62  ;;  %v3427_v59 = vld [vmem:[#allocation2 + $0x458] sm:$0xff] }
 0x58a   :  { %4017 = vmatpush2.msra.mxu1 %v3418_v25  ;;  %4054 = vmatpush1.msra.mxu0 %v3537_v4  ;;  %v3315_v62 = vld [vmem:[#allocation2 + $0xd8] sm:$0xff]  ;;  %v3525_v25 = vld [vmem:[#allocation2 + $0x768] sm:$0xff]  ;;  %v3420_v4 = vld [vmem:[#allocation2 + $0x420] sm:$0xff] }
 0x58b   :  { %4018 = vmatprep.subr.mxu1 %v3412_v9  ;;  %4055 = vmatprep.subr.mxu0 %v3531_v3  ;;  %v3308_v9 = vld [vmem:[#allocation2 + $0xa0] sm:$0xff]  ;;  %v3518_v3 = vld [vmem:[#allocation2 + $0x730] sm:$0xff] }
 0x58c   :  { %4019 = vmatpush2.msra.mxu1 %v3411_v42  ;;  %4056 = vmatpush1.msra.mxu0 %v3530_v52  ;;  %v3413_v42 = vld [vmem:[#allocation2 + $0x3e8] sm:$0xff] }
 0x58d   :  { %4020 = vmatprep.subr.mxu1 %v3405_v40  ;;  %4057 = vmatprep.subr.mxu0 %v3524_v11  ;;  %v3301_v52 = vld [vmem:[#allocation2 + $0x68] sm:$0xff]  ;;  %v3630_v40 = vld [vmem:[#allocation2 + $0xab0] sm:$0xff] }
 0x58e   :  { %4021 = vmatpush2.msra.mxu1 %v3404_v1  ;;  %4058 = vmatpush1.msra.mxu0 %v3523_v32  ;;  %v3406_v11 = vld [vmem:[#allocation2 + $0x3b0] sm:$0xff]  ;;  %v4577_v32 = vld [vmem:[#allocation4 + $0xa50] sm:$0xff] }
 0x58f   :  { %4023 = vmatmul.mubr.f32.vlgmr.msra.gmra.mxu1 %v10240_v63  ;;  %4059 = vmatprep.subr.mxu0 %v3517_v60  ;;  %v3294_v1 = vld [vmem:[#allocation2 + $0x30] sm:$0xff]  ;;  %v4353_v60 = vld [vmem:[#allocation4 + $0x350] sm:$0xff] }
 0x590   :  { %4170 = vmatprep.subr.mxu1 %v6529_v17  ;;  %4060 = vmatpush1.msra.mxu0 %v3516_v13  ;;  %v4352_v13 = vld [vmem:[#allocation4 + $0x348] sm:$0xff] }
 0x591   :  { %4171 = vmatpush1.msra.mxu1 %v3623_v15  ;;  %6144 = vmatprep.mubr.msk.f32.mxu1 %vm2972_vm2, %v10245_v39  ;;  %v3497_v39 = vld [vmem:[#allocation2 + $0x688] sm:$0xff]  ;;  %v4576_v15 = vld [vmem:[#allocation4 + $0xa48] sm:$0xff] }
 0x592   :  { %4091 = vmatprep.subr.mxu0 %v3629_v16  ;;  %4172 = vmatprep.subr.mxu1 %v6529_v17  ;;  %v4346_v16 = vld [vmem:[#allocation4 + $0x318] sm:$0xff] }
 0x593   :  { %4092 = vmatpush2.msra.mxu0 %v3628_v18  ;;  %4173 = vmatpush1.msra.mxu1 %v3616_v19  ;;  %v4570_v18 = vld [vmem:[#allocation4 + $0xa18] sm:$0xff]  ;;  %v4345_v19 = vld [vmem:[#allocation4 + $0x310] sm:$0xff] }
 0x594   :  { %4094 = vmatmul.mubr.f32.vlgmr.msra.gmra.mxu0 %v10247_v14  ;;  %6294 = vmatprep.subr.mxu0 %v3511_v21  ;;  %v4569_v21 = vld [vmem:[#allocation4 + $0xa10] sm:$0xff] }
 0x595   :  { %4174 = vmatprep.subr.mxu1 %v6529_v17  ;;  %6295 = vmatpush3.msra.mxu0 %v3399_v23  ;;  %v4339_v23 = vld [vmem:[#allocation4 + $0x2e0] sm:$0xff] }
 0x596   :  { %4164 = vmatprep.mubr.f32.mxu0 %v10237_v26  ;;  %4175 = vmatpush1.msra.mxu1 %v3609_v7  ;;  %v3371_v26 = vld [vmem:[#allocation2 + $0x298] sm:$0xff] }
 0x597   :  { %6296 = vmatprep.subr.mxu0 %v3504_v43  ;;  %4176 = vmatprep.subr.mxu1 %v6529_v17  ;;  %v4563_v7 = vld [vmem:[#allocation4 + $0x9e0] sm:$0xff]  ;;  %v4338_v43 = vld [vmem:[#allocation4 + $0x2d8] sm:$0xff] }
 0x598   :  { %6297 = vmatpush3.msra.mxu0 %v3392_v30  ;;  %4177 = vmatpush1.msra.mxu1 %v3602_v33  ;;  %v4562_v30 = vld [vmem:[#allocation4 + $0x9d8] sm:$0xff]  ;;  %v4556_v33 = vld [vmem:[#allocation4 + $0x9a8] sm:$0xff] }
 0x599   :  { %6298 = vmatprep.subr.mxu0 %v3497_v39  ;;  %4178 = vmatprep.subr.mxu1 %v6529_v17  ;;  %v4331_v39 = vld [vmem:[#allocation4 + $0x2a0] sm:$0xff] }
 0x59a   :  { %6299 = vmatpush3.msra.mxu0 %v3385_v24  ;;  %4179 = vmatpush1.msra.mxu1 %v3595_v0  ;;  %v4555_v24 = vld [vmem:[#allocation4 + $0x9a0] sm:$0xff]  ;;  %v4549_v0 = vld [vmem:[#allocation4 + $0x970] sm:$0xff] }
 0x59b   :  { %6300 = vmatprep.subr.mxu0 %v3490_v27  ;;  %4180 = vmatprep.subr.mxu1 %v6529_v17  ;;  %v4324_v27 = vld [vmem:[#allocation4 + $0x268] sm:$0xff] }
 0x59c   :  { %6301 = vmatpush3.msra.mxu0 %v3378_v29  ;;  %4181 = vmatpush1.msra.mxu1 %v3588_v31  ;;  %v4548_v29 = vld [vmem:[#allocation4 + $0x968] sm:$0xff]  ;;  %v4318_v31 = vld [vmem:[#allocation4 + $0x238] sm:$0xff] }
 0x59d   :  { %6302 = vmatprep.subr.mxu0 %v3483_v10  ;;  %4182 = vmatprep.subr.mxu1 %v6529_v17  ;;  %v4542_v10 = vld [vmem:[#allocation4 + $0x938] sm:$0xff] }
 0x59e   :  { %6303 = vmatpush3.msra.mxu0 %v3371_v26  ;;  %4183 = vmatpush1.msra.mxu1 %v3581_v12  ;;  %v4317_v26 = vld [vmem:[#allocation4 + $0x230] sm:$0xff] }
 0x59f   :  { %6304 = vmatprep.subr.mxu0 %v3476_v35  ;;  %4184 = vmatprep.subr.mxu1 %v6529_v17  ;;  %v4541_v12 = vld [vmem:[#allocation4 + $0x930] sm:$0xff]  ;;  %v4311_v35 = vld [vmem:[#allocation4 + $0x200] sm:$0xff] }
 0x5a0   :  { %6305 = vmatpush3.msra.mxu0 %v3364_v37  ;;  %4185 = vmatpush1.msra.mxu1 %v3574_v44  ;;  %v4535_v37 = vld [vmem:[#allocation4 + $0x900] sm:$0xff]  ;;  %v4310_v44 = vld [vmem:[#allocation4 + $0x1f8] sm:$0xff] }
 0x5a1   :  { %6306 = vmatprep.subr.mxu0 %v3469_v22  ;;  %4186 = vmatprep.subr.mxu1 %v6529_v17  ;;  %v4534_v22 = vld [vmem:[#allocation4 + $0x8f8] sm:$0xff] }
 0x5a2   :  { %6307 = vmatpush3.msra.mxu0 %v3357_v28  ;;  %4187 = vmatpush1.msra.mxu1 %v3567_v46  ;;  %v4304_v28 = vld [vmem:[#allocation4 + $0x1c8] sm:$0xff] }
 0x5a3   :  { %6308 = vmatprep.subr.mxu0 %v3462_v47  ;;  %4188 = vmatprep.subr.mxu1 %v6529_v17  ;;  %v4528_v46 = vld [vmem:[#allocation4 + $0x8c8] sm:$0xff]  ;;  %v4303_v47 = vld [vmem:[#allocation4 + $0x1c0] sm:$0xff] }
 0x5a4   :  { %6309 = vmatpush3.msra.mxu0 %v3350_v48  ;;  %4189 = vmatpush1.msra.mxu1 %v3560_v49  ;;  %v4527_v48 = vld [vmem:[#allocation4 + $0x8c0] sm:$0xff]  ;;  %v4297_v49 = vld [vmem:[#allocation4 + $0x190] sm:$0xff] }
 0x5a5   :  { %6310 = vmatprep.subr.mxu0 %v3455_v61  ;;  %4190 = vmatprep.subr.mxu1 %v6529_v17  ;;  %v4521_v61 = vld [vmem:[#allocation4 + $0x890] sm:$0xff] }
 0x5a6   :  { %6311 = vmatpush3.msra.mxu0 %v3343_v36  ;;  %4191 = vmatpush1.msra.mxu1 %v3553_v45  ;;  %v4296_v36 = vld [vmem:[#allocation4 + $0x188] sm:$0xff] }
 0x5a7   :  { %6312 = vmatprep.subr.mxu0 %v3448_v51  ;;  %4192 = vmatprep.subr.mxu1 %v6529_v17  ;;  %v4520_v45 = vld [vmem:[#allocation4 + $0x888] sm:$0xff]  ;;  %v4290_v51 = vld [vmem:[#allocation4 + $0x158] sm:$0xff] }
 0x5a8   :  { %6313 = vmatpush3.msra.mxu0 %v3336_v34  ;;  %4193 = vmatpush1.msra.mxu1 %v3546_v53  ;;  %v4514_v34 = vld [vmem:[#allocation4 + $0x858] sm:$0xff]  ;;  %v4289_v53 = vld [vmem:[#allocation4 + $0x150] sm:$0xff] }
 0x5a9   :  { %6314 = vmatprep.subr.mxu0 %v3441_v41  ;;  %4194 = vmatprep.subr.mxu1 %v6529_v17  ;;  %v4513_v41 = vld [vmem:[#allocation4 + $0x850] sm:$0xff] }
 0x5aa   :  { %6315 = vmatpush3.msra.mxu0 %v3329_v54  ;;  %4195 = vmatpush1.msra.mxu1 %v3539_v50  ;;  %v4283_v54 = vld [vmem:[#allocation4 + $0x120] sm:$0xff] }
 0x5ab   :  { %6316 = vmatprep.subr.mxu0 %v3434_v58  ;;  %4196 = vmatprep.subr.mxu1 %v6529_v17  ;;  %v4507_v50 = vld [vmem:[#allocation4 + $0x820] sm:$0xff]  ;;  %v4282_v58 = vld [vmem:[#allocation4 + $0x118] sm:$0xff] }
 0x5ac   :  { %6317 = vmatpush3.msra.mxu0 %v3322_v55  ;;  %4197 = vmatpush1.msra.mxu1 %v3532_v57  ;;  %v4506_v55 = vld [vmem:[#allocation4 + $0x818] sm:$0xff]  ;;  %v4276_v57 = vld [vmem:[#allocation4 + $0xe8] sm:$0xff] }
 0x5ad   :  { %6318 = vmatprep.subr.mxu0 %v3427_v59  ;;  %4198 = vmatprep.subr.mxu1 %v6529_v17  ;;  %v4500_v59 = vld [vmem:[#allocation4 + $0x7e8] sm:$0xff] }
 0x5ae   :  { %6319 = vmatpush3.msra.mxu0 %v3315_v62  ;;  %4199 = vmatpush1.msra.mxu1 %v3525_v25  ;;  %v4275_v62 = vld [vmem:[#allocation4 + $0xe0] sm:$0xff] }
 0x5af   :  { %6320 = vmatprep.subr.mxu0 %v3420_v4  ;;  %4200 = vmatprep.subr.mxu1 %v6529_v17  ;;  %v4499_v25 = vld [vmem:[#allocation4 + $0x7e0] sm:$0xff]  ;;  %v4269_v4 = vld [vmem:[#allocation4 + $0xb0] sm:$0xff] }
 0x5b0   :  { %6321 = vmatpush3.msra.mxu0 %v3308_v9  ;;  %4201 = vmatpush1.msra.mxu1 %v3518_v3  ;;  %v4493_v9 = vld [vmem:[#allocation4 + $0x7b0] sm:$0xff]  ;;  %v4268_v3 = vld [vmem:[#allocation4 + $0xa8] sm:$0xff] }
 0x5b1   :  { %6322 = vmatprep.subr.mxu0 %v3413_v42  ;;  %4232 = vmatprep.subr.mxu1 %v6529_v17  ;;  %v4492_v42 = vld [vmem:[#allocation4 + $0x7a8] sm:$0xff] }
 0x5b2   :  { %6323 = vmatpush3.msra.mxu0 %v3301_v52  ;;  %4233 = vmatpush2.msra.mxu1 %v3630_v40  ;;  %v4262_v52 = vld [vmem:[#allocation4 + $0x78] sm:$0xff] }
 0x5b3   :  { %6324 = vmatprep.subr.mxu0 %v3406_v11  ;;  %4235 = vmatmul.mubr.f32.vlgmr.msra.gmra.mxu1 %v10247_v14  ;;  %v4332_v14 = vld [vmem:[#allocation4 + $0x2a8] sm:$0xff]  ;;  %v4486_v40 = vld [vmem:[#allocation4 + $0x778] sm:$0xff]  ;;  %v4261_v11 = vld [vmem:[#allocation4 + $0x70] sm:$0xff] }
 0x5b4   :  { %6325 = vmatpush3.msra.mxu0 %v3294_v1  ;;  %5047 = vmatprep.subr.mxu1 %v4577_v32  ;;  %v4485_v1 = vld [vmem:[#allocation4 + $0x770] sm:$0xff]  ;;  %v4255_v32 = vld [vmem:[#allocation4 + $0x40] sm:$0xff] }
 0x5b5   :  { %4165 = vmatmul.mubr.f32.vlgmr.msra.gmra.mxu0 %v10240_v63  ;;  %4976 = vmatprep.subr.mxu0 %v4353_v60  ;;  %v4325_v63 = vld [vmem:[#allocation4 + $0x270] sm:$0xff]  ;;  %v4479_v60 = vld [vmem:[#allocation4 + $0x740] sm:$0xff] }
 0x5b6   :  { %4977 = vmatpush1.msra.mxu0 %v4352_v13  ;;  %5048 = vmatpush1.msra.mxu1 %v4576_v15  ;;  %v4254_v13 = vld [vmem:[#allocation4 + $0x38] sm:$0xff] }
 0x5b7   :  { %4978 = vmatprep.subr.mxu0 %v4346_v16  ;;  %5049 = vmatprep.subr.mxu1 %v4570_v18  ;;  %v4478_v15 = vld [vmem:[#allocation4 + $0x738] sm:$0xff]  ;;  %v4248_v16 = vld [vmem:[#allocation4 + $0x8] sm:$0xff] }
 0x5b8   :  { %4979 = vmatpush1.msra.mxu0 %v4345_v19  ;;  %5050 = vmatpush1.msra.mxu1 %v4569_v21  ;;  %v4472_v18 = vld [vmem:[#allocation4 + $0x708] sm:$0xff]  ;;  %v4247_v19 = vld [vmem:[#allocation4] sm:$0xff] }
 0x5b9   :  { %4980 = vmatprep.subr.mxu0 %v4339_v23  ;;  %5051 = vmatprep.subr.mxu1 %v4563_v7  ;;  %v4471_v21 = vld [vmem:[#allocation4 + $0x700] sm:$0xff]  ;;  %v4465_v23 = vld [vmem:[#allocation4 + $0x6d0] sm:$0xff] }
 0x5ba   :  { %4981 = vmatpush1.msra.mxu0 %v4338_v43  ;;  %5052 = vmatpush1.msra.mxu1 %v4562_v30  ;;  %v4689_v7 = vld [vmem:[#allocation4 + $0xdd0] sm:$0xff]  ;;  %v4464_v43 = vld [vmem:[#allocation4 + $0x6c8] sm:$0xff] }
 0x5bb   :  { %4982 = vmatprep.subr.mxu0 %v4332_v14  ;;  %5053 = vmatprep.subr.mxu1 %v4556_v33  ;;  %v4688_v30 = vld [vmem:[#allocation4 + $0xdc8] sm:$0xff]  ;;  %v4458_v14 = vld [vmem:[#allocation4 + $0x698] sm:$0xff] }
 0x5bc   :  { %4983 = vmatpush1.msra.mxu0 %v4331_v39  ;;  %5054 = vmatpush1.msra.mxu1 %v4555_v24  ;;  %v4682_v33 = vld [vmem:[#allocation4 + $0xd98] sm:$0xff]  ;;  %v4457_v39 = vld [vmem:[#allocation4 + $0x690] sm:$0xff] }
 0x5bd   :  { %4984 = vmatprep.subr.mxu0 %v4325_v63  ;;  %5055 = vmatprep.subr.mxu1 %v4549_v0  ;;  %v4681_v24 = vld [vmem:[#allocation4 + $0xd90] sm:$0xff]  ;;  %v4451_v63 = vld [vmem:[#allocation4 + $0x660] sm:$0xff] }
 0x5be   :  { %4985 = vmatpush1.msra.mxu0 %v4324_v27  ;;  %5056 = vmatpush1.msra.mxu1 %v4548_v29  ;;  %v4675_v0 = vld [vmem:[#allocation4 + $0xd60] sm:$0xff]  ;;  %v4450_v27 = vld [vmem:[#allocation4 + $0x658] sm:$0xff] }
 0x5bf   :  { %4986 = vmatprep.subr.mxu0 %v4318_v31  ;;  %5057 = vmatprep.subr.mxu1 %v4542_v10  ;;  %v4674_v29 = vld [vmem:[#allocation4 + $0xd58] sm:$0xff]  ;;  %v4444_v31 = vld [vmem:[#allocation4 + $0x628] sm:$0xff] }
 0x5c0   :  { %4987 = vmatpush1.msra.mxu0 %v4317_v26  ;;  %5058 = vmatpush1.msra.mxu1 %v4541_v12  ;;  %v4668_v10 = vld [vmem:[#allocation4 + $0xd28] sm:$0xff]  ;;  %v4443_v26 = vld [vmem:[#allocation4 + $0x620] sm:$0xff] }
 0x5c1   :  { %4988 = vmatprep.subr.mxu0 %v4311_v35  ;;  %5059 = vmatprep.subr.mxu1 %v4535_v37  ;;  %v4667_v12 = vld [vmem:[#allocation4 + $0xd20] sm:$0xff]  ;;  %v4437_v35 = vld [vmem:[#allocation4 + $0x5f0] sm:$0xff] }
 0x5c2   :  { %4989 = vmatpush1.msra.mxu0 %v4310_v44  ;;  %5060 = vmatpush1.msra.mxu1 %v4534_v22  ;;  %v4661_v37 = vld [vmem:[#allocation4 + $0xcf0] sm:$0xff]  ;;  %v4436_v44 = vld [vmem:[#allocation4 + $0x5e8] sm:$0xff] }
 0x5c3   :  { %4990 = vmatprep.subr.mxu0 %v4304_v28  ;;  %5061 = vmatprep.subr.mxu1 %v4528_v46  ;;  %v4660_v22 = vld [vmem:[#allocation4 + $0xce8] sm:$0xff]  ;;  %v4430_v28 = vld [vmem:[#allocation4 + $0x5b8] sm:$0xff] }
 0x5c4   :  { %4991 = vmatpush1.msra.mxu0 %v4303_v47  ;;  %5062 = vmatpush1.msra.mxu1 %v4527_v48  ;;  %v4654_v46 = vld [vmem:[#allocation4 + $0xcb8] sm:$0xff]  ;;  %v4429_v47 = vld [vmem:[#allocation4 + $0x5b0] sm:$0xff] }
 0x5c5   :  { %4992 = vmatprep.subr.mxu0 %v4297_v49  ;;  %5063 = vmatprep.subr.mxu1 %v4521_v61  ;;  %v4653_v48 = vld [vmem:[#allocation4 + $0xcb0] sm:$0xff]  ;;  %v4423_v49 = vld [vmem:[#allocation4 + $0x580] sm:$0xff] }
 0x5c6   :  { %4993 = vmatpush1.msra.mxu0 %v4296_v36  ;;  %5064 = vmatpush1.msra.mxu1 %v4520_v45  ;;  %v4647_v61 = vld [vmem:[#allocation4 + $0xc80] sm:$0xff]  ;;  %v4422_v36 = vld [vmem:[#allocation4 + $0x578] sm:$0xff] }
 0x5c7   :  { %4994 = vmatprep.subr.mxu0 %v4290_v51  ;;  %5065 = vmatprep.subr.mxu1 %v4514_v34  ;;  %v4646_v45 = vld [vmem:[#allocation4 + $0xc78] sm:$0xff]  ;;  %v4416_v51 = vld [vmem:[#allocation4 + $0x548] sm:$0xff] }
 0x5c8   :  { %4995 = vmatpush1.msra.mxu0 %v4289_v53  ;;  %5066 = vmatpush1.msra.mxu1 %v4513_v41  ;;  %v4640_v34 = vld [vmem:[#allocation4 + $0xc48] sm:$0xff]  ;;  %v4415_v53 = vld [vmem:[#allocation4 + $0x540] sm:$0xff] }
 0x5c9   :  { %4996 = vmatprep.subr.mxu0 %v4283_v54  ;;  %5067 = vmatprep.subr.mxu1 %v4507_v50  ;;  %v4639_v41 = vld [vmem:[#allocation4 + $0xc40] sm:$0xff]  ;;  %v4409_v54 = vld [vmem:[#allocation4 + $0x510] sm:$0xff] }
 0x5ca   :  { %4997 = vmatpush1.msra.mxu0 %v4282_v58  ;;  %5068 = vmatpush1.msra.mxu1 %v4506_v55  ;;  %v4633_v50 = vld [vmem:[#allocation4 + $0xc10] sm:$0xff]  ;;  %v4408_v58 = vld [vmem:[#allocation4 + $0x508] sm:$0xff] }
 0x5cb   :  { %4998 = vmatprep.subr.mxu0 %v4276_v57  ;;  %5069 = vmatprep.subr.mxu1 %v4500_v59  ;;  %v6139_v55 = vld [vmem:[%s10410_s7 + $0x4] ss:$8 sm:$0xf] }
 0x5cc   :  { %4999 = vmatpush1.msra.mxu0 %v4275_v62  ;;  %5070 = vmatpush1.msra.mxu1 %v4499_v25  ;;  %v4632_v57 = vld [vmem:[#allocation4 + $0xc08] sm:$0xff]  ;;  %v4402_v59 = vld [vmem:[#allocation4 + $0x4d8] sm:$0xff] }
 0x5cd   :  { %5000 = vmatprep.subr.mxu0 %v4269_v4  ;;  %5071 = vmatprep.subr.mxu1 %v4493_v9  ;;  %v6140_v62 = vld [vmem:[%s10410_s7 + $0x4] ss:$8 sm:$0x70] }
 0x5ce   :  { %5001 = vmatpush1.msra.mxu0 %v4268_v3  ;;  %5072 = vmatpush1.msra.mxu1 %v4492_v42  ;;  %v4626_v25 = vld [vmem:[#allocation4 + $0xbd8] sm:$0xff]  ;;  %v4401_v4 = vld [vmem:[#allocation4 + $0x4d0] sm:$0xff]  ;;  %v4395_v3 = vld [vmem:[#allocation4 + $0x4a0] sm:$0xff] }
 0x5cf   :  { %5002 = vmatprep.subr.mxu0 %v4262_v52  ;;  %5073 = vmatprep.subr.mxu1 %v4486_v40  ;;  %v4625_v9 = vld [vmem:[#allocation4 + $0xbd0] sm:$0xff]  ;;  %v4619_v42 = vld [vmem:[#allocation4 + $0xba0] sm:$0xff]  ;;  %v10290_v52 = vor.u32 %v6140_v62, %v6139_v55  ;;  %v4394_v40 = vld [vmem:[#allocation4 + $0x498] sm:$0xff] }
 0x5d0   :  { %5003 = vmatpush1.msra.mxu0 %v4261_v11  ;;  %5074 = vmatpush1.msra.mxu1 %v4485_v1  ;;  %v4618_v11 = vld [vmem:[#allocation4 + $0xb98] sm:$0xff]  ;;  %v4388_v1 = vld [vmem:[#allocation4 + $0x468] sm:$0xff]  ;;  %v4765_v55 = vld [vmem:[#allocation4 + $0x1030] sm:$0xff] }
 0x5d1   :  { %5004 = vmatprep.subr.mxu0 %v4255_v32  ;;  %5075 = vmatprep.subr.mxu1 %v4479_v60  ;;  %v4612_v32 = vld [vmem:[#allocation4 + $0xb68] sm:$0xff]  ;;  %v4387_v60 = vld [vmem:[#allocation4 + $0x460] sm:$0xff] }
 0x5d2   :  { %5005 = vmatpush1.msra.mxu0 %v4254_v13  ;;  %5076 = vmatpush1.msra.mxu1 %v4478_v15  ;;  %v4611_v13 = vld [vmem:[#allocation4 + $0xb60] sm:$0xff]  ;;  %v4752_v62 = vld [vmem:[#allocation4 + $0xfc8] sm:$0xff] }
 0x5d3   :  { %5006 = vmatprep.subr.mxu0 %v4248_v16  ;;  %5077 = vmatprep.subr.mxu1 %v4472_v18  ;;  %v4381_v16 = vld [vmem:[#allocation4 + $0x430] sm:$0xff] }
 0x5d4   :  { %5007 = vmatpush1.msra.mxu0 %v4247_v19  ;;  %5078 = vmatpush1.msra.mxu1 %v4471_v21  ;;  %v4605_v18 = vld [vmem:[#allocation4 + $0xb30] sm:$0xff]  ;;  %v3639_v19 = vrot.slane %v10290_v52, %v8122_v8  ;;  %v4380_v21 = vld [vmem:[#allocation4 + $0x428] sm:$0xff] }
 0x5d5   :  { %5008 = vmatprep.subr.mxu0 %v4465_v23  ;;  %5079 = vmatprep.subr.mxu1 %v4689_v7  ;;  %v4604_v23 = vld [vmem:[#allocation4 + $0xb28] sm:$0xff]  ;;  %v3643_v7 = vrot.slane %v10290_v52, %v8602_v56 }
 0x5d6   :  { %5009 = vmatpush2.msra.mxu0 %v4464_v43  ;;  %5080 = vmatpush2.msra.mxu1 %v4688_v30  ;;  %v4374_v43 = vld [vmem:[#allocation4 + $0x3f8] sm:$0xff] }
 0x5d7   :  { %5010 = vmatprep.subr.mxu0 %v4458_v14  ;;  %5081 = vmatprep.subr.mxu1 %v4682_v33  ;;  %v4598_v30 = vld [vmem:[#allocation4 + $0xaf8] sm:$0xff]  ;;  %v4373_v33 = vld [vmem:[#allocation4 + $0x3f0] sm:$0xff] }
 0x5d8   :  { %5011 = vmatpush2.msra.mxu0 %v4457_v39  ;;  %5082 = vmatpush2.msra.mxu1 %v4681_v24  ;;  %v4597_v39 = vld [vmem:[#allocation4 + $0xaf0] sm:$0xff]  ;;  %v4367_v24 = vld [vmem:[#allocation4 + $0x3c0] sm:$0xff] }
 0x5d9   :  { %5012 = vmatprep.subr.mxu0 %v4451_v63  ;;  %5083 = vmatprep.subr.mxu1 %v4675_v0  ;;  %v4591_v63 = vld [vmem:[#allocation4 + $0xac0] sm:$0xff] }
 0x5da   :  { %5013 = vmatpush2.msra.mxu0 %v4450_v27  ;;  %5084 = vmatpush2.msra.mxu1 %v4674_v29  ;;  %v4366_v29 = vld [vmem:[#allocation4 + $0x3b8] sm:$0xff] }
 0x5db   :  { %5014 = vmatprep.subr.mxu0 %v4444_v31  ;;  %5085 = vmatprep.subr.mxu1 %v4668_v10  ;;  %v4590_v31 = vld [vmem:[#allocation4 + $0xab8] sm:$0xff] }
 0x5dc   :  { %5015 = vmatpush2.msra.mxu0 %v4443_v26  ;;  %5086 = vmatpush2.msra.mxu1 %v4667_v12  ;;  %v4360_v26 = vld [vmem:[#allocation4 + $0x388] sm:$0xff] }
 0x5dd   :  { %5016 = vmatprep.subr.mxu0 %v4437_v35  ;;  %5087 = vmatprep.subr.mxu1 %v4661_v37  ;;  %v4584_v12 = vld [vmem:[#allocation4 + $0xa88] sm:$0xff] }
 0x5de   :  { %5017 = vmatpush2.msra.mxu0 %v4436_v44  ;;  %5088 = vmatpush2.msra.mxu1 %v4660_v22  ;;  %v4359_v44 = vld [vmem:[#allocation4 + $0x380] sm:$0xff] }
 0x5df   :  { %5018 = vmatprep.subr.mxu0 %v4430_v28  ;;  %5089 = vmatprep.subr.mxu1 %v4654_v46  ;;  %v4583_v22 = vld [vmem:[#allocation4 + $0xa80] sm:$0xff]  ;;  %v4801_v46 = vld [vmem:[#allocation4 + $0x1150] sm:$0xff] }
 0x5e0   :  { %5019 = vmatpush2.msra.mxu0 %v4429_v47  ;;  %5090 = vmatpush2.msra.mxu1 %v4653_v48 }
 0x5e1   :  { %5020 = vmatprep.subr.mxu0 %v4423_v49  ;;  %5091 = vmatprep.subr.mxu1 %v4647_v61  ;;  %v4800_v49 = vld [vmem:[#allocation4 + $0x1148] sm:$0xff]  ;;  %v4794_v61 = vld [vmem:[#allocation4 + $0x1118] sm:$0xff] }
 0x5e2   :  { %5021 = vmatpush2.msra.mxu0 %v4422_v36  ;;  %5092 = vmatpush2.msra.mxu1 %v4646_v45  ;;  %v4793_v36 = vld [vmem:[#allocation4 + $0x1110] sm:$0xff]  ;;  %v4787_v45 = vld [vmem:[#allocation4 + $0x10e0] sm:$0xff] }
 0x5e3   :  { %5022 = vmatprep.subr.mxu0 %v4416_v51  ;;  %5093 = vmatprep.subr.mxu1 %v4640_v34  ;;  %v4786_v51 = vld [vmem:[#allocation4 + $0x10d8] sm:$0xff]  ;;  %v4780_v34 = vld [vmem:[#allocation4 + $0x10a8] sm:$0xff] }
 0x5e4   :  { %5023 = vmatpush2.msra.mxu0 %v4415_v53  ;;  %5094 = vmatpush2.msra.mxu1 %v4639_v41  ;;  %v4927_v53 = vld [vmem:[#allocation4 + $0x1540] sm:$0xff] }
 0x5e5   :  { %5024 = vmatprep.subr.mxu0 %v4409_v54  ;;  %5095 = vmatprep.subr.mxu1 %v4633_v50  ;;  %v4779_v41 = vld [vmem:[#allocation4 + $0x10a0] sm:$0xff]  ;;  %v4773_v54 = vld [vmem:[#allocation4 + $0x1070] sm:$0xff]  ;;  %v4772_v50 = vld [vmem:[#allocation4 + $0x1068] sm:$0xff] }
 0x5e6   :  { %5025 = vmatpush2.msra.mxu0 %v4408_v58  ;;  %5096 = vmatpush2.msra.mxu1 %v4632_v57  ;;  %v4766_v58 = vld [vmem:[#allocation4 + $0x1038] sm:$0xff]  ;;  %v4759_v57 = vld [vmem:[#allocation4 + $0x1000] sm:$0xff] }
 0x5e7   :  { %5026 = vmatprep.subr.mxu0 %v4402_v59  ;;  %5097 = vmatprep.subr.mxu1 %v4626_v25  ;;  %v4758_v59 = vld [vmem:[#allocation4 + $0xff8] sm:$0xff]  ;;  %v4751_v25 = vld [vmem:[#allocation4 + $0xfc0] sm:$0xff] }
 0x5e8   :  { %5027 = vmatpush2.msra.mxu0 %v4401_v4  ;;  %5098 = vmatpush2.msra.mxu1 %v4625_v9  ;;  %v4745_v4 = vld [vmem:[#allocation4 + $0xf90] sm:$0xff]  ;;  %v4744_v9 = vld [vmem:[#allocation4 + $0xf88] sm:$0xff] }
 0x5e9   :  { %5028 = vmatprep.subr.mxu0 %v4395_v3  ;;  %5099 = vmatprep.subr.mxu1 %v4619_v42  ;;  %v4738_v3 = vld [vmem:[#allocation4 + $0xf58] sm:$0xff]  ;;  %v4737_v42 = vld [vmem:[#allocation4 + $0xf50] sm:$0xff] }
 0x5ea   :  { %v3740_v15 = vpop.f32.mrf.mxu1  ;;  %5029 = vmatpush2.msra.mxu0 %v4394_v40  ;;  %5100 = vmatpush2.msra.mxu1 %v4618_v11  ;;  %v4731_v40 = vld [vmem:[#allocation4 + $0xf20] sm:$0xff]  ;;  %v4730_v11 = vld [vmem:[#allocation4 + $0xf18] sm:$0xff] }
 0x5eb   :  { %5030 = vmatprep.subr.mxu0 %v4388_v1  ;;  %5101 = vmatprep.subr.mxu1 %v4612_v32  ;;  %v3741_v0 = vadd.f32 %v3740_v15, %v3639_v19  ;;  %v4724_v1 = vld [vmem:[#allocation4 + $0xee8] sm:$0xff]  ;;  %v4723_v32 = vld [vmem:[#allocation4 + $0xee0] sm:$0xff]  ;;  %v4710_v15 = vld [vmem:[#allocation4 + $0xe78] sm:$0xff] }
 0x5ec   :  { %5031 = vmatpush2.msra.mxu0 %v4387_v60  ;;  %5102 = vmatpush2.msra.mxu1 %v4611_v13  ;;  %v3742_v14 = vpop.f32.mrf.mxu1  ;;  %v4717_v60 = vld [vmem:[#allocation4 + $0xeb0] sm:$0xff]  ;;  %v4716_v13 = vld [vmem:[#allocation4 + $0xea8] sm:$0xff]  ;;  %v4702_v19 = vld [vmem:[#allocation4 + $0xe38] sm:$0xff] }
 0x5ed   :  { %5032 = vmatprep.subr.mxu0 %v4381_v16  ;;  %5103 = vmatprep.subr.mxu1 %v4605_v18  ;;  %v3743_v10 = vadd.f32 %v3742_v14, %v3643_v7  ;;  %v4709_v16 = vld [vmem:[#allocation4 + $0xe70] sm:$0xff]  ;;  %v4703_v18 = vld [vmem:[#allocation4 + $0xe40] sm:$0xff] }
 0x5ee   :  { %5033 = vmatpush2.msra.mxu0 %v4380_v21  ;;  %5104 = vmatpush2.msra.mxu1 %v4604_v23  ;;  %v4696_v21 = vld [vmem:[#allocation4 + $0xe08] sm:$0xff]  ;;  %v4695_v23 = vld [vmem:[#allocation4 + $0xe00] sm:$0xff]  ;;  %v4913_v7 = vld [vmem:[#allocation4 + $0x14d0] sm:$0xff] }
 0x5ef   :  { %v3811_v27 = vpop.f32.mrf.mxu0  ;;  %5034 = vmatprep.subr.mxu0 %v4374_v43  ;;  %5105 = vmatprep.subr.mxu1 %v4598_v30  ;;  %v4912_v43 = vld [vmem:[#allocation4 + $0x14c8] sm:$0xff]  ;;  %v4906_v30 = vld [vmem:[#allocation4 + $0x1498] sm:$0xff]  ;;  %v4905_v14 = vld [vmem:[#allocation4 + $0x1490] sm:$0xff] }
 0x5f0   :  { %5035 = vmatpush2.msra.mxu0 %v4373_v33  ;;  %5106 = vmatpush2.msra.mxu1 %v4597_v39  ;;  %v3812_v35 = vadd.f32 %v3811_v27, %v3741_v0  ;;  %v4899_v33 = vld [vmem:[#allocation4 + $0x1460] sm:$0xff]  ;;  %v4898_v39 = vld [vmem:[#allocation4 + $0x1458] sm:$0xff]  ;;  %v4885_v0 = vld [vmem:[#allocation4 + $0x13f0] sm:$0xff] }
 0x5f1   :  { %v3813_v37 = vpop.f32.mrf.mxu0  ;;  %5036 = vmatprep.subr.mxu0 %v4367_v24  ;;  %5107 = vmatprep.subr.mxu1 %v4591_v63  ;;  %v4892_v24 = vld [vmem:[#allocation4 + $0x1428] sm:$0xff]  ;;  %v4891_v63 = vld [vmem:[#allocation4 + $0x1420] sm:$0xff] }
 0x5f2   :  { %v3814_v28 = vadd.f32 %v3813_v37, %v3743_v10  ;;  %5037 = vmatpush2.msra.mxu0 %v4366_v29  ;;  %5108 = vmatpush2.msra.mxu1 %v4590_v31  ;;  %v10298_v48 = vmax.f32 %v3812_v35, 0.0  ;;  %v4884_v27 = vld [vmem:[#allocation4 + $0x13e8] sm:$0xff]  ;;  %v4878_v29 = vld [vmem:[#allocation4 + $0x13b8] sm:$0xff]  ;;  %v4877_v31 = vld [vmem:[#allocation4 + $0x13b0] sm:$0xff] }
 0x5f3   :  { %5038 = vmatprep.subr.mxu0 %v4360_v26  ;;  %5109 = vmatprep.subr.mxu1 %v4584_v12  ;;  %v4871_v10 = vld [vmem:[#allocation4 + $0x1380] sm:$0xff]  ;;  %v4870_v26 = vld [vmem:[#allocation4 + $0x1378] sm:$0xff]  ;;  %v4864_v12 = vld [vmem:[#allocation4 + $0x1348] sm:$0xff] }
 0x5f4   :  { %v10296_v47 = vmax.f32 %v3814_v28, 0.0  ;;  %5039 = vmatpush2.msra.mxu0 %v4359_v44  ;;  %5110 = vmatpush2.msra.mxu1 %v4583_v22  ;;  %v4863_v35 = vld [vmem:[#allocation4 + $0x1340] sm:$0xff]  ;;  %v4857_v37 = vld [vmem:[#allocation4 + $0x1310] sm:$0xff]  ;;  %v4856_v44 = vld [vmem:[#allocation4 + $0x1308] sm:$0xff] }
 0x5f5   :  { %5118 = vmatprep.subr.mxu0 %v4801_v46  ;;  %5217 = vmatprep.subr.mxu1 %v4927_v53  ;;  %v4850_v22 = vld [vmem:[#allocation4 + $0x12d8] sm:$0xff]  ;;  %v4849_v28 = vld [vmem:[#allocation4 + $0x12d0] sm:$0xff]  ;;  %v4843_v46 = vld [vmem:[#allocation4 + $0x12a0] sm:$0xff] }
 0x5f6   :  { %5040 = vmatprep.mubr.f32.mxu0 %v10296_v47  ;;  %v4822_v53 = vld [vmem:[#allocation4 + $0x11f8] sm:$0xff] }
 0x5f7   :  { %5041 = vmatmul.mubr.f32.vlgmr.msra.gmra.mxu0 %v10298_v48 }
 0x5f8   :  { %5119 = vmatpush1.msra.mxu0 %v4800_v49  ;;  %v4842_v49 = vld [vmem:[#allocation4 + $0x1298] sm:$0xff] }
 0x5f9   :  { %5120 = vmatprep.subr.mxu0 %v4794_v61  ;;  %v4836_v61 = vld [vmem:[#allocation4 + $0x1268] sm:$0xff] }
 0x5fa   :  { %5121 = vmatpush1.msra.mxu0 %v4793_v36  ;;  %v4835_v36 = vld [vmem:[#allocation4 + $0x1260] sm:$0xff] }
 0x5fb   :  { %5122 = vmatprep.subr.mxu0 %v4787_v45  ;;  %v4829_v45 = vld [vmem:[#allocation4 + $0x1230] sm:$0xff] }
 0x5fc   :  { %5123 = vmatpush1.msra.mxu0 %v4786_v51  ;;  %v3647_v51 = vrot.slane %v10290_v52, %v9132_v38 }
 0x5fd   :  { %5124 = vmatprep.subr.mxu0 %v4780_v34  ;;  %v4828_v34 = vld [vmem:[#allocation4 + $0x1228] sm:$0xff] }
 0x5fe   :  { %5125 = vmatpush1.msra.mxu0 %v4779_v41  ;;  %v3651_v41 = vrot.slane %v10290_v52, %v9004_v20 }
 0x5ff   :  { %5126 = vmatprep.subr.mxu0 %v4773_v54  ;;  %v4821_v54 = vld [vmem:[#allocation4 + $0x11f0] sm:$0xff] }
 0x600   :  { %5127 = vmatpush1.msra.mxu0 %v4772_v50 }
 0x601   :  { %5128 = vmatprep.subr.mxu0 %v4766_v58 }
 0x602   :  { %5129 = vmatpush1.msra.mxu0 %v4765_v55  ;;  %v4815_v55 = vld [vmem:[#allocation4 + $0x11c0] sm:$0xff] }
 0x603   :  { %5130 = vmatprep.subr.mxu0 %v4759_v57 }
 0x604   :  { %5131 = vmatpush1.msra.mxu0 %v4758_v59  ;;  %v4814_v59 = vld [vmem:[#allocation4 + $0x11b8] sm:$0xff] }
 0x605   :  { %5132 = vmatprep.subr.mxu0 %v4752_v62 }
 0x606   :  { %5133 = vmatpush1.msra.mxu0 %v4751_v25  ;;  %v4808_v25 = vld [vmem:[#allocation4 + $0x1188] sm:$0xff] }
 0x607   :  { %5134 = vmatprep.subr.mxu0 %v4745_v4 }
 0x608   :  { %5135 = vmatpush1.msra.mxu0 %v4744_v9  ;;  %v4807_v9 = vld [vmem:[#allocation4 + $0x1180] sm:$0xff] }
 0x609   :  { %5136 = vmatprep.subr.mxu0 %v4738_v3 }
 0x60a   :  { %5137 = vmatpush1.msra.mxu0 %v4737_v42 }
 0x60b   :  { %5138 = vmatprep.subr.mxu0 %v4731_v40  ;;  %v4579_v40 = vld [vmem:[#allocation4 + $0xa60] sm:$0xff] }
 0x60c   :  { %5139 = vmatpush1.msra.mxu0 %v4730_v11 }
 0x60d   :  { %5140 = vmatprep.subr.mxu0 %v4724_v1  ;;  %v3953_v50 = vpop.f32.mrf.mxu1 }
 0x60e   :  { %5141 = vmatpush1.msra.mxu0 %v4723_v32 }
 0x60f   :  { %5142 = vmatprep.subr.mxu0 %v4717_v60  ;;  %v3955_v3 = vpop.f32.mrf.mxu1  ;;  %v4926_v60 = vld [vmem:[#allocation4 + $0x1538] sm:$0xff] }
 0x610   :  { %5143 = vmatpush1.msra.mxu0 %v4716_v13  ;;  %v4920_v13 = vld [vmem:[#allocation4 + $0x1508] sm:$0xff] }
 0x611   :  { %5144 = vmatprep.subr.mxu0 %v4710_v15  ;;  %v4919_v15 = vld [vmem:[#allocation4 + $0x1500] sm:$0xff] }
 0x612   :  { %5145 = vmatpush1.msra.mxu0 %v4709_v16  ;;  %v4355_v16 = vld [vmem:[#allocation4 + $0x360] sm:$0xff] }
 0x613   :  { %5146 = vmatprep.subr.mxu0 %v4703_v18 }
 0x614   :  { %5147 = vmatpush1.msra.mxu0 %v4702_v19  ;;  %v3655_v19 = vrot.slane %v10290_v52, %v9413_v5 }
 0x615   :  { %5148 = vmatprep.subr.mxu0 %v4696_v21  ;;  %v3659_v21 = vrot.slane %v10290_v52, %v9416_v6 }
 0x616   :  { %5149 = vmatpush1.msra.mxu0 %v4695_v23 }
 0x617   :  { %5150 = vmatprep.subr.mxu0 %v4913_v7 }
 0x618   :  { %5151 = vmatpush2.msra.mxu0 %v4912_v43 }
 0x619   :  { %5152 = vmatprep.subr.mxu0 %v4906_v30 }
 0x61a   :  { %5153 = vmatpush2.msra.mxu0 %v4905_v14 }
 0x61b   :  { %5154 = vmatprep.subr.mxu0 %v4899_v33 }
 0x61c   :  { %5155 = vmatpush2.msra.mxu0 %v4898_v39 }
 0x61d   :  { %5156 = vmatprep.subr.mxu0 %v4892_v24 }
 0x61e   :  { %5157 = vmatpush2.msra.mxu0 %v4891_v63 }
 0x61f   :  { %5158 = vmatprep.subr.mxu0 %v4885_v0  ;;  %v4578_v0 = vld [vmem:[#allocation4 + $0xa58] sm:$0xff] }
 0x620   :  { %5159 = vmatpush2.msra.mxu0 %v4884_v27  ;;  %v4572_v27 = vld [vmem:[#allocation4 + $0xa28] sm:$0xff] }
 0x621   :  { %5160 = vmatprep.subr.mxu0 %v4878_v29  ;;  %v4571_v29 = vld [vmem:[#allocation4 + $0xa20] sm:$0xff] }
 0x622   :  { %5161 = vmatpush2.msra.mxu0 %v4877_v31  ;;  %v4565_v31 = vld [vmem:[#allocation4 + $0x9f0] sm:$0xff] }
 0x623   :  { %5162 = vmatprep.subr.mxu0 %v4871_v10  ;;  %v4564_v10 = vld [vmem:[#allocation4 + $0x9e8] sm:$0xff] }
 0x624   :  { %5163 = vmatpush2.msra.mxu0 %v4870_v26  ;;  %v4558_v26 = vld [vmem:[#allocation4 + $0x9b8] sm:$0xff] }
 0x625   :  { %5164 = vmatprep.subr.mxu0 %v4864_v12  ;;  %v4557_v12 = vld [vmem:[#allocation4 + $0x9b0] sm:$0xff] }
 0x626   :  { %5165 = vmatpush2.msra.mxu0 %v4863_v35  ;;  %v4551_v35 = vld [vmem:[#allocation4 + $0x980] sm:$0xff] }
 0x627   :  { %5166 = vmatprep.subr.mxu0 %v4857_v37  ;;  %v4550_v37 = vld [vmem:[#allocation4 + $0x978] sm:$0xff] }
 0x628   :  { %5167 = vmatpush2.msra.mxu0 %v4856_v44  ;;  %v4544_v44 = vld [vmem:[#allocation4 + $0x948] sm:$0xff] }
 0x629   :  { %5168 = vmatprep.subr.mxu0 %v4850_v22  ;;  %v4543_v22 = vld [vmem:[#allocation4 + $0x940] sm:$0xff] }
 0x62a   :  { %5169 = vmatpush2.msra.mxu0 %v4849_v28  ;;  %v4537_v28 = vld [vmem:[#allocation4 + $0x910] sm:$0xff] }
 0x62b   :  { %5170 = vmatprep.subr.mxu0 %v4843_v46  ;;  %v4536_v46 = vld [vmem:[#allocation4 + $0x908] sm:$0xff] }
 0x62c   :  { %5171 = vmatpush2.msra.mxu0 %v4842_v49  ;;  %v4530_v49 = vld [vmem:[#allocation4 + $0x8d8] sm:$0xff] }
 0x62d   :  { %5172 = vmatprep.subr.mxu0 %v4836_v61  ;;  %v4529_v61 = vld [vmem:[#allocation4 + $0x8d0] sm:$0xff] }
 0x62e   :  { %5173 = vmatpush2.msra.mxu0 %v4835_v36  ;;  %v4523_v36 = vld [vmem:[#allocation4 + $0x8a0] sm:$0xff] }
 0x62f   :  { %5174 = vmatprep.subr.mxu0 %v4829_v45  ;;  %v4522_v45 = vld [vmem:[#allocation4 + $0x898] sm:$0xff] }
 0x630   :  { %v3882_v58 = vpop.f32.mrf.mxu0  ;;  %5175 = vmatpush2.msra.mxu0 %v4828_v34  ;;  %v4515_v34 = vld [vmem:[#allocation4 + $0x860] sm:$0xff] }
 0x631   :  { %v3883_v57 = vadd.f32 %v3882_v58, %v3647_v51  ;;  %5176 = vmatprep.subr.mxu0 %v4822_v53  ;;  %v4516_v51 = vld [vmem:[#allocation4 + $0x868] sm:$0xff]  ;;  %v4509_v53 = vld [vmem:[#allocation4 + $0x830] sm:$0xff]  ;;  %v4495_v58 = vld [vmem:[#allocation4 + $0x7c0] sm:$0xff] }
 0x632   :  { %v3884_v62 = vpop.f32.mrf.mxu0  ;;  %5177 = vmatpush2.msra.mxu0 %v4821_v54  ;;  %v4502_v54 = vld [vmem:[#allocation4 + $0x7f8] sm:$0xff] }
 0x633   :  { %v3885_v4 = vadd.f32 %v3884_v62, %v3651_v41  ;;  %5178 = vmatprep.subr.mxu0 %v4815_v55  ;;  %v3954_v42 = vadd.f32 %v3953_v50, %v3883_v57  ;;  %v4508_v41 = vld [vmem:[#allocation4 + $0x828] sm:$0xff]  ;;  %v4501_v50 = vld [vmem:[#allocation4 + $0x7f0] sm:$0xff]  ;;  %v4494_v55 = vld [vmem:[#allocation4 + $0x7b8] sm:$0xff] }
 0x634   :  { %5179 = vmatpush2.msra.mxu0 %v4814_v59  ;;  %v4488_v59 = vld [vmem:[#allocation4 + $0x788] sm:$0xff]  ;;  %v4487_v62 = vld [vmem:[#allocation4 + $0x780] sm:$0xff] }
 0x635   :  { %v3956_v11 = vadd.f32 %v3955_v3, %v3885_v4  ;;  %5180 = vmatprep.subr.mxu0 %v4808_v25  ;;  %v10308_v32 = vmax.f32 %v3954_v42, 0.0  ;;  %v3663_v3 = vrot.slane %v10290_v52, %v9498_v2  ;;  %v4480_v42 = vld [vmem:[#allocation4 + $0x748] sm:$0xff] }
 0x636   :  { %5181 = vmatpush2.msra.mxu0 %v4807_v9  ;;  %v4481_v9 = vld [vmem:[#allocation4 + $0x750] sm:$0xff] }
 0x637   :  { %v10306_v1 = vmax.f32 %v3956_v11, 0.0  ;;  %5331 = vmatprep.subr.mxu0 %v4579_v40  ;;  %v4474_v11 = vld [vmem:[#allocation4 + $0x718] sm:$0xff] }
 0x639   :  { %5111 = vmatprep.mubr.f32.mxu1 %v10306_v1 }
 0x63a   :  { %5112 = vmatmul.mubr.f32.vlgmr.msra.gmra.mxu1 %v10308_v32 }
 0x63b   :  { %5218 = vmatpush1.msra.mxu1 %v4926_v60  ;;  %5253 = vmatprep.mubr.f32.mxu1 %v6529_v17 }
 0x63c   :  { %5219 = vmatprep.subr.mxu1 %v4920_v13  ;;  %v4473_v13 = vld [vmem:[#allocation4 + $0x710] sm:$0xff] }
 0x63d   :  { %5220 = vmatpush1.msra.mxu1 %v4919_v15  ;;  %v4691_v15 = vld [vmem:[#allocation4 + $0xde0] sm:$0xff] }
 0x63e   :  { %5260 = vmatprep.subr.mxu1 %v4355_v16 }
 0x64f   :  { %v4024_v18 = vpop.f32.mrf.mxu1 }
 0x650   :  { %v4025_v7 = vadd.f32 %v4024_v18, %v3655_v19  ;;  %v4690_v18 = vld [vmem:[#allocation4 + $0xdd8] sm:$0xff]  ;;  %v4684_v19 = vld [vmem:[#allocation4 + $0xda8] sm:$0xff] }
 0x651   :  { %v4026_v23 = vpop.f32.mrf.mxu1 }
 0x652   :  { %v4027_v30 = vadd.f32 %v4026_v23, %v3659_v21  ;;  %v4683_v23 = vld [vmem:[#allocation4 + $0xda0] sm:$0xff] }
 0x654   :  { %v4095_v43 = vpop.f32.mrf.mxu0 }
 0x655   :  { %v4096_v14 = vadd.f32 %v4095_v43, %v4025_v7  ;;  %v4677_v7 = vld [vmem:[#allocation4 + $0xd70] sm:$0xff]  ;;  %v4354_v43 = vld [vmem:[#allocation4 + $0x358] sm:$0xff] }
 0x656   :  { %v4097_v33 = vpop.f32.mrf.mxu0 }
 0x657   :  { %v4098_v39 = vadd.f32 %v4097_v33, %v4027_v30  ;;  %v10319_v63 = vmax.f32 %v4096_v14, 0.0  ;;  %v4348_v30 = vld [vmem:[#allocation4 + $0x328] sm:$0xff]  ;;  %v4347_v33 = vld [vmem:[#allocation4 + $0x320] sm:$0xff] }
 0x658   :  { %v4676_v14 = vld [vmem:[#allocation4 + $0xd68] sm:$0xff] }
 0x659   :  { %v10317_v24 = vmax.f32 %v4098_v39, 0.0  ;;  %v4670_v39 = vld [vmem:[#allocation4 + $0xd38] sm:$0xff] }
 0x65b   :  { %5182 = vmatprep.mubr.f32.mxu0 %v10317_v24 }
 0x65c   :  { %5183 = vmatmul.mubr.f32.vlgmr.msra.gmra.mxu0 %v10319_v63 }
 0x65d   :  { %5332 = vmatpush1.msra.mxu0 %v4578_v0  ;;  %5395 = vmatprep.mubr.f32.mxu0 %v10306_v1  ;;  %v4341_v0 = vld [vmem:[#allocation4 + $0x2f0] sm:$0xff] }
 0x65e   :  { %5333 = vmatprep.subr.mxu0 %v4572_v27  ;;  %v4669_v27 = vld [vmem:[#allocation4 + $0xd30] sm:$0xff] }
 0x65f   :  { %5334 = vmatpush1.msra.mxu0 %v4571_v29  ;;  %v4340_v29 = vld [vmem:[#allocation4 + $0x2e8] sm:$0xff] }
 0x660   :  { %5335 = vmatprep.subr.mxu0 %v4565_v31  ;;  %v4663_v31 = vld [vmem:[#allocation4 + $0xd00] sm:$0xff] }
 0x661   :  { %5336 = vmatpush1.msra.mxu0 %v4564_v10  ;;  %v4334_v10 = vld [vmem:[#allocation4 + $0x2b8] sm:$0xff] }
 0x662   :  { %5337 = vmatprep.subr.mxu0 %v4558_v26  ;;  %v4662_v26 = vld [vmem:[#allocation4 + $0xcf8] sm:$0xff] }
 0x663   :  { %5338 = vmatpush1.msra.mxu0 %v4557_v12  ;;  %v4333_v12 = vld [vmem:[#allocation4 + $0x2b0] sm:$0xff] }
 0x664   :  { %5339 = vmatprep.subr.mxu0 %v4551_v35  ;;  %v4656_v35 = vld [vmem:[#allocation4 + $0xcc8] sm:$0xff] }
 0x665   :  { %5340 = vmatpush1.msra.mxu0 %v4550_v37  ;;  %v4327_v37 = vld [vmem:[#allocation4 + $0x280] sm:$0xff] }
 0x666   :  { %5341 = vmatprep.subr.mxu0 %v4544_v44  ;;  %v4655_v44 = vld [vmem:[#allocation4 + $0xcc0] sm:$0xff] }
 0x667   :  { %5342 = vmatpush1.msra.mxu0 %v4543_v22  ;;  %v4326_v22 = vld [vmem:[#allocation4 + $0x278] sm:$0xff] }
 0x668   :  { %5343 = vmatprep.subr.mxu0 %v4537_v28  ;;  %v4649_v28 = vld [vmem:[#allocation4 + $0xc90] sm:$0xff] }
 0x669   :  { %5344 = vmatpush1.msra.mxu0 %v4536_v46  ;;  %v4320_v46 = vld [vmem:[#allocation4 + $0x248] sm:$0xff] }
 0x66a   :  { %5345 = vmatprep.subr.mxu0 %v4530_v49  ;;  %v4648_v49 = vld [vmem:[#allocation4 + $0xc88] sm:$0xff] }
 0x66b   :  { %5346 = vmatpush1.msra.mxu0 %v4529_v61  ;;  %v4319_v61 = vld [vmem:[#allocation4 + $0x240] sm:$0xff] }
 0x66c   :  { %5347 = vmatprep.subr.mxu0 %v4523_v36  ;;  %v4642_v36 = vld [vmem:[#allocation4 + $0xc58] sm:$0xff] }
 0x66d   :  { %5348 = vmatpush1.msra.mxu0 %v4522_v45  ;;  %v4313_v45 = vld [vmem:[#allocation4 + $0x210] sm:$0xff] }
 0x66e   :  { %5349 = vmatprep.subr.mxu0 %v4516_v51  ;;  %v4641_v51 = vld [vmem:[#allocation4 + $0xc50] sm:$0xff] }
 0x66f   :  { %5350 = vmatpush1.msra.mxu0 %v4515_v34  ;;  %v4312_v34 = vld [vmem:[#allocation4 + $0x208] sm:$0xff] }
 0x670   :  { %5351 = vmatprep.subr.mxu0 %v4509_v53  ;;  %v4635_v53 = vld [vmem:[#allocation4 + $0xc20] sm:$0xff] }
 0x671   :  { %5352 = vmatpush1.msra.mxu0 %v4508_v41  ;;  %v4306_v41 = vld [vmem:[#allocation4 + $0x1d8] sm:$0xff] }
 0x672   :  { %5353 = vmatprep.subr.mxu0 %v4502_v54  ;;  %v4634_v54 = vld [vmem:[#allocation4 + $0xc18] sm:$0xff] }
 0x673   :  { %v4236_v57 = vpop.f32.mrf.mxu1  ;;  %5354 = vmatpush1.msra.mxu0 %v4501_v50  ;;  %v4305_v50 = vld [vmem:[#allocation4 + $0x1d0] sm:$0xff] }
 0x674   :  { %5355 = vmatprep.subr.mxu0 %v4495_v58  ;;  %v4628_v58 = vld [vmem:[#allocation4 + $0xbe8] sm:$0xff] }
 0x675   :  { %v6326_v25 = vpop.f32.mrf.mxu0  ;;  %v4238_v4 = vpop.f32.mrf.mxu1  ;;  %5356 = vmatpush1.msra.mxu0 %v4494_v55  ;;  %v4299_v55 = vld [vmem:[#allocation4 + $0x1a0] sm:$0xff] }
 0x676   :  { %5357 = vmatprep.subr.mxu0 %v4488_v59  ;;  %v4298_v59 = vld [vmem:[#allocation4 + $0x198] sm:$0xff]  ;;  %v4620_v4 = vld [vmem:[#allocation4 + $0xba8] sm:$0xff] }
 0x677   :  { %v6327_v40 = vpop.f32.mrf.mxu0  ;;  %5358 = vmatpush1.msra.mxu0 %v4487_v62  ;;  %v4621_v62 = vld [vmem:[#allocation4 + $0xbb0] sm:$0xff] }
 0x678   :  { %v6328_v60 = vadd.f32 %v6327_v40, %v6326_v25  ;;  %5359 = vmatprep.subr.mxu0 %v4481_v9  ;;  %v4292_v25 = vld [vmem:[#allocation4 + $0x168] sm:$0xff]  ;;  %v4291_v9 = vld [vmem:[#allocation4 + $0x160] sm:$0xff]  ;;  %v4613_v40 = vld [vmem:[#allocation4 + $0xb70] sm:$0xff] }
 0x679   :  { %5360 = vmatpush1.msra.mxu0 %v4480_v42  ;;  %v4285_v42 = vld [vmem:[#allocation4 + $0x130] sm:$0xff] }
 0x67a   :  { %v4167_v16 = vadd.f32 %v6328_v60, %v3663_v3  ;;  %5361 = vmatprep.subr.mxu0 %v4474_v11  ;;  %v4614_v3 = vld [vmem:[#allocation4 + $0xb78] sm:$0xff]  ;;  %v4284_v11 = vld [vmem:[#allocation4 + $0x128] sm:$0xff]  ;;  %v4607_v60 = vld [vmem:[#allocation4 + $0xb40] sm:$0xff] }
 0x67b   :  { %5362 = vmatpush1.msra.mxu0 %v4473_v13  ;;  %v4278_v13 = vld [vmem:[#allocation4 + $0xf8] sm:$0xff] }
 0x67c   :  { %v4237_v21 = vadd.f32 %v4236_v57, %v4167_v16  ;;  %5363 = vmatprep.subr.mxu0 %v4691_v15  ;;  %v4627_v57 = vld [vmem:[#allocation4 + $0xbe0] sm:$0xff]  ;;  %v4606_v15 = vld [vmem:[#allocation4 + $0xb38] sm:$0xff]  ;;  %v4277_v16 = vld [vmem:[#allocation4 + $0xf0] sm:$0xff] }
 0x67d   :  { %5364 = vmatpush2.msra.mxu0 %v4690_v18  ;;  %v4600_v18 = vld [vmem:[#allocation4 + $0xb08] sm:$0xff] }
 0x67e   :  { %v10326_v52 = vmax.f32 %v4237_v21, 0.0  ;;  %5365 = vmatprep.subr.mxu0 %v4684_v19  ;;  %v4271_v19 = vld [vmem:[#allocation4 + $0xc0] sm:$0xff] }
 0x67f   :  { %5366 = vmatpush2.msra.mxu0 %v4683_v23  ;;  %v4599_v21 = vld [vmem:[#allocation4 + $0xb00] sm:$0xff]  ;;  %v4270_v23 = vld [vmem:[#allocation4 + $0xb8] sm:$0xff] }
 0x680   :  { %6147 = vmatmul.mubr.msk.f32.vlgmr.msra.gmra.mxu1 %vm789_vm0, %v10326_v52  ;;  %5367 = vmatprep.subr.mxu0 %v4677_v7  ;;  %v4593_v7 = vld [vmem:[#allocation4 + $0xad0] sm:$0xff] }
 0x681   :  { %5261 = vmatpush1.msra.mxu1 %v4354_v43  ;;  %5324 = vmatprep.mubr.f32.mxu1 %v10296_v47  ;;  %v4264_v43 = vld [vmem:[#allocation4 + $0x88] sm:$0xff] }
 0x682   :  { %5262 = vmatprep.subr.mxu1 %v4348_v30  ;;  %5368 = vmatpush2.msra.mxu0 %v4676_v14  ;;  %v4592_v30 = vld [vmem:[#allocation4 + $0xac8] sm:$0xff]  ;;  %v4263_v14 = vld [vmem:[#allocation4 + $0x80] sm:$0xff] }
 0x683   :  { %5263 = vmatpush1.msra.mxu1 %v4347_v33  ;;  %5369 = vmatprep.subr.mxu0 %v4670_v39  ;;  %v4586_v33 = vld [vmem:[#allocation4 + $0xa98] sm:$0xff]  ;;  %v4257_v39 = vld [vmem:[#allocation4 + $0x50] sm:$0xff] }
 0x684   :  { %5264 = vmatprep.subr.mxu1 %v4341_v0  ;;  %5370 = vmatpush2.msra.mxu0 %v4669_v27  ;;  %v4585_v0 = vld [vmem:[#allocation4 + $0xa90] sm:$0xff]  ;;  %v4256_v27 = vld [vmem:[#allocation4 + $0x48] sm:$0xff] }
 0x685   :  { %5265 = vmatpush1.msra.mxu1 %v4340_v29  ;;  %5371 = vmatprep.subr.mxu0 %v4663_v31  ;;  %v4929_v29 = vld [vmem:[#allocation4 + $0x1550] sm:$0xff]  ;;  %v4250_v31 = vld [vmem:[#allocation4 + $0x18] sm:$0xff] }
 0x686   :  { %5266 = vmatprep.subr.mxu1 %v4334_v10  ;;  %5372 = vmatpush2.msra.mxu0 %v4662_v26  ;;  %v4928_v10 = vld [vmem:[#allocation4 + $0x1548] sm:$0xff]  ;;  %v4249_v26 = vld [vmem:[#allocation4 + $0x10] sm:$0xff] }
 0x687   :  { %5267 = vmatpush1.msra.mxu1 %v4333_v12  ;;  %5373 = vmatprep.subr.mxu0 %v4656_v35  ;;  %v4922_v12 = vld [vmem:[#allocation4 + $0x1518] sm:$0xff]  ;;  %v4467_v35 = vld [vmem:[#allocation4 + $0x6e0] sm:$0xff] }
 0x688   :  { %5268 = vmatprep.subr.mxu1 %v4327_v37  ;;  %5374 = vmatpush2.msra.mxu0 %v4655_v44  ;;  %v4921_v37 = vld [vmem:[#allocation4 + $0x1510] sm:$0xff]  ;;  %v4466_v44 = vld [vmem:[#allocation4 + $0x6d8] sm:$0xff] }
 0x689   :  { %5269 = vmatpush1.msra.mxu1 %v4326_v22  ;;  %5375 = vmatprep.subr.mxu0 %v4649_v28  ;;  %v4357_v22 = vld [vmem:[#allocation4 + $0x370] sm:$0xff]  ;;  %v4460_v28 = vld [vmem:[#allocation4 + $0x6a8] sm:$0xff] }
 0x68a   :  { %5270 = vmatprep.subr.mxu1 %v4320_v46  ;;  %5376 = vmatpush2.msra.mxu0 %v4648_v49  ;;  %v4356_v46 = vld [vmem:[#allocation4 + $0x368] sm:$0xff]  ;;  %v4459_v49 = vld [vmem:[#allocation4 + $0x6a0] sm:$0xff] }
 0x68b   :  { %5271 = vmatpush1.msra.mxu1 %v4319_v61  ;;  %5377 = vmatprep.subr.mxu0 %v4642_v36  ;;  %v4350_v61 = vld [vmem:[#allocation4 + $0x338] sm:$0xff]  ;;  %v4453_v36 = vld [vmem:[#allocation4 + $0x670] sm:$0xff] }
 0x68c   :  { %5272 = vmatprep.subr.mxu1 %v4313_v45  ;;  %5378 = vmatpush2.msra.mxu0 %v4641_v51  ;;  %v4349_v45 = vld [vmem:[#allocation4 + $0x330] sm:$0xff]  ;;  %v4452_v51 = vld [vmem:[#allocation4 + $0x668] sm:$0xff] }
 0x68d   :  { %5273 = vmatpush1.msra.mxu1 %v4312_v34  ;;  %5379 = vmatprep.subr.mxu0 %v4635_v53  ;;  %v4343_v34 = vld [vmem:[#allocation4 + $0x300] sm:$0xff]  ;;  %v4446_v53 = vld [vmem:[#allocation4 + $0x638] sm:$0xff] }
 0x68e   :  { %5274 = vmatprep.subr.mxu1 %v4306_v41  ;;  %5380 = vmatpush2.msra.mxu0 %v4634_v54  ;;  %v4342_v41 = vld [vmem:[#allocation4 + $0x2f8] sm:$0xff]  ;;  %v4445_v54 = vld [vmem:[#allocation4 + $0x630] sm:$0xff] }
 0x68f   :  { %5275 = vmatpush1.msra.mxu1 %v4305_v50  ;;  %5381 = vmatprep.subr.mxu0 %v4628_v58  ;;  %v4336_v50 = vld [vmem:[#allocation4 + $0x2c8] sm:$0xff]  ;;  %v4439_v58 = vld [vmem:[#allocation4 + $0x600] sm:$0xff] }
 0x690   :  { %5276 = vmatprep.subr.mxu1 %v4299_v55  ;;  %5382 = vmatpush2.msra.mxu0 %v4627_v57  ;;  %v4335_v55 = vld [vmem:[#allocation4 + $0x2c0] sm:$0xff]  ;;  %v4438_v57 = vld [vmem:[#allocation4 + $0x5f8] sm:$0xff] }
 0x691   :  { %5277 = vmatpush1.msra.mxu1 %v4298_v59  ;;  %5383 = vmatprep.subr.mxu0 %v4621_v62  ;;  %v4329_v59 = vld [vmem:[#allocation4 + $0x290] sm:$0xff]  ;;  %v4432_v62 = vld [vmem:[#allocation4 + $0x5c8] sm:$0xff] }
 0x692   :  { %5278 = vmatprep.subr.mxu1 %v4292_v25  ;;  %5384 = vmatpush2.msra.mxu0 %v4620_v4  ;;  %v4328_v25 = vld [vmem:[#allocation4 + $0x288] sm:$0xff]  ;;  %v4431_v4 = vld [vmem:[#allocation4 + $0x5c0] sm:$0xff] }
 0x693   :  { %5279 = vmatpush1.msra.mxu1 %v4291_v9  ;;  %5385 = vmatprep.subr.mxu0 %v4614_v3  ;;  %v4322_v9 = vld [vmem:[#allocation4 + $0x258] sm:$0xff]  ;;  %v4425_v3 = vld [vmem:[#allocation4 + $0x590] sm:$0xff] }
 0x694   :  { %5280 = vmatprep.subr.mxu1 %v4285_v42  ;;  %5386 = vmatpush2.msra.mxu0 %v4613_v40  ;;  %v4321_v42 = vld [vmem:[#allocation4 + $0x250] sm:$0xff]  ;;  %v4424_v40 = vld [vmem:[#allocation4 + $0x588] sm:$0xff] }
 0x695   :  { %5281 = vmatpush1.msra.mxu1 %v4284_v11  ;;  %5387 = vmatprep.subr.mxu0 %v4607_v60  ;;  %v4315_v11 = vld [vmem:[#allocation4 + $0x220] sm:$0xff]  ;;  %v4418_v60 = vld [vmem:[#allocation4 + $0x558] sm:$0xff] }
 0x696   :  { %5282 = vmatprep.subr.mxu1 %v4278_v13  ;;  %5388 = vmatpush2.msra.mxu0 %v4606_v15  ;;  %v4314_v13 = vld [vmem:[#allocation4 + $0x218] sm:$0xff]  ;;  %v4417_v15 = vld [vmem:[#allocation4 + $0x550] sm:$0xff] }
 0x697   :  { %5283 = vmatpush1.msra.mxu1 %v4277_v16  ;;  %5389 = vmatprep.subr.mxu0 %v4600_v18  ;;  %v4308_v16 = vld [vmem:[#allocation4 + $0x1e8] sm:$0xff]  ;;  %v4411_v18 = vld [vmem:[#allocation4 + $0x520] sm:$0xff] }
 0x698   :  { %5284 = vmatprep.subr.mxu1 %v4271_v19  ;;  %5390 = vmatpush2.msra.mxu0 %v4599_v21  ;;  %v4307_v19 = vld [vmem:[#allocation4 + $0x1e0] sm:$0xff]  ;;  %v4410_v21 = vld [vmem:[#allocation4 + $0x518] sm:$0xff] }
 0x699   :  { %5285 = vmatpush1.msra.mxu1 %v4270_v23  ;;  %5391 = vmatprep.subr.mxu0 %v4593_v7  ;;  %v4301_v23 = vld [vmem:[#allocation4 + $0x1b0] sm:$0xff]  ;;  %v4404_v7 = vld [vmem:[#allocation4 + $0x4e8] sm:$0xff] }
 0x69a   :  { %5286 = vmatprep.subr.mxu1 %v4264_v43  ;;  %5392 = vmatpush2.msra.mxu0 %v4592_v30  ;;  %v4300_v43 = vld [vmem:[#allocation4 + $0x1a8] sm:$0xff]  ;;  %v4403_v30 = vld [vmem:[#allocation4 + $0x4e0] sm:$0xff] }
 0x69b   :  { %5287 = vmatpush1.msra.mxu1 %v4263_v14  ;;  %5393 = vmatprep.subr.mxu0 %v4586_v33  ;;  %v4294_v14 = vld [vmem:[#allocation4 + $0x178] sm:$0xff]  ;;  %v4397_v33 = vld [vmem:[#allocation4 + $0x4b0] sm:$0xff] }
 0x69c   :  { %5288 = vmatprep.subr.mxu1 %v4257_v39  ;;  %5394 = vmatpush2.msra.mxu0 %v4585_v0  ;;  %v4293_v39 = vld [vmem:[#allocation4 + $0x170] sm:$0xff]  ;;  %v4396_v0 = vld [vmem:[#allocation4 + $0x4a8] sm:$0xff] }
 0x69d   :  { %5289 = vmatpush1.msra.mxu1 %v4256_v27  ;;  %5396 = vmatmul.mubr.f32.vlgmr.msra.gmra.mxu0 %v10308_v32  ;;  %v4287_v27 = vld [vmem:[#allocation4 + $0x140] sm:$0xff] }
 0x69e   :  { %5501 = vmatprep.subr.mxu0 %v4929_v29  ;;  %5290 = vmatprep.subr.mxu1 %v4250_v31  ;;  %v4390_v29 = vld [vmem:[#allocation4 + $0x478] sm:$0xff] }
 0x69f   :  { %5502 = vmatpush1.msra.mxu0 %v4928_v10  ;;  %5291 = vmatpush1.msra.mxu1 %v4249_v26  ;;  %v4286_v31 = vld [vmem:[#allocation4 + $0x138] sm:$0xff]  ;;  %v4389_v10 = vld [vmem:[#allocation4 + $0x470] sm:$0xff]  ;;  %v4280_v26 = vld [vmem:[#allocation4 + $0x108] sm:$0xff] }
 0x6a0   :  { %5503 = vmatprep.subr.mxu0 %v4922_v12  ;;  %5292 = vmatprep.subr.mxu1 %v4467_v35  ;;  %v4383_v12 = vld [vmem:[#allocation4 + $0x440] sm:$0xff] }
 0x6a1   :  { %5504 = vmatpush1.msra.mxu0 %v4921_v37  ;;  %5537 = vmatprep.mubr.f32.mxu0 %v6529_v17  ;;  %v4279_v35 = vld [vmem:[#allocation4 + $0x100] sm:$0xff]  ;;  %v4382_v37 = vld [vmem:[#allocation4 + $0x438] sm:$0xff] }
 0x6a2   :  { %5293 = vmatpush2.msra.mxu1 %v4466_v44  ;;  %6148 = vmatmul.mubr.msk.f32.vlgmr.msra.gmra.mxu0 %vm789_vm0, %v10326_v52  ;;  %v4273_v44 = vld [vmem:[#allocation4 + $0xd0] sm:$0xff] }
 0x6a3   :  { %5544 = vmatprep.subr.mxu0 %v4357_v22  ;;  %5294 = vmatprep.subr.mxu1 %v4460_v28  ;;  %v4376_v22 = vld [vmem:[#allocation4 + $0x408] sm:$0xff] }
 0x6a4   :  { %5545 = vmatpush1.msra.mxu0 %v4356_v46  ;;  %5608 = vmatprep.mubr.f32.mxu0 %v10296_v47  ;;  %v4272_v28 = vld [vmem:[#allocation4 + $0xc8] sm:$0xff]  ;;  %v4375_v46 = vld [vmem:[#allocation4 + $0x400] sm:$0xff] }
 0x6a5   :  { %5295 = vmatpush2.msra.mxu1 %v4459_v49  ;;  %5546 = vmatprep.subr.mxu0 %v4350_v61  ;;  %v4266_v49 = vld [vmem:[#allocation4 + $0x98] sm:$0xff]  ;;  %v4369_v61 = vld [vmem:[#allocation4 + $0x3d0] sm:$0xff] }
 0x6a6   :  { %5296 = vmatprep.subr.mxu1 %v4453_v36  ;;  %5547 = vmatpush1.msra.mxu0 %v4349_v45  ;;  %v4265_v36 = vld [vmem:[#allocation4 + $0x90] sm:$0xff]  ;;  %v4368_v45 = vld [vmem:[#allocation4 + $0x3c8] sm:$0xff] }
 0x6a7   :  { %5297 = vmatpush2.msra.mxu1 %v4452_v51  ;;  %5548 = vmatprep.subr.mxu0 %v4343_v34  ;;  %v4259_v51 = vld [vmem:[#allocation4 + $0x60] sm:$0xff]  ;;  %v4362_v34 = vld [vmem:[#allocation4 + $0x398] sm:$0xff] }
 0x6a8   :  { %5298 = vmatprep.subr.mxu1 %v4446_v53  ;;  %5549 = vmatpush1.msra.mxu0 %v4342_v41  ;;  %v4258_v53 = vld [vmem:[#allocation4 + $0x58] sm:$0xff]  ;;  %v4361_v41 = vld [vmem:[#allocation4 + $0x390] sm:$0xff] }
 0x6a9   :  { %5299 = vmatpush2.msra.mxu1 %v4445_v54  ;;  %5550 = vmatprep.subr.mxu0 %v4336_v50  ;;  %v4252_v54 = vld [vmem:[#allocation4 + $0x28] sm:$0xff]  ;;  %v4803_v50 = vld [vmem:[#allocation4 + $0x1160] sm:$0xff] }
 0x6aa   :  { %5300 = vmatprep.subr.mxu1 %v4439_v58  ;;  %5551 = vmatpush1.msra.mxu0 %v4335_v55  ;;  %v4251_v58 = vld [vmem:[#allocation4 + $0x20] sm:$0xff]  ;;  %v4802_v55 = vld [vmem:[#allocation4 + $0x1158] sm:$0xff] }
 0x6ab   :  { %5301 = vmatpush2.msra.mxu1 %v4438_v57  ;;  %5552 = vmatprep.subr.mxu0 %v4329_v59  ;;  %v4469_v57 = vld [vmem:[#allocation4 + $0x6f0] sm:$0xff]  ;;  %v4796_v59 = vld [vmem:[#allocation4 + $0x1128] sm:$0xff] }
 0x6ac   :  { %5302 = vmatprep.subr.mxu1 %v4432_v62  ;;  %5553 = vmatpush1.msra.mxu0 %v4328_v25  ;;  %v4468_v62 = vld [vmem:[#allocation4 + $0x6e8] sm:$0xff]  ;;  %v4795_v25 = vld [vmem:[#allocation4 + $0x1120] sm:$0xff] }
 0x6ad   :  { %5303 = vmatpush2.msra.mxu1 %v4431_v4  ;;  %5554 = vmatprep.subr.mxu0 %v4322_v9  ;;  %v4462_v4 = vld [vmem:[#allocation4 + $0x6b8] sm:$0xff]  ;;  %v4789_v9 = vld [vmem:[#allocation4 + $0x10f0] sm:$0xff] }
 0x6ae   :  { %5304 = vmatprep.subr.mxu1 %v4425_v3  ;;  %5555 = vmatpush1.msra.mxu0 %v4321_v42  ;;  %v4461_v3 = vld [vmem:[#allocation4 + $0x6b0] sm:$0xff]  ;;  %v4788_v42 = vld [vmem:[#allocation4 + $0x10e8] sm:$0xff] }
 0x6af   :  { %5305 = vmatpush2.msra.mxu1 %v4424_v40  ;;  %5556 = vmatprep.subr.mxu0 %v4315_v11  ;;  %v4455_v40 = vld [vmem:[#allocation4 + $0x680] sm:$0xff]  ;;  %v4782_v11 = vld [vmem:[#allocation4 + $0x10b8] sm:$0xff] }
 0x6b0   :  { %5306 = vmatprep.subr.mxu1 %v4418_v60  ;;  %5557 = vmatpush1.msra.mxu0 %v4314_v13  ;;  %v4454_v60 = vld [vmem:[#allocation4 + $0x678] sm:$0xff]  ;;  %v4781_v13 = vld [vmem:[#allocation4 + $0x10b0] sm:$0xff] }
 0x6b1   :  { %5307 = vmatpush2.msra.mxu1 %v4417_v15  ;;  %5558 = vmatprep.subr.mxu0 %v4308_v16  ;;  %v4448_v15 = vld [vmem:[#allocation4 + $0x648] sm:$0xff]  ;;  %v4775_v16 = vld [vmem:[#allocation4 + $0x1080] sm:$0xff] }
 0x6b2   :  { %5308 = vmatprep.subr.mxu1 %v4411_v18  ;;  %5559 = vmatpush1.msra.mxu0 %v4307_v19  ;;  %v4447_v18 = vld [vmem:[#allocation4 + $0x640] sm:$0xff]  ;;  %v4774_v19 = vld [vmem:[#allocation4 + $0x1078] sm:$0xff] }
 0x6b3   :  { %5309 = vmatpush2.msra.mxu1 %v4410_v21  ;;  %5560 = vmatprep.subr.mxu0 %v4301_v23  ;;  %v4441_v21 = vld [vmem:[#allocation4 + $0x610] sm:$0xff]  ;;  %v4768_v23 = vld [vmem:[#allocation4 + $0x1048] sm:$0xff] }
 0x6b4   :  { %5310 = vmatprep.subr.mxu1 %v4404_v7  ;;  %5561 = vmatpush1.msra.mxu0 %v4300_v43  ;;  %v4440_v7 = vld [vmem:[#allocation4 + $0x608] sm:$0xff]  ;;  %v4767_v43 = vld [vmem:[#allocation4 + $0x1040] sm:$0xff] }
 0x6b5   :  { %5311 = vmatpush2.msra.mxu1 %v4403_v30  ;;  %5562 = vmatprep.subr.mxu0 %v4294_v14  ;;  %v4434_v30 = vld [vmem:[#allocation4 + $0x5d8] sm:$0xff]  ;;  %v4761_v14 = vld [vmem:[#allocation4 + $0x1010] sm:$0xff] }
 0x6b6   :  { %5312 = vmatprep.subr.mxu1 %v4397_v33  ;;  %5563 = vmatpush1.msra.mxu0 %v4293_v39  ;;  %v4433_v33 = vld [vmem:[#allocation4 + $0x5d0] sm:$0xff]  ;;  %v4760_v39 = vld [vmem:[#allocation4 + $0x1008] sm:$0xff] }
 0x6b7   :  { %5313 = vmatpush2.msra.mxu1 %v4396_v0  ;;  %5564 = vmatprep.subr.mxu0 %v4287_v27  ;;  %v4427_v0 = vld [vmem:[#allocation4 + $0x5a0] sm:$0xff]  ;;  %v4754_v27 = vld [vmem:[#allocation4 + $0xfd8] sm:$0xff] }
 0x6b8   :  { %5314 = vmatprep.subr.mxu1 %v4390_v29  ;;  %5565 = vmatpush1.msra.mxu0 %v4286_v31  ;;  %v4426_v29 = vld [vmem:[#allocation4 + $0x598] sm:$0xff]  ;;  %v4753_v31 = vld [vmem:[#allocation4 + $0xfd0] sm:$0xff] }
 0x6b9   :  { %5315 = vmatpush2.msra.mxu1 %v4389_v10  ;;  %5566 = vmatprep.subr.mxu0 %v4280_v26  ;;  %v4420_v10 = vld [vmem:[#allocation4 + $0x568] sm:$0xff]  ;;  %v4747_v26 = vld [vmem:[#allocation4 + $0xfa0] sm:$0xff] }
 0x6ba   :  { %5316 = vmatprep.subr.mxu1 %v4383_v12  ;;  %5567 = vmatpush1.msra.mxu0 %v4279_v35  ;;  %v4419_v12 = vld [vmem:[#allocation4 + $0x560] sm:$0xff]  ;;  %v4746_v35 = vld [vmem:[#allocation4 + $0xf98] sm:$0xff] }
 0x6bb   :  { %5317 = vmatpush2.msra.mxu1 %v4382_v37  ;;  %5568 = vmatprep.subr.mxu0 %v4273_v44  ;;  %v4413_v37 = vld [vmem:[#allocation4 + $0x530] sm:$0xff]  ;;  %v4740_v44 = vld [vmem:[#allocation4 + $0xf68] sm:$0xff] }
 0x6bc   :  { %5318 = vmatprep.subr.mxu1 %v4376_v22  ;;  %5569 = vmatpush1.msra.mxu0 %v4272_v28  ;;  %v4412_v22 = vld [vmem:[#allocation4 + $0x528] sm:$0xff]  ;;  %v4739_v28 = vld [vmem:[#allocation4 + $0xf60] sm:$0xff] }
 0x6bd   :  { %5319 = vmatpush2.msra.mxu1 %v4375_v46  ;;  %5570 = vmatprep.subr.mxu0 %v4266_v49  ;;  %v4406_v46 = vld [vmem:[#allocation4 + $0x4f8] sm:$0xff]  ;;  %v4733_v49 = vld [vmem:[#allocation4 + $0xf30] sm:$0xff] }
 0x6be   :  { %5320 = vmatprep.subr.mxu1 %v4369_v61  ;;  %5571 = vmatpush1.msra.mxu0 %v4265_v36  ;;  %v4405_v61 = vld [vmem:[#allocation4 + $0x4f0] sm:$0xff]  ;;  %v4732_v36 = vld [vmem:[#allocation4 + $0xf28] sm:$0xff] }
 0x6bf   :  { %5321 = vmatpush2.msra.mxu1 %v4368_v45  ;;  %5572 = vmatprep.subr.mxu0 %v4259_v51  ;;  %v4399_v45 = vld [vmem:[#allocation4 + $0x4c0] sm:$0xff]  ;;  %v4726_v51 = vld [vmem:[#allocation4 + $0xef8] sm:$0xff] }
 0x6c0   :  { %5322 = vmatprep.subr.mxu1 %v4362_v34  ;;  %5573 = vmatpush1.msra.mxu0 %v4258_v53  ;;  %v4398_v34 = vld [vmem:[#allocation4 + $0x4b8] sm:$0xff]  ;;  %v4725_v53 = vld [vmem:[#allocation4 + $0xef0] sm:$0xff] }
 0x6c1   :  { %5323 = vmatpush2.msra.mxu1 %v4361_v41  ;;  %5574 = vmatprep.subr.mxu0 %v4252_v54  ;;  %v4392_v41 = vld [vmem:[#allocation4 + $0x488] sm:$0xff]  ;;  %v4719_v54 = vld [vmem:[#allocation4 + $0xec0] sm:$0xff] }
 0x6c2   :  { %5325 = vmatmul.mubr.f32.vlgmr.msra.gmra.mxu1 %v10298_v48  ;;  %5402 = vmatprep.subr.mxu1 %v4803_v50  ;;  %v4391_v50 = vld [vmem:[#allocation4 + $0x480] sm:$0xff] }
 0x6c3   :  { %5575 = vmatpush1.msra.mxu0 %v4251_v58  ;;  %5403 = vmatpush1.msra.mxu1 %v4802_v55  ;;  %v4718_v58 = vld [vmem:[#allocation4 + $0xeb8] sm:$0xff]  ;;  %v4385_v55 = vld [vmem:[#allocation4 + $0x450] sm:$0xff] }
 0x6c4   :  { %5466 = vmatprep.mubr.f32.mxu1 %v10317_v24  ;;  %5576 = vmatprep.subr.mxu0 %v4469_v57  ;;  %v4712_v57 = vld [vmem:[#allocation4 + $0xe88] sm:$0xff] }
 0x6c5   :  { %5404 = vmatprep.subr.mxu1 %v4796_v59  ;;  %5577 = vmatpush2.msra.mxu0 %v4468_v62  ;;  %v4384_v59 = vld [vmem:[#allocation4 + $0x448] sm:$0xff]  ;;  %v4711_v62 = vld [vmem:[#allocation4 + $0xe80] sm:$0xff] }
 0x6c6   :  { %5405 = vmatpush1.msra.mxu1 %v4795_v25  ;;  %5578 = vmatprep.subr.mxu0 %v4462_v4  ;;  %v4378_v25 = vld [vmem:[#allocation4 + $0x418] sm:$0xff]  ;;  %v4705_v4 = vld [vmem:[#allocation4 + $0xe50] sm:$0xff] }
 0x6c7   :  { %5406 = vmatprep.subr.mxu1 %v4789_v9  ;;  %5579 = vmatpush2.msra.mxu0 %v4461_v3  ;;  %v4377_v9 = vld [vmem:[#allocation4 + $0x410] sm:$0xff]  ;;  %v4704_v3 = vld [vmem:[#allocation4 + $0xe48] sm:$0xff] }
 0x6c8   :  { %5407 = vmatpush1.msra.mxu1 %v4788_v42  ;;  %5580 = vmatprep.subr.mxu0 %v4455_v40  ;;  %v4371_v42 = vld [vmem:[#allocation4 + $0x3e0] sm:$0xff]  ;;  %v4698_v40 = vld [vmem:[#allocation4 + $0xe18] sm:$0xff] }
 0x6c9   :  { %5408 = vmatprep.subr.mxu1 %v4782_v11  ;;  %5581 = vmatpush2.msra.mxu0 %v4454_v60  ;;  %v4370_v11 = vld [vmem:[#allocation4 + $0x3d8] sm:$0xff]  ;;  %v4697_v60 = vld [vmem:[#allocation4 + $0xe10] sm:$0xff] }
 0x6ca   :  { %5409 = vmatpush1.msra.mxu1 %v4781_v13  ;;  %5582 = vmatprep.subr.mxu0 %v4448_v15  ;;  %v4364_v13 = vld [vmem:[#allocation4 + $0x3a8] sm:$0xff]  ;;  %v4915_v15 = vld [vmem:[#allocation4 + $0x14e0] sm:$0xff] }
 0x6cb   :  { %5410 = vmatprep.subr.mxu1 %v4775_v16  ;;  %5583 = vmatpush2.msra.mxu0 %v4447_v18  ;;  %v4363_v16 = vld [vmem:[#allocation4 + $0x3a0] sm:$0xff]  ;;  %v4914_v18 = vld [vmem:[#allocation4 + $0x14d8] sm:$0xff] }
 0x6cc   :  { %5411 = vmatpush1.msra.mxu1 %v4774_v19  ;;  %5584 = vmatprep.subr.mxu0 %v4441_v21  ;;  %v4805_v19 = vld [vmem:[#allocation4 + $0x1170] sm:$0xff]  ;;  %v4908_v21 = vld [vmem:[#allocation4 + $0x14a8] sm:$0xff] }
 0x6cd   :  { %5412 = vmatprep.subr.mxu1 %v4768_v23  ;;  %5585 = vmatpush2.msra.mxu0 %v4440_v7  ;;  %v4804_v23 = vld [vmem:[#allocation4 + $0x1168] sm:$0xff]  ;;  %v4907_v7 = vld [vmem:[#allocation4 + $0x14a0] sm:$0xff] }
 0x6ce   :  { %5413 = vmatpush1.msra.mxu1 %v4767_v43  ;;  %5586 = vmatprep.subr.mxu0 %v4434_v30  ;;  %v4798_v43 = vld [vmem:[#allocation4 + $0x1138] sm:$0xff]  ;;  %v4901_v30 = vld [vmem:[#allocation4 + $0x1470] sm:$0xff] }
 0x6cf   :  { %5414 = vmatprep.subr.mxu1 %v4761_v14  ;;  %5587 = vmatpush2.msra.mxu0 %v4433_v33  ;;  %v4797_v14 = vld [vmem:[#allocation4 + $0x1130] sm:$0xff]  ;;  %v4900_v33 = vld [vmem:[#allocation4 + $0x1468] sm:$0xff] }
 0x6d0   :  { %5415 = vmatpush1.msra.mxu1 %v4760_v39  ;;  %5588 = vmatprep.subr.mxu0 %v4427_v0  ;;  %v4791_v39 = vld [vmem:[#allocation4 + $0x1100] sm:$0xff]  ;;  %v4894_v0 = vld [vmem:[#allocation4 + $0x1438] sm:$0xff] }
 0x6d1   :  { %5416 = vmatprep.subr.mxu1 %v4754_v27  ;;  %5589 = vmatpush2.msra.mxu0 %v4426_v29  ;;  %v4790_v27 = vld [vmem:[#allocation4 + $0x10f8] sm:$0xff]  ;;  %v4893_v29 = vld [vmem:[#allocation4 + $0x1430] sm:$0xff] }
 0x6d2   :  { %5417 = vmatpush1.msra.mxu1 %v4753_v31  ;;  %5590 = vmatprep.subr.mxu0 %v4420_v10  ;;  %v4784_v31 = vld [vmem:[#allocation4 + $0x10c8] sm:$0xff]  ;;  %v4887_v10 = vld [vmem:[#allocation4 + $0x1400] sm:$0xff] }
 0x6d3   :  { %5418 = vmatprep.subr.mxu1 %v4747_v26  ;;  %5591 = vmatpush2.msra.mxu0 %v4419_v12  ;;  %v4783_v26 = vld [vmem:[#allocation4 + $0x10c0] sm:$0xff]  ;;  %v4886_v12 = vld [vmem:[#allocation4 + $0x13f8] sm:$0xff] }
 0x6d4   :  { %5419 = vmatpush1.msra.mxu1 %v4746_v35  ;;  %5592 = vmatprep.subr.mxu0 %v4413_v37  ;;  %v4777_v35 = vld [vmem:[#allocation4 + $0x1090] sm:$0xff]  ;;  %v4880_v37 = vld [vmem:[#allocation4 + $0x13c8] sm:$0xff] }
 0x6d5   :  { %5420 = vmatprep.subr.mxu1 %v4740_v44  ;;  %5593 = vmatpush2.msra.mxu0 %v4412_v22  ;;  %v4776_v44 = vld [vmem:[#allocation4 + $0x1088] sm:$0xff]  ;;  %v4879_v22 = vld [vmem:[#allocation4 + $0x13c0] sm:$0xff] }
 0x6d6   :  { %5421 = vmatpush1.msra.mxu1 %v4739_v28  ;;  %5594 = vmatprep.subr.mxu0 %v4406_v46  ;;  %v4770_v28 = vld [vmem:[#allocation4 + $0x1058] sm:$0xff]  ;;  %v4873_v46 = vld [vmem:[#allocation4 + $0x1390] sm:$0xff] }
 0x6d7   :  { %5422 = vmatprep.subr.mxu1 %v4733_v49  ;;  %5595 = vmatpush2.msra.mxu0 %v4405_v61  ;;  %v4769_v49 = vld [vmem:[#allocation4 + $0x1050] sm:$0xff]  ;;  %v4872_v61 = vld [vmem:[#allocation4 + $0x1388] sm:$0xff] }
 0x6d8   :  { %5423 = vmatpush1.msra.mxu1 %v4732_v36  ;;  %5596 = vmatprep.subr.mxu0 %v4399_v45  ;;  %v4763_v36 = vld [vmem:[#allocation4 + $0x1020] sm:$0xff]  ;;  %v4866_v45 = vld [vmem:[#allocation4 + $0x1358] sm:$0xff] }
 0x6d9   :  { %5424 = vmatprep.subr.mxu1 %v4726_v51  ;;  %5597 = vmatpush2.msra.mxu0 %v4398_v34  ;;  %v4762_v51 = vld [vmem:[#allocation4 + $0x1018] sm:$0xff]  ;;  %v4865_v34 = vld [vmem:[#allocation4 + $0x1350] sm:$0xff] }
 0x6da   :  { %5425 = vmatpush1.msra.mxu1 %v4725_v53  ;;  %5598 = vmatprep.subr.mxu0 %v4392_v41  ;;  %v4756_v53 = vld [vmem:[#allocation4 + $0xfe8] sm:$0xff]  ;;  %v4859_v41 = vld [vmem:[#allocation4 + $0x1320] sm:$0xff] }
 0x6db   :  { %5426 = vmatprep.subr.mxu1 %v4719_v54  ;;  %5599 = vmatpush2.msra.mxu0 %v4391_v50  ;;  %v4755_v54 = vld [vmem:[#allocation4 + $0xfe0] sm:$0xff]  ;;  %v4858_v50 = vld [vmem:[#allocation4 + $0x1318] sm:$0xff] }
 0x6dc   :  { %5427 = vmatpush1.msra.mxu1 %v4718_v58  ;;  %5600 = vmatprep.subr.mxu0 %v4385_v55  ;;  %v4749_v58 = vld [vmem:[#allocation4 + $0xfb0] sm:$0xff]  ;;  %v4852_v55 = vld [vmem:[#allocation4 + $0x12e8] sm:$0xff] }
 0x6dd   :  { %5428 = vmatprep.subr.mxu1 %v4712_v57  ;;  %5601 = vmatpush2.msra.mxu0 %v4384_v59  ;;  %v4748_v57 = vld [vmem:[#allocation4 + $0xfa8] sm:$0xff]  ;;  %v4851_v59 = vld [vmem:[#allocation4 + $0x12e0] sm:$0xff] }
 0x6de   :  { %5429 = vmatpush1.msra.mxu1 %v4711_v62  ;;  %5602 = vmatprep.subr.mxu0 %v4378_v25  ;;  %v4742_v62 = vld [vmem:[#allocation4 + $0xf78] sm:$0xff]  ;;  %v4845_v25 = vld [vmem:[#allocation4 + $0x12b0] sm:$0xff] }
 0x6df   :  { %5430 = vmatprep.subr.mxu1 %v4705_v4  ;;  %5603 = vmatpush2.msra.mxu0 %v4377_v9  ;;  %v4741_v4 = vld [vmem:[#allocation4 + $0xf70] sm:$0xff]  ;;  %v4844_v9 = vld [vmem:[#allocation4 + $0x12a8] sm:$0xff] }
 0x6e0   :  { %5431 = vmatpush1.msra.mxu1 %v4704_v3  ;;  %5604 = vmatprep.subr.mxu0 %v4371_v42  ;;  %v4735_v3 = vld [vmem:[#allocation4 + $0xf40] sm:$0xff]  ;;  %v4838_v42 = vld [vmem:[#allocation4 + $0x1278] sm:$0xff] }
 0x6e1   :  { %5432 = vmatprep.subr.mxu1 %v4698_v40  ;;  %5605 = vmatpush2.msra.mxu0 %v4370_v11  ;;  %v4734_v40 = vld [vmem:[#allocation4 + $0xf38] sm:$0xff]  ;;  %v4837_v11 = vld [vmem:[#allocation4 + $0x1270] sm:$0xff] }
 0x6e2   :  { %5433 = vmatpush1.msra.mxu1 %v4697_v60  ;;  %5606 = vmatprep.subr.mxu0 %v4364_v13  ;;  %v4728_v60 = vld [vmem:[#allocation4 + $0xf08] sm:$0xff]  ;;  %v4831_v13 = vld [vmem:[#allocation4 + $0x1240] sm:$0xff] }
 0x6e3   :  { %5434 = vmatprep.subr.mxu1 %v4915_v15  ;;  %5607 = vmatpush2.msra.mxu0 %v4363_v16  ;;  %v4727_v15 = vld [vmem:[#allocation4 + $0xf00] sm:$0xff]  ;;  %v4830_v16 = vld [vmem:[#allocation4 + $0x1238] sm:$0xff] }
 0x6e4   :  { %5435 = vmatpush2.msra.mxu1 %v4914_v18  ;;  %5609 = vmatmul.mubr.f32.vlgmr.msra.gmra.mxu0 %v10298_v48  ;;  %v4721_v18 = vld [vmem:[#allocation4 + $0xed0] sm:$0xff] }
 0x6e5   :  { %5686 = vmatprep.subr.mxu0 %v4805_v19  ;;  %5436 = vmatprep.subr.mxu1 %v4908_v21  ;;  %v4824_v19 = vld [vmem:[#allocation4 + $0x1208] sm:$0xff] }
 0x6e6   :  { %5687 = vmatpush1.msra.mxu0 %v4804_v23  ;;  %5750 = vmatprep.mubr.f32.mxu0 %v10317_v24  ;;  %v4720_v21 = vld [vmem:[#allocation4 + $0xec8] sm:$0xff]  ;;  %v4823_v23 = vld [vmem:[#allocation4 + $0x1200] sm:$0xff] }
 0x6e7   :  { %5437 = vmatpush2.msra.mxu1 %v4907_v7  ;;  %5688 = vmatprep.subr.mxu0 %v4798_v43  ;;  %v4714_v7 = vld [vmem:[#allocation4 + $0xe98] sm:$0xff]  ;;  %v4817_v43 = vld [vmem:[#allocation4 + $0x11d0] sm:$0xff] }
 0x6e8   :  { %5438 = vmatprep.subr.mxu1 %v4901_v30  ;;  %5689 = vmatpush1.msra.mxu0 %v4797_v14  ;;  %v4713_v30 = vld [vmem:[#allocation4 + $0xe90] sm:$0xff]  ;;  %v4816_v14 = vld [vmem:[#allocation4 + $0x11c8] sm:$0xff] }
 0x6e9   :  { %5439 = vmatpush2.msra.mxu1 %v4900_v33  ;;  %5690 = vmatprep.subr.mxu0 %v4791_v39  ;;  %v4707_v33 = vld [vmem:[#allocation4 + $0xe60] sm:$0xff]  ;;  %v4810_v39 = vld [vmem:[#allocation4 + $0x1198] sm:$0xff] }
 0x6ea   :  { %5440 = vmatprep.subr.mxu1 %v4894_v0  ;;  %5691 = vmatpush1.msra.mxu0 %v4790_v27  ;;  %v4706_v0 = vld [vmem:[#allocation4 + $0xe58] sm:$0xff]  ;;  %v4809_v27 = vld [vmem:[#allocation4 + $0x1190] sm:$0xff] }
 0x6eb   :  { %5441 = vmatpush2.msra.mxu1 %v4893_v29  ;;  %5692 = vmatprep.subr.mxu0 %v4784_v31  ;;  %v4700_v29 = vld [vmem:[#allocation4 + $0xe28] sm:$0xff]  ;;  %v4581_v31 = vld [vmem:[#allocation4 + $0xa70] sm:$0xff] }
 0x6ec   :  { %5442 = vmatprep.subr.mxu1 %v4887_v10  ;;  %5693 = vmatpush1.msra.mxu0 %v4783_v26  ;;  %v4699_v10 = vld [vmem:[#allocation4 + $0xe20] sm:$0xff]  ;;  %v4580_v26 = vld [vmem:[#allocation4 + $0xa68] sm:$0xff] }
 0x6ed   :  { %5443 = vmatpush2.msra.mxu1 %v4886_v12  ;;  %5694 = vmatprep.subr.mxu0 %v4777_v35  ;;  %v4917_v12 = vld [vmem:[#allocation4 + $0x14f0] sm:$0xff]  ;;  %v4574_v35 = vld [vmem:[#allocation4 + $0xa38] sm:$0xff] }
 0x6ee   :  { %5444 = vmatprep.subr.mxu1 %v4880_v37  ;;  %5695 = vmatpush1.msra.mxu0 %v4776_v44  ;;  %v4916_v37 = vld [vmem:[#allocation4 + $0x14e8] sm:$0xff]  ;;  %v4573_v44 = vld [vmem:[#allocation4 + $0xa30] sm:$0xff] }
 0x6ef   :  { %5445 = vmatpush2.msra.mxu1 %v4879_v22  ;;  %5696 = vmatprep.subr.mxu0 %v4770_v28  ;;  %v4910_v22 = vld [vmem:[#allocation4 + $0x14b8] sm:$0xff]  ;;  %v4567_v28 = vld [vmem:[#allocation4 + $0xa00] sm:$0xff] }
 0x6f0   :  { %5446 = vmatprep.subr.mxu1 %v4873_v46  ;;  %5697 = vmatpush1.msra.mxu0 %v4769_v49  ;;  %v4909_v46 = vld [vmem:[#allocation4 + $0x14b0] sm:$0xff]  ;;  %v4566_v49 = vld [vmem:[#allocation4 + $0x9f8] sm:$0xff] }
 0x6f1   :  { %5447 = vmatpush2.msra.mxu1 %v4872_v61  ;;  %5698 = vmatprep.subr.mxu0 %v4763_v36  ;;  %v4903_v61 = vld [vmem:[#allocation4 + $0x1480] sm:$0xff]  ;;  %v4560_v36 = vld [vmem:[#allocation4 + $0x9c8] sm:$0xff] }
 0x6f2   :  { %5448 = vmatprep.subr.mxu1 %v4866_v45  ;;  %5699 = vmatpush1.msra.mxu0 %v4762_v51  ;;  %v4902_v45 = vld [vmem:[#allocation4 + $0x1478] sm:$0xff]  ;;  %v4559_v51 = vld [vmem:[#allocation4 + $0x9c0] sm:$0xff] }
 0x6f3   :  { %5449 = vmatpush2.msra.mxu1 %v4865_v34  ;;  %5700 = vmatprep.subr.mxu0 %v4756_v53  ;;  %v4896_v34 = vld [vmem:[#allocation4 + $0x1448] sm:$0xff]  ;;  %v4553_v53 = vld [vmem:[#allocation4 + $0x990] sm:$0xff] }
 0x6f4   :  { %5450 = vmatprep.subr.mxu1 %v4859_v41  ;;  %5701 = vmatpush1.msra.mxu0 %v4755_v54  ;;  %v4895_v41 = vld [vmem:[#allocation4 + $0x1440] sm:$0xff]  ;;  %v4552_v54 = vld [vmem:[#allocation4 + $0x988] sm:$0xff] }
 0x6f5   :  { %5451 = vmatpush2.msra.mxu1 %v4858_v50  ;;  %5702 = vmatprep.subr.mxu0 %v4749_v58  ;;  %v4889_v50 = vld [vmem:[#allocation4 + $0x1410] sm:$0xff]  ;;  %v4546_v58 = vld [vmem:[#allocation4 + $0x958] sm:$0xff] }
 0x6f6   :  { %5452 = vmatprep.subr.mxu1 %v4852_v55  ;;  %5703 = vmatpush1.msra.mxu0 %v4748_v57  ;;  %v4888_v55 = vld [vmem:[#allocation4 + $0x1408] sm:$0xff]  ;;  %v4545_v57 = vld [vmem:[#allocation4 + $0x950] sm:$0xff] }
 0x6f7   :  { %5453 = vmatpush2.msra.mxu1 %v4851_v59  ;;  %5704 = vmatprep.subr.mxu0 %v4742_v62  ;;  %v4882_v59 = vld [vmem:[#allocation4 + $0x13d8] sm:$0xff]  ;;  %v4539_v62 = vld [vmem:[#allocation4 + $0x920] sm:$0xff] }
 0x6f8   :  { %5454 = vmatprep.subr.mxu1 %v4845_v25  ;;  %5705 = vmatpush1.msra.mxu0 %v4741_v4  ;;  %v4881_v25 = vld [vmem:[#allocation4 + $0x13d0] sm:$0xff]  ;;  %v4538_v4 = vld [vmem:[#allocation4 + $0x918] sm:$0xff] }
 0x6f9   :  { %5455 = vmatpush2.msra.mxu1 %v4844_v9  ;;  %5706 = vmatprep.subr.mxu0 %v4735_v3  ;;  %v4875_v9 = vld [vmem:[#allocation4 + $0x13a0] sm:$0xff]  ;;  %v4532_v3 = vld [vmem:[#allocation4 + $0x8e8] sm:$0xff] }
 0x6fa   :  { %5456 = vmatprep.subr.mxu1 %v4838_v42  ;;  %5707 = vmatpush1.msra.mxu0 %v4734_v40  ;;  %v4874_v42 = vld [vmem:[#allocation4 + $0x1398] sm:$0xff]  ;;  %v4531_v40 = vld [vmem:[#allocation4 + $0x8e0] sm:$0xff] }
 0x6fb   :  { %5457 = vmatpush2.msra.mxu1 %v4837_v11  ;;  %5708 = vmatprep.subr.mxu0 %v4728_v60  ;;  %v4868_v11 = vld [vmem:[#allocation4 + $0x1368] sm:$0xff]  ;;  %v4525_v60 = vld [vmem:[#allocation4 + $0x8b0] sm:$0xff] }
 0x6fc   :  { %5458 = vmatprep.subr.mxu1 %v4831_v13  ;;  %5709 = vmatpush1.msra.mxu0 %v4727_v15  ;;  %v4867_v13 = vld [vmem:[#allocation4 + $0x1360] sm:$0xff]  ;;  %v4524_v15 = vld [vmem:[#allocation4 + $0x8a8] sm:$0xff] }
 0x6fd   :  { %5459 = vmatpush2.msra.mxu1 %v4830_v16  ;;  %5710 = vmatprep.subr.mxu0 %v4721_v18  ;;  %v4861_v16 = vld [vmem:[#allocation4 + $0x1330] sm:$0xff]  ;;  %v4518_v18 = vld [vmem:[#allocation4 + $0x878] sm:$0xff] }
 0x6fe   :  { %5460 = vmatprep.subr.mxu1 %v4824_v19  ;;  %5711 = vmatpush1.msra.mxu0 %v4720_v21  ;;  %v4860_v19 = vld [vmem:[#allocation4 + $0x1328] sm:$0xff]  ;;  %v4517_v21 = vld [vmem:[#allocation4 + $0x870] sm:$0xff] }
 0x6ff   :  { %5461 = vmatpush2.msra.mxu1 %v4823_v23  ;;  %5712 = vmatprep.subr.mxu0 %v4714_v7  ;;  %v4854_v23 = vld [vmem:[#allocation4 + $0x12f8] sm:$0xff]  ;;  %v4511_v7 = vld [vmem:[#allocation4 + $0x840] sm:$0xff] }
 0x700   :  { %5462 = vmatprep.subr.mxu1 %v4817_v43  ;;  %5713 = vmatpush1.msra.mxu0 %v4713_v30  ;;  %v4853_v43 = vld [vmem:[#allocation4 + $0x12f0] sm:$0xff]  ;;  %v4510_v30 = vld [vmem:[#allocation4 + $0x838] sm:$0xff] }
 0x701   :  { %5463 = vmatpush2.msra.mxu1 %v4816_v14  ;;  %5714 = vmatprep.subr.mxu0 %v4707_v33  ;;  %v4847_v14 = vld [vmem:[#allocation4 + $0x12c0] sm:$0xff]  ;;  %v4504_v33 = vld [vmem:[#allocation4 + $0x808] sm:$0xff] }
 0x702   :  { %5464 = vmatprep.subr.mxu1 %v4810_v39  ;;  %5715 = vmatpush1.msra.mxu0 %v4706_v0  ;;  %v4846_v39 = vld [vmem:[#allocation4 + $0x12b8] sm:$0xff]  ;;  %v4503_v0 = vld [vmem:[#allocation4 + $0x800] sm:$0xff] }
 0x703   :  { %5465 = vmatpush2.msra.mxu1 %v4809_v27  ;;  %5716 = vmatprep.subr.mxu0 %v4700_v29  ;;  %v4840_v27 = vld [vmem:[#allocation4 + $0x1288] sm:$0xff]  ;;  %v4497_v29 = vld [vmem:[#allocation4 + $0x7d0] sm:$0xff] }
 0x704   :  { %5467 = vmatmul.mubr.f32.vlgmr.msra.gmra.mxu1 %v10319_v63  ;;  %5615 = vmatprep.subr.mxu1 %v4581_v31  ;;  %v4839_v31 = vld [vmem:[#allocation4 + $0x1280] sm:$0xff] }
 0x705   :  { %5717 = vmatpush1.msra.mxu0 %v4699_v10  ;;  %5616 = vmatpush1.msra.mxu1 %v4580_v26  ;;  %v4496_v10 = vld [vmem:[#allocation4 + $0x7c8] sm:$0xff]  ;;  %v4833_v26 = vld [vmem:[#allocation4 + $0x1250] sm:$0xff] }
 0x706   :  { %5679 = vmatprep.mubr.f32.mxu1 %v10306_v1  ;;  %5718 = vmatprep.subr.mxu0 %v4917_v12  ;;  %v4490_v12 = vld [vmem:[#allocation4 + $0x798] sm:$0xff] }
 0x707   :  { %5617 = vmatprep.subr.mxu1 %v4574_v35  ;;  %5719 = vmatpush2.msra.mxu0 %v4916_v37  ;;  %v4832_v35 = vld [vmem:[#allocation4 + $0x1248] sm:$0xff]  ;;  %v4489_v37 = vld [vmem:[#allocation4 + $0x790] sm:$0xff] }
 0x708   :  { %5618 = vmatpush1.msra.mxu1 %v4573_v44  ;;  %5720 = vmatprep.subr.mxu0 %v4910_v22  ;;  %v4826_v44 = vld [vmem:[#allocation4 + $0x1218] sm:$0xff]  ;;  %v4483_v22 = vld [vmem:[#allocation4 + $0x760] sm:$0xff] }
 0x709   :  { %5619 = vmatprep.subr.mxu1 %v4567_v28  ;;  %5721 = vmatpush2.msra.mxu0 %v4909_v46  ;;  %v4825_v28 = vld [vmem:[#allocation4 + $0x1210] sm:$0xff]  ;;  %v4482_v46 = vld [vmem:[#allocation4 + $0x758] sm:$0xff] }
 0x70a   :  { %5620 = vmatpush1.msra.mxu1 %v4566_v49  ;;  %5722 = vmatprep.subr.mxu0 %v4903_v61  ;;  %v4819_v49 = vld [vmem:[#allocation4 + $0x11e0] sm:$0xff]  ;;  %v4476_v61 = vld [vmem:[#allocation4 + $0x728] sm:$0xff] }
 0x70b   :  { %5621 = vmatprep.subr.mxu1 %v4560_v36  ;;  %5723 = vmatpush2.msra.mxu0 %v4902_v45  ;;  %v4818_v36 = vld [vmem:[#allocation4 + $0x11d8] sm:$0xff]  ;;  %v4475_v45 = vld [vmem:[#allocation4 + $0x720] sm:$0xff] }
 0x70c   :  { %5622 = vmatpush1.msra.mxu1 %v4559_v51  ;;  %5724 = vmatprep.subr.mxu0 %v4896_v34  ;;  %v4812_v51 = vld [vmem:[#allocation4 + $0x11a8] sm:$0xff]  ;;  %v4693_v34 = vld [vmem:[#allocation4 + $0xdf0] sm:$0xff] }
 0x70d   :  { %5623 = vmatprep.subr.mxu1 %v4553_v53  ;;  %5725 = vmatpush2.msra.mxu0 %v4895_v41  ;;  %v4811_v53 = vld [vmem:[#allocation4 + $0x11a0] sm:$0xff]  ;;  %v4692_v41 = vld [vmem:[#allocation4 + $0xde8] sm:$0xff] }
 0x70e   :  { %5624 = vmatpush1.msra.mxu1 %v4552_v54  ;;  %5726 = vmatprep.subr.mxu0 %v4889_v50  ;;  %v4918_v54 = vld [vmem:[#allocation4 + $0x14f8] sm:$0xff] }
 0x70f   :  { %5625 = vmatprep.subr.mxu1 %v4546_v58  ;;  %5727 = vmatpush2.msra.mxu0 %v4888_v55  ;;  %v4686_v50 = vld [vmem:[#allocation4 + $0xdb8] sm:$0xff]  ;;  %v4685_v55 = vld [vmem:[#allocation4 + $0xdb0] sm:$0xff] }
 0x710   :  { %5626 = vmatpush1.msra.mxu1 %v4545_v57  ;;  %5728 = vmatprep.subr.mxu0 %v4882_v59  ;;  %v4806_v58 = vld [vmem:[#allocation4 + $0x1178] sm:$0xff]  ;;  %v4911_v57 = vld [vmem:[#allocation4 + $0x14c0] sm:$0xff] }
 0x711   :  { %5627 = vmatprep.subr.mxu1 %v4539_v62  ;;  %5729 = vmatpush2.msra.mxu0 %v4881_v25  ;;  %v4679_v59 = vld [vmem:[#allocation4 + $0xd80] sm:$0xff]  ;;  %v4678_v25 = vld [vmem:[#allocation4 + $0xd78] sm:$0xff] }
 0x712   :  { %5628 = vmatpush1.msra.mxu1 %v4538_v4  ;;  %5730 = vmatprep.subr.mxu0 %v4875_v9  ;;  %v4799_v62 = vld [vmem:[#allocation4 + $0x1140] sm:$0xff]  ;;  %v4904_v4 = vld [vmem:[#allocation4 + $0x1488] sm:$0xff] }
 0x713   :  { %5629 = vmatprep.subr.mxu1 %v4532_v3  ;;  %5731 = vmatpush2.msra.mxu0 %v4874_v42  ;;  %v4672_v9 = vld [vmem:[#allocation4 + $0xd48] sm:$0xff]  ;;  %v4671_v42 = vld [vmem:[#allocation4 + $0xd40] sm:$0xff] }
 0x714   :  { %5630 = vmatpush1.msra.mxu1 %v4531_v40  ;;  %5732 = vmatprep.subr.mxu0 %v4868_v11  ;;  %v4792_v3 = vld [vmem:[#allocation4 + $0x1108] sm:$0xff]  ;;  %v4897_v40 = vld [vmem:[#allocation4 + $0x1450] sm:$0xff] }
 0x715   :  { %5631 = vmatprep.subr.mxu1 %v4525_v60  ;;  %5733 = vmatpush2.msra.mxu0 %v4867_v13  ;;  %v4665_v11 = vld [vmem:[#allocation4 + $0xd10] sm:$0xff]  ;;  %v4664_v13 = vld [vmem:[#allocation4 + $0xd08] sm:$0xff] }
 0x716   :  { %5632 = vmatpush1.msra.mxu1 %v4524_v15  ;;  %5734 = vmatprep.subr.mxu0 %v4861_v16  ;;  %v4785_v60 = vld [vmem:[#allocation4 + $0x10d0] sm:$0xff]  ;;  %v4890_v15 = vld [vmem:[#allocation4 + $0x1418] sm:$0xff] }
 0x717   :  { %5633 = vmatprep.subr.mxu1 %v4518_v18  ;;  %5735 = vmatpush2.msra.mxu0 %v4860_v19  ;;  %v4778_v16 = vld [vmem:[#allocation4 + $0x1098] sm:$0xff]  ;;  %v4657_v18 = vld [vmem:[#allocation4 + $0xcd0] sm:$0xff]  ;;  %v4883_v19 = vld [vmem:[#allocation4 + $0x13e0] sm:$0xff] }
 0x718   :  { %5634 = vmatpush1.msra.mxu1 %v4517_v21  ;;  %5736 = vmatprep.subr.mxu0 %v4854_v23  ;;  %v6145_v21 = vld [vmem:[%s10410_s7 + $0x5] ss:$8 sm:$0xf] }
 0x719   :  { %5635 = vmatprep.subr.mxu1 %v4511_v7  ;;  %5737 = vmatpush2.msra.mxu0 %v4853_v43  ;;  %v4651_v23 = vld [vmem:[#allocation4 + $0xca0] sm:$0xff]  ;;  %v6146_v43 = vld [vmem:[%s10410_s7 + $0x5] ss:$8 sm:$0x70] }
 0x71a   :  { %5636 = vmatpush1.msra.mxu1 %v4510_v30  ;;  %5738 = vmatprep.subr.mxu0 %v4847_v14  ;;  %v4771_v7 = vld [vmem:[#allocation4 + $0x1060] sm:$0xff]  ;;  %v4650_v30 = vld [vmem:[#allocation4 + $0xc98] sm:$0xff]  ;;  %v4876_v14 = vld [vmem:[#allocation4 + $0x13a8] sm:$0xff] }
 0x71b   :  { %5637 = vmatprep.subr.mxu1 %v4504_v33  ;;  %5739 = vmatpush2.msra.mxu0 %v4846_v39  ;;  %v4644_v33 = vld [vmem:[#allocation4 + $0xc68] sm:$0xff] }
 0x71c   :  { %5638 = vmatpush1.msra.mxu1 %v4503_v0  ;;  %5740 = vmatprep.subr.mxu0 %v4840_v27  ;;  %v4764_v39 = vld [vmem:[#allocation4 + $0x1028] sm:$0xff]  ;;  %v4643_v0 = vld [vmem:[#allocation4 + $0xc60] sm:$0xff]  ;;  %v4869_v27 = vld [vmem:[#allocation4 + $0x1370] sm:$0xff] }
 0x71d   :  { %5639 = vmatprep.subr.mxu1 %v4497_v29  ;;  %5741 = vmatpush2.msra.mxu0 %v4839_v31  ;;  %v10350_v29 = vor.u32 %v6146_v43, %v6145_v21  ;;  %v4637_v31 = vld [vmem:[#allocation4 + $0xc30] sm:$0xff]  ;;  %v4708_v43 = vld [vmem:[#allocation4 + $0xe68] sm:$0xff] }
 0x71e   :  { %5640 = vmatpush1.msra.mxu1 %v4496_v10  ;;  %5742 = vmatprep.subr.mxu0 %v4833_v26  ;;  %v4757_v10 = vld [vmem:[#allocation4 + $0xff0] sm:$0xff]  ;;  %v5042_v26 = vpop.f32.mrf.mxu0 }
 0x71f   :  { %5641 = vmatprep.subr.mxu1 %v4490_v12  ;;  %5743 = vmatpush2.msra.mxu0 %v4832_v35  ;;  %v4636_v12 = vld [vmem:[#allocation4 + $0xc28] sm:$0xff]  ;;  %v4862_v35 = vld [vmem:[#allocation4 + $0x1338] sm:$0xff] }
 0x720   :  { %5642 = vmatpush1.msra.mxu1 %v4489_v37  ;;  %5744 = vmatprep.subr.mxu0 %v4826_v44  ;;  %v4630_v37 = vld [vmem:[#allocation4 + $0xbf8] sm:$0xff] }
 0x721   :  { %5643 = vmatprep.subr.mxu1 %v4483_v22  ;;  %5745 = vmatpush2.msra.mxu0 %v4825_v28  ;;  %v4750_v44 = vld [vmem:[#allocation4 + $0xfb8] sm:$0xff]  ;;  %v4629_v22 = vld [vmem:[#allocation4 + $0xbf0] sm:$0xff]  ;;  %v4855_v28 = vld [vmem:[#allocation4 + $0x1300] sm:$0xff] }
 0x722   :  { %5644 = vmatpush1.msra.mxu1 %v4482_v46  ;;  %5746 = vmatprep.subr.mxu0 %v4819_v49  ;;  %v4941_v46 = vrot.slane %v10350_v29, %v8122_v8  ;;  %v4623_v49 = vld [vmem:[#allocation4 + $0xbc0] sm:$0xff] }
 0x723   :  { %5645 = vmatprep.subr.mxu1 %v4476_v61  ;;  %5747 = vmatpush2.msra.mxu0 %v4818_v36  ;;  %v4743_v61 = vld [vmem:[#allocation4 + $0xf80] sm:$0xff]  ;;  %v5044_v36 = vpop.f32.mrf.mxu0 }
 0x724   :  { %5646 = vmatpush1.msra.mxu1 %v4475_v45  ;;  %5748 = vmatprep.subr.mxu0 %v4812_v51  ;;  %v5113_v45 = vpop.f32.mrf.mxu1  ;;  %v4622_v51 = vld [vmem:[#allocation4 + $0xbb8] sm:$0xff]  ;;  %v4615_v8 = vld [vmem:[#allocation4 + $0xb80] sm:$0xff] }
 0x725   :  { %5647 = vmatprep.subr.mxu1 %v4693_v34  ;;  %5749 = vmatpush2.msra.mxu0 %v4811_v53  ;;  %v4848_v34 = vld [vmem:[#allocation4 + $0x12c8] sm:$0xff]  ;;  %v4945_v53 = vrot.slane %v10350_v29, %v8602_v56 }
 0x726   :  { %5648 = vmatpush2.msra.mxu1 %v4692_v41  ;;  %5751 = vmatmul.mubr.f32.vlgmr.msra.gmra.mxu0 %v10319_v63  ;;  %v4616_v41 = vld [vmem:[#allocation4 + $0xb88] sm:$0xff] }
 0x727   :  { %6399 = vmatprep.subr.mxu0 %v4918_v54  ;;  %5649 = vmatprep.subr.mxu1 %v4686_v50  ;;  %v4736_v54 = vld [vmem:[#allocation4 + $0xf48] sm:$0xff]  ;;  %v5184_v50 = vpop.f32.mrf.mxu0  ;;  %v5045_v56 = vadd.f32 %v5044_v36, %v4945_v53 }
 0x728   :  { %6400 = vmatpush3.msra.mxu0 %v4806_v58  ;;  %6032 = vmatprep.mubr.f32.mxu0 %v10317_v24  ;;  %v4658_v24 = vld [vmem:[#allocation4 + $0xcd8] sm:$0xff]  ;;  %v4841_v58 = vld [vmem:[#allocation4 + $0x1290] sm:$0xff]  ;;  %v4428_v53 = vld [vmem:[#allocation4 + $0x5a8] sm:$0xff] }
 0x729   :  { %5650 = vmatpush2.msra.mxu1 %v4685_v55  ;;  %6401 = vmatprep.subr.mxu0 %v4911_v57  ;;  %v5043_v55 = vadd.f32 %v5042_v26, %v4941_v46  ;;  %v4609_v57 = vld [vmem:[#allocation4 + $0xb50] sm:$0xff]  ;;  %v4924_v26 = vld [vmem:[#allocation4 + $0x1528] sm:$0xff] }
 0x72a   :  { %5651 = vmatprep.subr.mxu1 %v4679_v59  ;;  %6402 = vmatpush3.msra.mxu0 %v4799_v62  ;;  %v4729_v59 = vld [vmem:[#allocation4 + $0xf10] sm:$0xff]  ;;  %v5115_v62 = vpop.f32.mrf.mxu1  ;;  %v4344_v46 = vld [vmem:[#allocation4 + $0x308] sm:$0xff] }
 0x72b   :  { %5652 = vmatpush2.msra.mxu1 %v4678_v25  ;;  %6403 = vmatprep.subr.mxu0 %v4904_v4  ;;  %v4608_v25 = vld [vmem:[#allocation4 + $0xb48] sm:$0xff]  ;;  %v4834_v4 = vld [vmem:[#allocation4 + $0x1258] sm:$0xff] }
 0x72c   :  { %5653 = vmatprep.subr.mxu1 %v4672_v9  ;;  %6404 = vmatpush3.msra.mxu0 %v4792_v3  ;;  %v5114_v9 = vadd.f32 %v5113_v45, %v5043_v55  ;;  %v4602_v3 = vld [vmem:[#allocation4 + $0xb18] sm:$0xff]  ;;  %v4407_v55 = vld [vmem:[#allocation4 + $0x500] sm:$0xff] }
 0x72d   :  { %5654 = vmatpush2.msra.mxu1 %v4671_v42  ;;  %6405 = vmatprep.subr.mxu0 %v4897_v40  ;;  %v4722_v42 = vld [vmem:[#allocation4 + $0xed8] sm:$0xff]  ;;  %v5186_v40 = vpop.f32.mrf.mxu0 }
 0x72e   :  { %5655 = vmatprep.subr.mxu1 %v4665_v11  ;;  %6406 = vmatpush3.msra.mxu0 %v4785_v60  ;;  %v4601_v11 = vld [vmem:[#allocation4 + $0xb10] sm:$0xff]  ;;  %v4827_v60 = vld [vmem:[#allocation4 + $0x1220] sm:$0xff]  ;;  %v4330_v45 = vld [vmem:[#allocation4 + $0x298] sm:$0xff] }
 0x72f   :  { %5656 = vmatpush2.msra.mxu1 %v4664_v13  ;;  %6407 = vmatprep.subr.mxu0 %v4890_v15  ;;  %v5116_v13 = vadd.f32 %v5115_v62, %v5045_v56  ;;  %v5185_v15 = vadd.f32 %v5184_v50, %v5114_v9  ;;  %v4309_v50 = vld [vmem:[#allocation4 + $0x1f0] sm:$0xff]  ;;  %v4288_v62 = vld [vmem:[#allocation4 + $0x148] sm:$0xff]  ;;  %v4386_v56 = vld [vmem:[#allocation4 + $0x458] sm:$0xff] }
 0x730   :  { %5657 = vmatprep.subr.mxu1 %v4658_v24  ;;  %6408 = vmatpush3.msra.mxu0 %v4778_v16  ;;  %v4595_v24 = vld [vmem:[#allocation4 + $0xae0] sm:$0xff]  ;;  %v4274_v9 = vld [vmem:[#allocation4 + $0xd8] sm:$0xff] }
 0x731   :  { %5658 = vmatpush2.msra.mxu1 %v4657_v18  ;;  %6409 = vmatprep.subr.mxu0 %v4883_v19  ;;  %v4715_v16 = vld [vmem:[#allocation4 + $0xea0] sm:$0xff]  ;;  %v4594_v18 = vld [vmem:[#allocation4 + $0xad8] sm:$0xff]  ;;  %v4820_v19 = vld [vmem:[#allocation4 + $0x11e8] sm:$0xff] }
 0x732   :  { %5659 = vmatprep.subr.mxu1 %v4651_v23  ;;  %6410 = vmatpush3.msra.mxu0 %v4771_v7  ;;  %v5187_v23 = vadd.f32 %v5186_v40, %v5116_v13  ;;  %v4588_v7 = vld [vmem:[#allocation4 + $0xaa8] sm:$0xff]  ;;  %v4253_v13 = vld [vmem:[#allocation4 + $0x30] sm:$0xff] }
 0x733   :  { %5660 = vmatpush2.msra.mxu1 %v4650_v30  ;;  %6411 = vmatprep.subr.mxu0 %v4876_v14  ;;  %v4587_v14 = vld [vmem:[#allocation4 + $0xaa0] sm:$0xff]  ;;  %v4372_v40 = vld [vmem:[#allocation4 + $0x3e8] sm:$0xff] }
 0x734   :  { %5661 = vmatprep.subr.mxu1 %v4644_v33  ;;  %6412 = vmatpush3.msra.mxu0 %v4764_v39  ;;  %v4813_v33 = vld [vmem:[#allocation4 + $0x11b0] sm:$0xff] }
 0x735   :  { %5662 = vmatpush2.msra.mxu1 %v4643_v0  ;;  %6413 = vmatprep.subr.mxu0 %v4869_v27  ;;  %v4931_v0 = vld [vmem:[#allocation4 + $0x1560] sm:$0xff] }
 0x736   :  { %5663 = vmatprep.subr.mxu1 %v4637_v31  ;;  %6414 = vmatpush3.msra.mxu0 %v4757_v10  ;;  %v4701_v31 = vld [vmem:[#allocation4 + $0xe30] sm:$0xff]  ;;  %v4930_v10 = vld [vmem:[#allocation4 + $0x1558] sm:$0xff] }
 0x737   :  { %5664 = vmatpush2.msra.mxu1 %v4636_v12  ;;  %6415 = vmatprep.subr.mxu0 %v4862_v35  ;;  %v4923_v12 = vld [vmem:[#allocation4 + $0x1520] sm:$0xff]  ;;  %v4470_v35 = vld [vmem:[#allocation4 + $0x6f8] sm:$0xff] }
 0x738   :  { %5665 = vmatprep.subr.mxu1 %v4630_v37  ;;  %6416 = vmatpush3.msra.mxu0 %v4750_v44  ;;  %v4358_v37 = vld [vmem:[#allocation4 + $0x378] sm:$0xff]  ;;  %v4463_v44 = vld [vmem:[#allocation4 + $0x6c0] sm:$0xff] }
 0x739   :  { %5666 = vmatpush2.msra.mxu1 %v4629_v22  ;;  %6417 = vmatprep.subr.mxu0 %v4855_v28  ;;  %v4351_v22 = vld [vmem:[#allocation4 + $0x340] sm:$0xff]  ;;  %v4456_v28 = vld [vmem:[#allocation4 + $0x688] sm:$0xff] }
 0x73a   :  { %5667 = vmatprep.subr.mxu1 %v4623_v49  ;;  %6418 = vmatpush3.msra.mxu0 %v4743_v61  ;;  %v4449_v49 = vld [vmem:[#allocation4 + $0x650] sm:$0xff]  ;;  %v4442_v61 = vld [vmem:[#allocation4 + $0x618] sm:$0xff] }
 0x73b   :  { %5668 = vmatpush2.msra.mxu1 %v4622_v51  ;;  %6419 = vmatprep.subr.mxu0 %v4848_v34  ;;  %v4435_v51 = vld [vmem:[#allocation4 + $0x5e0] sm:$0xff] }
 0x73c   :  { %5669 = vmatprep.subr.mxu1 %v4616_v41  ;;  %6420 = vmatpush3.msra.mxu0 %v4736_v54  ;;  %v4316_v41 = vld [vmem:[#allocation4 + $0x228] sm:$0xff]  ;;  %v4421_v54 = vld [vmem:[#allocation4 + $0x570] sm:$0xff] }
 0x73d   :  { %5670 = vmatpush2.msra.mxu1 %v4615_v8  ;;  %6421 = vmatprep.subr.mxu0 %v4841_v58  ;;  %v4414_v8 = vld [vmem:[#allocation4 + $0x538] sm:$0xff] }
 0x73e   :  { %5671 = vmatprep.subr.mxu1 %v4609_v57  ;;  %6422 = vmatpush3.msra.mxu0 %v4729_v59  ;;  %v4302_v58 = vld [vmem:[#allocation4 + $0x1b8] sm:$0xff]  ;;  %v4295_v57 = vld [vmem:[#allocation4 + $0x180] sm:$0xff]  ;;  %v4400_v59 = vld [vmem:[#allocation4 + $0x4c8] sm:$0xff] }
 0x73f   :  { %5672 = vmatpush2.msra.mxu1 %v4608_v25  ;;  %6423 = vmatprep.subr.mxu0 %v4834_v4  ;;  %v4393_v25 = vld [vmem:[#allocation4 + $0x490] sm:$0xff] }
 0x740   :  { %5673 = vmatprep.subr.mxu1 %v4602_v3  ;;  %6424 = vmatpush3.msra.mxu0 %v4722_v42  ;;  %v5255_v21 = vpop.f32.mrf.mxu1  ;;  %v4281_v4 = vld [vmem:[#allocation4 + $0x110] sm:$0xff]  ;;  %v4379_v3 = vld [vmem:[#allocation4 + $0x420] sm:$0xff] }
 0x741   :  { %5674 = vmatpush2.msra.mxu1 %v4601_v11  ;;  %6425 = vmatprep.subr.mxu0 %v4827_v60  ;;  %v5256_v30 = vadd.f32 %v5255_v21, %v5185_v15  ;;  %v4267_v42 = vld [vmem:[#allocation4 + $0xa0] sm:$0xff]  ;;  %v4260_v11 = vld [vmem:[#allocation4 + $0x68] sm:$0xff]  ;;  %v4365_v60 = vld [vmem:[#allocation4 + $0x3b0] sm:$0xff] }
 0x742   :  { %5675 = vmatprep.subr.mxu1 %v4595_v24  ;;  %6426 = vmatpush3.msra.mxu0 %v4715_v16  ;;  %v5257_v39 = vpop.f32.mrf.mxu1  ;;  %v4694_v15 = vld [vmem:[#allocation4 + $0xdf8] sm:$0xff]  ;;  %v4687_v16 = vld [vmem:[#allocation4 + $0xdc0] sm:$0xff]  ;;  %v4568_v21 = vld [vmem:[#allocation4 + $0xa08] sm:$0xff] }
 0x743   :  { %5676 = vmatpush2.msra.mxu1 %v4594_v18  ;;  %6427 = vmatprep.subr.mxu0 %v4820_v19  ;;  %6457 = vtanh.f32 %v5256_v30  ;;  %v5258_v27 = vadd.f32 %v5257_v39, %v5187_v23  ;;  %v4582_v24 = vld [vmem:[#allocation4 + $0xa78] sm:$0xff]  ;;  %v4575_v18 = vld [vmem:[#allocation4 + $0xa40] sm:$0xff]  ;;  %v4680_v19 = vld [vmem:[#allocation4 + $0xd88] sm:$0xff] }
 0x744   :  { %5677 = vmatprep.subr.mxu1 %v4588_v7  ;;  %6428 = vmatpush3.msra.mxu0 %v4708_v43  ;;  %v4673_v23 = vld [vmem:[#allocation4 + $0xd50] sm:$0xff]  ;;  %v4666_v43 = vld [vmem:[#allocation4 + $0xd18] sm:$0xff]  ;;  %v4540_v39 = vld [vmem:[#allocation4 + $0x928] sm:$0xff] }
 0x745   :  { %5678 = vmatpush2.msra.mxu1 %v4587_v14  ;;  %6429 = vmatprep.subr.mxu0 %v4813_v33  ;;  %6459 = vtanh.f32 %v5258_v27  ;;  %v4561_v7 = vld [vmem:[#allocation4 + $0x9d0] sm:$0xff]  ;;  %v4554_v30 = vld [vmem:[#allocation4 + $0x998] sm:$0xff]  ;;  %v4659_v14 = vld [vmem:[#allocation4 + $0xce0] sm:$0xff] }
 0x746   :  { %5680 = vmatmul.mubr.f32.vlgmr.msra.gmra.mxu1 %v10308_v32  ;;  %5785 = vmatprep.subr.mxu1 %v4931_v0  ;;  %v4652_v33 = vld [vmem:[#allocation4 + $0xca8] sm:$0xff]  ;;  %v4533_v0 = vld [vmem:[#allocation4 + $0x8f0] sm:$0xff]  ;;  %v4638_v27 = vld [vmem:[#allocation4 + $0xc38] sm:$0xff] }
 0x747   :  { %6430 = vmatpush3.msra.mxu0 %v4701_v31  ;;  %5786 = vmatpush1.msra.mxu1 %v4930_v10  ;;  %v4526_v31 = vld [vmem:[#allocation4 + $0x8b8] sm:$0xff]  ;;  %v4631_v10 = vld [vmem:[#allocation4 + $0xc00] sm:$0xff] }
 0x748   :  { %6033 = vmatmul.mubr.f32.vlgmr.msra.gmra.mxu0 %v10319_v63  ;;  %5787 = vmatprep.subr.mxu1 %v4924_v26  ;;  %v4337_v63 = vld [vmem:[#allocation4 + $0x2d0] sm:$0xff]  ;;  %v4519_v26 = vld [vmem:[#allocation4 + $0x880] sm:$0xff] }
 0x749   :  { %5788 = vmatpush1.msra.mxu1 %v4923_v12  ;;  %5821 = vmatprep.mubr.f32.mxu1 %v6529_v17  ;;  %v4624_v12 = vld [vmem:[#allocation4 + $0xbc8] sm:$0xff] }
 0x74a   :  { %6149 = vmatmul.mubr.msk.f32.vlgmr.msra.gmra.mxu1 %vm789_vm0, %v10326_v52  ;;  %6329 = vmatprep.subr.mxu1 %v4470_v35  ;;  %v4512_v35 = vld [vmem:[#allocation4 + $0x848] sm:$0xff] }
 0x74b   :  { %6330 = vmatpush3.msra.mxu1 %v4358_v37  ;;  %5892 = vmatprep.mubr.f32.mxu1 %v10296_v47  ;;  %v4323_v47 = vld [vmem:[#allocation4 + $0x260] sm:$0xff]  ;;  %v4617_v37 = vld [vmem:[#allocation4 + $0xb90] sm:$0xff] }
 0x74c   :  { %6331 = vmatprep.subr.mxu1 %v4463_v44  ;;  %v4505_v44 = vld [vmem:[#allocation4 + $0x810] sm:$0xff] }
 0x74d   :  { %6332 = vmatpush3.msra.mxu1 %v4351_v22  ;;  %v4610_v22 = vld [vmem:[#allocation4 + $0xb58] sm:$0xff] }
 0x74e   :  { %6333 = vmatprep.subr.mxu1 %v4456_v28  ;;  %v4498_v28 = vld [vmem:[#allocation4 + $0x7d8] sm:$0xff] }
 0x74f   :  { %6334 = vmatpush3.msra.mxu1 %v4344_v46  ;;  %v4603_v46 = vld [vmem:[#allocation4 + $0xb20] sm:$0xff] }
 0x750   :  { %v6458_v36 = vpop.eup %6457  ;;  %6335 = vmatprep.subr.mxu1 %v4449_v49  ;;  %v4491_v49 = vld [vmem:[#allocation4 + $0x7a0] sm:$0xff] }
 0x751   :  { %6115 = vst [vmem:[%s10411_s8] sm:$0xff] %v6458_v36  ;;  %6336 = vmatpush3.msra.mxu1 %v4337_v63  ;;  %v4596_v63 = vld [vmem:[#allocation4 + $0xae8] sm:$0xff]  ;;  %v4589_v36 = vld [vmem:[#allocation4 + $0xab0] sm:$0xff] }
 0x752   :  { %v6460_v34 = vpop.eup %6459  ;;  %6337 = vmatprep.subr.mxu1 %v4442_v61  ;;  %v4484_v61 = vld [vmem:[#allocation4 + $0x768] sm:$0xff] }
 0x753   :  { %6116 = vst [vmem:[%s10411_s8 + $0x8] sm:$0xff] %v6460_v34  ;;  %6338 = vmatpush3.msra.mxu1 %v4330_v45  ;;  %v4477_v45 = vld [vmem:[#allocation4 + $0x730] sm:$0xff] }
 0x754   :  { %6339 = vmatprep.subr.mxu1 %v4435_v51  ;;  %v4932_v51 = vld [vmem:[#allocation4 + $0x1568] sm:$0xff]  ;;  %v4925_v34 = vld [vmem:[#allocation4 + $0x1530] sm:$0xff] }
 0x755   :  { %6340 = vmatpush3.msra.mxu1 %v4323_v47 }
 0x756   :  { %6341 = vmatprep.subr.mxu1 %v4428_v53  ;;  %v4949_v53 = vrot.slane %v10350_v29, %v9132_v38 }
 0x757   :  { %6342 = vmatpush3.msra.mxu1 %v4316_v41 }
 0x758   :  { %6343 = vmatprep.subr.mxu1 %v4421_v54 }
 0x759   :  { %6344 = vmatpush3.msra.mxu1 %v4309_v50 }
 0x75a   :  { %6345 = vmatprep.subr.mxu1 %v4414_v8 }
 0x75b   :  { %6346 = vmatpush3.msra.mxu1 %v4302_v58 }
 0x75c   :  { %6347 = vmatprep.subr.mxu1 %v4407_v55 }
 0x75d   :  { %6348 = vmatpush3.msra.mxu1 %v4295_v57  ;;  %v5397_v41 = vpop.f32.mrf.mxu0 }
 0x75e   :  { %6349 = vmatprep.subr.mxu1 %v4400_v59 }
 0x75f   :  { %6350 = vmatpush3.msra.mxu1 %v4288_v62  ;;  %v5399_v8 = vpop.f32.mrf.mxu0 }
 0x760   :  { %6351 = vmatprep.subr.mxu1 %v4393_v25 }
 0x761   :  { %6352 = vmatpush3.msra.mxu1 %v4281_v4 }
 0x762   :  { %6353 = vmatprep.subr.mxu1 %v4386_v56  ;;  %v5539_v57 = vpop.f32.mrf.mxu0 }
 0x763   :  { %6354 = vmatpush3.msra.mxu1 %v4274_v9 }
 0x764   :  { %6355 = vmatprep.subr.mxu1 %v4379_v3  ;;  %v5541_v56 = vpop.f32.mrf.mxu0 }
 0x765   :  { %6356 = vmatpush3.msra.mxu1 %v4267_v42  ;;  %v4957_v42 = vrot.slane %v10350_v29, %v9413_v5 }
 0x766   :  { %6357 = vmatprep.subr.mxu1 %v4372_v40  ;;  %v4961_v40 = vrot.slane %v10350_v29, %v9416_v6 }
 0x767   :  { %6358 = vmatpush3.msra.mxu1 %v4260_v11 }
 0x768   :  { %6359 = vmatprep.subr.mxu1 %v4365_v60 }
 0x769   :  { %6360 = vmatpush3.msra.mxu1 %v4253_v13 }
 0x76a   :  { %5893 = vmatmul.mubr.f32.vlgmr.msra.gmra.mxu1 %v10298_v48  ;;  %6364 = vmatprep.subr.mxu1 %v4694_v15  ;;  %v4547_v48 = vld [vmem:[#allocation4 + $0x960] sm:$0xff] }
 0x76b   :  { %6365 = vmatpush3.msra.mxu1 %v4582_v24  ;;  %5962 = vmatprep.mubr.f32.mxu1 %v10306_v1  ;;  %v4645_v1 = vld [vmem:[#allocation4 + $0xc70] sm:$0xff] }
 0x76c   :  { %6366 = vmatprep.subr.mxu1 %v4687_v16 }
 0x76d   :  { %6367 = vmatpush3.msra.mxu1 %v4575_v18 }
 0x76e   :  { %6368 = vmatprep.subr.mxu1 %v4680_v19 }
 0x76f   :  { %6369 = vmatpush3.msra.mxu1 %v4568_v21 }
 0x770   :  { %6370 = vmatprep.subr.mxu1 %v4673_v23 }
 0x771   :  { %6371 = vmatpush3.msra.mxu1 %v4561_v7 }
 0x772   :  { %6372 = vmatprep.subr.mxu1 %v4666_v43 }
 0x773   :  { %6373 = vmatpush3.msra.mxu1 %v4554_v30 }
 0x774   :  { %6374 = vmatprep.subr.mxu1 %v4659_v14 }
 0x775   :  { %6375 = vmatpush3.msra.mxu1 %v4547_v48 }
 0x776   :  { %6376 = vmatprep.subr.mxu1 %v4652_v33 }
 0x777   :  { %6377 = vmatpush3.msra.mxu1 %v4540_v39 }
 0x778   :  { %6378 = vmatprep.subr.mxu1 %v4645_v1 }
 0x779   :  { %6379 = vmatpush3.msra.mxu1 %v4533_v0  ;;  %v4965_v0 = vrot.slane %v10350_v29, %v9498_v2 }
 0x77a   :  { %6380 = vmatprep.subr.mxu1 %v4638_v27 }
 0x77b   :  { %6381 = vmatpush3.msra.mxu1 %v4526_v31 }
 0x77c   :  { %6382 = vmatprep.subr.mxu1 %v4631_v10 }
 0x77d   :  { %6383 = vmatpush3.msra.mxu1 %v4519_v26 }
 0x77e   :  { %6384 = vmatprep.subr.mxu1 %v4624_v12 }
 0x77f   :  { %6385 = vmatpush3.msra.mxu1 %v4512_v35 }
 0x780   :  { %6386 = vmatprep.subr.mxu1 %v4617_v37 }
 0x781   :  { %6387 = vmatpush3.msra.mxu1 %v4505_v44 }
 0x782   :  { %6388 = vmatprep.subr.mxu1 %v4610_v22  ;;  %v5326_v47 = vpop.f32.mrf.mxu1 }
 0x783   :  { %6389 = vmatpush3.msra.mxu1 %v4498_v28  ;;  %v5327_v50 = vadd.f32 %v5326_v47, %v4949_v53 }
 0x784   :  { %6390 = vmatprep.subr.mxu1 %v4603_v46  ;;  %v5328_v54 = vpop.f32.mrf.mxu1 }
 0x785   :  { %6391 = vmatpush3.msra.mxu1 %v4491_v49  ;;  %v5398_v55 = vadd.f32 %v5397_v41, %v5327_v50 }
 0x786   :  { %6392 = vmatprep.subr.mxu1 %v4596_v63 }
 0x787   :  { %6393 = vmatpush3.msra.mxu1 %v4484_v61 }
 0x788   :  { %6394 = vmatprep.subr.mxu1 %v4589_v36 }
 0x789   :  { %6395 = vmatpush3.msra.mxu1 %v4477_v45 }
 0x78a   :  { %5963 = vmatmul.mubr.f32.vlgmr.msra.gmra.mxu1 %v10308_v32  ;;  %6444 = vmatprep.subr.mxu1 %v6529_v17  ;;  %v4953_v32 = vrot.slane %v10350_v29, %v9004_v20 }
 0x78b   :  { %6445 = vmatpush3.msra.mxu1 %v4932_v51  ;;  %6448 = vmatprep.mubr.msk.f32.mxu1 %vm6530_vm1, %v6529_v17 }
 0x78c   :  { %6446 = vmatprep.subr.mxu1 %v6529_v17  ;;  %v5329_v58 = vadd.f32 %v5328_v54, %v4953_v32 }
 0x78d   :  { %6447 = vmatpush3.msra.mxu1 %v4925_v34 }
 0x78e   :  { %6449 = vmatmul.mubr.msk.f32.vlgmr.msra.gmra.mxu1 %vm789_vm0, %v10326_v52  ;;  %v5400_v62 = vadd.f32 %v5399_v8, %v5329_v58 }
 0x7a4   :  { %v5610_v3 = vpop.f32.mrf.mxu0 }
 0x7a5   :  { %v5611_v60 = vadd.f32 %v5610_v3, %v4957_v42 }
 0x7a6   :  { %v5612_v11 = vpop.f32.mrf.mxu0 }
 0x7a7   :  { %v5613_v24 = vadd.f32 %v5612_v11, %v4961_v40 }
 0x7c4   :  { %v5468_v59 = vpop.f32.mrf.mxu1 }
 0x7c5   :  { %v5469_v17 = vadd.f32 %v5468_v59, %v5398_v55 }
 0x7c6   :  { %v5470_v25 = vpop.f32.mrf.mxu1 }
 0x7c7   :  { %v5540_v4 = vadd.f32 %v5539_v57, %v5469_v17  ;;  %v5471_v52 = vadd.f32 %v5470_v25, %v5400_v62 }
 0x7c9   :  { %6461 = vtanh.f32 %v5540_v4  ;;  %v5542_v9 = vadd.f32 %v5541_v56, %v5471_v52 }
 0x7cb   :  { %6463 = vtanh.f32 %v5542_v9 }
 0x7d6   :  { %v6462_v38 = vpop.eup %6461 }
 0x7d7   :  { %6117 = vst [vmem:[%s10411_s8 + $0x10] sm:$0xff] %v6462_v38 }
 0x7d8   :  { %v6464_v20 = vpop.eup %6463 }
 0x7d9   :  { %6118 = vst [vmem:[%s10411_s8 + $0x18] sm:$0xff] %v6464_v20 }
 0x7e6   :  { %v5752_v13 = vpop.f32.mrf.mxu0 }
 0x7e8   :  { %v5754_v23 = vpop.f32.mrf.mxu0 }
 0x806   :  { %v5681_v15 = vpop.f32.mrf.mxu1 }
 0x807   :  { %v5682_v16 = vadd.f32 %v5681_v15, %v5611_v60 }
 0x808   :  { %v5683_v18 = vpop.f32.mrf.mxu1  ;;  %v6431_v1 = vpop.f32.mrf.mxu0 }
 0x809   :  { %v5684_v19 = vadd.f32 %v5683_v18, %v5613_v24  ;;  %v5753_v21 = vadd.f32 %v5752_v13, %v5682_v16 }
 0x80a   :  { %v5823_v7 = vpop.f32.mrf.mxu1  ;;  %v6432_v10 = vpop.f32.mrf.mxu0 }
 0x80b   :  { %v5824_v43 = vadd.f32 %v5823_v7, %v5753_v21  ;;  %v5755_v30 = vadd.f32 %v5754_v23, %v5684_v19  ;;  %v6433_v44 = vadd.f32 %v6432_v10, %v6431_v1 }
 0x80c   :  { %v5825_v14 = vpop.f32.mrf.mxu1 }
 0x80d   :  { %6465 = vtanh.f32 %v5824_v43  ;;  %v5826_v48 = vadd.f32 %v5825_v14, %v5755_v30 }
 0x80f   :  { %6467 = vtanh.f32 %v5826_v48 }
 0x81a   :  { %v6466_v5 = vpop.eup %6465 }
 0x81b   :  { %6119 = vst [vmem:[%s10411_s8 + $0x20] sm:$0xff] %v6466_v5 }
 0x81c   :  { %v6468_v6 = vpop.eup %6467 }
 0x81d   :  { %6120 = vst [vmem:[%s10411_s8 + $0x28] sm:$0xff] %v6468_v6 }
 0x82a   :  { %v6361_v33 = vpop.f32.mrf.mxu1 }
 0x82c   :  { %v6362_v39 = vpop.f32.mrf.mxu1 }
 0x82d   :  { %v6363_v27 = vadd.f32 %v6362_v39, %v6361_v33 }
 0x82f   :  { %v5895_v12 = vadd.f32 %v6363_v27, %v4965_v0 }
 0x84a   :  { %v6396_v31 = vpop.f32.mrf.mxu1 }
 0x84c   :  { %v6397_v26 = vpop.f32.mrf.mxu1 }
 0x84d   :  { %v6398_v35 = vadd.f32 %v6397_v26, %v6396_v31 }
 0x84e   :  { %v6104_v37 = vpop.f32.mrf.mxu1 }
 0x84f   :  { %v5965_v22 = vadd.f32 %v6398_v35, %v5895_v12 }
 0x850   :  { %v6450_v28 = vpop.f32.mrf.mxu1 }
 0x851   :  { %v6035_v46 = vadd.f32 %v6433_v44, %v5965_v22 }
 0x853   :  { %v6105_v49 = vadd.f32 %v6104_v37, %v6035_v46 }
 0x855   :  { %6469 = vtanh.f32 %v6105_v49 }
 0x862   :  { %v6470_v63 = vpop.eup %6469 }
 0x863   :  { %6121 = vst.msk [vmem:[%s10411_s8 + $0x30] sm:$0xff] %vm789_vm0, %v6470_v63 }
 0x864   :  { %6126 = vsyncpa [#allocation3], 1 }
 0x865   :  { %6127 = vsyncpa [#allocation5], 1 }

</bundles_post_ra>
